<compile_context>
chip_gen: v6e
topology: v6e:2x2x1
jax: 0.10.0
libtpu: 0.0.40
codegen_flags: <defaults>
</compile_context>

<pallas_src>
import jax
import jax.numpy as jnp
from jax.experimental import pallas as pl
from jax.experimental.pallas import tpu as pltpu


def _silu(x):
    return x * (1.0 / (1.0 + jnp.exp(-x)))


def _max5(s0, s1, s2, s3, s4):
    # Depth-3 tree instead of a length-4 dependent chain.
    return jnp.maximum(jnp.maximum(jnp.maximum(s0, s1), jnp.maximum(s2, s3)), s4)


# ---------------------------------------------------------------------------
# Kernel
# ---------------------------------------------------------------------------

def _sppf_kernel(x_ref, w1_ref, b1_ref, w2_ref, b2_ref, o_ref,
                 wpad_ref, hpad_ref):
    # x_ref block: (Nb, H, W, Cin); weights are full arrays resident in VMEM.
    Nb, H, W, Cin = x_ref.shape
    Chid = w1_ref.shape[1]
    Cout = w2_ref.shape[2]
    M = Nb * H * W

    # ---- cv1: 1x1 conv (+ folded BN) + SiLU == channel matmul on the MXU ---
    x = x_ref[...]                                   # native dtype (f32/bf16)
    h = jnp.dot(x.reshape(M, Cin), w1_ref[...],
                preferred_element_type=jnp.float32)
    h = _silu(h + b1_ref[...].astype(jnp.float32)).reshape(Nb, H, W, Chid)

    # ---- -inf border strips (interiors are rewritten by every pool stage) --
    neg_w = jnp.full((Nb, H, 2, Chid), -jnp.inf, jnp.float32)
    wpad_ref[:, :, 0:2, :] = neg_w
    wpad_ref[:, :, W + 2:W + 4, :] = neg_w
    neg_h = jnp.full((Nb, 2, W, Chid), -jnp.inf, jnp.float32)
    hpad_ref[:, 0:2, :, :] = neg_h
    hpad_ref[:, H + 2:H + 4, :, :] = neg_h

    def pool5(a):
        # Separable 5x5 / stride 1 / pad 2 max pool: 4 + 4 maxes vs 24.
        # W (sublane) pass on the W-padded buffer.
        wpad_ref[:, :, 2:W + 2, :] = a
        rm = _max5(wpad_ref[:, :, 0:W, :],
                   wpad_ref[:, :, 1:W + 1, :],
                   wpad_ref[:, :, 2:W + 2, :],
                   wpad_ref[:, :, 3:W + 3, :],
                   wpad_ref[:, :, 4:W + 4, :])
        # H (cheap leading-dim) pass on the H-padded buffer; all slices are
        # sublane-aligned (W starts at 0).
        hpad_ref[:, 2:H + 2, :, :] = rm
        return _max5(hpad_ref[:, 0:H, :, :],
                     hpad_ref[:, 1:H + 1, :, :],
                     hpad_ref[:, 2:H + 2, :, :],
                     hpad_ref[:, 3:H + 3, :, :],
                     hpad_ref[:, 4:H + 4, :, :])

    # ---- cv2 with w2 split 4-way: no (H, W, 4*Chid) concat buffer ----------
    def cv2_partial(a, i):
        w = w2_ref[i].astype(jnp.float32)            # (Chid, Cout)
        return jnp.dot(a.reshape(M, Chid), w,
                       preferred_element_type=jnp.float32)

    acc = cv2_partial(h, 0)
    y1 = pool5(h)
    acc += cv2_partial(y1, 1)
    y2 = pool5(y1)
    acc += cv2_partial(y2, 2)
    y3 = pool5(y2)
    acc += cv2_partial(y3, 3)

    out = _silu(acc + b2_ref[...].astype(jnp.float32))
    o_ref[...] = out.reshape(Nb, H, W, Cout).astype(o_ref.dtype)


# ---------------------------------------------------------------------------
# Wrappers
# ---------------------------------------------------------------------------

def _pick_block_n(N, max_nb=8):
    """Largest divisor of N that is <= max_nb (images per grid step)."""
    nb = 1
    for d in range(1, min(N, max_nb) + 1):
        if N % d == 0:
            nb = d
    return nb


def _vmem_limit_bytes(nb, H, W, Cin, Chid, Cout, act_itemsize):
    x_blk = nb * H * W * Cin * act_itemsize
    o_blk = nb * H * W * Cout * act_itemsize
    w_all = (Cin * Chid + 4 * Chid * Cout) * act_itemsize + 4 * (Chid + Cout)
    pad_s = nb * (H * (W + 4) + (H + 4) * W) * Chid * 4     # two pool scratches
    temps = nb * H * W * (Cin + 2 * Chid + Cout) * 4        # f32 in-kernel temps
    est = 2 * (x_blk + o_blk + w_all) + pad_s + temps       # x2: double buffering
    return int(min(48 << 20, max(16 << 20, 2 * est)))


def sppf_pallas_nhwc(x, w1, b1, w2, b2, *, block_n=None):
    """Fused SPPF.

    x : (N, H, W, Cin) float32 or bfloat16
    w1: (Cin, Chid)   BN-folded cv1 weight      b1: (1, Chid)  folded bias
    w2: (4*Chid, Cout) BN-folded cv2 weight     b2: (1, Cout)  folded bias
    Returns (N, H, W, Cout) in x.dtype.
    """
    N, H, W, Cin = x.shape
    Chid = w1.shape[1]
    Cout = w2.shape[-1]
    w2 = w2.reshape(4, Chid, Cout)                 # row blocks: [h, y1, y2, y3]
    b1 = jnp.asarray(b1, jnp.float32).reshape(1, Chid)
    b2 = jnp.asarray(b2, jnp.float32).reshape(1, Cout)

    if block_n is None:
        block_n = _pick_block_n(N)
    assert N % block_n == 0

    vmem_limit = _vmem_limit_bytes(block_n, H, W, Cin, Chid, Cout,
                                   jnp.dtype(x.dtype).itemsize)

    # TODO(synk): for very large feature maps (and v7x's 2 TCs / 64 MiB VMEM),
    # add an H-tiled "parallel" grid axis with a 6-row halo per block.
    return pl.pallas_call(
        _sppf_kernel,
        out_shape=jax.ShapeDtypeStruct((N, H, W, Cout), x.dtype),
        grid_spec=pltpu.PrefetchScalarGridSpec(
            num_scalar_prefetch=0,
            grid=(N // block_n,),
            in_specs=[
                pl.BlockSpec((block_n, H, W, Cin), lambda n: (n, 0, 0, 0)),
                pl.BlockSpec((Cin, Chid), lambda n: (0, 0)),
                pl.BlockSpec((1, Chid), lambda n: (0, 0)),
                pl.BlockSpec((4, Chid, Cout), lambda n: (0, 0, 0)),
                pl.BlockSpec((1, Cout), lambda n: (0, 0)),
            ],
            out_specs=pl.BlockSpec((block_n, H, W, Cout),
                                   lambda n: (n, 0, 0, 0)),
            scratch_shapes=[
                pltpu.VMEM((block_n, H, W + 4, Chid), jnp.float32),   # W-padded
                pltpu.VMEM((block_n, H + 4, W, Chid), jnp.float32),   # H-padded
            ],
        ),
        compiler_params=pltpu.CompilerParams(
            dimension_semantics=("parallel",),
            vmem_limit_bytes=vmem_limit),
    )(x, w1, b1, w2, b2)


def sppf_pallas(x_nchw, w1, b1, w2, b2, **kw):
    """PyTorch-layout wrapper (NCHW in / NCHW out).

    Prefer sppf_pallas_nhwc end-to-end: each transpose here is a full HBM
    read+write of the tensor (near-2x traffic on a memory-bound SPPF).
    """
    x = jnp.transpose(x_nchw, (0, 2, 3, 1))
    out = sppf_pallas_nhwc(x, w1, b1, w2, b2, **kw)
    return jnp.transpose(out, (0, 3, 1, 2))


# ---------------------------------------------------------------------------
# BN folding and a pure-JAX reference
# ---------------------------------------------------------------------------

def _fold_bn(w_oi, gamma, beta, mean, var, eps=1e-5):
    """Fold eval-mode BatchNorm into a bias-free 1x1 conv.

    w_oi: (Cout, Cin) conv weight (PyTorch order).  Returns the (Cin, Cout)
    matmul weight and (1, Cout) bias.
    """
    scale = gamma / jnp.sqrt(var + eps)
    w_eff = (w_oi * scale[:, None]).T
    b_eff = (beta - mean * scale)[None, :]
    return w_eff.astype(jnp.float32), b_eff.astype(jnp.float32)


def _maxpool5_ref(x_nhwc):
    xp = jnp.pad(x_nhwc, ((0, 0), (2, 2), (2, 2), (0, 0)),
                 constant_values=-jnp.inf)
    N, H, W, C = x_nhwc.shape
    out = xp[:, 0:H, 0:W, :]
    for dh in range(5):
        for dw in range(5):
            out = jnp.maximum(out, xp[:, dh:dh + H, dw:dw + W, :])
    return out


def sppf_ref_nhwc(x, w1, b1, w2, b2):
    h = x @ w1 + b1
    h = h * jax.nn.sigmoid(h)
    y1 = _maxpool5_ref(h)
    y2 = _maxpool5_ref(y1)
    y3 = _maxpool5_ref(y2)
    cat = jnp.concatenate([h, y1, y2, y3], axis=-1)
    out = cat @ w2.reshape(-1, w2.shape[-1]) + b2
    return out * jax.nn.sigmoid(out)


# ---------------------------------------------------------------------------
# Demo / correctness check
# ---------------------------------------------------------------------------

if __name__ == "__main__":
    # Shapes consistent with SPPF(in_channels=8, out_channels=8) -> Chid = 4.
    N, Cin, H, W = 2, 8, 16, 16
    Cout = 8
    Chid = Cin // 2

    key = jax.random.PRNGKey(0)
    keys = jax.random.split(key, 12)

    x_nchw = jax.random.normal(keys[0], (N, Cin, H, W), dtype=jnp.float32)

    # cv1: Conv2d(Cin, Chid, 1, bias=False) + BatchNorm2d(Chid)
    w1_raw = 0.3 * jax.random.normal(keys[1], (Chid, Cin), dtype=jnp.float32)
    g1 = 0.5 + jax.random.uniform(keys[2], (Chid,), dtype=jnp.float32)
    be1 = 0.1 * jax.random.normal(keys[3], (Chid,), dtype=jnp.float32)
    m1 = 0.1 * jax.random.normal(keys[4], (Chid,), dtype=jnp.float32)
    v1 = 0.5 + jax.random.uniform(keys[5], (Chid,), dtype=jnp.float32)

    # cv2: Conv2d(4*Chid, Cout, 1, bias=False) + BatchNorm2d(Cout)
    w2_raw = 0.3 * jax.random.normal(keys[6], (Cout, 4 * Chid), dtype=jnp.float32)
    g2 = 0.5 + jax.random.uniform(keys[7], (Cout,), dtype=jnp.float32)
    be2 = 0.1 * jax.random.normal(keys[8], (Cout,), dtype=jnp.float32)
    m2 = 0.1 * jax.random.normal(keys[9], (Cout,), dtype=jnp.float32)
    v2 = 0.5 + jax.random.uniform(keys[10], (Cout,), dtype=jnp.float32)

    w1, b1 = _fold_bn(w1_raw, g1, be1, m1, v1)
    w2, b2 = _fold_bn(w2_raw, g2, be2, m2, v2)

    # --- float32 check through the PyTorch-layout (NCHW) wrapper -----------
    out = jax.block_until_ready(sppf_pallas(x_nchw, w1, b1, w2, b2))
    x_nhwc = jnp.transpose(x_nchw, (0, 2, 3, 1))
    ref = jnp.transpose(sppf_ref_nhwc(x_nhwc, w1, b1, w2, b2), (0, 3, 1, 2))
    ref = jax.block_until_ready(ref)
    assert out.shape == (N, Cout, H, W)
    err = float(jnp.max(jnp.abs(out - ref)))
    assert jnp.allclose(out, ref, atol=2e-4, rtol=2e-4), err

    # --- bf16 activations/weights through the transpose-free NHWC path -----
    xb = x_nhwc.astype(jnp.bfloat16)
    w1b = w1.astype(jnp.bfloat16)
    w2b = w2.astype(jnp.bfloat16)
    out_b = jax.block_until_ready(sppf_pallas_nhwc(xb, w1b, b1, w2b, b2))
    ref_b = sppf_ref_nhwc(xb.astype(jnp.float32), w1b.astype(jnp.float32),
                          b1, w2b.astype(jnp.float32), b2)
    ref_b = jax.block_until_ready(ref_b)
    err_b = float(jnp.max(jnp.abs(out_b.astype(jnp.float32) - ref_b)))
    assert jnp.allclose(out_b.astype(jnp.float32), ref_b,
                        atol=3e-2, rtol=3e-2), err_b

    print("KERNEL_OK")
</pallas_src>

<mosaic_0001>
module attributes {stable_mosaic.version = 11 : i64} {
  func.func @_sppf_kernel(%arg0: i32, %arg1: memref<2x16x16x8xf32, #tpu.memory_space<vmem>>, %arg2: memref<8x4xf32, #tpu.memory_space<vmem>>, %arg3: memref<1x4xf32, #tpu.memory_space<vmem>>, %arg4: memref<4x4x8xf32, #tpu.memory_space<vmem>>, %arg5: memref<1x8xf32, #tpu.memory_space<vmem>>, %arg6: memref<2x16x16x8xf32, #tpu.memory_space<vmem>>, %arg7: memref<2x16x20x4xf32, #tpu.memory_space<vmem>>, %arg8: memref<2x20x16x4xf32, #tpu.memory_space<vmem>>) attributes {dimension_semantics = [#tpu.dimension_semantics<parallel>], iteration_bounds = array<i64: 1>, scalar_prefetch = 0 : i64, scratch_operands = 2 : i64, tpu.core_type = #tpu.core_type<tc>, window_params = [{transform_indices = @transform_0, window_bounds = array<i64: 2, 16, 16, 8>}, {pipeline_mode = #tpu.pipeline_mode<synchronous>, transform_indices = @transform_1, window_bounds = array<i64: 8, 4>}, {pipeline_mode = #tpu.pipeline_mode<synchronous>, transform_indices = @transform_2, window_bounds = array<i64: 1, 4>}, {pipeline_mode = #tpu.pipeline_mode<synchronous>, transform_indices = @transform_3, window_bounds = array<i64: 4, 4, 8>}, {pipeline_mode = #tpu.pipeline_mode<synchronous>, transform_indices = @transform_4, window_bounds = array<i64: 1, 8>}, {transform_indices = @transform_5, window_bounds = array<i64: 2, 16, 16, 8>}]} {
    %c0 = arith.constant 0 : index
    %c0_0 = arith.constant 0 : index
    %c0_1 = arith.constant 0 : index
    %c0_2 = arith.constant 0 : index
    %0 = vector.load %arg1[%c0, %c0_0, %c0_1, %c0_2] : memref<2x16x16x8xf32, #tpu.memory_space<vmem>>, vector<2x16x16x8xf32>
    %1 = vector.shape_cast %0 : vector<2x16x16x8xf32> to vector<512x8xf32>
    %c0_3 = arith.constant 0 : index
    %c0_4 = arith.constant 0 : index
    %2 = vector.load %arg2[%c0_3, %c0_4] : memref<8x4xf32, #tpu.memory_space<vmem>>, vector<8x4xf32>
    %cst = arith.constant dense<0.000000e+00> : vector<512x4xf32>
    %3 = tpu.matmul %1, %2, %cst {dimension_numbers = #tpu.dot_dimension_numbers<[1], [0], [0], [1], [0, 0, 1, 1], [], []>} : vector<512x8xf32>, vector<8x4xf32>, vector<512x4xf32> -> vector<512x4xf32>
    %c0_5 = arith.constant 0 : index
    %c0_6 = arith.constant 0 : index
    %4 = vector.load %arg3[%c0_5, %c0_6] : memref<1x4xf32, #tpu.memory_space<vmem>>, vector<1x4xf32>
    %5 = vector.broadcast %4 : vector<1x4xf32> to vector<512x4xf32>
    %6 = arith.addf %3, %5 : vector<512x4xf32>
    %cst_7 = arith.constant 0.000000e+00 : f32
    %7 = vector.broadcast %cst_7 : f32 to vector<512x4xf32>
    %8 = arith.subf %7, %6 : vector<512x4xf32>
    %9 = math.exp %8 : vector<512x4xf32>
    %cst_8 = arith.constant 1.000000e+00 : f32
    %10 = vector.broadcast %cst_8 : f32 to vector<512x4xf32>
    %11 = arith.addf %10, %9 : vector<512x4xf32>
    %cst_9 = arith.constant 1.000000e+00 : f32
    %12 = vector.broadcast %cst_9 : f32 to vector<512x4xf32>
    %13 = arith.divf %12, %11 : vector<512x4xf32>
    %14 = arith.mulf %6, %13 : vector<512x4xf32>
    %15 = vector.shape_cast %14 : vector<512x4xf32> to vector<2x16x16x4xf32>
    %cst_10 = arith.constant 0xFF800000 : f32
    %16 = vector.broadcast %cst_10 : f32 to vector<2x16x2x4xf32>
    %c0_11 = arith.constant 0 : index
    %c0_12 = arith.constant 0 : index
    %c0_13 = arith.constant 0 : index
    %c0_14 = arith.constant 0 : index
    %17 = vector.load %arg7[%c0_11, %c0_12, %c0_13, %c0_14] : memref<2x16x20x4xf32, #tpu.memory_space<vmem>>, vector<2x16x2x4xf32>
    tpu.vector_store %arg7[%c0_11, %c0_12, %c0_13, %c0_14], %16 {strides = array<i32>} : memref<2x16x20x4xf32, #tpu.memory_space<vmem>>, vector<2x16x2x4xf32>,
    %c0_15 = arith.constant 0 : index
    %c0_16 = arith.constant 0 : index
    %c18 = arith.constant 18 : index
    %c0_17 = arith.constant 0 : index
    %18 = vector.load %arg7[%c0_15, %c0_16, %c18, %c0_17] : memref<2x16x20x4xf32, #tpu.memory_space<vmem>>, vector<2x16x2x4xf32>
    tpu.vector_store %arg7[%c0_15, %c0_16, %c18, %c0_17], %16 {strides = array<i32>} : memref<2x16x20x4xf32, #tpu.memory_space<vmem>>, vector<2x16x2x4xf32>,
    %cst_18 = arith.constant 0xFF800000 : f32
    %19 = vector.broadcast %cst_18 : f32 to vector<2x2x16x4xf32>
    %c0_19 = arith.constant 0 : index
    %c0_20 = arith.constant 0 : index
    %c0_21 = arith.constant 0 : index
    %c0_22 = arith.constant 0 : index
    %20 = vector.load %arg8[%c0_19, %c0_20, %c0_21, %c0_22] : memref<2x20x16x4xf32, #tpu.memory_space<vmem>>, vector<2x2x16x4xf32>
    tpu.vector_store %arg8[%c0_19, %c0_20, %c0_21, %c0_22], %19 {strides = array<i32>} : memref<2x20x16x4xf32, #tpu.memory_space<vmem>>, vector<2x2x16x4xf32>,
    %c0_23 = arith.constant 0 : index
    %c18_24 = arith.constant 18 : index
    %c0_25 = arith.constant 0 : index
    %c0_26 = arith.constant 0 : index
    %21 = vector.load %arg8[%c0_23, %c18_24, %c0_25, %c0_26] : memref<2x20x16x4xf32, #tpu.memory_space<vmem>>, vector<2x2x16x4xf32>
    tpu.vector_store %arg8[%c0_23, %c18_24, %c0_25, %c0_26], %19 {strides = array<i32>} : memref<2x20x16x4xf32, #tpu.memory_space<vmem>>, vector<2x2x16x4xf32>,
    %c0_27 = arith.constant 0 : index
    %c0_28 = arith.constant 0 : index
    %c0_29 = arith.constant 0 : index
    %22 = vector.load %arg4[%c0_27, %c0_28, %c0_29] : memref<4x4x8xf32, #tpu.memory_space<vmem>>, vector<1x4x8xf32>
    %23 = vector.shape_cast %22 : vector<1x4x8xf32> to vector<4x8xf32>
    %24 = vector.shape_cast %15 : vector<2x16x16x4xf32> to vector<512x4xf32>
    %cst_30 = arith.constant dense<0.000000e+00> : vector<512x8xf32>
    %25 = tpu.matmul %24, %23, %cst_30 {dimension_numbers = #tpu.dot_dimension_numbers<[1], [0], [0], [1], [0, 0, 1, 1], [], []>} : vector<512x4xf32>, vector<4x8xf32>, vector<512x8xf32> -> vector<512x8xf32>
    %c0_31 = arith.constant 0 : index
    %c0_32 = arith.constant 0 : index
    %c2 = arith.constant 2 : index
    %c0_33 = arith.constant 0 : index
    %26 = vector.load %arg7[%c0_31, %c0_32, %c2, %c0_33] : memref<2x16x20x4xf32, #tpu.memory_space<vmem>>, vector<2x16x16x4xf32>
    tpu.vector_store %arg7[%c0_31, %c0_32, %c2, %c0_33], %15 {strides = array<i32>} : memref<2x16x20x4xf32, #tpu.memory_space<vmem>>, vector<2x16x16x4xf32>,
    %c0_34 = arith.constant 0 : index
    %c0_35 = arith.constant 0 : index
    %c0_36 = arith.constant 0 : index
    %c0_37 = arith.constant 0 : index
    %27 = vector.load %arg7[%c0_34, %c0_35, %c0_36, %c0_37] : memref<2x16x20x4xf32, #tpu.memory_space<vmem>>, vector<2x16x16x4xf32>
    %c0_38 = arith.constant 0 : index
    %c0_39 = arith.constant 0 : index
    %c1 = arith.constant 1 : index
    %c0_40 = arith.constant 0 : index
    %28 = vector.load %arg7[%c0_38, %c0_39, %c1, %c0_40] : memref<2x16x20x4xf32, #tpu.memory_space<vmem>>, vector<2x16x16x4xf32>
    %c0_41 = arith.constant 0 : index
    %c0_42 = arith.constant 0 : index
    %c2_43 = arith.constant 2 : index
    %c0_44 = arith.constant 0 : index
    %29 = vector.load %arg7[%c0_41, %c0_42, %c2_43, %c0_44] : memref<2x16x20x4xf32, #tpu.memory_space<vmem>>, vector<2x16x16x4xf32>
    %c0_45 = arith.constant 0 : index
    %c0_46 = arith.constant 0 : index
    %c3 = arith.constant 3 : index
    %c0_47 = arith.constant 0 : index
    %30 = vector.load %arg7[%c0_45, %c0_46, %c3, %c0_47] : memref<2x16x20x4xf32, #tpu.memory_space<vmem>>, vector<2x16x16x4xf32>
    %c0_48 = arith.constant 0 : index
    %c0_49 = arith.constant 0 : index
    %c4 = arith.constant 4 : index
    %c0_50 = arith.constant 0 : index
    %31 = vector.load %arg7[%c0_48, %c0_49, %c4, %c0_50] : memref<2x16x20x4xf32, #tpu.memory_space<vmem>>, vector<2x16x16x4xf32>
    %32 = arith.maximumf %27, %28 : vector<2x16x16x4xf32>
    %33 = arith.maximumf %29, %30 : vector<2x16x16x4xf32>
    %34 = arith.maximumf %32, %33 : vector<2x16x16x4xf32>
    %35 = arith.maximumf %34, %31 : vector<2x16x16x4xf32>
    %c0_51 = arith.constant 0 : index
    %c2_52 = arith.constant 2 : index
    %c0_53 = arith.constant 0 : index
    %c0_54 = arith.constant 0 : index
    %36 = vector.load %arg8[%c0_51, %c2_52, %c0_53, %c0_54] : memref<2x20x16x4xf32, #tpu.memory_space<vmem>>, vector<2x16x16x4xf32>
    tpu.vector_store %arg8[%c0_51, %c2_52, %c0_53, %c0_54], %35 {strides = array<i32>} : memref<2x20x16x4xf32, #tpu.memory_space<vmem>>, vector<2x16x16x4xf32>,
    %c0_55 = arith.constant 0 : index
    %c0_56 = arith.constant 0 : index
    %c0_57 = arith.constant 0 : index
    %c0_58 = arith.constant 0 : index
    %37 = vector.load %arg8[%c0_55, %c0_56, %c0_57, %c0_58] : memref<2x20x16x4xf32, #tpu.memory_space<vmem>>, vector<2x16x16x4xf32>
    %c0_59 = arith.constant 0 : index
    %c1_60 = arith.constant 1 : index
    %c0_61 = arith.constant 0 : index
    %c0_62 = arith.constant 0 : index
    %38 = vector.load %arg8[%c0_59, %c1_60, %c0_61, %c0_62] : memref<2x20x16x4xf32, #tpu.memory_space<vmem>>, vector<2x16x16x4xf32>
    %c0_63 = arith.constant 0 : index
    %c2_64 = arith.constant 2 : index
    %c0_65 = arith.constant 0 : index
    %c0_66 = arith.constant 0 : index
    %39 = vector.load %arg8[%c0_63, %c2_64, %c0_65, %c0_66] : memref<2x20x16x4xf32, #tpu.memory_space<vmem>>, vector<2x16x16x4xf32>
    %c0_67 = arith.constant 0 : index
    %c3_68 = arith.constant 3 : index
    %c0_69 = arith.constant 0 : index
    %c0_70 = arith.constant 0 : index
    %40 = vector.load %arg8[%c0_67, %c3_68, %c0_69, %c0_70] : memref<2x20x16x4xf32, #tpu.memory_space<vmem>>, vector<2x16x16x4xf32>
    %c0_71 = arith.constant 0 : index
    %c4_72 = arith.constant 4 : index
    %c0_73 = arith.constant 0 : index
    %c0_74 = arith.constant 0 : index
    %41 = vector.load %arg8[%c0_71, %c4_72, %c0_73, %c0_74] : memref<2x20x16x4xf32, #tpu.memory_space<vmem>>, vector<2x16x16x4xf32>
    %42 = arith.maximumf %37, %38 : vector<2x16x16x4xf32>
    %43 = arith.maximumf %39, %40 : vector<2x16x16x4xf32>
    %44 = arith.maximumf %42, %43 : vector<2x16x16x4xf32>
    %45 = arith.maximumf %44, %41 : vector<2x16x16x4xf32>
    %c1_75 = arith.constant 1 : index
    %c0_76 = arith.constant 0 : index
    %c0_77 = arith.constant 0 : index
    %46 = vector.load %arg4[%c1_75, %c0_76, %c0_77] : memref<4x4x8xf32, #tpu.memory_space<vmem>>, vector<1x4x8xf32>
    %47 = vector.shape_cast %46 : vector<1x4x8xf32> to vector<4x8xf32>
    %48 = vector.shape_cast %45 : vector<2x16x16x4xf32> to vector<512x4xf32>
    %cst_78 = arith.constant dense<0.000000e+00> : vector<512x8xf32>
    %49 = tpu.matmul %48, %47, %cst_78 {dimension_numbers = #tpu.dot_dimension_numbers<[1], [0], [0], [1], [0, 0, 1, 1], [], []>} : vector<512x4xf32>, vector<4x8xf32>, vector<512x8xf32> -> vector<512x8xf32>
    %50 = arith.addf %25, %49 : vector<512x8xf32>
    %c0_79 = arith.constant 0 : index
    %c0_80 = arith.constant 0 : index
    %c2_81 = arith.constant 2 : index
    %c0_82 = arith.constant 0 : index
    %51 = vector.load %arg7[%c0_79, %c0_80, %c2_81, %c0_82] : memref<2x16x20x4xf32, #tpu.memory_space<vmem>>, vector<2x16x16x4xf32>
    tpu.vector_store %arg7[%c0_79, %c0_80, %c2_81, %c0_82], %45 {strides = array<i32>} : memref<2x16x20x4xf32, #tpu.memory_space<vmem>>, vector<2x16x16x4xf32>,
    %c0_83 = arith.constant 0 : index
    %c0_84 = arith.constant 0 : index
    %c0_85 = arith.constant 0 : index
    %c0_86 = arith.constant 0 : index
    %52 = vector.load %arg7[%c0_83, %c0_84, %c0_85, %c0_86] : memref<2x16x20x4xf32, #tpu.memory_space<vmem>>, vector<2x16x16x4xf32>
    %c0_87 = arith.constant 0 : index
    %c0_88 = arith.constant 0 : index
    %c1_89 = arith.constant 1 : index
    %c0_90 = arith.constant 0 : index
    %53 = vector.load %arg7[%c0_87, %c0_88, %c1_89, %c0_90] : memref<2x16x20x4xf32, #tpu.memory_space<vmem>>, vector<2x16x16x4xf32>
    %c0_91 = arith.constant 0 : index
    %c0_92 = arith.constant 0 : index
    %c2_93 = arith.constant 2 : index
    %c0_94 = arith.constant 0 : index
    %54 = vector.load %arg7[%c0_91, %c0_92, %c2_93, %c0_94] : memref<2x16x20x4xf32, #tpu.memory_space<vmem>>, vector<2x16x16x4xf32>
    %c0_95 = arith.constant 0 : index
    %c0_96 = arith.constant 0 : index
    %c3_97 = arith.constant 3 : index
    %c0_98 = arith.constant 0 : index
    %55 = vector.load %arg7[%c0_95, %c0_96, %c3_97, %c0_98] : memref<2x16x20x4xf32, #tpu.memory_space<vmem>>, vector<2x16x16x4xf32>
    %c0_99 = arith.constant 0 : index
    %c0_100 = arith.constant 0 : index
    %c4_101 = arith.constant 4 : index
    %c0_102 = arith.constant 0 : index
    %56 = vector.load %arg7[%c0_99, %c0_100, %c4_101, %c0_102] : memref<2x16x20x4xf32, #tpu.memory_space<vmem>>, vector<2x16x16x4xf32>
    %57 = arith.maximumf %52, %53 : vector<2x16x16x4xf32>
    %58 = arith.maximumf %54, %55 : vector<2x16x16x4xf32>
    %59 = arith.maximumf %57, %58 : vector<2x16x16x4xf32>
    %60 = arith.maximumf %59, %56 : vector<2x16x16x4xf32>
    %c0_103 = arith.constant 0 : index
    %c2_104 = arith.constant 2 : index
    %c0_105 = arith.constant 0 : index
    %c0_106 = arith.constant 0 : index
    %61 = vector.load %arg8[%c0_103, %c2_104, %c0_105, %c0_106] : memref<2x20x16x4xf32, #tpu.memory_space<vmem>>, vector<2x16x16x4xf32>
    tpu.vector_store %arg8[%c0_103, %c2_104, %c0_105, %c0_106], %60 {strides = array<i32>} : memref<2x20x16x4xf32, #tpu.memory_space<vmem>>, vector<2x16x16x4xf32>,
    %c0_107 = arith.constant 0 : index
    %c0_108 = arith.constant 0 : index
    %c0_109 = arith.constant 0 : index
    %c0_110 = arith.constant 0 : index
    %62 = vector.load %arg8[%c0_107, %c0_108, %c0_109, %c0_110] : memref<2x20x16x4xf32, #tpu.memory_space<vmem>>, vector<2x16x16x4xf32>
    %c0_111 = arith.constant 0 : index
    %c1_112 = arith.constant 1 : index
    %c0_113 = arith.constant 0 : index
    %c0_114 = arith.constant 0 : index
    %63 = vector.load %arg8[%c0_111, %c1_112, %c0_113, %c0_114] : memref<2x20x16x4xf32, #tpu.memory_space<vmem>>, vector<2x16x16x4xf32>
    %c0_115 = arith.constant 0 : index
    %c2_116 = arith.constant 2 : index
    %c0_117 = arith.constant 0 : index
    %c0_118 = arith.constant 0 : index
    %64 = vector.load %arg8[%c0_115, %c2_116, %c0_117, %c0_118] : memref<2x20x16x4xf32, #tpu.memory_space<vmem>>, vector<2x16x16x4xf32>
    %c0_119 = arith.constant 0 : index
    %c3_120 = arith.constant 3 : index
    %c0_121 = arith.constant 0 : index
    %c0_122 = arith.constant 0 : index
    %65 = vector.load %arg8[%c0_119, %c3_120, %c0_121, %c0_122] : memref<2x20x16x4xf32, #tpu.memory_space<vmem>>, vector<2x16x16x4xf32>
    %c0_123 = arith.constant 0 : index
    %c4_124 = arith.constant 4 : index
    %c0_125 = arith.constant 0 : index
    %c0_126 = arith.constant 0 : index
    %66 = vector.load %arg8[%c0_123, %c4_124, %c0_125, %c0_126] : memref<2x20x16x4xf32, #tpu.memory_space<vmem>>, vector<2x16x16x4xf32>
    %67 = arith.maximumf %62, %63 : vector<2x16x16x4xf32>
    %68 = arith.maximumf %64, %65 : vector<2x16x16x4xf32>
    %69 = arith.maximumf %67, %68 : vector<2x16x16x4xf32>
    %70 = arith.maximumf %69, %66 : vector<2x16x16x4xf32>
    %c2_127 = arith.constant 2 : index
    %c0_128 = arith.constant 0 : index
    %c0_129 = arith.constant 0 : index
    %71 = vector.load %arg4[%c2_127, %c0_128, %c0_129] : memref<4x4x8xf32, #tpu.memory_space<vmem>>, vector<1x4x8xf32>
    %72 = vector.shape_cast %71 : vector<1x4x8xf32> to vector<4x8xf32>
    %73 = vector.shape_cast %70 : vector<2x16x16x4xf32> to vector<512x4xf32>
    %cst_130 = arith.constant dense<0.000000e+00> : vector<512x8xf32>
    %74 = tpu.matmul %73, %72, %cst_130 {dimension_numbers = #tpu.dot_dimension_numbers<[1], [0], [0], [1], [0, 0, 1, 1], [], []>} : vector<512x4xf32>, vector<4x8xf32>, vector<512x8xf32> -> vector<512x8xf32>
    %75 = arith.addf %50, %74 : vector<512x8xf32>
    %c0_131 = arith.constant 0 : index
    %c0_132 = arith.constant 0 : index
    %c2_133 = arith.constant 2 : index
    %c0_134 = arith.constant 0 : index
    %76 = vector.load %arg7[%c0_131, %c0_132, %c2_133, %c0_134] : memref<2x16x20x4xf32, #tpu.memory_space<vmem>>, vector<2x16x16x4xf32>
    tpu.vector_store %arg7[%c0_131, %c0_132, %c2_133, %c0_134], %70 {strides = array<i32>} : memref<2x16x20x4xf32, #tpu.memory_space<vmem>>, vector<2x16x16x4xf32>,
    %c0_135 = arith.constant 0 : index
    %c0_136 = arith.constant 0 : index
    %c0_137 = arith.constant 0 : index
    %c0_138 = arith.constant 0 : index
    %77 = vector.load %arg7[%c0_135, %c0_136, %c0_137, %c0_138] : memref<2x16x20x4xf32, #tpu.memory_space<vmem>>, vector<2x16x16x4xf32>
    %c0_139 = arith.constant 0 : index
    %c0_140 = arith.constant 0 : index
    %c1_141 = arith.constant 1 : index
    %c0_142 = arith.constant 0 : index
    %78 = vector.load %arg7[%c0_139, %c0_140, %c1_141, %c0_142] : memref<2x16x20x4xf32, #tpu.memory_space<vmem>>, vector<2x16x16x4xf32>
    %c0_143 = arith.constant 0 : index
    %c0_144 = arith.constant 0 : index
    %c2_145 = arith.constant 2 : index
    %c0_146 = arith.constant 0 : index
    %79 = vector.load %arg7[%c0_143, %c0_144, %c2_145, %c0_146] : memref<2x16x20x4xf32, #tpu.memory_space<vmem>>, vector<2x16x16x4xf32>
    %c0_147 = arith.constant 0 : index
    %c0_148 = arith.constant 0 : index
    %c3_149 = arith.constant 3 : index
    %c0_150 = arith.constant 0 : index
    %80 = vector.load %arg7[%c0_147, %c0_148, %c3_149, %c0_150] : memref<2x16x20x4xf32, #tpu.memory_space<vmem>>, vector<2x16x16x4xf32>
    %c0_151 = arith.constant 0 : index
    %c0_152 = arith.constant 0 : index
    %c4_153 = arith.constant 4 : index
    %c0_154 = arith.constant 0 : index
    %81 = vector.load %arg7[%c0_151, %c0_152, %c4_153, %c0_154] : memref<2x16x20x4xf32, #tpu.memory_space<vmem>>, vector<2x16x16x4xf32>
    %82 = arith.maximumf %77, %78 : vector<2x16x16x4xf32>
    %83 = arith.maximumf %79, %80 : vector<2x16x16x4xf32>
    %84 = arith.maximumf %82, %83 : vector<2x16x16x4xf32>
    %85 = arith.maximumf %84, %81 : vector<2x16x16x4xf32>
    %c0_155 = arith.constant 0 : index
    %c2_156 = arith.constant 2 : index
    %c0_157 = arith.constant 0 : index
    %c0_158 = arith.constant 0 : index
    %86 = vector.load %arg8[%c0_155, %c2_156, %c0_157, %c0_158] : memref<2x20x16x4xf32, #tpu.memory_space<vmem>>, vector<2x16x16x4xf32>
    tpu.vector_store %arg8[%c0_155, %c2_156, %c0_157, %c0_158], %85 {strides = array<i32>} : memref<2x20x16x4xf32, #tpu.memory_space<vmem>>, vector<2x16x16x4xf32>,
    %c0_159 = arith.constant 0 : index
    %c0_160 = arith.constant 0 : index
    %c0_161 = arith.constant 0 : index
    %c0_162 = arith.constant 0 : index
    %87 = vector.load %arg8[%c0_159, %c0_160, %c0_161, %c0_162] : memref<2x20x16x4xf32, #tpu.memory_space<vmem>>, vector<2x16x16x4xf32>
    %c0_163 = arith.constant 0 : index
    %c1_164 = arith.constant 1 : index
    %c0_165 = arith.constant 0 : index
    %c0_166 = arith.constant 0 : index
    %88 = vector.load %arg8[%c0_163, %c1_164, %c0_165, %c0_166] : memref<2x20x16x4xf32, #tpu.memory_space<vmem>>, vector<2x16x16x4xf32>
    %c0_167 = arith.constant 0 : index
    %c2_168 = arith.constant 2 : index
    %c0_169 = arith.constant 0 : index
    %c0_170 = arith.constant 0 : index
    %89 = vector.load %arg8[%c0_167, %c2_168, %c0_169, %c0_170] : memref<2x20x16x4xf32, #tpu.memory_space<vmem>>, vector<2x16x16x4xf32>
    %c0_171 = arith.constant 0 : index
    %c3_172 = arith.constant 3 : index
    %c0_173 = arith.constant 0 : index
    %c0_174 = arith.constant 0 : index
    %90 = vector.load %arg8[%c0_171, %c3_172, %c0_173, %c0_174] : memref<2x20x16x4xf32, #tpu.memory_space<vmem>>, vector<2x16x16x4xf32>
    %c0_175 = arith.constant 0 : index
    %c4_176 = arith.constant 4 : index
    %c0_177 = arith.constant 0 : index
    %c0_178 = arith.constant 0 : index
    %91 = vector.load %arg8[%c0_175, %c4_176, %c0_177, %c0_178] : memref<2x20x16x4xf32, #tpu.memory_space<vmem>>, vector<2x16x16x4xf32>
    %92 = arith.maximumf %87, %88 : vector<2x16x16x4xf32>
    %93 = arith.maximumf %89, %90 : vector<2x16x16x4xf32>
    %94 = arith.maximumf %92, %93 : vector<2x16x16x4xf32>
    %95 = arith.maximumf %94, %91 : vector<2x16x16x4xf32>
    %c3_179 = arith.constant 3 : index
    %c0_180 = arith.constant 0 : index
    %c0_181 = arith.constant 0 : index
    %96 = vector.load %arg4[%c3_179, %c0_180, %c0_181] : memref<4x4x8xf32, #tpu.memory_space<vmem>>, vector<1x4x8xf32>
    %97 = vector.shape_cast %96 : vector<1x4x8xf32> to vector<4x8xf32>
    %98 = vector.shape_cast %95 : vector<2x16x16x4xf32> to vector<512x4xf32>
    %cst_182 = arith.constant dense<0.000000e+00> : vector<512x8xf32>
    %99 = tpu.matmul %98, %97, %cst_182 {dimension_numbers = #tpu.dot_dimension_numbers<[1], [0], [0], [1], [0, 0, 1, 1], [], []>} : vector<512x4xf32>, vector<4x8xf32>, vector<512x8xf32> -> vector<512x8xf32>
    %100 = arith.addf %75, %99 : vector<512x8xf32>
    %c0_183 = arith.constant 0 : index
    %c0_184 = arith.constant 0 : index
    %101 = vector.load %arg5[%c0_183, %c0_184] : memref<1x8xf32, #tpu.memory_space<vmem>>, vector<1x8xf32>
    %102 = vector.broadcast %101 : vector<1x8xf32> to vector<512x8xf32>
    %103 = arith.addf %100, %102 : vector<512x8xf32>
    %cst_185 = arith.constant 0.000000e+00 : f32
    %104 = vector.broadcast %cst_185 : f32 to vector<512x8xf32>
    %105 = arith.subf %104, %103 : vector<512x8xf32>
    %106 = math.exp %105 : vector<512x8xf32>
    %cst_186 = arith.constant 1.000000e+00 : f32
    %107 = vector.broadcast %cst_186 : f32 to vector<512x8xf32>
    %108 = arith.addf %107, %106 : vector<512x8xf32>
    %cst_187 = arith.constant 1.000000e+00 : f32
    %109 = vector.broadcast %cst_187 : f32 to vector<512x8xf32>
    %110 = arith.divf %109, %108 : vector<512x8xf32>
    %111 = arith.mulf %103, %110 : vector<512x8xf32>
    %112 = vector.shape_cast %111 : vector<512x8xf32> to vector<2x16x16x8xf32>
    %c0_188 = arith.constant 0 : index
    %c0_189 = arith.constant 0 : index
    %c0_190 = arith.constant 0 : index
    %c0_191 = arith.constant 0 : index
    %113 = vector.load %arg6[%c0_188, %c0_189, %c0_190, %c0_191] : memref<2x16x16x8xf32, #tpu.memory_space<vmem>>, vector<2x16x16x8xf32>
    tpu.vector_store %arg6[%c0_188, %c0_189, %c0_190, %c0_191], %112 {strides = array<i32>} : memref<2x16x16x8xf32, #tpu.memory_space<vmem>>, vector<2x16x16x8xf32>,
    return
  }
  func.func @transform_0(%arg0: i32) -> (i32, i32, i32, i32) {
    %c0_i32 = arith.constant 0 : i32
    %c0_i32_0 = arith.constant 0 : i32
    %c0_i32_1 = arith.constant 0 : i32
    %c0_i32_2 = arith.constant 0 : i32
    return %arg0, %c0_i32, %c0_i32_0, %c0_i32_1 : i32, i32, i32, i32
  }
  func.func @transform_1(%arg0: i32) -> (i32, i32) {
    %c0_i32 = arith.constant 0 : i32
    %c0_i32_0 = arith.constant 0 : i32
    %c0_i32_1 = arith.constant 0 : i32
    return %c0_i32, %c0_i32_0 : i32, i32
  }
  func.func @transform_2(%arg0: i32) -> (i32, i32) {
    %c0_i32 = arith.constant 0 : i32
    %c0_i32_0 = arith.constant 0 : i32
    %c0_i32_1 = arith.constant 0 : i32
    return %c0_i32, %c0_i32_0 : i32, i32
  }
  func.func @transform_3(%arg0: i32) -> (i32, i32, i32) {
    %c0_i32 = arith.constant 0 : i32
    %c0_i32_0 = arith.constant 0 : i32
    %c0_i32_1 = arith.constant 0 : i32
    %c0_i32_2 = arith.constant 0 : i32
    return %c0_i32, %c0_i32_0, %c0_i32_1 : i32, i32, i32
  }
  func.func @transform_4(%arg0: i32) -> (i32, i32) {
    %c0_i32 = arith.constant 0 : i32
    %c0_i32_0 = arith.constant 0 : i32
    %c0_i32_1 = arith.constant 0 : i32
    return %c0_i32, %c0_i32_0 : i32, i32
  }
  func.func @transform_5(%arg0: i32) -> (i32, i32, i32, i32) {
    %c0_i32 = arith.constant 0 : i32
    %c0_i32_0 = arith.constant 0 : i32
    %c0_i32_1 = arith.constant 0 : i32
    %c0_i32_2 = arith.constant 0 : i32
    return %arg0, %c0_i32, %c0_i32_0, %c0_i32_1 : i32, i32, i32, i32
  }
}

</mosaic_0001>

<bundles_post_ra>
// kernel: tpu_custom_call.1
= control target key start
LH: loop header
LB: loop body
LE: loop exit
PB: predicated region body
PF: predicated region fallthrough
CT: control target
= control target key end

     0   :  { %vm92_vm0 = vcmask 64512   ;;  %vm1118_vm1 = vcmask 25600   ;;  %vm1183_vm2 = vcmask 31744   ;;  %vm2680_vm3 = vcmask 1043456   ;;  %s15320_s1 = inlined_call_operand.vmem [shape: f32[8,4], index: 1, kind: input, shape index: {}]   ;;  %s15321_s0 = inlined_call_operand.vmem [shape: f32[2,16,16,8], index: 0, kind: input, shape index: {}]   ;;  %s15322_s3 = inlined_call_operand.vmem [shape: f32[4,4,8], index: 3, kind: input, shape index: {}]   ;;  %s15323_s2 = inlined_call_operand.vmem [shape: f32[1,4], index: 2, kind: input, shape index: {}]   ;;  %s15324_s4 = inlined_call_operand.vmem [shape: f32[1,8], index: 4, kind: input, shape index: {}]   ;;  %s15325_s5 = inlined_call_operand.vmem [shape: f32[2,16,16,8], index: 5, kind: output, shape index: {}]  }
   0x1   :  { %v84_v0 = vld [vmem:[%s15320_s1] sm:$0xff]  ;;  %v21_v3 = vld [vmem:[%s15321_s0 + $0x8] sm:$0xff]  ;;  %v22_v5 = vld [vmem:[%s15321_s0 + $0x10] sm:$0xff] }
   0x2   :  { %v20_v1 = vld [vmem:[%s15321_s0] sm:$0xff]  ;;  %8742 = vmatprep.subr.mxu0 %v84_v0  ;;  %9232 = vmatprep.subr.mxu1 %v84_v0  ;;  %v53_v4 = vld [vmem:[%s15321_s0 + $0x108] sm:$0xff]  ;;  %v54_v6 = vld [vmem:[%s15321_s0 + $0x110] sm:$0xff] }
   0x3   :  { %v52_v2 = vld [vmem:[%s15321_s0 + $0x100] sm:$0xff]  ;;  %8743 = vmatpush3.msra.mxu0 %v84_v0  ;;  %9233 = vmatpush3.msra.mxu1 %v84_v0  ;;  %v23_v7 = vld [vmem:[%s15321_s0 + $0x18] sm:$0xff]  ;;  %v25_v11 = vld [vmem:[%s15321_s0 + $0x28] sm:$0xff] }
   0x4   :  { %8744 = vmatprep.mubr.msk.f32.mxu0 %vm92_vm0, %v20_v1  ;;  %8792 = vmatprep.mubr.msk.f32.mxu1 %vm92_vm0, %v52_v2  ;;  %v55_v8 = vld [vmem:[%s15321_s0 + $0x118] sm:$0xff]  ;;  %v24_v9 = vld [vmem:[%s15321_s0 + $0x20] sm:$0xff]  ;;  %v57_v12 = vld [vmem:[%s15321_s0 + $0x128] sm:$0xff]  ;;  %v9763_v1 = vmov -inf  }
   0x5   :  { %8745 = vmatmul.mubr.msk.f32.vlgmr.msra.gmra.mxu0 %vm92_vm0, %v21_v3  ;;  %8793 = vmatmul.mubr.msk.f32.vlgmr.msra.gmra.mxu1 %vm92_vm0, %v53_v4  ;;  %v56_v10 = vld [vmem:[%s15321_s0 + $0x120] sm:$0xff]  ;;  %v26_v13 = vld [vmem:[%s15321_s0 + $0x30] sm:$0xff]  ;;  %v27_v15 = vld [vmem:[%s15321_s0 + $0x38] sm:$0xff]  ;;  %1151 = vst.msk [vmem:[#allocation2 + $0x12] sm:$0x3] %vm1118_vm1, %v9763_v1 }
   0x6   :  { %8747 = vmatprep.mubr.msk.f32.mxu0 %vm92_vm0, %v22_v5  ;;  %8795 = vmatprep.mubr.msk.f32.mxu1 %vm92_vm0, %v54_v6  ;;  %v58_v14 = vld [vmem:[%s15321_s0 + $0x130] sm:$0xff]  ;;  %v59_v16 = vld [vmem:[%s15321_s0 + $0x138] sm:$0xff]  ;;  %v28_v17 = vld [vmem:[%s15321_s0 + $0x40] sm:$0xff]  ;;  %1119 = vst.msk [vmem:[#allocation2] sm:$0x3] %vm1118_vm1, %v9763_v1 }
   0x7   :  { %v60_v18 = vld [vmem:[%s15321_s0 + $0x140] sm:$0xff]  ;;  %v29_v19 = vld [vmem:[%s15321_s0 + $0x48] sm:$0xff]  ;;  %v30_v21 = vld [vmem:[%s15321_s0 + $0x50] sm:$0xff]  ;;  %1120 = vst.msk [vmem:[#allocation2 + $0x18] sm:$0x3] %vm1118_vm1, %v9763_v1 }
   0x8   :  { %v61_v20 = vld [vmem:[%s15321_s0 + $0x148] sm:$0xff]  ;;  %v62_v22 = vld [vmem:[%s15321_s0 + $0x150] sm:$0xff]  ;;  %v31_v23 = vld [vmem:[%s15321_s0 + $0x58] sm:$0xff]  ;;  %1121 = vst.msk [vmem:[#allocation2 + $0x30] sm:$0x3] %vm1118_vm1, %v9763_v1 }
   0x9   :  { %8748 = vmatmul.mubr.msk.f32.gmra.mxu0 %vm92_vm0, %v23_v7  ;;  %8796 = vmatmul.mubr.msk.f32.gmra.mxu1 %vm92_vm0, %v55_v8  ;;  %v63_v24 = vld [vmem:[%s15321_s0 + $0x158] sm:$0xff]  ;;  %v32_v25 = vld [vmem:[%s15321_s0 + $0x60] sm:$0xff]  ;;  %v33_v27 = vld [vmem:[%s15321_s0 + $0x68] sm:$0xff]  ;;  %1122 = vst.msk [vmem:[#allocation2 + $0x48] sm:$0x3] %vm1118_vm1, %v9763_v1 }
   0xa   :  { %8750 = vmatprep.mubr.msk.f32.mxu0 %vm92_vm0, %v24_v9  ;;  %8798 = vmatprep.mubr.msk.f32.mxu1 %vm92_vm0, %v56_v10  ;;  %v64_v26 = vld [vmem:[%s15321_s0 + $0x160] sm:$0xff]  ;;  %v65_v28 = vld [vmem:[%s15321_s0 + $0x168] sm:$0xff]  ;;  %v34_v29 = vld [vmem:[%s15321_s0 + $0x70] sm:$0xff]  ;;  %1123 = vst.msk [vmem:[#allocation2 + $0x60] sm:$0x3] %vm1118_vm1, %v9763_v1 }
   0xb   :  { %v66_v30 = vld [vmem:[%s15321_s0 + $0x170] sm:$0xff]  ;;  %v35_v31 = vld [vmem:[%s15321_s0 + $0x78] sm:$0xff]  ;;  %v36_v33 = vld [vmem:[%s15321_s0 + $0x80] sm:$0xff]  ;;  %1124 = vst.msk [vmem:[#allocation2 + $0x78] sm:$0x3] %vm1118_vm1, %v9763_v1 }
   0xc   :  { %v67_v32 = vld [vmem:[%s15321_s0 + $0x178] sm:$0xff]  ;;  %v68_v34 = vld [vmem:[%s15321_s0 + $0x180] sm:$0xff]  ;;  %v37_v35 = vld [vmem:[%s15321_s0 + $0x88] sm:$0xff]  ;;  %1125 = vst.msk [vmem:[#allocation2 + $0x90] sm:$0x3] %vm1118_vm1, %v9763_v1 }
   0xd   :  { %8751 = vmatmul.mubr.msk.f32.gmra.mxu0 %vm92_vm0, %v25_v11  ;;  %8799 = vmatmul.mubr.msk.f32.gmra.mxu1 %vm92_vm0, %v57_v12  ;;  %v69_v36 = vld [vmem:[%s15321_s0 + $0x188] sm:$0xff]  ;;  %v38_v37 = vld [vmem:[%s15321_s0 + $0x90] sm:$0xff]  ;;  %v39_v39 = vld [vmem:[%s15321_s0 + $0x98] sm:$0xff]  ;;  %1126 = vst.msk [vmem:[#allocation2 + $0xa8] sm:$0x3] %vm1118_vm1, %v9763_v1 }
   0xe   :  { %8753 = vmatprep.mubr.msk.f32.mxu0 %vm92_vm0, %v26_v13  ;;  %8801 = vmatprep.mubr.msk.f32.mxu1 %vm92_vm0, %v58_v14  ;;  %v70_v38 = vld [vmem:[%s15321_s0 + $0x190] sm:$0xff]  ;;  %v71_v40 = vld [vmem:[%s15321_s0 + $0x198] sm:$0xff]  ;;  %v40_v41 = vld [vmem:[%s15321_s0 + $0xa0] sm:$0xff]  ;;  %1127 = vst.msk [vmem:[#allocation2 + $0xc0] sm:$0x3] %vm1118_vm1, %v9763_v1 }
   0xf   :  { %v72_v42 = vld [vmem:[%s15321_s0 + $0x1a0] sm:$0xff]  ;;  %v41_v43 = vld [vmem:[%s15321_s0 + $0xa8] sm:$0xff]  ;;  %v42_v45 = vld [vmem:[%s15321_s0 + $0xb0] sm:$0xff]  ;;  %1128 = vst.msk [vmem:[#allocation2 + $0xd8] sm:$0x3] %vm1118_vm1, %v9763_v1 }
  0x10   :  { %v73_v44 = vld [vmem:[%s15321_s0 + $0x1a8] sm:$0xff]  ;;  %v74_v46 = vld [vmem:[%s15321_s0 + $0x1b0] sm:$0xff]  ;;  %v43_v47 = vld [vmem:[%s15321_s0 + $0xb8] sm:$0xff]  ;;  %1129 = vst.msk [vmem:[#allocation2 + $0xf0] sm:$0x3] %vm1118_vm1, %v9763_v1 }
  0x11   :  { %8754 = vmatmul.mubr.msk.f32.gmra.mxu0 %vm92_vm0, %v27_v15  ;;  %8802 = vmatmul.mubr.msk.f32.gmra.mxu1 %vm92_vm0, %v59_v16  ;;  %v75_v48 = vld [vmem:[%s15321_s0 + $0x1b8] sm:$0xff]  ;;  %v44_v49 = vld [vmem:[%s15321_s0 + $0xc0] sm:$0xff]  ;;  %v45_v51 = vld [vmem:[%s15321_s0 + $0xc8] sm:$0xff]  ;;  %1130 = vst.msk [vmem:[#allocation2 + $0x108] sm:$0x3] %vm1118_vm1, %v9763_v1 }
  0x12   :  { %8756 = vmatprep.mubr.msk.f32.mxu0 %vm92_vm0, %v28_v17  ;;  %8804 = vmatprep.mubr.msk.f32.mxu1 %vm92_vm0, %v60_v18  ;;  %v76_v50 = vld [vmem:[%s15321_s0 + $0x1c0] sm:$0xff]  ;;  %v77_v52 = vld [vmem:[%s15321_s0 + $0x1c8] sm:$0xff]  ;;  %v46_v53 = vld [vmem:[%s15321_s0 + $0xd0] sm:$0xff]  ;;  %1131 = vst.msk [vmem:[#allocation2 + $0x120] sm:$0x3] %vm1118_vm1, %v9763_v1 }
  0x13   :  { %v78_v54 = vld [vmem:[%s15321_s0 + $0x1d0] sm:$0xff]  ;;  %v47_v55 = vld [vmem:[%s15321_s0 + $0xd8] sm:$0xff]  ;;  %v48_v57 = vld [vmem:[%s15321_s0 + $0xe0] sm:$0xff]  ;;  %1132 = vst.msk [vmem:[#allocation2 + $0x138] sm:$0x3] %vm1118_vm1, %v9763_v1 }
  0x14   :  { %v79_v56 = vld [vmem:[%s15321_s0 + $0x1d8] sm:$0xff]  ;;  %v80_v58 = vld [vmem:[%s15321_s0 + $0x1e0] sm:$0xff]  ;;  %v49_v59 = vld [vmem:[%s15321_s0 + $0xe8] sm:$0xff]  ;;  %1133 = vst.msk [vmem:[#allocation2 + $0x150] sm:$0x3] %vm1118_vm1, %v9763_v1 }
  0x15   :  { %8757 = vmatmul.mubr.msk.f32.gmra.mxu0 %vm92_vm0, %v29_v19  ;;  %8805 = vmatmul.mubr.msk.f32.gmra.mxu1 %vm92_vm0, %v61_v20  ;;  %v81_v60 = vld [vmem:[%s15321_s0 + $0x1e8] sm:$0xff]  ;;  %v50_v61 = vld [vmem:[%s15321_s0 + $0xf0] sm:$0xff]  ;;  %v51_v63 = vld [vmem:[%s15321_s0 + $0xf8] sm:$0xff]  ;;  %1134 = vst.msk [vmem:[#allocation2 + $0x168] sm:$0x3] %vm1118_vm1, %v9763_v1 }
  0x16   :  { %8759 = vmatprep.mubr.msk.f32.mxu0 %vm92_vm0, %v30_v21  ;;  %8807 = vmatprep.mubr.msk.f32.mxu1 %vm92_vm0, %v62_v22  ;;  %v82_v62 = vld [vmem:[%s15321_s0 + $0x1f0] sm:$0xff]  ;;  %v83_v0 = vld [vmem:[%s15321_s0 + $0x1f8] sm:$0xff]  ;;  %1135 = vst.msk [vmem:[#allocation2 + $0x180] sm:$0x3] %vm1118_vm1, %v9763_v1  ;;  %1136 = vst.msk [vmem:[#allocation2 + $0x198] sm:$0x3] %vm1118_vm1, %v9763_v1 }
  0x17   :  { %1137 = vst.msk [vmem:[#allocation2 + $0x1b0] sm:$0x3] %vm1118_vm1, %v9763_v1  ;;  %1138 = vst.msk [vmem:[#allocation2 + $0x1c8] sm:$0x3] %vm1118_vm1, %v9763_v1  ;;  %v1201_v2 = vld [vmem:[%s15322_s3] sm:$0xf] }
  0x18   :  { %1139 = vst.msk [vmem:[#allocation2 + $0x1e0] sm:$0x3] %vm1118_vm1, %v9763_v1  ;;  %1140 = vst.msk [vmem:[#allocation2 + $0x1f8] sm:$0x3] %vm1118_vm1, %v9763_v1  ;;  %8938 = vmatprep.subr.msk.mxu0 %vm2680_vm3, %v1201_v2  ;;  %v8153_v3 = vld [vmem:[%s15322_s3 + $0x4] sm:$0xf] }
  0x19   :  { %8760 = vmatmul.mubr.msk.f32.gmra.mxu0 %vm92_vm0, %v31_v23  ;;  %8808 = vmatmul.mubr.msk.f32.gmra.mxu1 %vm92_vm0, %v63_v24  ;;  %1141 = vst.msk [vmem:[#allocation2 + $0x210] sm:$0x3] %vm1118_vm1, %v9763_v1  ;;  %1142 = vst.msk [vmem:[#allocation2 + $0x228] sm:$0x3] %vm1118_vm1, %v9763_v1  ;;  %v10226_v4 = vld [vmem:[%s15323_s2] ss:$0 sm:$0xff] }
  0x1a   :  { %8762 = vmatprep.mubr.msk.f32.mxu0 %vm92_vm0, %v32_v25  ;;  %8810 = vmatprep.mubr.msk.f32.mxu1 %vm92_vm0, %v64_v26  ;;  %1143 = vst.msk [vmem:[#allocation2 + $0x240] sm:$0x3] %vm1118_vm1, %v9763_v1  ;;  %1144 = vst.msk [vmem:[#allocation2 + $0x258] sm:$0x3] %vm1118_vm1, %v9763_v1 }
  0x1b   :  { %1145 = vst.msk [vmem:[#allocation2 + $0x270] sm:$0x3] %vm1118_vm1, %v9763_v1  ;;  %1146 = vst.msk [vmem:[#allocation2 + $0x288] sm:$0x3] %vm1118_vm1, %v9763_v1  ;;  %8939 = vmatpush3.msk.msra.mxu0 %vm2680_vm3, %v1201_v2  ;;  %8840 = vmatprep.subr.msk.mxu1 %vm2680_vm3, %v8153_v3 }
  0x1c   :  { %1147 = vst.msk [vmem:[#allocation2 + $0x2a0] sm:$0x3] %vm1118_vm1, %v9763_v1  ;;  %1148 = vst.msk [vmem:[#allocation2 + $0x2b8] sm:$0x3] %vm1118_vm1, %v9763_v1  ;;  %8841 = vmatpush3.msk.msra.mxu1 %vm2680_vm3, %v8153_v3 }
  0x1d   :  { %8763 = vmatmul.mubr.msk.f32.gmra.mxu0 %vm92_vm0, %v33_v27  ;;  %8811 = vmatmul.mubr.msk.f32.gmra.mxu1 %vm92_vm0, %v65_v28  ;;  %1149 = vst.msk [vmem:[#allocation2 + $0x2d0] sm:$0x3] %vm1118_vm1, %v9763_v1  ;;  %1150 = vst.msk [vmem:[#allocation2 + $0x2e8] sm:$0x3] %vm1118_vm1, %v9763_v1 }
  0x1e   :  { %8765 = vmatprep.mubr.msk.f32.mxu0 %vm92_vm0, %v34_v29  ;;  %8813 = vmatprep.mubr.msk.f32.mxu1 %vm92_vm0, %v66_v30  ;;  %1152 = vst.msk [vmem:[#allocation2 + $0x2a] sm:$0x3] %vm1118_vm1, %v9763_v1  ;;  %1153 = vst.msk [vmem:[#allocation2 + $0x42] sm:$0x3] %vm1118_vm1, %v9763_v1 }
  0x1f   :  { %1154 = vst.msk [vmem:[#allocation2 + $0x5a] sm:$0x3] %vm1118_vm1, %v9763_v1  ;;  %1155 = vst.msk [vmem:[#allocation2 + $0x72] sm:$0x3] %vm1118_vm1, %v9763_v1 }
  0x20   :  { %1156 = vst.msk [vmem:[#allocation2 + $0x8a] sm:$0x3] %vm1118_vm1, %v9763_v1  ;;  %1157 = vst.msk [vmem:[#allocation2 + $0xa2] sm:$0x3] %vm1118_vm1, %v9763_v1 }
  0x21   :  { %8766 = vmatmul.mubr.msk.f32.gmra.mxu0 %vm92_vm0, %v35_v31  ;;  %8814 = vmatmul.mubr.msk.f32.gmra.mxu1 %vm92_vm0, %v67_v32  ;;  %1158 = vst.msk [vmem:[#allocation2 + $0xba] sm:$0x3] %vm1118_vm1, %v9763_v1  ;;  %1159 = vst.msk [vmem:[#allocation2 + $0xd2] sm:$0x3] %vm1118_vm1, %v9763_v1 }
  0x22   :  { %8768 = vmatprep.mubr.msk.f32.mxu0 %vm92_vm0, %v36_v33  ;;  %8816 = vmatprep.mubr.msk.f32.mxu1 %vm92_vm0, %v68_v34  ;;  %1160 = vst.msk [vmem:[#allocation2 + $0xea] sm:$0x3] %vm1118_vm1, %v9763_v1  ;;  %1161 = vst.msk [vmem:[#allocation2 + $0x102] sm:$0x3] %vm1118_vm1, %v9763_v1 }
  0x23   :  { %1162 = vst.msk [vmem:[#allocation2 + $0x11a] sm:$0x3] %vm1118_vm1, %v9763_v1  ;;  %1163 = vst.msk [vmem:[#allocation2 + $0x132] sm:$0x3] %vm1118_vm1, %v9763_v1 }
  0x24   :  { %1164 = vst.msk [vmem:[#allocation2 + $0x14a] sm:$0x3] %vm1118_vm1, %v9763_v1  ;;  %1165 = vst.msk [vmem:[#allocation2 + $0x162] sm:$0x3] %vm1118_vm1, %v9763_v1 }
  0x25   :  { %8769 = vmatmul.mubr.msk.f32.gmra.mxu0 %vm92_vm0, %v37_v35  ;;  %8817 = vmatmul.mubr.msk.f32.gmra.mxu1 %vm92_vm0, %v69_v36  ;;  %1166 = vst.msk [vmem:[#allocation2 + $0x17a] sm:$0x3] %vm1118_vm1, %v9763_v1  ;;  %1167 = vst.msk [vmem:[#allocation2 + $0x192] sm:$0x3] %vm1118_vm1, %v9763_v1 }
  0x26   :  { %8771 = vmatprep.mubr.msk.f32.mxu0 %vm92_vm0, %v38_v37  ;;  %8819 = vmatprep.mubr.msk.f32.mxu1 %vm92_vm0, %v70_v38  ;;  %1168 = vst.msk [vmem:[#allocation2 + $0x1aa] sm:$0x3] %vm1118_vm1, %v9763_v1  ;;  %1169 = vst.msk [vmem:[#allocation2 + $0x1c2] sm:$0x3] %vm1118_vm1, %v9763_v1 }
  0x27   :  { %1170 = vst.msk [vmem:[#allocation2 + $0x1da] sm:$0x3] %vm1118_vm1, %v9763_v1  ;;  %1171 = vst.msk [vmem:[#allocation2 + $0x1f2] sm:$0x3] %vm1118_vm1, %v9763_v1 }
  0x28   :  { %1172 = vst.msk [vmem:[#allocation2 + $0x20a] sm:$0x3] %vm1118_vm1, %v9763_v1  ;;  %1173 = vst.msk [vmem:[#allocation2 + $0x222] sm:$0x3] %vm1118_vm1, %v9763_v1 }
  0x29   :  { %8772 = vmatmul.mubr.msk.f32.gmra.mxu0 %vm92_vm0, %v39_v39  ;;  %8820 = vmatmul.mubr.msk.f32.gmra.mxu1 %vm92_vm0, %v71_v40  ;;  %1174 = vst.msk [vmem:[#allocation2 + $0x23a] sm:$0x3] %vm1118_vm1, %v9763_v1  ;;  %1175 = vst.msk [vmem:[#allocation2 + $0x252] sm:$0x3] %vm1118_vm1, %v9763_v1 }
  0x2a   :  { %8774 = vmatprep.mubr.msk.f32.mxu0 %vm92_vm0, %v40_v41  ;;  %8822 = vmatprep.mubr.msk.f32.mxu1 %vm92_vm0, %v72_v42  ;;  %1176 = vst.msk [vmem:[#allocation2 + $0x26a] sm:$0x3] %vm1118_vm1, %v9763_v1  ;;  %1177 = vst.msk [vmem:[#allocation2 + $0x282] sm:$0x3] %vm1118_vm1, %v9763_v1 }
  0x2b   :  { %1178 = vst.msk [vmem:[#allocation2 + $0x29a] sm:$0x3] %vm1118_vm1, %v9763_v1  ;;  %1179 = vst.msk [vmem:[#allocation2 + $0x2b2] sm:$0x3] %vm1118_vm1, %v9763_v1 }
  0x2c   :  { %1180 = vst.msk [vmem:[#allocation2 + $0x2ca] sm:$0x3] %vm1118_vm1, %v9763_v1  ;;  %1181 = vst.msk [vmem:[#allocation2 + $0x2e2] sm:$0x3] %vm1118_vm1, %v9763_v1 }
  0x2d   :  { %8775 = vmatmul.mubr.msk.f32.gmra.mxu0 %vm92_vm0, %v41_v43  ;;  %8823 = vmatmul.mubr.msk.f32.gmra.mxu1 %vm92_vm0, %v73_v44  ;;  %1182 = vst.msk [vmem:[#allocation2 + $0x2fa] sm:$0x3] %vm1118_vm1, %v9763_v1 }
  0x2e   :  { %8777 = vmatprep.mubr.msk.f32.mxu0 %vm92_vm0, %v42_v45  ;;  %8825 = vmatprep.mubr.msk.f32.mxu1 %vm92_vm0, %v74_v46  ;;  %1184 = vst.msk [vmem:[#allocation3] sm:$0xff] %vm1183_vm2, %v9763_v1  ;;  %1185 = vst.msk [vmem:[#allocation3 + $0x8] sm:$0xff] %vm1183_vm2, %v9763_v1 }
  0x2f   :  { %1186 = vst.msk [vmem:[#allocation3 + $0x10] sm:$0xff] %vm1183_vm2, %v9763_v1  ;;  %1187 = vst.msk [vmem:[#allocation3 + $0x18] sm:$0xff] %vm1183_vm2, %v9763_v1 }
  0x30   :  { %1188 = vst.msk [vmem:[#allocation3 + $0x140] sm:$0xff] %vm1183_vm2, %v9763_v1  ;;  %1189 = vst.msk [vmem:[#allocation3 + $0x148] sm:$0xff] %vm1183_vm2, %v9763_v1 }
  0x31   :  { %8778 = vmatmul.mubr.msk.f32.gmra.mxu0 %vm92_vm0, %v43_v47  ;;  %8826 = vmatmul.mubr.msk.f32.gmra.mxu1 %vm92_vm0, %v75_v48  ;;  %1190 = vst.msk [vmem:[#allocation3 + $0x150] sm:$0xff] %vm1183_vm2, %v9763_v1  ;;  %1191 = vst.msk [vmem:[#allocation3 + $0x158] sm:$0xff] %vm1183_vm2, %v9763_v1 }
  0x32   :  { %8780 = vmatprep.mubr.msk.f32.mxu0 %vm92_vm0, %v44_v49  ;;  %8828 = vmatprep.mubr.msk.f32.mxu1 %vm92_vm0, %v76_v50  ;;  %1193 = vst.msk [vmem:[#allocation3 + $0x120] sm:$0xff] %vm1183_vm2, %v9763_v1  ;;  %1194 = vst.msk [vmem:[#allocation3 + $0x128] sm:$0xff] %vm1183_vm2, %v9763_v1 }
  0x33   :  { %1195 = vst.msk [vmem:[#allocation3 + $0x130] sm:$0xff] %vm1183_vm2, %v9763_v1  ;;  %1196 = vst.msk [vmem:[#allocation3 + $0x138] sm:$0xff] %vm1183_vm2, %v9763_v1 }
  0x34   :  { %1197 = vst.msk [vmem:[#allocation3 + $0x260] sm:$0xff] %vm1183_vm2, %v9763_v1  ;;  %1198 = vst.msk [vmem:[#allocation3 + $0x268] sm:$0xff] %vm1183_vm2, %v9763_v1 }
  0x35   :  { %8781 = vmatmul.mubr.msk.f32.gmra.mxu0 %vm92_vm0, %v45_v51  ;;  %8829 = vmatmul.mubr.msk.f32.gmra.mxu1 %vm92_vm0, %v77_v52  ;;  %1199 = vst.msk [vmem:[#allocation3 + $0x270] sm:$0xff] %vm1183_vm2, %v9763_v1  ;;  %1200 = vst.msk [vmem:[#allocation3 + $0x278] sm:$0xff] %vm1183_vm2, %v9763_v1 }
  0x36   :  { %8783 = vmatprep.mubr.msk.f32.mxu0 %vm92_vm0, %v46_v53  ;;  %8831 = vmatprep.mubr.msk.f32.mxu1 %vm92_vm0, %v78_v54 }
  0x39   :  { %8784 = vmatmul.mubr.msk.f32.gmra.mxu0 %vm92_vm0, %v47_v55  ;;  %8832 = vmatmul.mubr.msk.f32.gmra.mxu1 %vm92_vm0, %v79_v56 }
  0x3a   :  { %8786 = vmatprep.mubr.msk.f32.mxu0 %vm92_vm0, %v48_v57  ;;  %8834 = vmatprep.mubr.msk.f32.mxu1 %vm92_vm0, %v80_v58 }
  0x3d   :  { %8787 = vmatmul.mubr.msk.f32.gmra.mxu0 %vm92_vm0, %v49_v59  ;;  %8835 = vmatmul.mubr.msk.f32.gmra.mxu1 %vm92_vm0, %v81_v60 }
  0x3e   :  { %8789 = vmatprep.mubr.msk.f32.mxu0 %vm92_vm0, %v50_v61  ;;  %8837 = vmatprep.mubr.msk.f32.mxu1 %vm92_vm0, %v82_v62 }
  0x41   :  { %8790 = vmatmul.mubr.msk.f32.gmra.mxu0 %vm92_vm0, %v51_v63  ;;  %8838 = vmatmul.mubr.msk.f32.gmra.mxu1 %vm92_vm0, %v83_v0 }
  0xc5   :  { %v8746_v5 = vpop.f32.mrf.mxu0  ;;  %v8794_v6 = vpop.f32.mrf.mxu1 }
  0xc6   :  { %v10229_v7 = vadd.f32 %v8746_v5, %v10226_v4  ;;  %v10232_v8 = vadd.f32 %v8794_v6, %v10226_v4 }
  0xc7   :  { %v351_v9 = vpop.f32.mrf.mxu0  ;;  %v511_v10 = vpop.f32.mrf.mxu1 }
  0xc8   :  { %v671_v11 = vsub.f32 0.0, %v10229_v7  ;;  %v703_v12 = vsub.f32 0.0, %v10232_v8  ;;  %v10237_v13 = vadd.f32 %v10226_v4, %v351_v9  ;;  %v10240_v14 = vadd.f32 %v10226_v4, %v511_v10 }
  0xc9   :  { %v8749_v15 = vpop.f32.mrf.mxu0  ;;  %v8797_v16 = vpop.f32.mrf.mxu1 }
  0xca   :  { %v736_v17 = vmul.f32 1.442695, %v671_v11  ;;  %v800_v18 = vmul.f32 1.442695, %v703_v12  ;;  %v670_v19 = vsub.f32 0.0, %v10237_v13  ;;  %v702_v20 = vsub.f32 0.0, %v10240_v14 }
  0xcb   :  { %v10245_v21 = vadd.f32 %v8749_v15, %v10226_v4  ;;  %v10248_v22 = vadd.f32 %v8797_v16, %v10226_v4  ;;  %v361_v23 = vpop.f32.mrf.mxu0  ;;  %v521_v24 = vpop.f32.mrf.mxu1 }
  0xcc   :  { %9235 = vpow2.f32 %v736_v17  ;;  %v734_v25 = vmul.f32 1.442695, %v670_v19  ;;  %v798_v26 = vmul.f32 1.442695, %v702_v20  ;;  %v10251_v27 = vadd.f32 %v10226_v4, %v361_v23 }
  0xcd   :  { %9237 = vpow2.f32 %v800_v18  ;;  %v673_v28 = vsub.f32 0.0, %v10245_v21  ;;  %v705_v29 = vsub.f32 0.0, %v10248_v22  ;;  %v10256_v30 = vadd.f32 %v10226_v4, %v521_v24  ;;  %v8752_v31 = vpop.f32.mrf.mxu0  ;;  %v8800_v32 = vpop.f32.mrf.mxu1 }
  0xce   :  { %9239 = vpow2.f32 %v734_v25  ;;  %v672_v33 = vsub.f32 0.0, %v10251_v27  ;;  %v10260_v34 = vadd.f32 %v8752_v31, %v10226_v4  ;;  %v10263_v35 = vadd.f32 %v8800_v32, %v10226_v4 }
  0xcf   :  { %9241 = vpow2.f32 %v798_v26  ;;  %v740_v36 = vmul.f32 1.442695, %v673_v28  ;;  %v804_v37 = vmul.f32 1.442695, %v705_v29  ;;  %v704_v38 = vsub.f32 0.0, %v10256_v30  ;;  %v371_v39 = vpop.f32.mrf.mxu0  ;;  %v531_v40 = vpop.f32.mrf.mxu1 }
  0xd0   :  { %v738_v41 = vmul.f32 1.442695, %v672_v33  ;;  %v675_v42 = vsub.f32 0.0, %v10260_v34  ;;  %v707_v43 = vsub.f32 0.0, %v10263_v35  ;;  %v10269_v44 = vadd.f32 %v10226_v4, %v371_v39 }
  0xd1   :  { %9243 = vpow2.f32 %v740_v36  ;;  %v802_v45 = vmul.f32 1.442695, %v704_v38  ;;  %v10272_v46 = vadd.f32 %v10226_v4, %v531_v40  ;;  %v8755_v47 = vpop.f32.mrf.mxu0  ;;  %v8803_v48 = vpop.f32.mrf.mxu1 }
  0xd2   :  { %9245 = vpow2.f32 %v804_v37  ;;  %v744_v49 = vmul.f32 1.442695, %v675_v42  ;;  %v808_v50 = vmul.f32 1.442695, %v707_v43  ;;  %v674_v51 = vsub.f32 0.0, %v10269_v44 }
  0xd3   :  { %9247 = vpow2.f32 %v738_v41  ;;  %v706_v52 = vsub.f32 0.0, %v10272_v46  ;;  %v10277_v53 = vadd.f32 %v8755_v47, %v10226_v4  ;;  %v10280_v54 = vadd.f32 %v8803_v48, %v10226_v4  ;;  %v381_v55 = vpop.f32.mrf.mxu0  ;;  %v541_v56 = vpop.f32.mrf.mxu1 }
  0xd4   :  { %9249 = vpow2.f32 %v802_v45  ;;  %v742_v57 = vmul.f32 1.442695, %v674_v51  ;;  %v10283_v58 = vadd.f32 %v10226_v4, %v381_v55  ;;  %v10286_v59 = vadd.f32 %v10226_v4, %v541_v56 }
  0xd5   :  { %9251 = vpow2.f32 %v744_v49  ;;  %v806_v60 = vmul.f32 1.442695, %v706_v52  ;;  %v677_v61 = vsub.f32 0.0, %v10277_v53  ;;  %v709_v62 = vsub.f32 0.0, %v10280_v54  ;;  %v8758_v63 = vpop.f32.mrf.mxu0  ;;  %v8806_v0 = vpop.f32.mrf.mxu1 }
  0xd6   :  { %9253 = vpow2.f32 %v808_v50  ;;  %v676_v1 = vsub.f32 0.0, %v10283_v58  ;;  %v10292_v2 = vadd.f32 %v8758_v63, %v10226_v4  ;;  %v10295_v6 = vadd.f32 %v8806_v0, %v10226_v4 }
  0xd7   :  { %9255 = vpow2.f32 %v742_v57  ;;  %v748_v3 = vmul.f32 1.442695, %v677_v61  ;;  %v812_v5 = vmul.f32 1.442695, %v709_v62  ;;  %v391_v9 = vpop.f32.mrf.mxu0  ;;  %v551_v10 = vpop.f32.mrf.mxu1  ;;  %v708_v12 = vsub.f32 0.0, %v10286_v59 }
  0xd8   :  { %9257 = vpow2.f32 %v806_v60  ;;  %v746_v11 = vmul.f32 1.442695, %v676_v1  ;;  %v10299_v16 = vadd.f32 %v10226_v4, %v391_v9  ;;  %v679_v23 = vsub.f32 0.0, %v10292_v2 }
  0xd9   :  { %v9236_v15 = vpop.eup %9235  ;;  %9259 = vpow2.f32 %v748_v3  ;;  %v8761_v17 = vpop.f32.mrf.mxu0  ;;  %v711_v26 = vsub.f32 0.0, %v10295_v6  ;;  %v810_v33 = vmul.f32 1.442695, %v708_v12  ;;  %v10304_v36 = vadd.f32 %v10226_v4, %v551_v10 }
  0xda   :  { %v8809_v18 = vpop.f32.mrf.mxu1  ;;  %v9238_v19 = vpop.eup %9237  ;;  %v863_v20 = vadd.f32 1.0, %v9236_v15  ;;  %9261 = vpow2.f32 %v812_v5  ;;  %v678_v38 = vsub.f32 0.0, %v10299_v16  ;;  %v10308_v39 = vadd.f32 %v8761_v17, %v10226_v4 }
  0xdb   :  { %v9240_v24 = vpop.eup %9239  ;;  %v895_v25 = vadd.f32 1.0, %v9238_v19  ;;  %9263 = vpow2.f32 %v746_v11  ;;  %v401_v28 = vpop.f32.mrf.mxu0  ;;  %v10310_v43 = vmul.f32 1.442695, %v679_v23  ;;  %v10313_v45 = vadd.f32 %v8809_v18, %v10226_v4 }
  0xdc   :  { %v561_v29 = vpop.f32.mrf.mxu1  ;;  %v9242_v31 = vpop.eup %9241  ;;  %9265 = vrcp.f32 %v863_v20  ;;  %v862_v32 = vadd.f32 1.0, %v9240_v24  ;;  %v10316_v47 = vadd.f32 %v10226_v4, %v401_v28  ;;  %v10318_v50 = vmul.f32 1.442695, %v711_v26 }
  0xdd   :  { %9267 = vrcp.f32 %v895_v25  ;;  %v894_v37 = vadd.f32 1.0, %v9242_v31  ;;  %v8764_v40 = vpop.f32.mrf.mxu0  ;;  %v10321_v51 = vadd.f32 %v10226_v4, %v561_v29  ;;  %v710_v57 = vsub.f32 0.0, %v10304_v36 }
  0xde   :  { %v8812_v41 = vpop.f32.mrf.mxu1  ;;  %v9244_v42 = vpop.eup %9243  ;;  %9269 = vrcp.f32 %v862_v32  ;;  %v10325_v60 = vadd.f32 %v8764_v40, %v10226_v4  ;;  %v10327_v0 = vmul.f32 1.442695, %v678_v38  ;;  %v681_v1 = vsub.f32 0.0, %v10308_v39 }
  0xdf   :  { %v9246_v48 = vpop.eup %9245  ;;  %9271 = vrcp.f32 %v894_v37  ;;  %v865_v49 = vadd.f32 1.0, %v9244_v42  ;;  %v411_v52 = vpop.f32.mrf.mxu0  ;;  %v713_v10 = vsub.f32 0.0, %v10313_v45  ;;  %v680_v11 = vsub.f32 0.0, %v10316_v47 }
  0xe0   :  { %v9248_v55 = vpop.eup %9247  ;;  %v897_v56 = vadd.f32 1.0, %v9246_v48  ;;  %9273 = vpow2.f32 %v810_v33  ;;  %v571_v61 = vpop.f32.mrf.mxu1  ;;  %v712_v17 = vsub.f32 0.0, %v10321_v51  ;;  %v10334_v18 = vadd.f32 %v8812_v41, %v10226_v4 }
  0xe1   :  { %v9250_v62 = vpop.eup %9249  ;;  %9275 = vrcp.f32 %v865_v49  ;;  %v864_v63 = vadd.f32 1.0, %v9248_v55  ;;  %v8767_v3 = vpop.f32.mrf.mxu0  ;;  %v10336_v23 = vmul.f32 1.442695, %v710_v57  ;;  %v683_v24 = vsub.f32 0.0, %v10325_v60 }
  0xe2   :  { %v9252_v5 = vpop.eup %9251  ;;  %9277 = vrcp.f32 %v897_v56  ;;  %v896_v9 = vadd.f32 1.0, %v9250_v62  ;;  %v8815_v25 = vpop.f32.mrf.mxu1  ;;  %v10339_v29 = vmul.f32 1.442695, %v681_v1  ;;  %v10342_v31 = vadd.f32 %v10226_v4, %v411_v52 }
  0xe3   :  { %v9254_v12 = vpop.eup %9253  ;;  %9279 = vrcp.f32 %v864_v63  ;;  %v867_v15 = vadd.f32 1.0, %v9252_v5  ;;  %v421_v32 = vpop.f32.mrf.mxu0  ;;  %v10344_v38 = vmul.f32 1.442695, %v713_v10  ;;  %v10346_v40 = vmul.f32 1.442695, %v680_v11 }
  0xe4   :  { %v9256_v19 = vpop.eup %9255  ;;  %9281 = vrcp.f32 %v896_v9  ;;  %v899_v20 = vadd.f32 1.0, %v9254_v12  ;;  %v10348_v48 = vmul.f32 1.442695, %v712_v17  ;;  %v715_v49 = vsub.f32 0.0, %v10334_v18  ;;  %v581_v62 = vpop.f32.mrf.mxu1 }
  0xe5   :  { %v9258_v26 = vpop.eup %9257  ;;  %9283 = vrcp.f32 %v867_v15  ;;  %v866_v28 = vadd.f32 1.0, %v9256_v19  ;;  %v10351_v52 = vmul.f32 1.442695, %v683_v24  ;;  %v10354_v57 = vadd.f32 %v10226_v4, %v571_v61  ;;  %v8770_v10 = vpop.f32.mrf.mxu0 }
  0xe6   :  { %v9260_v33 = vpop.eup %9259  ;;  %9285 = vrcp.f32 %v899_v20  ;;  %v898_v37 = vadd.f32 1.0, %v9258_v26  ;;  %v682_v5 = vsub.f32 0.0, %v10342_v31  ;;  %v10358_v9 = vadd.f32 %v8767_v3, %v10226_v4 }
  0xe7   :  { %v9262_v41 = vpop.eup %9261  ;;  %9287 = vrcp.f32 %v866_v28  ;;  %v869_v42 = vadd.f32 1.0, %v9260_v33  ;;  %v10362_v15 = vadd.f32 %v8815_v25, %v10226_v4  ;;  %v10365_v61 = vadd.f32 %v10226_v4, %v421_v32  ;;  %v8818_v33 = vpop.f32.mrf.mxu1 }
  0xe8   :  { %v9264_v55 = vpop.eup %9263  ;;  %9289 = vrcp.f32 %v898_v37  ;;  %v901_v56 = vadd.f32 1.0, %v9262_v41  ;;  %v10370_v20 = vmul.f32 1.442695, %v715_v49  ;;  %v10373_v3 = vadd.f32 %v10226_v4, %v581_v62  ;;  %v431_v49 = vpop.f32.mrf.mxu0 }
  0xe9   :  { %v9266_v63 = vpop.eup %9265  ;;  %9291 = vrcp.f32 %v869_v42  ;;  %v868_v1 = vadd.f32 1.0, %v9264_v55  ;;  %v714_v25 = vsub.f32 0.0, %v10354_v57  ;;  %v10380_v26 = vadd.f32 %v8770_v10, %v10226_v4 }
  0xea   :  { %v9268_v11 = vpop.eup %9267  ;;  %v1055_v12 = vmul.f32 %v9266_v63, %v10229_v7  ;;  %9293 = vrcp.f32 %v901_v56  ;;  %v10388_v32 = vmul.f32 1.442695, %v682_v5  ;;  %v717_v41 = vsub.f32 0.0, %v10362_v15 }
  0xeb   :  { %v9270_v17 = vpop.eup %9269  ;;  %v10368_v19 = vmul.f32 %v9268_v11, %v10232_v8  ;;  %9295 = vrcp.f32 %v868_v1  ;;  %v684_v42 = vsub.f32 0.0, %v10365_v61  ;;  %v716_v55 = vsub.f32 0.0, %v10373_v3 }
  0xec   :  { %v9272_v24 = vpop.eup %9271  ;;  %1203 = vst.msk [vmem:[#allocation2 + $0xa] sm:$0xff] %vm1183_vm2, %v1055_v12  ;;  %v1054_v7 = vmul.f32 %v9270_v17, %v10237_v13  ;;  %9297 = vpow2.f32 %v10310_v43  ;;  %v685_v13 = vsub.f32 0.0, %v10358_v9  ;;  %v687_v56 = vsub.f32 0.0, %v10380_v26 }
  0xed   :  { %15465 = vst [vmem:[#allocation4_spill] sm:$0xff] %v10368_v19  ;;  %v9274_v8 = vpop.eup %9273  ;;  %1235 = vst.msk [vmem:[#allocation2 + $0x18a] sm:$0xff] %vm1183_vm2, %v10368_v19  ;;  %v10385_v28 = vmul.f32 %v9272_v24, %v10240_v14  ;;  %9299 = vpow2.f32 %v10318_v50  ;;  %v10406_v63 = vmul.f32 1.442695, %v714_v25  ;;  %v10409_v1 = vadd.f32 %v8818_v33, %v10226_v4 }
  0xee   :  { %v9276_v43 = vpop.eup %9275  ;;  %1202 = vst.msk [vmem:[#allocation2 + $0x2] sm:$0xff] %vm1183_vm2, %v1054_v7  ;;  %v900_v37 = vadd.f32 1.0, %v9274_v8  ;;  %9301 = vpow2.f32 %v10327_v0  ;;  %8940 = vmatprep.mubr.msk.f32.mxu0 %vm1183_vm2, %v1054_v7  ;;  %v10417_v10 = vadd.f32 %v10226_v4, %v431_v49  ;;  %v10425_v17 = vmul.f32 1.442695, %v717_v41 }
  0xef   :  { %15466 = vst [vmem:[#allocation5_spill] sm:$0xff] %v10385_v28  ;;  %v9278_v14 = vpop.eup %9277  ;;  %1234 = vst.msk [vmem:[#allocation2 + $0x182] sm:$0xff] %vm1183_vm2, %v10385_v28  ;;  %v1057_v50 = vmul.f32 %v9276_v43, %v10245_v21  ;;  %9303 = vpow2.f32 %v10336_v23  ;;  %8941 = vmatmul.mubr.msk.f32.vlgmr.msra.gmra.mxu0 %vm1183_vm2, %v1055_v12  ;;  %v10414_v23 = vmul.f32 1.442695, %v685_v13  ;;  %v10432_v13 = vmul.f32 1.442695, %v716_v55 }
  0xf0   :  { %v9280_v0 = vpop.eup %9279  ;;  %v10404_v62 = vmul.f32 %v9278_v14, %v10248_v22  ;;  %9305 = vrcp.f32 %v900_v37  ;;  %15468 = vst [vmem:[#allocation7_spill] sm:$0xff] %v10417_v10  ;;  %v591_v22 = vpop.f32.mrf.mxu1  ;;  %v719_v43 = vsub.f32 0.0, %v10409_v1 }
  0xf1   :  { %v9282_v5 = vpop.eup %9281  ;;  %1205 = vst.msk [vmem:[#allocation2 + $0x22] sm:$0xff] %vm1183_vm2, %v1057_v50  ;;  %v1056_v21 = vmul.f32 %v9280_v0, %v10251_v27  ;;  %9307 = vpow2.f32 %v10339_v29  ;;  %v10427_v27 = vmul.f32 1.442695, %v684_v42  ;;  %v8773_v29 = vpop.f32.mrf.mxu0 }
  0xf2   :  { %15467 = vst [vmem:[#allocation6_spill] sm:$0xff] %v10404_v62  ;;  %v9284_v11 = vpop.eup %9283  ;;  %1237 = vst.msk [vmem:[#allocation2 + $0x1a2] sm:$0xff] %vm1183_vm2, %v10404_v62  ;;  %v10422_v12 = vmul.f32 %v9282_v5, %v10256_v30  ;;  %9309 = vpow2.f32 %v10344_v38  ;;  %v10434_v30 = vmul.f32 1.442695, %v687_v56 }
  0xf3   :  { %v9286_v24 = vpop.eup %9285  ;;  %v1395_v7 = vld [vmem:[#allocation2 + $0xa] sm:$0xff]  ;;  %1204 = vst.msk [vmem:[#allocation2 + $0x1a] sm:$0xff] %vm1183_vm2, %v1056_v21  ;;  %v1059_v8 = vmul.f32 %v9284_v11, %v10260_v34  ;;  %9311 = vpow2.f32 %v10346_v40  ;;  %8943 = vmatprep.mubr.msk.f32.mxu0 %vm1183_vm2, %v1056_v21  ;;  %v10445_v34 = vadd.f32 %v10226_v4, %v591_v22 }
  0xf4   :  { %15469 = vst [vmem:[#allocation8_spill] sm:$0xff] %v10422_v12  ;;  %v1459_v25 = vld [vmem:[#allocation2 + $0xb] sm:$0xff]  ;;  %v9288_v38 = vpop.eup %9287  ;;  %1236 = vst.msk [vmem:[#allocation2 + $0x19a] sm:$0xff] %vm1183_vm2, %v10422_v12  ;;  %v10440_v33 = vmul.f32 %v9286_v24, %v10263_v35  ;;  %9313 = vpow2.f32 %v10348_v48  ;;  %8944 = vmatmul.mubr.msk.f32.gmra.mxu0 %vm1183_vm2, %v1057_v50  ;;  %v686_v35 = vsub.f32 0.0, %v10417_v10  ;;  %v10453_v48 = vadd.f32 %v8773_v29, %v10226_v4 }
  0xf5   :  { %15471 = vst [vmem:[#allocation10_spill] sm:$0xff] %v10445_v34  ;;  %v9290_v40 = vpop.eup %9289  ;;  %v1266_v37 = vld [vmem:[#allocation2] sm:$0xff]  ;;  %v1267_v41 = vld [vmem:[#allocation2 + $0x8] sm:$0xff]  ;;  %1207 = vst.msk [vmem:[#allocation2 + $0x3a] sm:$0xff] %vm1183_vm2, %v1059_v8  ;;  %v1058_v49 = vmul.f32 %v9288_v38, %v10269_v44  ;;  %9315 = vpow2.f32 %v10351_v52  ;;  %v1651_v55 = vmax.f32 %v1395_v7, %v1459_v25 }
  0xf6   :  { %15470 = vst [vmem:[#allocation9_spill] sm:$0xff] %v10440_v33  ;;  %v1330_v42 = vld [vmem:[#allocation2 + $0x1] sm:$0xff]  ;;  %15472 = vst [vmem:[#allocation11_spill] sm:$0xff] %v10453_v48  ;;  %v9292_v14 = vpop.eup %9291  ;;  %v1331_v56 = vld [vmem:[#allocation2 + $0x9] sm:$0xff]  ;;  %v10458_v21 = vmul.f32 %v9290_v40, %v10272_v46  ;;  %9317 = vpow2.f32 %v10370_v20  ;;  %v10475_v40 = vmul.f32 1.442695, %v719_v43 }
  0xf7   :  { %v1394_v0 = vld [vmem:[#allocation2 + $0x2] sm:$0xff]  ;;  %v1586_v5 = vmax.f32 %v1266_v37, %v1330_v42  ;;  %1239 = vst.msk [vmem:[#allocation2 + $0x1ba] sm:$0xff] %vm1183_vm2, %v10440_v33  ;;  %v9294_v44 = vpop.eup %9293  ;;  %v10461_v52 = vld [vmem:[#allocation2 + $0x18a] sm:$0xff]  ;;  %v1587_v22 = vmax.f32 %v1267_v41, %v1331_v56  ;;  %1206 = vst.msk [vmem:[#allocation2 + $0x32] sm:$0xff] %vm1183_vm2, %v1058_v49  ;;  %v1061_v24 = vmul.f32 %v9292_v14, %v10277_v53  ;;  %9319 = vpow2.f32 %v10388_v32 }
  0xf8   :  { %v1458_v50 = vld [vmem:[#allocation2 + $0x3] sm:$0xff]  ;;  %15473 = vst [vmem:[#allocation12_spill] sm:$0xff] %v10458_v21  ;;  %8946 = vmatprep.mubr.msk.f32.mxu0 %vm1183_vm2, %v1058_v49  ;;  %v9296_v7 = vpop.eup %9295  ;;  %v10467_v25 = vld [vmem:[#allocation2 + $0x18b] sm:$0xff]  ;;  %1238 = vst.msk [vmem:[#allocation2 + $0x1b2] sm:$0xff] %vm1183_vm2, %v10458_v21  ;;  %v10472_v20 = vmul.f32 %v9294_v44, %v10280_v54  ;;  %9321 = vpow2.f32 %v10406_v63  ;;  %v10480_v56 = vmul.f32 1.442695, %v686_v35 }
  0xf9   :  { %v1650_v11 = vmax.f32 %v1394_v0, %v1458_v50  ;;  %v1298_v29 = vld [vmem:[#allocation2 + $0x180] sm:$0xff]  ;;  %8947 = vmatmul.mubr.msk.f32.gmra.mxu0 %vm1183_vm2, %v1059_v8  ;;  %v9298_v32 = vpop.eup %9297  ;;  %v1715_v41 = vmax.f32 %v1587_v22, %v1651_v55  ;;  %1209 = vst.msk [vmem:[#allocation2 + $0x52] sm:$0xff] %vm1183_vm2, %v1061_v24  ;;  %v1523_v0 = vld [vmem:[#allocation2 + $0xc] sm:$0xff]  ;;  %v1060_v8 = vmul.f32 %v9296_v7, %v10283_v58  ;;  %9323 = vpow2.f32 %v10414_v23 }
  0xfa   :  { %v1362_v46 = vld [vmem:[#allocation2 + $0x181] sm:$0xff]  ;;  %15474 = vst [vmem:[#allocation13_spill] sm:$0xff] %v10472_v20  ;;  %v9300_v54 = vpop.eup %9299  ;;  %1241 = vst.msk [vmem:[#allocation2 + $0x1d2] sm:$0xff] %vm1183_vm2, %v10472_v20  ;;  %v871_v44 = vadd.f32 1.0, %v9298_v32  ;;  %v1332_v20 = vld [vmem:[#allocation2 + $0x19] sm:$0xff] }
  0xfb   :  { %v1426_v38 = vld [vmem:[#allocation2 + $0x182] sm:$0xff]  ;;  %v1714_v37 = vmax.f32 %v1586_v5, %v1650_v11  ;;  %v1618_v49 = vmax.f32 %v1298_v29, %v1362_v46  ;;  %v9302_v55 = vpop.eup %9301  ;;  %v1779_v35 = vmax.f32 %v1715_v41, %v1523_v0  ;;  %v1268_v29 = vld [vmem:[#allocation2 + $0x18] sm:$0xff]  ;;  %v689_v46 = vsub.f32 0.0, %v10453_v48  ;;  %1208 = vst.msk [vmem:[#allocation2 + $0x4a] sm:$0xff] %vm1183_vm2, %v1060_v8  ;;  %8949 = vmatprep.mubr.msk.f32.mxu0 %vm1183_vm2, %v1060_v8 }
  0xfc   :  { %v1490_v42 = vld [vmem:[#allocation2 + $0x183] sm:$0xff]  ;;  %9325 = vrcp.f32 %v871_v44  ;;  %v903_v58 = vadd.f32 1.0, %v9300_v54  ;;  %v1396_v32 = vld [vmem:[#allocation2 + $0x1a] sm:$0xff]  ;;  %v1588_v41 = vmax.f32 %v1268_v29, %v1332_v20 }
  0xfd   :  { %v1397_v14 = vld [vmem:[#allocation2 + $0x22] sm:$0xff]  ;;  %v1682_v63 = vmax.f32 %v1426_v38, %v1490_v42  ;;  %v9304_v38 = vpop.eup %9303  ;;  %1844 = vst.msk [vmem:[#allocation3 + $0x28] sm:$0xff] %vm1183_vm2, %v1779_v35  ;;  %8950 = vmatmul.mubr.msk.f32.gmra.mxu0 %vm1183_vm2, %v1061_v24  ;;  %v1300_v8 = vld [vmem:[#allocation2 + $0x198] sm:$0xff] }
  0xfe   :  { %v1522_v50 = vld [vmem:[#allocation2 + $0x4] sm:$0xff]  ;;  %v9306_v23 = vpop.eup %9305  ;;  %v902_v0 = vadd.f32 1.0, %v9304_v38  ;;  %v1364_v44 = vld [vmem:[#allocation2 + $0x199] sm:$0xff]  ;;  %9327 = vrcp.f32 %v903_v58 }
  0xff   :  { %v1461_v43 = vld [vmem:[#allocation2 + $0x23] sm:$0xff]  ;;  %v1778_v22 = vmax.f32 %v1714_v37, %v1522_v50  ;;  %v1746_v42 = vmax.f32 %v1618_v49, %v1682_v63  ;;  %v1460_v37 = vld [vmem:[#allocation2 + $0x1b] sm:$0xff]  ;;  %v9308_v50 = vpop.eup %9307  ;;  %v10499_v35 = vmul.f32 %v9306_v23, %v10286_v59  ;;  %v1302_v19 = vld [vmem:[#allocation2 + $0x1b0] sm:$0xff] }
 0x100   :  { %v1554_v11 = vld [vmem:[#allocation2 + $0x184] sm:$0xff]  ;;  %v1653_v53 = vmax.f32 %v1397_v14, %v1461_v43  ;;  %v870_v14 = vadd.f32 1.0, %v9302_v55  ;;  %v1652_v43 = vmax.f32 %v1396_v32, %v1460_v37  ;;  %v1428_v20 = vld [vmem:[#allocation2 + $0x19a] sm:$0xff]  ;;  %v873_v55 = vadd.f32 1.0, %v9308_v50 }
 0x101   :  { %v1269_v33 = vld [vmem:[#allocation2 + $0x20] sm:$0xff]  ;;  %1843 = vst.msk [vmem:[#allocation3 + $0x20] sm:$0xff] %vm1183_vm2, %v1778_v22  ;;  %v10493_v7 = vld [vmem:[#allocation2 + $0x188] sm:$0xff]  ;;  %v1810_v54 = vmax.f32 %v1746_v42, %v1554_v11  ;;  %15475 = vst [vmem:[#allocation14_spill] sm:$0xff] %v10499_v35  ;;  %v9310_v22 = vpop.eup %9309 }
 0x102   :  { %v1333_v21 = vld [vmem:[#allocation2 + $0x21] sm:$0xff]  ;;  %v10496_v63 = vld [vmem:[#allocation2 + $0x189] sm:$0xff]  ;;  %9329 = vrcp.f32 %v870_v14  ;;  %v9312_v24 = vpop.eup %9311  ;;  %v1716_v42 = vmax.f32 %v1588_v41, %v1652_v43  ;;  %1240 = vst.msk [vmem:[#allocation2 + $0x1ca] sm:$0xff] %vm1183_vm2, %v10499_v35  ;;  %v905_v50 = vadd.f32 1.0, %v9310_v22  ;;  %v1335_v22 = vld [vmem:[#allocation2 + $0x39] sm:$0xff] }
 0x103   :  { %v1589_v49 = vmax.f32 %v1269_v33, %v1333_v21  ;;  %v1525_v5 = vld [vmem:[#allocation2 + $0x24] sm:$0xff]  ;;  %v1492_v33 = vld [vmem:[#allocation2 + $0x19b] sm:$0xff]  ;;  %v1620_v21 = vmax.f32 %v1300_v8, %v1364_v44  ;;  %1875 = vst.msk [vmem:[#allocation3 + $0x160] sm:$0xff] %vm1183_vm2, %v1810_v54  ;;  %9331 = vrcp.f32 %v902_v0  ;;  %v9314_v23 = vpop.eup %9313  ;;  %v10512_v54 = vmul.f32 1.442695, %v689_v46  ;;  %v8821_v8 = vpop.f32.mrf.mxu1  ;;  %v10522_v46 = vld [vmem:[#allocation2 + $0x31] sm:$0xff] }
 0x104   :  { %v10502_v29 = vld [vmem:[#allocation2 + $0x1a2] sm:$0xff]  ;;  %v1684_v59 = vmax.f32 %v1428_v20, %v1492_v33  ;;  %9333 = vrcp.f32 %v873_v55  ;;  %v9316_v41 = vpop.eup %9315  ;;  %v1619_v43 = vmax.f32 %v10493_v7, %v10496_v63  ;;  %v10517_v35 = vadd.f32 %v8821_v8, %v10226_v4 }
 0x105   :  { %v1717_v62 = vmax.f32 %v1589_v49, %v1653_v53  ;;  %v10504_v11 = vld [vmem:[#allocation2 + $0x1a3] sm:$0xff]  ;;  %v15476_v53 = vsub.f32 0.0, %v10445_v34  ;;  %v1399_v49 = vld [vmem:[#allocation2 + $0x3a] sm:$0xff]  ;;  %9335 = vrcp.f32 %v905_v50  ;;  %v872_v55 = vadd.f32 1.0, %v9312_v24  ;;  %v1366_v24 = vld [vmem:[#allocation2 + $0x1b1] sm:$0xff] }
 0x106   :  { %v1524_v38 = vld [vmem:[#allocation2 + $0x1c] sm:$0xff]  ;;  %v1748_v33 = vmax.f32 %v1620_v21, %v1684_v59  ;;  %v904_v12 = vadd.f32 1.0, %v9314_v23  ;;  %v875_v7 = vadd.f32 1.0, %v9316_v41  ;;  %v1462_v59 = vld [vmem:[#allocation2 + $0x33] sm:$0xff]  ;;  %v1685_v34 = vmax.f32 %v10502_v29, %v10504_v11 }
 0x107   :  { %v10510_v58 = vmul.f32 1.442695, %v15476_v53  ;;  %v1781_v32 = vmax.f32 %v1717_v62, %v1525_v5  ;;  %v1556_v37 = vld [vmem:[#allocation2 + $0x19c] sm:$0xff]  ;;  %v1780_v44 = vmax.f32 %v1716_v42, %v1524_v38  ;;  %v9318_v62 = vpop.eup %9317  ;;  %v10520_v5 = vld [vmem:[#allocation2 + $0x30] sm:$0xff]  ;;  %9337 = vrcp.f32 %v872_v55 }
 0x108   :  { %v1463_v14 = vld [vmem:[#allocation2 + $0x3b] sm:$0xff]  ;;  %v9320_v63 = vpop.eup %9319  ;;  %v1812_v21 = vmax.f32 %v1748_v33, %v1556_v37  ;;  %v1398_v42 = vld [vmem:[#allocation2 + $0x32] sm:$0xff]  ;;  %v907_v28 = vadd.f32 1.0, %v9318_v62  ;;  %v15478_v37 = vmax.f32 %v10461_v52, %v10467_v25  ;;  %v1590_v41 = vmax.f32 %v10520_v5, %v10522_v46 }
 0x109   :  { %v1301_v0 = vld [vmem:[#allocation2 + $0x1a0] sm:$0xff]  ;;  %v1271_v53 = vld [vmem:[#allocation2 + $0x38] sm:$0xff]  ;;  %1846 = vst.msk [vmem:[#allocation3 + $0x38] sm:$0xff] %vm1183_vm2, %v1781_v32  ;;  %1845 = vst.msk [vmem:[#allocation3 + $0x30] sm:$0xff] %vm1183_vm2, %v1780_v44  ;;  %v1655_v38 = vmax.f32 %v1399_v49, %v1463_v14  ;;  %v441_v32 = vpop.f32.mrf.mxu0  ;;  %v9322_v48 = vpop.eup %9321  ;;  %v874_v23 = vadd.f32 1.0, %v9320_v63  ;;  %9339 = vrcp.f32 %v904_v12  ;;  %v1654_v33 = vmax.f32 %v1398_v42, %v1462_v59 }
 0x10a   :  { %v1365_v20 = vld [vmem:[#allocation2 + $0x1a1] sm:$0xff]  ;;  %v1591_v8 = vmax.f32 %v1271_v53, %v1335_v22  ;;  %v10532_v49 = vmax.f32 %v1619_v43, %v15478_v37  ;;  %1877 = vst.msk [vmem:[#allocation3 + $0x170] sm:$0xff] %vm1183_vm2, %v1812_v21  ;;  %v1430_v29 = vld [vmem:[#allocation2 + $0x1b2] sm:$0xff]  ;;  %v1622_v52 = vmax.f32 %v1302_v19, %v1366_v24  ;;  %9341 = vrcp.f32 %v875_v7  ;;  %v601_v43 = vpop.f32.mrf.mxu1  ;;  %v1336_v7 = vld [vmem:[#allocation2 + $0x49] sm:$0xff] }
 0x10b   :  { %v1621_v10 = vmax.f32 %v1301_v0, %v1365_v20  ;;  %v10527_v50 = vld [vmem:[#allocation2 + $0x1ba] sm:$0xff]  ;;  %v9324_v0 = vpop.eup %9323  ;;  %v906_v25 = vadd.f32 1.0, %v9322_v48  ;;  %v10543_v63 = vld [vmem:[#allocation2 + $0x52] sm:$0xff]  ;;  %9343 = vrcp.f32 %v907_v28  ;;  %v8776_v12 = vpop.f32.mrf.mxu0  ;;  %v1272_v59 = vld [vmem:[#allocation2 + $0x48] sm:$0xff]  ;;  %v721_v19 = vsub.f32 0.0, %v10517_v35 }
 0x10c   :  { %15477 = vst [vmem:[#allocation15_spill] sm:$0xff] %v10527_v50  ;;  %15479 = vst [vmem:[#allocation16_spill] sm:$0xff] %v10532_v49  ;;  %v10535_v14 = vld [vmem:[#allocation2 + $0x1bb] sm:$0xff]  ;;  %v1719_v44 = vmax.f32 %v1591_v8, %v1655_v38  ;;  %v1494_v11 = vld [vmem:[#allocation2 + $0x1b3] sm:$0xff]  ;;  %v877_v46 = vadd.f32 1.0, %v9324_v0  ;;  %v9326_v21 = vpop.eup %9325  ;;  %9345 = vrcp.f32 %v874_v23  ;;  %v10559_v37 = vmax.f32 %v1590_v41, %v1654_v33  ;;  %v8824_v0 = vpop.f32.mrf.mxu1 }
 0x10d   :  { %15480 = vst [vmem:[#allocation17_spill] sm:$0xff] %v10535_v14  ;;  %v1527_v20 = vld [vmem:[#allocation2 + $0x3c] sm:$0xff]  ;;  %v1686_v55 = vmax.f32 %v1430_v29, %v1494_v11  ;;  %v10545_v5 = vld [vmem:[#allocation2 + $0x53] sm:$0xff]  ;;  %v10547_v38 = vmax.f32 %v1621_v10, %v1685_v34  ;;  %v1400_v8 = vld [vmem:[#allocation2 + $0x4a] sm:$0xff]  ;;  %v1063_v24 = vmul.f32 %v9326_v21, %v10292_v2  ;;  %9347 = vrcp.f32 %v906_v25  ;;  %v9328_v34 = vpop.eup %9327 }
 0x10e   :  { %v10539_v53 = vld [vmem:[#allocation2 + $0x1b8] sm:$0xff]  ;;  %v1783_v22 = vmax.f32 %v1719_v44, %v1527_v20  ;;  %v1464_v28 = vld [vmem:[#allocation2 + $0x4b] sm:$0xff]  ;;  %v10557_v10 = vadd.f32 %v10226_v4, %v441_v32  ;;  %9349 = vrcp.f32 %v877_v46  ;;  %v10568_v11 = vadd.f32 %v10226_v4, %v601_v43  ;;  %v451_v43 = vpop.f32.mrf.mxu0 }
 0x10f   :  { %15481 = vst [vmem:[#allocation18_spill] sm:$0xff] %v10539_v53  ;;  %v10541_v62 = vld [vmem:[#allocation2 + $0x1b9] sm:$0xff]  ;;  %15483 = vst [vmem:[#allocation20_spill] sm:$0xff] %v10547_v38  ;;  %v9330_v2 = vpop.eup %9329  ;;  %v10570_v20 = vmax.f32 %v1622_v52, %v1686_v55  ;;  %v10572_v32 = vld [vmem:[#allocation2 + $0x50] sm:$0xff]  ;;  %v10578_v41 = vmul.f32 %v9328_v34, %v10295_v6  ;;  %9351 = vpow2.f32 %v10425_v17  ;;  %v10582_v33 = vadd.f32 %v8776_v12, %v10226_v4 }
 0x110   :  { %15482 = vst [vmem:[#allocation19_spill] sm:$0xff] %v10541_v62  ;;  %1848 = vst.msk [vmem:[#allocation3 + $0x48] sm:$0xff] %vm1183_vm2, %v1783_v22  ;;  %v10563_v44 = vld [vmem:[#allocation2 + $0x1d2] sm:$0xff]  ;;  %v9332_v22 = vpop.eup %9331  ;;  %v1592_v46 = vmax.f32 %v1272_v59, %v1336_v7  ;;  %v1656_v21 = vmax.f32 %v1400_v8, %v1464_v28  ;;  %v1062_v52 = vmul.f32 %v9330_v2, %v10299_v16  ;;  %v688_v55 = vsub.f32 0.0, %v10557_v10  ;;  %v8284_v12 = vld [vmem:[%s15322_s3 + $0x8] sm:$0xf]  ;;  %v611_v7 = vpop.f32.mrf.mxu1 }
 0x111   :  { %15484 = vst [vmem:[#allocation21_spill] sm:$0xff] %v10563_v44  ;;  %v10565_v29 = vld [vmem:[#allocation2 + $0x1d3] sm:$0xff]  ;;  %15486 = vst [vmem:[#allocation23_spill] sm:$0xff] %v10570_v20  ;;  %v9334_v48 = vpop.eup %9333  ;;  %v10591_v6 = vmul.f32 %v9332_v22, %v10304_v36  ;;  %9353 = vpow2.f32 %v10427_v27  ;;  %v836_v17 = vmul.f32 1.442695, %v721_v19  ;;  %v720_v36 = vsub.f32 0.0, %v10568_v11  ;;  %9036 = vmatprep.subr.msk.mxu1 %vm2680_vm3, %v8284_v12  ;;  %v8779_v8 = vpop.f32.mrf.mxu0 }
 0x112   :  { %15485 = vst [vmem:[#allocation22_spill] sm:$0xff] %v10565_v29  ;;  %v10574_v25 = vld [vmem:[#allocation2 + $0x51] sm:$0xff]  ;;  %1211 = vst.msk [vmem:[#allocation2 + $0x6a] sm:$0xff] %vm1183_vm2, %v1063_v24  ;;  %v10601_v59 = vmul.f32 %v9334_v48, %v10308_v39  ;;  %9355 = vpow2.f32 %v10432_v13  ;;  %8952 = vmatprep.mubr.msk.f32.mxu0 %vm1183_vm2, %v1062_v52  ;;  %v8350_v27 = vld [vmem:[%s15322_s3 + $0xc] sm:$0xf]  ;;  %v9336_v19 = vpop.eup %9335  ;;  %v691_v39 = vsub.f32 0.0, %v10582_v33  ;;  %v10615_v13 = vadd.f32 %v8824_v0, %v10226_v4 }
 0x113   :  { %15487 = vst [vmem:[#allocation24_spill] sm:$0xff] %v10578_v41  ;;  %1243 = vst.msk [vmem:[#allocation2 + $0x1ea] sm:$0xff] %vm1183_vm2, %v10578_v41  ;;  %9357 = vpow2.f32 %v10434_v30  ;;  %v10618_v48 = vadd.f32 %v10226_v4, %v451_v43  ;;  %8953 = vmatmul.mubr.msk.f32.gmra.mxu0 %vm1183_vm2, %v1063_v24  ;;  %9134 = vmatprep.subr.msk.mxu0 %vm2680_vm3, %v8350_v27  ;;  %v10622_v28 = vmax.f32 %v1592_v46, %v1656_v21  ;;  %v10624_v34 = vld [vmem:[#allocation2 + $0x1c8] sm:$0xff]  ;;  %v10656_v42 = vld [vmem:[#allocation2 + $0x1d0] sm:$0xff] }
 0x114   :  { %15488 = vst [vmem:[#allocation25_spill] sm:$0xff] %v10591_v6  ;;  %1210 = vst.msk [vmem:[#allocation2 + $0x62] sm:$0xff] %vm1183_vm2, %v1062_v52  ;;  %v10626_v2 = vld [vmem:[#allocation2 + $0x1c9] sm:$0xff]  ;;  %v10631_v30 = vmul.f32 %v9336_v19, %v10313_v45  ;;  %9359 = vpow2.f32 %v10475_v40  ;;  %v770_v0 = vmul.f32 1.442695, %v688_v55  ;;  %9135 = vmatpush3.msk.msra.mxu0 %vm2680_vm3, %v8350_v27  ;;  %v9338_v24 = vpop.eup %9337  ;;  %v723_v22 = vsub.f32 0.0, %v10615_v13 }
 0x115   :  { %1242 = vst.msk [vmem:[#allocation2 + $0x1e2] sm:$0xff] %vm1183_vm2, %v10591_v6  ;;  %1213 = vst.msk [vmem:[#allocation2 + $0x82] sm:$0xff] %vm1183_vm2, %v10601_v59  ;;  %9361 = vpow2.f32 %v10480_v56  ;;  %v834_v43 = vmul.f32 1.442695, %v720_v36  ;;  %v10638_v46 = vadd.f32 %v10226_v4, %v611_v7  ;;  %v10640_v52 = vld [vmem:[#allocation2 + $0x1ca] sm:$0xff]  ;;  %v1064_v45 = vmul.f32 %v9338_v24, %v10316_v47 }
 0x116   :  { %15489 = vst [vmem:[#allocation26_spill] sm:$0xff] %v10631_v30  ;;  %v9340_v21 = vpop.eup %9339  ;;  %v1496_v12 = vld [vmem:[#allocation2 + $0x1cb] sm:$0xff]  ;;  %1245 = vst.msk [vmem:[#allocation2 + $0x202] sm:$0xff] %vm1183_vm2, %v10631_v30  ;;  %9363 = vpow2.f32 %v10510_v58  ;;  %v690_v40 = vsub.f32 0.0, %v10618_v48  ;;  %v10648_v56 = vadd.f32 %v8779_v8, %v10226_v4  ;;  %v1624_v36 = vmax.f32 %v10624_v34, %v10626_v2 }
 0x117   :  { %v9342_v55 = vpop.eup %9341  ;;  %v10653_v7 = vmul.f32 %v9340_v21, %v10321_v51  ;;  %9365 = vpow2.f32 %v10512_v54  ;;  %v776_v27 = vmul.f32 1.442695, %v691_v39  ;;  %15491 = vst [vmem:[#allocation28_spill] sm:$0xff] %v10656_v42  ;;  %v10658_v47 = vld [vmem:[#allocation2 + $0x1d1] sm:$0xff]  ;;  %1212 = vst.msk [vmem:[#allocation2 + $0x7a] sm:$0xff] %vm1183_vm2, %v1064_v45  ;;  %v722_v34 = vsub.f32 0.0, %v10638_v46  ;;  %v8827_v51 = vpop.f32.mrf.mxu1  ;;  %8955 = vmatprep.mubr.msk.f32.mxu0 %vm1183_vm2, %v1064_v45 }
 0x118   :  { %v9344_v19 = vpop.eup %9343  ;;  %15492 = vst [vmem:[#allocation29_spill] sm:$0xff] %v10658_v47  ;;  %v1067_v4 = vmul.f32 %v9342_v55, %v10325_v60  ;;  %9367 = vpow2.f32 %v836_v17  ;;  %v840_v8 = vmul.f32 1.442695, %v723_v22  ;;  %v1688_v39 = vmax.f32 %v10640_v52, %v1496_v12  ;;  %v10677_v60 = vld [vmem:[%s15323_s2] ss:$0 sm:$0xff]  ;;  %8956 = vmatmul.mubr.msk.f32.gmra.mxu0 %vm1183_vm2, %v10601_v59 }
 0x119   :  { %15490 = vst [vmem:[#allocation27_spill] sm:$0xff] %v10653_v7  ;;  %v10660_v58 = vld [vmem:[#allocation2 + $0x6a] sm:$0xff]  ;;  %v9346_v54 = vpop.eup %9345  ;;  %1244 = vst.msk [vmem:[#allocation2 + $0x1fa] sm:$0xff] %vm1183_vm2, %v10653_v7  ;;  %v10672_v16 = vmul.f32 %v9344_v19, %v10334_v18  ;;  %9369 = vpow2.f32 %v770_v0  ;;  %v10680_v17 = vadd.f32 %v10677_v60, %v8827_v51  ;;  %v774_v0 = vmul.f32 1.442695, %v690_v40 }
 0x11a   :  { %v10667_v2 = vld [vmem:[#allocation2 + $0x6b] sm:$0xff]  ;;  %v9348_v22 = vpop.eup %9347  ;;  %1215 = vst.msk [vmem:[#allocation2 + $0x9a] sm:$0xff] %vm1183_vm2, %v1067_v4  ;;  %v1066_v18 = vmul.f32 %v9346_v54, %v10342_v31  ;;  %9371 = vpow2.f32 %v834_v43  ;;  %v693_v55 = vsub.f32 0.0, %v10648_v56  ;;  %v838_v47 = vmul.f32 1.442695, %v722_v34 }
 0x11b   :  { %v1274_v24 = vld [vmem:[#allocation2 + $0x60] sm:$0xff]  ;;  %15493 = vst [vmem:[#allocation30_spill] sm:$0xff] %v10672_v16  ;;  %v10684_v52 = vld [vmem:[#allocation2 + $0x1ea] sm:$0xff]  ;;  %v9350_v19 = vpop.eup %9349  ;;  %1247 = vst.msk [vmem:[#allocation2 + $0x21a] sm:$0xff] %vm1183_vm2, %v10672_v16  ;;  %v10700_v31 = vmul.f32 %v9348_v22, %v10354_v57  ;;  %9373 = vpow2.f32 %v776_v27 }
 0x11c   :  { %v1338_v21 = vld [vmem:[#allocation2 + $0x61] sm:$0xff]  ;;  %15494 = vst [vmem:[#allocation31_spill] sm:$0xff] %v10684_v52  ;;  %v10691_v23 = vld [vmem:[#allocation2 + $0x1eb] sm:$0xff]  ;;  %v9352_v43 = vpop.eup %9351  ;;  %1214 = vst.msk [vmem:[#allocation2 + $0x92] sm:$0xff] %vm1183_vm2, %v1066_v18  ;;  %v10704_v51 = vmul.f32 %v9350_v19, %v10358_v9  ;;  %9375 = vpow2.f32 %v840_v8  ;;  %8958 = vmatprep.mubr.msk.f32.mxu0 %vm1183_vm2, %v1066_v18  ;;  %v725_v9 = vsub.f32 0.0, %v10680_v17 }
 0x11d   :  { %v1402_v12 = vld [vmem:[#allocation2 + $0x62] sm:$0xff]  ;;  %15495 = vst [vmem:[#allocation32_spill] sm:$0xff] %v10691_v23  ;;  %v1594_v7 = vmax.f32 %v1274_v24, %v1338_v21  ;;  %15496 = vst [vmem:[#allocation33_spill] sm:$0xff] %v10700_v31  ;;  %v10707_v24 = vmax.f32 %v1624_v36, %v1688_v39  ;;  %8959 = vmatmul.mubr.msk.f32.gmra.mxu0 %vm1183_vm2, %v1067_v4  ;;  %9377 = vpow2.f32 %v774_v0  ;;  %v780_v39 = vmul.f32 1.442695, %v693_v55 }
 0x11e   :  { %v1466_v45 = vld [vmem:[#allocation2 + $0x63] sm:$0xff]  ;;  %1246 = vst.msk [vmem:[#allocation2 + $0x212] sm:$0xff] %vm1183_vm2, %v10700_v31  ;;  %v9354_v8 = vpop.eup %9353  ;;  %1217 = vst.msk [vmem:[#allocation2 + $0xb2] sm:$0xff] %vm1183_vm2, %v10704_v51  ;;  %v621_v31 = vpop.f32.mrf.mxu1  ;;  %v1276_v55 = vld [vmem:[#allocation2 + $0x78] sm:$0xff] }
 0x11f   :  { %v10693_v59 = vld [vmem:[#allocation2 + $0x68] sm:$0xff]  ;;  %v1658_v40 = vmax.f32 %v1402_v12, %v1466_v45  ;;  %v1306_v54 = vld [vmem:[#allocation2 + $0x1e0] sm:$0xff]  ;;  %15497 = vst [vmem:[#allocation34_spill] sm:$0xff] %v10707_v24  ;;  %v909_v12 = vadd.f32 1.0, %v9352_v43  ;;  %v461_v45 = vpop.f32.mrf.mxu0  ;;  %v9356_v18 = vpop.eup %9355  ;;  %v876_v4 = vadd.f32 1.0, %v9354_v8  ;;  %v10747_v44 = vadd.f32 %v10677_v60, %v621_v31 }
 0x120   :  { %v10695_v30 = vld [vmem:[#allocation2 + $0x69] sm:$0xff]  ;;  %v1370_v41 = vld [vmem:[#allocation2 + $0x1e1] sm:$0xff]  ;;  %v9358_v36 = vpop.eup %9357  ;;  %v10737_v8 = vmul.f32 1.442695, %v725_v9 }
 0x121   :  { %v1434_v29 = vld [vmem:[#allocation2 + $0x1e2] sm:$0xff]  ;;  %v1626_v19 = vmax.f32 %v1306_v54, %v1370_v41  ;;  %9379 = vrcp.f32 %v909_v12  ;;  %v10729_v23 = vmax.f32 %v1594_v7, %v1658_v40  ;;  %v908_v41 = vadd.f32 1.0, %v9356_v18  ;;  %v1340_v54 = vld [vmem:[#allocation2 + $0x79] sm:$0xff] }
 0x122   :  { %v10711_v27 = vld [vmem:[#allocation2 + $0x1e8] sm:$0xff]  ;;  %9381 = vpow2.f32 %v838_v47  ;;  %v1468_v42 = vld [vmem:[#allocation2 + $0x7b] sm:$0xff]  ;;  %v879_v12 = vadd.f32 1.0, %v9358_v36  ;;  %v10740_v7 = vadd.f32 %v10677_v60, %v461_v45  ;;  %v1596_v62 = vmax.f32 %v1276_v55, %v1340_v54  ;;  %v8830_v55 = vpop.f32.mrf.mxu1 }
 0x123   :  { %15498 = vst [vmem:[#allocation35_spill] sm:$0xff] %v10711_v27  ;;  %v10713_v21 = vld [vmem:[#allocation2 + $0x1e9] sm:$0xff]  ;;  %9383 = vrcp.f32 %v876_v4  ;;  %v1308_v27 = vld [vmem:[#allocation2 + $0x1f8] sm:$0xff]  ;;  %v8782_v4 = vpop.f32.mrf.mxu0  ;;  %v10753_v6 = vld [vmem:[#allocation2 + $0x81] sm:$0xff] }
 0x124   :  { %15499 = vst [vmem:[#allocation36_spill] sm:$0xff] %v10713_v21  ;;  %v1498_v22 = vld [vmem:[#allocation2 + $0x1e3] sm:$0xff]  ;;  %v1372_v18 = vld [vmem:[#allocation2 + $0x1f9] sm:$0xff]  ;;  %9385 = vrcp.f32 %v908_v41  ;;  %15505 = vst [vmem:[#allocation42_spill] sm:$0xff] %v10753_v6 }
 0x125   :  { %v1690_v43 = vmax.f32 %v1434_v29, %v1498_v22  ;;  %v10725_v57 = vld [vmem:[#allocation2 + $0x82] sm:$0xff]  ;;  %v9360_v29 = vpop.eup %9359  ;;  %v1404_v22 = vld [vmem:[#allocation2 + $0x7a] sm:$0xff]  ;;  %9387 = vrcp.f32 %v879_v12  ;;  %v471_v54 = vpop.f32.mrf.mxu0  ;;  %v10790_v6 = vld [vmem:[#allocation2 + $0x92] sm:$0xff] }
 0x126   :  { %v10727_v16 = vld [vmem:[#allocation2 + $0x83] sm:$0xff]  ;;  %v9362_v40 = vpop.eup %9361  ;;  %v911_v47 = vadd.f32 1.0, %v9360_v29  ;;  %v1436_v24 = vld [vmem:[#allocation2 + $0x1fa] sm:$0xff]  ;;  %v1660_v41 = vmax.f32 %v1404_v22, %v1468_v42  ;;  %v1628_v29 = vmax.f32 %v1308_v27, %v1372_v18  ;;  %v692_v27 = vsub.f32 0.0, %v10740_v7 }
 0x127   :  { %15500 = vst [vmem:[#allocation37_spill] sm:$0xff] %v10727_v16  ;;  %v10733_v52 = vld [vmem:[#allocation2 + $0x202] sm:$0xff]  ;;  %v9364_v36 = vpop.eup %9363  ;;  %v10749_v9 = vmax.f32 %v1626_v19, %v1690_v43  ;;  %v878_v38 = vadd.f32 1.0, %v9362_v40  ;;  %v10761_v12 = vld [vmem:[#allocation2 + $0x9a] sm:$0xff] }
 0x128   :  { %15501 = vst [vmem:[#allocation38_spill] sm:$0xff] %v10733_v52  ;;  %v10735_v0 = vld [vmem:[#allocation2 + $0x203] sm:$0xff]  ;;  %v1500_v34 = vld [vmem:[#allocation2 + $0x1fb] sm:$0xff]  ;;  %v9366_v49 = vpop.eup %9365  ;;  %9389 = vrcp.f32 %v911_v47  ;;  %v910_v43 = vadd.f32 1.0, %v9364_v36  ;;  %15508 = vst [vmem:[#allocation45_spill] sm:$0xff] %v10761_v12  ;;  %v10774_v47 = vadd.f32 %v10677_v60, %v8782_v4 }
 0x129   :  { %15502 = vst [vmem:[#allocation39_spill] sm:$0xff] %v10735_v0  ;;  %v10744_v21 = vld [vmem:[#allocation2 + $0x80] sm:$0xff]  ;;  %15504 = vst [vmem:[#allocation41_spill] sm:$0xff] %v10749_v9  ;;  %v9368_v31 = vpop.eup %9367  ;;  %v1692_v19 = vmax.f32 %v1436_v24, %v1500_v34  ;;  %9391 = vrcp.f32 %v878_v38  ;;  %v881_v45 = vadd.f32 1.0, %v9366_v49  ;;  %v10770_v49 = vld [vmem:[#allocation2 + $0x90] sm:$0xff]  ;;  %v724_v34 = vsub.f32 0.0, %v10747_v44 }
 0x12a   :  { %15503 = vst [vmem:[#allocation40_spill] sm:$0xff] %v10744_v21  ;;  %v10755_v53 = vld [vmem:[#allocation2 + $0x200] sm:$0xff]  ;;  %v9370_v0 = vpop.eup %9369  ;;  %v913_v42 = vadd.f32 1.0, %v9368_v31  ;;  %9393 = vpow2.f32 %v780_v39  ;;  %v10776_v39 = vmax.f32 %v1596_v62, %v1660_v41  ;;  %v10780_v52 = vld [vmem:[#allocation2 + $0x98] sm:$0xff]  ;;  %v695_v4 = vsub.f32 0.0, %v10774_v47 }
 0x12b   :  { %15506 = vst [vmem:[#allocation43_spill] sm:$0xff] %v10755_v53  ;;  %v10757_v14 = vld [vmem:[#allocation2 + $0x201] sm:$0xff]  ;;  %v9372_v22 = vpop.eup %9371  ;;  %9395 = vrcp.f32 %v910_v43  ;;  %v880_v24 = vadd.f32 1.0, %v9370_v0  ;;  %15512 = vst [vmem:[#allocation49_spill] sm:$0xff] %v10780_v52  ;;  %v10782_v9 = vld [vmem:[#allocation2 + $0x91] sm:$0xff]  ;;  %v10786_v20 = vmax.f32 %v1628_v29, %v1692_v19 }
 0x12c   :  { %15507 = vst [vmem:[#allocation44_spill] sm:$0xff] %v10757_v14  ;;  %v10763_v40 = vld [vmem:[#allocation2 + $0x9b] sm:$0xff]  ;;  %v9374_v36 = vpop.eup %9373  ;;  %9397 = vrcp.f32 %v881_v45  ;;  %v912_v43 = vadd.f32 1.0, %v9372_v22  ;;  %v10792_v62 = vld [vmem:[#allocation2 + $0x93] sm:$0xff]  ;;  %v778_v53 = vmul.f32 1.442695, %v692_v27  ;;  %v631_v45 = vpop.f32.mrf.mxu1  ;;  %v10804_v27 = vadd.f32 %v10677_v60, %v8830_v55 }
 0x12d   :  { %15509 = vst [vmem:[#allocation46_spill] sm:$0xff] %v10763_v40  ;;  %v10766_v18 = vld [vmem:[#allocation2 + $0x21a] sm:$0xff]  ;;  %v9376_v0 = vpop.eup %9375  ;;  %15514 = vst [vmem:[#allocation51_spill] sm:$0xff] %v10786_v20  ;;  %9399 = vrcp.f32 %v913_v42  ;;  %v883_v41 = vadd.f32 1.0, %v9374_v36  ;;  %v8785_v22 = vpop.f32.mrf.mxu0  ;;  %v842_v29 = vmul.f32 1.442695, %v724_v34  ;;  %v10811_v20 = vadd.f32 %v10677_v60, %v471_v54 }
 0x12e   :  { %15510 = vst [vmem:[#allocation47_spill] sm:$0xff] %v10766_v18  ;;  %v10768_v38 = vld [vmem:[#allocation2 + $0x21b] sm:$0xff]  ;;  %9401 = vrcp.f32 %v880_v24  ;;  %v915_v14 = vadd.f32 1.0, %v9376_v0  ;;  %v9378_v21 = vpop.eup %9377  ;;  %v727_v18 = vsub.f32 0.0, %v10804_v27  ;;  %v10821_v55 = vadd.f32 %v10677_v60, %v8785_v22 }
 0x12f   :  { %15511 = vst [vmem:[#allocation48_spill] sm:$0xff] %v10768_v38  ;;  %v10784_v50 = vld [vmem:[#allocation2 + $0x99] sm:$0xff]  ;;  %9403 = vrcp.f32 %v912_v43  ;;  %v9380_v42 = vpop.eup %9379  ;;  %v882_v24 = vadd.f32 1.0, %v9378_v21  ;;  %v784_v38 = vmul.f32 1.442695, %v695_v4  ;;  %v481_v21 = vpop.f32.mrf.mxu0 }
 0x130   :  { %15513 = vst [vmem:[#allocation50_spill] sm:$0xff] %v10784_v50  ;;  %9405 = vrcp.f32 %v883_v41  ;;  %v9382_v0 = vpop.eup %9381  ;;  %v10807_v31 = vmul.f32 %v9380_v42, %v10362_v15  ;;  %v8833_v41 = vpop.f32.mrf.mxu1  ;;  %v848_v4 = vmul.f32 1.442695, %v727_v18  ;;  %v694_v42 = vsub.f32 0.0, %v10811_v20 }
 0x131   :  { %9407 = vrcp.f32 %v915_v14  ;;  %v9384_v19 = vpop.eup %9383  ;;  %v914_v43 = vadd.f32 1.0, %v9382_v0  ;;  %v10818_v14 = vadd.f32 %v10677_v60, %v631_v45  ;;  %v697_v45 = vsub.f32 0.0, %v10821_v55  ;;  %v15518_v0 = vld [vmem:[#allocation7_spill] sm:$0xff] }
 0x132   :  { %15515 = vst [vmem:[#allocation52_spill] sm:$0xff] %v10807_v31  ;;  %9409 = vrcp.f32 %v882_v24  ;;  %v9386_v36 = vpop.eup %9385  ;;  %1249 = vst.msk [vmem:[#allocation2 + $0x232] sm:$0xff] %vm1183_vm2, %v10807_v31  ;;  %v1068_v15 = vmul.f32 %v9384_v19, %v10365_v61  ;;  %v782_v18 = vmul.f32 1.442695, %v694_v42  ;;  %v10838_v19 = vadd.f32 %v10677_v60, %v8833_v41 }
 0x133   :  { %9411 = vpow2.f32 %v10737_v8  ;;  %v9388_v34 = vpop.eup %9387  ;;  %v10824_v54 = vmul.f32 %v9386_v36, %v10373_v3  ;;  %v726_v8 = vsub.f32 0.0, %v10818_v14  ;;  %v10852_v42 = vadd.f32 %v10677_v60, %v481_v21  ;;  %v10867_v21 = vld [vmem:[#allocation2 + $0x213] sm:$0xff] }
 0x134   :  { %9413 = vrcp.f32 %v914_v43  ;;  %1216 = vst.msk [vmem:[#allocation2 + $0xaa] sm:$0xff] %vm1183_vm2, %v1068_v15  ;;  %v1071_v61 = vmul.f32 %v9388_v34, %v10380_v26  ;;  %8961 = vmatprep.mubr.msk.f32.mxu0 %vm1183_vm2, %v1068_v15  ;;  %v641_v26 = vpop.f32.mrf.mxu1  ;;  %v788_v34 = vmul.f32 1.442695, %v697_v45 }
 0x135   :  { %15516 = vst [vmem:[#allocation53_spill] sm:$0xff] %v10824_v54  ;;  %v9390_v24 = vpop.eup %9389  ;;  %9415 = vpow2.f32 %v778_v53  ;;  %1248 = vst.msk [vmem:[#allocation2 + $0x22a] sm:$0xff] %vm1183_vm2, %v10824_v54  ;;  %v8788_v53 = vpop.f32.mrf.mxu0  ;;  %8962 = vmatmul.mubr.msk.f32.gmra.mxu0 %vm1183_vm2, %v10704_v51  ;;  %v846_v15 = vmul.f32 1.442695, %v726_v8  ;;  %v729_v51 = vsub.f32 0.0, %v10838_v19  ;;  %v10859_v45 = vadd.f32 %v10677_v60, %v641_v26  ;;  %v10872_v26 = vld [vmem:[#allocation2 + $0x218] sm:$0xff] }
 0x136   :  { %v9392_v22 = vpop.eup %9391  ;;  %v10835_v3 = vmul.f32 %v9390_v24, %v10409_v1  ;;  %9417 = vpow2.f32 %v842_v29  ;;  %1219 = vst.msk [vmem:[#allocation2 + $0xca] sm:$0xff] %vm1183_vm2, %v1071_v61  ;;  %v10844_v24 = vld [vmem:[#allocation2 + $0x210] sm:$0xff] }
 0x137   :  { %v9394_v36 = vpop.eup %9393  ;;  %v1070_v43 = vmul.f32 %v9392_v22, %v15518_v0  ;;  %9419 = vpow2.f32 %v784_v38  ;;  %v10846_v29 = vld [vmem:[#allocation2 + $0x211] sm:$0xff]  ;;  %v10862_v22 = vadd.f32 %v10677_v60, %v8788_v53  ;;  %v852_v54 = vmul.f32 1.442695, %v729_v51  ;;  %v10874_v53 = vld [vmem:[#allocation2 + $0x219] sm:$0xff] }
 0x138   :  { %15517 = vst [vmem:[#allocation54_spill] sm:$0xff] %v10835_v3  ;;  %v9396_v1 = vpop.eup %9395  ;;  %1251 = vst.msk [vmem:[#allocation2 + $0x24a] sm:$0xff] %vm1183_vm2, %v10835_v3  ;;  %v885_v41 = vadd.f32 1.0, %v9394_v36  ;;  %9421 = vpow2.f32 %v848_v4  ;;  %v15519_v38 = vld [vmem:[#allocation10_spill] sm:$0xff]  ;;  %v15521_v0 = vld [vmem:[#allocation11_spill] sm:$0xff] }
 0x139   :  { %v9398_v31 = vpop.eup %9397  ;;  %1218 = vst.msk [vmem:[#allocation2 + $0xc2] sm:$0xff] %vm1183_vm2, %v1070_v43  ;;  %v10856_v8 = vmul.f32 %v9396_v1, %v15519_v38  ;;  %9423 = vpow2.f32 %v782_v18  ;;  %8964 = vmatprep.mubr.msk.f32.mxu0 %vm1183_vm2, %v1070_v43  ;;  %v10865_v36 = vld [vmem:[#allocation2 + $0x212] sm:$0xff]  ;;  %v696_v1 = vsub.f32 0.0, %v10852_v42  ;;  %15522 = vst [vmem:[#allocation10_spill] sm:$0xff] %v10872_v26  ;;  %v1630_v43 = vmax.f32 %v10844_v24, %v10846_v29 }
 0x13a   :  { %v9400_v4 = vpop.eup %9399  ;;  %v1073_v3 = vmul.f32 %v9398_v31, %v15521_v0  ;;  %9425 = vrcp.f32 %v885_v41  ;;  %8965 = vmatmul.mubr.msk.f32.gmra.mxu0 %vm1183_vm2, %v1071_v61  ;;  %15523 = vst [vmem:[#allocation11_spill] sm:$0xff] %v10874_v53  ;;  %v728_v31 = vsub.f32 0.0, %v10859_v45  ;;  %v10884_v51 = vld [vmem:[#allocation2 + $0xb2] sm:$0xff] }
 0x13b   :  { %15520 = vst [vmem:[#allocation7_spill] sm:$0xff] %v10856_v8  ;;  %v9402_v18 = vpop.eup %9401  ;;  %1250 = vst.msk [vmem:[#allocation2 + $0x242] sm:$0xff] %vm1183_vm2, %v10856_v8  ;;  %v10881_v38 = vmul.f32 %v9400_v4, %v10517_v35  ;;  %9427 = vpow2.f32 %v846_v15  ;;  %v10886_v61 = vld [vmem:[#allocation2 + $0xa8] sm:$0xff]  ;;  %v786_v29 = vmul.f32 1.442695, %v696_v1  ;;  %v699_v8 = vsub.f32 0.0, %v10862_v22 }
 0x13c   :  { %v9404_v41 = vpop.eup %9403  ;;  %v10888_v0 = vld [vmem:[#allocation2 + $0xa9] sm:$0xff]  ;;  %1221 = vst.msk [vmem:[#allocation2 + $0xe2] sm:$0xff] %vm1183_vm2, %v1073_v3  ;;  %v1072_v24 = vmul.f32 %v9402_v18, %v10557_v10  ;;  %9429 = vpow2.f32 %v788_v34  ;;  %v1694_v15 = vmax.f32 %v10865_v36, %v10867_v21  ;;  %v10895_v4 = vld [vmem:[#allocation2 + $0xb3] sm:$0xff]  ;;  %v850_v10 = vmul.f32 1.442695, %v728_v31 }
 0x13d   :  { %15524 = vst [vmem:[#allocation55_spill] sm:$0xff] %v10881_v38  ;;  %v9406_v35 = vpop.eup %9405  ;;  %v1408_v50 = vld [vmem:[#allocation2 + $0xaa] sm:$0xff]  ;;  %1253 = vst.msk [vmem:[#allocation2 + $0x262] sm:$0xff] %vm1183_vm2, %v10881_v38  ;;  %v10900_v40 = vmul.f32 %v9404_v41, %v10568_v11  ;;  %9431 = vpow2.f32 %v852_v54  ;;  %v10902_v1 = vld [vmem:[#allocation2 + $0x232] sm:$0xff]  ;;  %v1600_v36 = vmax.f32 %v10886_v61, %v10888_v0  ;;  %v8836_v11 = vpop.f32.mrf.mxu1  ;;  %v15530_v0 = vmax.f32 %v10790_v6, %v10792_v62 }
 0x13e   :  { %v1472_v52 = vld [vmem:[#allocation2 + $0xab] sm:$0xff]  ;;  %v9408_v34 = vpop.eup %9407  ;;  %15526 = vst [vmem:[#allocation57_spill] sm:$0xff] %v10902_v1  ;;  %v10904_v18 = vld [vmem:[#allocation2 + $0x233] sm:$0xff]  ;;  %1220 = vst.msk [vmem:[#allocation2 + $0xda] sm:$0xff] %vm1183_vm2, %v1072_v24  ;;  %v1075_v38 = vmul.f32 %v9406_v35, %v10582_v33  ;;  %9433 = vpow2.f32 %v786_v29  ;;  %8967 = vmatprep.mubr.msk.f32.mxu0 %vm1183_vm2, %v1072_v24  ;;  %v10923_v33 = vadd.f32 %v10677_v60, %v8836_v11 }
 0x13f   :  { %15525 = vst [vmem:[#allocation56_spill] sm:$0xff] %v10900_v40  ;;  %15527 = vst [vmem:[#allocation58_spill] sm:$0xff] %v10904_v18  ;;  %v10906_v12 = vld [vmem:[#allocation2 + $0xb0] sm:$0xff]  ;;  %v1664_v21 = vmax.f32 %v1408_v50, %v1472_v52  ;;  %v9410_v54 = vpop.eup %9409  ;;  %v10913_v31 = vld [vmem:[#allocation2 + $0x228] sm:$0xff]  ;;  %v10920_v61 = vmul.f32 %v9408_v34, %v10615_v13  ;;  %9435 = vpow2.f32 %v850_v10  ;;  %v792_v50 = vmul.f32 1.442695, %v699_v8  ;;  %8968 = vmatmul.mubr.msk.f32.gmra.mxu0 %vm1183_vm2, %v1073_v3  ;;  %v491_v13 = vpop.f32.mrf.mxu0 }
 0x140   :  { %v10915_v41 = vld [vmem:[#allocation2 + $0x229] sm:$0xff]  ;;  %1252 = vst.msk [vmem:[#allocation2 + $0x25a] sm:$0xff] %vm1183_vm2, %v10900_v40  ;;  %15529 = vst [vmem:[#allocation60_spill] sm:$0xff] %v10923_v33  ;;  %v9412_v52 = vpop.eup %9411  ;;  %v15531_v24 = vmax.f32 %v10770_v49, %v10782_v9  ;;  %v10938_v35 = vld [vmem:[#allocation2 + $0xb1] sm:$0xff]  ;;  %v1074_v6 = vmul.f32 %v9410_v54, %v10618_v48  ;;  %v10944_v34 = vmax.f32 %v1630_v43, %v1694_v15 }
 0x141   :  { %v1440_v16 = vld [vmem:[#allocation2 + $0x22a] sm:$0xff]  ;;  %15528 = vst [vmem:[#allocation59_spill] sm:$0xff] %v10920_v61  ;;  %1223 = vst.msk [vmem:[#allocation2 + $0xfa] sm:$0xff] %vm1183_vm2, %v1075_v38  ;;  %v9414_v62 = vpop.eup %9413  ;;  %9437 = vpow2.f32 %v792_v50  ;;  %v1632_v43 = vmax.f32 %v10913_v31, %v10915_v41  ;;  %v651_v50 = vpop.f32.mrf.mxu1  ;;  %v10970_v18 = vmax.f32 %v1600_v36, %v1664_v21  ;;  %v1282_v31 = vld [vmem:[#allocation2 + $0xc0] sm:$0xff] }
 0x142   :  { %v10932_v29 = vmax.f32 %v15531_v24, %v15530_v0  ;;  %v10940_v10 = vld [vmem:[#allocation2 + $0x230] sm:$0xff]  ;;  %15533 = vst [vmem:[#allocation62_spill] sm:$0xff] %v10944_v34  ;;  %1255 = vst.msk [vmem:[#allocation2 + $0x27a] sm:$0xff] %vm1183_vm2, %v10920_v61  ;;  %v917_v0 = vadd.f32 1.0, %v9412_v52  ;;  %v731_v24 = vsub.f32 0.0, %v10923_v33  ;;  %v9416_v8 = vpop.eup %9415  ;;  %v10965_v52 = vmul.f32 %v9414_v62, %v10638_v46  ;;  %8970 = vmatprep.mubr.msk.f32.mxu0 %vm1183_vm2, %v1074_v6  ;;  %v1346_v41 = vld [vmem:[#allocation2 + $0xc1] sm:$0xff] }
 0x143   :  { %15532 = vst [vmem:[#allocation61_spill] sm:$0xff] %v10940_v10  ;;  %v1504_v3 = vld [vmem:[#allocation2 + $0x22b] sm:$0xff]  ;;  %1222 = vst.msk [vmem:[#allocation2 + $0xf2] sm:$0xff] %vm1183_vm2, %v1074_v6  ;;  %v9418_v61 = vpop.eup %9417  ;;  %8971 = vmatmul.mubr.msk.f32.gmra.mxu0 %vm1183_vm2, %v1075_v38  ;;  %v1410_v48 = vld [vmem:[#allocation2 + $0xc2] sm:$0xff]  ;;  %v10987_v46 = vadd.f32 %v10677_v60, %v651_v50  ;;  %v8791_v50 = vpop.f32.mrf.mxu0 }
 0x144   :  { %v10946_v9 = vld [vmem:[#allocation2 + $0x231] sm:$0xff]  ;;  %v1696_v15 = vmax.f32 %v1440_v16, %v1504_v3  ;;  %15539 = vst [vmem:[#allocation68_spill] sm:$0xff] %v10965_v52  ;;  %v10972_v16 = vld [vmem:[#allocation2 + $0xc8] sm:$0xff]  ;;  %9439 = vrcp.f32 %v917_v0  ;;  %v884_v3 = vadd.f32 1.0, %v9416_v8  ;;  %v9420_v1 = vpop.eup %9419  ;;  %1254 = vst.msk [vmem:[#allocation2 + $0x272] sm:$0xff] %vm1183_vm2, %v10965_v52  ;;  %v916_v21 = vadd.f32 1.0, %v9418_v61 }
 0x145   :  { %15534 = vst [vmem:[#allocation63_spill] sm:$0xff] %v10946_v9  ;;  %v10948_v49 = vld [vmem:[#allocation2 + $0xca] sm:$0xff]  ;;  %15540 = vst [vmem:[#allocation69_spill] sm:$0xff] %v10972_v16  ;;  %v10984_v0 = vadd.f32 %v10677_v60, %v491_v13  ;;  %v9422_v8 = vpop.eup %9421  ;;  %v1314_v38 = vld [vmem:[#allocation2 + $0x240] sm:$0xff]  ;;  %v887_v53 = vadd.f32 1.0, %v9420_v1 }
 0x146   :  { %15535 = vst [vmem:[#allocation64_spill] sm:$0xff] %v10948_v49  ;;  %v10950_v11 = vld [vmem:[#allocation2 + $0xcb] sm:$0xff]  ;;  %v1474_v36 = vld [vmem:[#allocation2 + $0xc3] sm:$0xff]  ;;  %9441 = vrcp.f32 %v884_v3  ;;  %v856_v26 = vmul.f32 1.442695, %v731_v24  ;;  %15543 = vst [vmem:[#allocation72_spill] sm:$0xff] %v10987_v46  ;;  %v9424_v6 = vpop.eup %9423  ;;  %v10989_v9 = vmax.f32 %v1632_v43, %v1696_v15 }
 0x147   :  { %15536 = vst [vmem:[#allocation65_spill] sm:$0xff] %v10950_v11  ;;  %v10959_v54 = vld [vmem:[#allocation2 + $0x24a] sm:$0xff]  ;;  %15542 = vst [vmem:[#allocation71_spill] sm:$0xff] %v10984_v0  ;;  %v1378_v34 = vld [vmem:[#allocation2 + $0x241] sm:$0xff]  ;;  %9443 = vrcp.f32 %v916_v21  ;;  %v919_v13 = vadd.f32 1.0, %v9422_v8  ;;  %v9426_v33 = vpop.eup %9425  ;;  %v1602_v11 = vmax.f32 %v1282_v31, %v1346_v41  ;;  %v1666_v24 = vmax.f32 %v1410_v48, %v1474_v36 }
 0x148   :  { %15537 = vst [vmem:[#allocation66_spill] sm:$0xff] %v10959_v54  ;;  %v10961_v40 = vld [vmem:[#allocation2 + $0x24b] sm:$0xff]  ;;  %15544 = vst [vmem:[#allocation73_spill] sm:$0xff] %v10989_v9  ;;  %v1442_v52 = vld [vmem:[#allocation2 + $0x242] sm:$0xff]  ;;  %9445 = vrcp.f32 %v887_v53  ;;  %v9428_v3 = vpop.eup %9427  ;;  %v11000_v15 = vmul.f32 %v9426_v33, %v10648_v56  ;;  %v886_v10 = vadd.f32 1.0, %v9424_v6  ;;  %v698_v21 = vsub.f32 0.0, %v10984_v0 }
 0x149   :  { %15538 = vst [vmem:[#allocation67_spill] sm:$0xff] %v10961_v40  ;;  %v10979_v62 = vld [vmem:[#allocation2 + $0xc9] sm:$0xff]  ;;  %9447 = vrcp.f32 %v919_v13  ;;  %v9430_v8 = vpop.eup %9429  ;;  %v1634_v31 = vmax.f32 %v1314_v38, %v1378_v34  ;;  %v918_v53 = vadd.f32 1.0, %v9428_v3  ;;  %v1284_v1 = vld [vmem:[#allocation2 + $0xd8] sm:$0xff]  ;;  %v730_v33 = vsub.f32 0.0, %v10987_v46  ;;  %v11025_v16 = vld [vmem:[#allocation2 + $0xe0] sm:$0xff] }
 0x14a   :  { %15541 = vst [vmem:[#allocation70_spill] sm:$0xff] %v10979_v62  ;;  %v1506_v61 = vld [vmem:[#allocation2 + $0x243] sm:$0xff]  ;;  %9449 = vpow2.f32 %v856_v26  ;;  %v9432_v36 = vpop.eup %9431  ;;  %v1348_v54 = vld [vmem:[#allocation2 + $0xd9] sm:$0xff]  ;;  %1225 = vst.msk [vmem:[#allocation2 + $0x112] sm:$0xff] %vm1183_vm2, %v11000_v15  ;;  %v889_v56 = vadd.f32 1.0, %v9430_v8  ;;  %v11011_v6 = vadd.f32 %v10677_v60, %v8791_v50 }
 0x14b   :  { %v10995_v49 = vld [vmem:[#allocation2 + $0x248] sm:$0xff]  ;;  %v1698_v41 = vmax.f32 %v1442_v52, %v1506_v61  ;;  %9451 = vrcp.f32 %v886_v10  ;;  %v9434_v34 = vpop.eup %9433  ;;  %v11013_v52 = vmax.f32 %v1602_v11, %v1666_v24  ;;  %v1412_v26 = vld [vmem:[#allocation2 + $0xda] sm:$0xff]  ;;  %v921_v13 = vadd.f32 1.0, %v9432_v36  ;;  %v8839_v24 = vpop.f32.mrf.mxu1 }
 0x14c   :  { %15545 = vst [vmem:[#allocation74_spill] sm:$0xff] %v10995_v49  ;;  %v10997_v43 = vld [vmem:[#allocation2 + $0x249] sm:$0xff]  ;;  %v1476_v61 = vld [vmem:[#allocation2 + $0xdb] sm:$0xff]  ;;  %9453 = vrcp.f32 %v918_v53  ;;  %v9436_v3 = vpop.eup %9435  ;;  %v888_v46 = vadd.f32 1.0, %v9434_v34  ;;  %v790_v11 = vmul.f32 1.442695, %v698_v21  ;;  %v1604_v38 = vmax.f32 %v1284_v1, %v1348_v54  ;;  %v501_v34 = vpop.f32.mrf.mxu0 }
 0x14d   :  { %15546 = vst [vmem:[#allocation75_spill] sm:$0xff] %v10997_v43  ;;  %v11003_v40 = vld [vmem:[#allocation2 + $0xe2] sm:$0xff]  ;;  %v1316_v50 = vld [vmem:[#allocation2 + $0x258] sm:$0xff]  ;;  %9455 = vrcp.f32 %v889_v56  ;;  %v11023_v0 = vmax.f32 %v1634_v31, %v1698_v41  ;;  %v920_v36 = vadd.f32 1.0, %v9436_v3  ;;  %v701_v56 = vsub.f32 0.0, %v11011_v6 }
 0x14e   :  { %15547 = vst [vmem:[#allocation76_spill] sm:$0xff] %v11003_v40  ;;  %v11005_v48 = vld [vmem:[#allocation2 + $0xe3] sm:$0xff]  ;;  %v1380_v43 = vld [vmem:[#allocation2 + $0x259] sm:$0xff]  ;;  %9457 = vrcp.f32 %v921_v13  ;;  %v9438_v62 = vpop.eup %9437  ;;  %v854_v40 = vmul.f32 1.442695, %v730_v33  ;;  %v11037_v41 = vadd.f32 %v10677_v60, %v8839_v24 }
 0x14f   :  { %15548 = vst [vmem:[#allocation77_spill] sm:$0xff] %v11005_v48  ;;  %v11019_v8 = vld [vmem:[#allocation2 + $0x262] sm:$0xff]  ;;  %15551 = vst [vmem:[#allocation80_spill] sm:$0xff] %v11023_v0  ;;  %v1444_v49 = vld [vmem:[#allocation2 + $0x25a] sm:$0xff]  ;;  %v1668_v48 = vmax.f32 %v1412_v26, %v1476_v61  ;;  %9459 = vrcp.f32 %v888_v46  ;;  %v891_v1 = vadd.f32 1.0, %v9438_v62  ;;  %v1636_v3 = vmax.f32 %v1316_v50, %v1380_v43  ;;  %v661_v61 = vpop.f32.mrf.mxu1 }
 0x150   :  { %15549 = vst [vmem:[#allocation78_spill] sm:$0xff] %v11019_v8  ;;  %v11021_v9 = vld [vmem:[#allocation2 + $0x263] sm:$0xff]  ;;  %v1508_v53 = vld [vmem:[#allocation2 + $0x25b] sm:$0xff]  ;;  %9461 = vrcp.f32 %v920_v36  ;;  %15554 = vst [vmem:[#allocation83_spill] sm:$0xff] %v11037_v41  ;;  %v796_v33 = vmul.f32 1.442695, %v701_v56  ;;  %v11062_v56 = vadd.f32 %v10677_v60, %v501_v34 }
 0x151   :  { %15550 = vst [vmem:[#allocation79_spill] sm:$0xff] %v11021_v9  ;;  %v11027_v10 = vld [vmem:[#allocation2 + $0xe1] sm:$0xff]  ;;  %v9440_v13 = vpop.eup %9439  ;;  %v1700_v26 = vmax.f32 %v1444_v49, %v1508_v53  ;;  %9463 = vpow2.f32 %v790_v11  ;;  %v733_v49 = vsub.f32 0.0, %v11037_v41  ;;  %v11053_v50 = vmax.f32 %v1604_v38, %v1668_v48  ;;  %v11057_v53 = vld [vmem:[#allocation2 + $0xf0] sm:$0xff]  ;;  %v11080_v41 = vld [vmem:[#allocation2 + $0xf9] sm:$0xff] }
 0x152   :  { %v11032_v31 = vld [vmem:[#allocation2 + $0x260] sm:$0xff]  ;;  %v11050_v24 = vmul.f32 %v9440_v13, %v10680_v17  ;;  %9465 = vrcp.f32 %v891_v1  ;;  %v11059_v36 = vld [vmem:[#allocation2 + $0xf1] sm:$0xff]  ;;  %15558 = vst [vmem:[#allocation87_spill] sm:$0xff] %v11062_v56  ;;  %v11072_v11 = vadd.f32 %v10677_v60, %v661_v61  ;;  %v700_v0 = vsub.f32 0.0, %v11062_v56 }
 0x153   :  { %15552 = vst [vmem:[#allocation81_spill] sm:$0xff] %v11032_v31  ;;  %v11034_v54 = vld [vmem:[#allocation2 + $0x261] sm:$0xff]  ;;  %v9442_v43 = vpop.eup %9441  ;;  %9467 = vpow2.f32 %v854_v40  ;;  %v11064_v17 = vld [vmem:[#allocation2 + $0xf8] sm:$0xff]  ;;  %v860_v38 = vmul.f32 1.442695, %v733_v49  ;;  %v11074_v34 = vmax.f32 %v1636_v3, %v1700_v26  ;;  %v1606_v3 = vmax.f32 %v11057_v53, %v11059_v36 }
 0x154   :  { %15553 = vst [vmem:[#allocation82_spill] sm:$0xff] %v11034_v54  ;;  %v11039_v46 = vld [vmem:[#allocation2 + $0xfa] sm:$0xff]  ;;  %15557 = vst [vmem:[#allocation86_spill] sm:$0xff] %v11050_v24  ;;  %v9444_v21 = vpop.eup %9443  ;;  %v11066_v1 = vld [vmem:[#allocation2 + $0xf2] sm:$0xff]  ;;  %v1076_v48 = vmul.f32 %v9442_v43, %v10740_v7  ;;  %9469 = vpow2.f32 %v796_v33  ;;  %v732_v36 = vsub.f32 0.0, %v11072_v11 }
 0x155   :  { %v11043_v9 = vld [vmem:[#allocation2 + $0xfb] sm:$0xff]  ;;  %v1478_v13 = vld [vmem:[#allocation2 + $0xf3] sm:$0xff]  ;;  %1257 = vst.msk [vmem:[#allocation2 + $0x292] sm:$0xff] %vm1183_vm2, %v11050_v24  ;;  %15559 = vst [vmem:[#allocation88_spill] sm:$0xff] %v11072_v11  ;;  %v9446_v54 = vpop.eup %9445  ;;  %v11087_v33 = vmul.f32 %v9444_v21, %v10747_v44  ;;  %9471 = vpow2.f32 %v860_v38 }
 0x156   :  { %v11045_v8 = vld [vmem:[#allocation2 + $0x27a] sm:$0xff]  ;;  %v1908_v40 = vld [vmem:[#allocation3 + $0x8] sm:$0xff]  ;;  %15560 = vst [vmem:[#allocation89_spill] sm:$0xff] %v11074_v34  ;;  %v11082_v24 = vld [vmem:[#allocation2 + $0x270] sm:$0xff]  ;;  %v9448_v60 = vpop.eup %9447  ;;  %v1079_v43 = vmul.f32 %v9446_v54, %v10774_v47  ;;  %8973 = vmatprep.mubr.msk.f32.mxu0 %vm1183_vm2, %v1076_v48  ;;  %v1670_v21 = vmax.f32 %v11066_v1, %v1478_v13  ;;  %v858_v34 = vmul.f32 1.442695, %v732_v36 }
 0x157   :  { %15555 = vst [vmem:[#allocation84_spill] sm:$0xff] %v11045_v8  ;;  %v11047_v62 = vld [vmem:[#allocation2 + $0x27b] sm:$0xff]  ;;  %v11084_v7 = vld [vmem:[#allocation2 + $0x271] sm:$0xff]  ;;  %15561 = vst [vmem:[#allocation90_spill] sm:$0xff] %v11087_v33  ;;  %v9450_v44 = vpop.eup %9449  ;;  %v11103_v53 = vmul.f32 %v9448_v60, %v10804_v27  ;;  %8974 = vmatmul.mubr.msk.f32.gmra.mxu0 %vm1183_vm2, %v11000_v15  ;;  %v794_v60 = vmul.f32 1.442695, %v700_v0 }
 0x158   :  { %15556 = vst [vmem:[#allocation85_spill] sm:$0xff] %v11047_v62  ;;  %v1526_v61 = vld [vmem:[#allocation2 + $0x34] sm:$0xff]  ;;  %1224 = vst.msk [vmem:[#allocation2 + $0x10a] sm:$0xff] %vm1183_vm2, %v1076_v48  ;;  %v9452_v54 = vpop.eup %9451  ;;  %v1528_v48 = vld [vmem:[#allocation2 + $0x4c] sm:$0xff]  ;;  %v1638_v38 = vmax.f32 %v11082_v24, %v11084_v7 }
 0x159   :  { %v11091_v26 = vld [vmem:[#allocation2 + $0x272] sm:$0xff]  ;;  %1256 = vst.msk [vmem:[#allocation2 + $0x28a] sm:$0xff] %vm1183_vm2, %v11087_v33  ;;  %15562 = vst [vmem:[#allocation91_spill] sm:$0xff] %v11103_v53  ;;  %v1782_v31 = vmax.f32 %v10559_v37, %v1526_v61  ;;  %v923_v37 = vadd.f32 1.0, %v9450_v44  ;;  %v9454_v61 = vpop.eup %9453  ;;  %v1078_v1 = vmul.f32 %v9452_v54, %v10811_v20  ;;  %v11132_v24 = vld [vmem:[#allocation3 + $0x28] sm:$0xff]  ;;  %v11149_v54 = vmax.f32 %v1606_v3, %v1670_v21 }
 0x15a   :  { %v11093_v49 = vld [vmem:[#allocation2 + $0x273] sm:$0xff]  ;;  %1227 = vst.msk [vmem:[#allocation2 + $0x12a] sm:$0xff] %vm1183_vm2, %v1079_v43  ;;  %1259 = vst.msk [vmem:[#allocation2 + $0x2aa] sm:$0xff] %vm1183_vm2, %v11103_v53  ;;  %v9456_v7 = vpop.eup %9455 }
 0x15b   :  { %v11107_v62 = vld [vmem:[#allocation3 + $0x18] sm:$0xff]  ;;  %v1702_v15 = vmax.f32 %v11091_v26, %v11093_v49  ;;  %1847 = vst.msk [vmem:[#allocation3 + $0x40] sm:$0xff] %vm1183_vm2, %v1782_v31  ;;  %v11138_v26 = vmul.f32 %v9454_v61, %v10818_v14  ;;  %9473 = vrcp.f32 %v923_v37  ;;  %v11140_v49 = vld [vmem:[#allocation3] sm:$0xff]  ;;  %v11142_v44 = vld [vmem:[#allocation3 + $0x30] sm:$0xff]  ;;  %v1784_v31 = vmax.f32 %v10622_v28, %v1528_v48  ;;  %v9458_v36 = vpop.eup %9457  ;;  %8976 = vmatprep.mubr.msk.f32.mxu0 %vm1183_vm2, %v1078_v1 }
 0x15c   :  { %v11109_v47 = vld [vmem:[#allocation3 + $0x38] sm:$0xff]  ;;  %v11135_v0 = vmax.f32 %v1908_v40, %v11107_v62  ;;  %1226 = vst.msk [vmem:[#allocation2 + $0x122] sm:$0xff] %vm1183_vm2, %v1078_v1  ;;  %v1081_v14 = vmul.f32 %v9456_v7, %v10821_v55  ;;  %9475 = vpow2.f32 %v794_v60  ;;  %v11155_v37 = vld [vmem:[#allocation3 + $0x10] sm:$0xff]  ;;  %v11157_v61 = vld [vmem:[#allocation3 + $0x48] sm:$0xff]  ;;  %v9460_v53 = vpop.eup %9459  ;;  %v11165_v21 = vmul.f32 %v9458_v36, %v10838_v19  ;;  %8977 = vmatmul.mubr.msk.f32.gmra.mxu0 %vm1183_vm2, %v1079_v43 }
 0x15d   :  { %v11115_v13 = vld [vmem:[#allocation2 + $0x278] sm:$0xff]  ;;  %15566 = vst [vmem:[#allocation95_spill] sm:$0xff] %v11138_v26  ;;  %v11146_v20 = vmax.f32 %v11132_v24, %v11109_v47  ;;  %v1530_v28 = vld [vmem:[#allocation2 + $0x64] sm:$0xff]  ;;  %1258 = vst.msk [vmem:[#allocation2 + $0x2a2] sm:$0xff] %vm1183_vm2, %v11138_v26  ;;  %9477 = vpow2.f32 %v858_v34  ;;  %v9462_v1 = vpop.eup %9461  ;;  %v1080_v19 = vmul.f32 %v9460_v53, %v10852_v42  ;;  %v2230_v34 = vmax.f32 %v11140_v49, %v11155_v37 }
 0x15e   :  { %15563 = vst [vmem:[#allocation92_spill] sm:$0xff] %v11115_v13  ;;  %v11117_v27 = vld [vmem:[#allocation2 + $0x279] sm:$0xff]  ;;  %15565 = vst [vmem:[#allocation94_spill] sm:$0xff] %v11135_v0  ;;  %v15571_v43 = vmax.f32 %v10543_v63, %v10545_v5  ;;  %v9464_v26 = vpop.eup %9463  ;;  %v11200_v49 = vmul.f32 %v9462_v1, %v10859_v45  ;;  %v1786_v63 = vmax.f32 %v10729_v23, %v1530_v28 }
 0x15f   :  { %15564 = vst [vmem:[#allocation93_spill] sm:$0xff] %v11117_v27  ;;  %v11124_v33 = vld [vmem:[#allocation2 + $0x112] sm:$0xff]  ;;  %15567 = vst [vmem:[#allocation96_spill] sm:$0xff] %v11146_v20  ;;  %v11167_v55 = vld [vmem:[#allocation3 + $0x20] sm:$0xff]  ;;  %v2359_v48 = vmax.f32 %v11135_v0, %v11146_v20  ;;  %v11193_v27 = vmax.f32 %v1638_v38, %v1702_v15  ;;  %v9466_v5 = vpop.eup %9465  ;;  %v890_v38 = vadd.f32 1.0, %v9464_v26  ;;  %8979 = vmatprep.mubr.msk.f32.mxu0 %vm1183_vm2, %v1080_v19 }
 0x160   :  { %v11126_v8 = vld [vmem:[#allocation2 + $0x113] sm:$0xff]  ;;  %15568 = vst [vmem:[#allocation97_spill] sm:$0xff] %v11165_v21  ;;  %1849 = vst.msk [vmem:[#allocation3 + $0x50] sm:$0xff] %vm1183_vm2, %v1784_v31  ;;  %v11175_v7 = vld [vmem:[#allocation2 + $0x108] sm:$0xff]  ;;  %v11185_v36 = vmax.f32 %v11167_v55, %v11142_v44  ;;  %v15572_v31 = vmax.f32 %v10572_v32, %v10574_v25  ;;  %v9468_v45 = vpop.eup %9467  ;;  %8980 = vmatmul.mubr.msk.f32.gmra.mxu0 %vm1183_vm2, %v1081_v14 }
 0x161   :  { %v1529_v11 = vld [vmem:[#allocation2 + $0x54] sm:$0xff]  ;;  %v11177_v40 = vld [vmem:[#allocation2 + $0x109] sm:$0xff]  ;;  %1229 = vst.msk [vmem:[#allocation2 + $0x142] sm:$0xff] %vm1183_vm2, %v1081_v14  ;;  %15573 = vst [vmem:[#allocation100_spill] sm:$0xff] %v11193_v27  ;;  %v11203_v0 = vmax.f32 %v2359_v48, %v11157_v61  ;;  %9479 = vrcp.f32 %v890_v38  ;;  %v922_v14 = vadd.f32 1.0, %v9468_v45 }
 0x162   :  { %v11173_v60 = vld [vmem:[#allocation2 + $0x292] sm:$0xff]  ;;  %15570 = vst [vmem:[#allocation99_spill] sm:$0xff] %v11185_v36  ;;  %v1721_v3 = vmax.f32 %v15572_v31, %v15571_v43  ;;  %v1416_v42 = vld [vmem:[#allocation2 + $0x10a] sm:$0xff]  ;;  %1261 = vst.msk [vmem:[#allocation2 + $0x2c2] sm:$0xff] %vm1183_vm2, %v11165_v21  ;;  %v1608_v25 = vmax.f32 %v11175_v7, %v11177_v40  ;;  %v11211_v43 = vmax.f32 %v11109_v47, %v11157_v61 }
 0x163   :  { %15569 = vst [vmem:[#allocation98_spill] sm:$0xff] %v11173_v60  ;;  %v11195_v13 = vld [vmem:[#allocation2 + $0x293] sm:$0xff]  ;;  %v1480_v53 = vld [vmem:[#allocation2 + $0x10b] sm:$0xff]  ;;  %15575 = vst [vmem:[#allocation102_spill] sm:$0xff] %v11200_v49  ;;  %v11221_v40 = vmul.f32 %v9466_v5, %v10862_v22  ;;  %v15578_v47 = vmax.f32 %v10693_v59, %v10695_v30  ;;  %9481 = vrcp.f32 %v922_v14 }
 0x164   :  { %15574 = vst [vmem:[#allocation101_spill] sm:$0xff] %v11195_v13  ;;  %15576 = vst [vmem:[#allocation103_spill] sm:$0xff] %v11203_v0  ;;  %v1532_v32 = vld [vmem:[#allocation2 + $0x7c] sm:$0xff]  ;;  %v1785_v15 = vmax.f32 %v1721_v3, %v1529_v11  ;;  %v11214_v48 = vld [vmem:[#allocation2 + $0x110] sm:$0xff]  ;;  %v1672_v23 = vmax.f32 %v1416_v42, %v1480_v53  ;;  %v15577_v11 = vmax.f32 %v10660_v58, %v10667_v2  ;;  %v9470_v3 = vpop.eup %9469 }
 0x165   :  { %1228 = vst.msk [vmem:[#allocation2 + $0x13a] sm:$0xff] %vm1183_vm2, %v1080_v19  ;;  %v11216_v1 = vld [vmem:[#allocation2 + $0x111] sm:$0xff]  ;;  %1260 = vst.msk [vmem:[#allocation2 + $0x2ba] sm:$0xff] %vm1183_vm2, %v11200_v49  ;;  %v1788_v28 = vmax.f32 %v10776_v39, %v1532_v32  ;;  %v11236_v31 = vld [vmem:[#allocation2 + $0x288] sm:$0xff]  ;;  %v11239_v42 = vmax.f32 %v2230_v34, %v11185_v36  ;;  %v893_v53 = vadd.f32 1.0, %v9470_v3  ;;  %v2233_v34 = vmax.f32 %v11107_v62, %v11132_v24  ;;  %v9472_v5 = vpop.eup %9471 }
 0x166   :  { %3650 = vst.msk [vmem:[#allocation2 + $0xa] sm:$0xff] %vm1183_vm2, %v11203_v0  ;;  %1851 = vst.msk [vmem:[#allocation3 + $0x60] sm:$0xff] %vm1183_vm2, %v1786_v63  ;;  %v1723_v26 = vmax.f32 %v15578_v47, %v15577_v11  ;;  %v1531_v7 = vld [vmem:[#allocation2 + $0x6c] sm:$0xff]  ;;  %v1534_v22 = vld [vmem:[#allocation2 + $0x94] sm:$0xff]  ;;  %v11276_v20 = vmax.f32 %v1608_v25, %v1672_v23 }
 0x167   :  { %1850 = vst.msk [vmem:[#allocation3 + $0x58] sm:$0xff] %vm1183_vm2, %v1785_v15  ;;  %v1533_v58 = vld [vmem:[#allocation2 + $0x84] sm:$0xff]  ;;  %v11244_v2 = vld [vmem:[#allocation2 + $0x290] sm:$0xff]  ;;  %1231 = vst.msk [vmem:[#allocation2 + $0x15a] sm:$0xff] %vm1183_vm2, %v11221_v40  ;;  %9483 = vrcp.f32 %v893_v53  ;;  %v15590_v53 = vmax.f32 %v10884_v51, %v10895_v4 }
 0x168   :  { %v11246_v59 = vld [vmem:[#allocation2 + $0x289] sm:$0xff]  ;;  %v11248_v39 = vld [vmem:[#allocation2 + $0x291] sm:$0xff]  ;;  %v1787_v63 = vmax.f32 %v1723_v26, %v1531_v7  ;;  %1853 = vst.msk [vmem:[#allocation3 + $0x70] sm:$0xff] %vm1183_vm2, %v1788_v28  ;;  %v1535_v32 = vld [vmem:[#allocation2 + $0x9c] sm:$0xff]  ;;  %v1790_v7 = vmax.f32 %v10932_v29, %v1534_v22 }
 0x169   :  { %v1536_v38 = vld [vmem:[#allocation2 + $0xac] sm:$0xff]  ;;  %v1290_v45 = vld [vmem:[#allocation2 + $0x120] sm:$0xff]  ;;  %v1640_v29 = vmax.f32 %v11236_v31, %v11246_v59 }
 0x16a   :  { %v11257_v11 = vld [vmem:[#allocation2 + $0x28a] sm:$0xff]  ;;  %v15581_v62 = vld [vmem:[#allocation40_spill] sm:$0xff]  ;;  %1852 = vst.msk [vmem:[#allocation3 + $0x68] sm:$0xff] %vm1183_vm2, %v1787_v63  ;;  %1855 = vst.msk [vmem:[#allocation3 + $0x80] sm:$0xff] %vm1183_vm2, %v1790_v7  ;;  %v1792_v63 = vmax.f32 %v10970_v18, %v1536_v38 }
 0x16b   :  { %v11259_v47 = vld [vmem:[#allocation2 + $0x28b] sm:$0xff]  ;;  %v11291_v22 = vld [vmem:[#allocation2 + $0x2a0] sm:$0xff] }
 0x16c   :  { %v11261_v19 = vld [vmem:[#allocation2 + $0x12a] sm:$0xff]  ;;  %v11293_v14 = vld [vmem:[#allocation2 + $0x2a1] sm:$0xff]  ;;  %v1704_v51 = vmax.f32 %v11257_v11, %v11259_v47  ;;  %1857 = vst.msk [vmem:[#allocation3 + $0x90] sm:$0xff] %vm1183_vm2, %v1792_v63 }
 0x16d   :  { %v15579_v3 = vld [vmem:[#allocation37_spill] sm:$0xff]  ;;  %v15582_v24 = vld [vmem:[#allocation42_spill] sm:$0xff]  ;;  %v1642_v11 = vmax.f32 %v11291_v22, %v11293_v14 }
 0x16e   :  { %v15580_v30 = vmax.f32 %v10725_v57, %v15579_v3  ;;  %v15583_v26 = vmax.f32 %v15581_v62, %v15582_v24  ;;  %v15584_v21 = vld [vmem:[#allocation45_spill] sm:$0xff]  ;;  %v15585_v49 = vld [vmem:[#allocation46_spill] sm:$0xff]  ;;  %v925_v3 = vadd.f32 1.0, %v9472_v5  ;;  %v9474_v5 = vpop.eup %9473  ;;  %v15591_v24 = vmax.f32 %v10906_v12, %v10938_v35  ;;  %v1540_v62 = vld [vmem:[#allocation2 + $0xdc] sm:$0xff] }
 0x16f   :  { %v15586_v13 = vmax.f32 %v15584_v21, %v15585_v49  ;;  %v15587_v15 = vld [vmem:[#allocation49_spill] sm:$0xff]  ;;  %v15588_v60 = vld [vmem:[#allocation50_spill] sm:$0xff]  ;;  %v15598_v35 = vld [vmem:[#allocation60_spill] sm:$0xff]  ;;  %v1796_v14 = vmax.f32 %v11053_v50, %v1540_v62  ;;  %v15605_v50 = vmax.f32 %v11025_v16, %v11027_v10 }
 0x170   :  { %v1725_v28 = vmax.f32 %v15583_v26, %v15580_v30  ;;  %v15589_v27 = vmax.f32 %v15587_v15, %v15588_v60  ;;  %v11278_v36 = vld [vmem:[#allocation2 + $0x12b] sm:$0xff]  ;;  %v1354_v57 = vld [vmem:[#allocation2 + $0x121] sm:$0xff]  ;;  %v11283_v30 = vmax.f32 %v2233_v34, %v11211_v43  ;;  %9485 = vrcp.f32 %v925_v3  ;;  %v1537_v15 = vld [vmem:[#allocation2 + $0xb4] sm:$0xff] }
 0x171   :  { %v11280_v0 = vld [vmem:[#allocation2 + $0x128] sm:$0xff]  ;;  %v1610_v60 = vmax.f32 %v1290_v45, %v1354_v57  ;;  %v15596_v7 = vld [vmem:[#allocation70_spill] sm:$0xff]  ;;  %v1675_v12 = vmax.f32 %v11261_v19, %v11278_v36  ;;  %v11377_v16 = vld [vmem:[#allocation2 + $0x140] sm:$0xff]  ;;  %1861 = vst.msk [vmem:[#allocation3 + $0xb0] sm:$0xff] %vm1183_vm2, %v1796_v14 }
 0x172   :  { %v1727_v56 = vmax.f32 %v15589_v27, %v15586_v13  ;;  %v11288_v21 = vld [vmem:[#allocation2 + $0x129] sm:$0xff]  ;;  %v1789_v49 = vmax.f32 %v1725_v28, %v1533_v58  ;;  %v11379_v10 = vld [vmem:[#allocation2 + $0x139] sm:$0xff] }
 0x173   :  { %v1418_v13 = vld [vmem:[#allocation2 + $0x122] sm:$0xff]  ;;  %v1611_v4 = vmax.f32 %v11280_v0, %v11288_v21 }
 0x174   :  { %v1482_v27 = vld [vmem:[#allocation2 + $0x123] sm:$0xff]  ;;  %v1791_v34 = vmax.f32 %v1727_v56, %v1535_v32  ;;  %1854 = vst.msk [vmem:[#allocation3 + $0x78] sm:$0xff] %vm1183_vm2, %v1789_v49  ;;  %v1729_v56 = vmax.f32 %v15591_v24, %v15590_v53  ;;  %v1542_v49 = vld [vmem:[#allocation2 + $0xf4] sm:$0xff]  ;;  %v1544_v53 = vld [vmem:[#allocation2 + $0x10c] sm:$0xff] }
 0x175   :  { %v1538_v25 = vld [vmem:[#allocation2 + $0xc4] sm:$0xff]  ;;  %v1674_v23 = vmax.f32 %v1418_v13, %v1482_v27  ;;  %v9476_v13 = vpop.eup %9475  ;;  %v1539_v27 = vld [vmem:[#allocation2 + $0xcc] sm:$0xff]  ;;  %v1543_v21 = vld [vmem:[#allocation2 + $0xfc] sm:$0xff] }
 0x176   :  { %v11298_v45 = vld [vmem:[#allocation2 + $0x2a2] sm:$0xff]  ;;  %v1794_v18 = vmax.f32 %v11013_v52, %v1538_v25  ;;  %v11323_v52 = vmul.f32 %v9474_v5, %v15598_v35  ;;  %1856 = vst.msk [vmem:[#allocation3 + $0x88] sm:$0xff] %vm1183_vm2, %v1791_v34  ;;  %v9478_v25 = vpop.eup %9477  ;;  %v11327_v24 = vld [vmem:[#allocation2 + $0x2aa] sm:$0xff]  ;;  %v892_v36 = vadd.f32 1.0, %v9476_v13  ;;  %v1793_v19 = vmax.f32 %v1729_v56, %v1537_v15  ;;  %v11345_v15 = vld [vmem:[#allocation2 + $0x1b4] sm:$0xff] }
 0x177   :  { %v11300_v58 = vld [vmem:[#allocation2 + $0x2a3] sm:$0xff]  ;;  %v1738_v5 = vmax.f32 %v1610_v60, %v1674_v23  ;;  %v924_v22 = vadd.f32 1.0, %v9478_v25  ;;  %v11375_v25 = vld [vmem:[#allocation2 + $0x138] sm:$0xff] }
 0x178   :  { %v15592_v32 = vld [vmem:[#allocation64_spill] sm:$0xff]  ;;  %v15593_v38 = vld [vmem:[#allocation65_spill] sm:$0xff]  ;;  %15599 = vst [vmem:[#allocation37_spill] sm:$0xff] %v11323_v52  ;;  %1859 = vst.msk [vmem:[#allocation3 + $0xa0] sm:$0xff] %vm1183_vm2, %v1794_v18  ;;  %9487 = vrcp.f32 %v892_v36 }
 0x179   :  { %v15594_v26 = vmax.f32 %v15592_v32, %v15593_v38  ;;  %v15595_v28 = vld [vmem:[#allocation69_spill] sm:$0xff]  ;;  %v1706_v38 = vmax.f32 %v11298_v45, %v11300_v58  ;;  %1263 = vst.msk [vmem:[#allocation2 + $0x2da] sm:$0xff] %vm1183_vm2, %v11323_v52  ;;  %1858 = vst.msk [vmem:[#allocation3 + $0x98] sm:$0xff] %vm1183_vm2, %v1793_v19  ;;  %v15602_v45 = vld [vmem:[#allocation76_spill] sm:$0xff]  ;;  %9489 = vrcp.f32 %v924_v22  ;;  %v1739_v22 = vmax.f32 %v1611_v4, %v1675_v12 }
 0x17a   :  { %v15597_v57 = vmax.f32 %v15595_v28, %v15596_v7  ;;  %v11329_v32 = vld [vmem:[#allocation2 + $0x2ab] sm:$0xff]  ;;  %v11347_v18 = vld [vmem:[#allocation2 + $0x143] sm:$0xff]  ;;  %v1798_v7 = vmax.f32 %v11149_v54, %v1542_v49  ;;  %v11389_v54 = vld [vmem:[#allocation2 + $0x13b] sm:$0xff]  ;;  %v15609_v49 = vmax.f32 %v11214_v48, %v11216_v1  ;;  %v1612_v48 = vmax.f32 %v11375_v25, %v11379_v10 }
 0x17b   :  { %v1541_v47 = vld [vmem:[#allocation2 + $0xe4] sm:$0xff]  ;;  %v11398_v36 = vmax.f32 %v1642_v11, %v1706_v38  ;;  %v15612_v38 = vld [vmem:[#allocation71_spill] sm:$0xff] }
 0x17c   :  { %v1731_v3 = vmax.f32 %v15597_v57, %v15594_v26  ;;  %v11334_v34 = vld [vmem:[#allocation2 + $0x2a8] sm:$0xff]  ;;  %v15606_v57 = vmax.f32 %v11039_v46, %v11043_v9  ;;  %v1800_v9 = vmax.f32 %v11276_v20, %v1544_v53  ;;  %1863 = vst.msk [vmem:[#allocation3 + $0xc0] sm:$0xff] %vm1183_vm2, %v1798_v7  ;;  %v1545_v53 = vld [vmem:[#allocation2 + $0x114] sm:$0xff]  ;;  %v11411_v1 = vld [vmem:[#allocation2 + $0x2c0] sm:$0xff] }
 0x17d   :  { %v11336_v63 = vld [vmem:[#allocation2 + $0x2a9] sm:$0xff]  ;;  %v11385_v46 = vld [vmem:[#allocation2 + $0x141] sm:$0xff]  ;;  %15610 = vst [vmem:[#allocation45_spill] sm:$0xff] %v11411_v1 }
 0x17e   :  { %v1795_v0 = vmax.f32 %v1731_v3, %v1539_v27  ;;  %v11340_v26 = vld [vmem:[#allocation2 + $0x142] sm:$0xff]  ;;  %v15607_v3 = vmax.f32 %v11064_v17, %v11080_v41  ;;  %v11371_v27 = vmax.f32 %v1640_v29, %v1704_v51  ;;  %v11387_v17 = vld [vmem:[#allocation2 + $0x13a] sm:$0xff]  ;;  %v15608_v29 = vmax.f32 %v11124_v33, %v11126_v8  ;;  %v9480_v51 = vpop.eup %9479  ;;  %1865 = vst.msk [vmem:[#allocation3 + $0xd0] sm:$0xff] %vm1183_vm2, %v1800_v9  ;;  %v1547_v8 = vld [vmem:[#allocation2 + $0x12c] sm:$0xff] }
 0x17f   :  { %v1546_v56 = vld [vmem:[#allocation2 + $0x124] sm:$0xff]  ;;  %v1082_v14 = vmul.f32 %v9480_v51, %v15612_v38  ;;  %v1676_v4 = vmax.f32 %v11387_v17, %v11389_v54  ;;  %v9482_v7 = vpop.eup %9481 }
 0x180   :  { %v11349_v60 = vld [vmem:[#allocation2 + $0x2c2] sm:$0xff]  ;;  %1860 = vst.msk [vmem:[#allocation3 + $0xa8] sm:$0xff] %vm1183_vm2, %v1795_v0  ;;  %v1735_v13 = vmax.f32 %v15607_v3, %v15606_v57  ;;  %v1737_v20 = vmax.f32 %v15609_v49, %v15608_v29  ;;  %v11402_v0 = vld [vmem:[#allocation2 + $0x2b8] sm:$0xff] }
 0x181   :  { %15600 = vst [vmem:[#allocation40_spill] sm:$0xff] %v11349_v60  ;;  %v11351_v23 = vld [vmem:[#allocation2 + $0x2c3] sm:$0xff]  ;;  %v11425_v57 = vld [vmem:[#allocation2 + $0x2ba] sm:$0xff]  ;;  %1230 = vst.msk [vmem:[#allocation2 + $0x152] sm:$0xff] %vm1183_vm2, %v1082_v14  ;;  %8982 = vmatprep.mubr.msk.f32.mxu0 %vm1183_vm2, %v1082_v14 }
 0x182   :  { %15601 = vst [vmem:[#allocation42_spill] sm:$0xff] %v11351_v23  ;;  %v15603_v58 = vld [vmem:[#allocation77_spill] sm:$0xff]  ;;  %v1799_v59 = vmax.f32 %v1735_v13, %v1543_v21  ;;  %v1802_v21 = vmax.f32 %v1738_v5, %v1546_v56  ;;  %v2166_v5 = vld [vmem:[#allocation3 + $0x40] sm:$0xff]  ;;  %v2168_v56 = vld [vmem:[#allocation3 + $0x50] sm:$0xff]  ;;  %8983 = vmatmul.mubr.msk.f32.gmra.mxu0 %vm1183_vm2, %v11221_v40 }
 0x183   :  { %v15604_v28 = vmax.f32 %v15602_v45, %v15603_v58  ;;  %v11413_v11 = vld [vmem:[#allocation2 + $0x2c1] sm:$0xff]  ;;  %v1801_v45 = vmax.f32 %v1737_v20, %v1545_v53  ;;  %v2169_v58 = vld [vmem:[#allocation3 + $0x58] sm:$0xff]  ;;  %v2422_v9 = vmax.f32 %v11239_v42, %v2166_v5  ;;  %v11442_v53 = vmax.f32 %v2166_v5, %v2168_v56 }
 0x184   :  { %15611 = vst [vmem:[#allocation46_spill] sm:$0xff] %v11413_v11  ;;  %1864 = vst.msk [vmem:[#allocation3 + $0xc8] sm:$0xff] %vm1183_vm2, %v1799_v59  ;;  %v11427_v3 = vld [vmem:[#allocation2 + $0x2bb] sm:$0xff]  ;;  %v2425_v59 = vmax.f32 %v11283_v30, %v2169_v58  ;;  %v11445_v42 = vmax.f32 %v11157_v61, %v2169_v58 }
 0x185   :  { %v1733_v62 = vmax.f32 %v15605_v50, %v15604_v28  ;;  %1867 = vst.msk [vmem:[#allocation3 + $0xe0] sm:$0xff] %vm1183_vm2, %v1802_v21  ;;  %v1803_v28 = vmax.f32 %v1739_v22, %v1547_v8  ;;  %v15613_v50 = vld [vmem:[#allocation23_spill] sm:$0xff]  ;;  %1866 = vst.msk [vmem:[#allocation3 + $0xd8] sm:$0xff] %vm1183_vm2, %v1801_v45  ;;  %v15614_v49 = vld [vmem:[#allocation72_spill] sm:$0xff]  ;;  %8842 = vmatprep.mubr.msk.f32.mxu1 %vm1183_vm2, %v2422_v9  ;;  %v15615_v22 = vmax.f32 %v11155_v37, %v11167_v55 }
 0x186   :  { %v11440_v20 = vmul.f32 %v9482_v7, %v15614_v49  ;;  %v2170_v51 = vld [vmem:[#allocation3 + $0x60] sm:$0xff]  ;;  %v2171_v21 = vld [vmem:[#allocation3 + $0x68] sm:$0xff]  ;;  %3649 = vst.msk [vmem:[#allocation2 + $0x2] sm:$0xff] %vm1183_vm2, %v2422_v9  ;;  %3652 = vst.msk [vmem:[#allocation2 + $0x22] sm:$0xff] %vm1183_vm2, %v2425_v59  ;;  %v1708_v14 = vmax.f32 %v11425_v57, %v11427_v3  ;;  %v15628_v3 = vmax.f32 %v11377_v16, %v11385_v46 }
 0x187   :  { %v1797_v31 = vmax.f32 %v1733_v62, %v1541_v47  ;;  %v11404_v47 = vld [vmem:[#allocation2 + $0x2b9] sm:$0xff]  ;;  %v1814_v62 = vmax.f32 %v15613_v50, %v11345_v15  ;;  %v9484_v15 = vpop.eup %9483  ;;  %1868 = vst.msk [vmem:[#allocation3 + $0xe8] sm:$0xff] %vm1183_vm2, %v1803_v28  ;;  %v2172_v8 = vld [vmem:[#allocation3 + $0x70] sm:$0xff]  ;;  %v11460_v40 = vmax.f32 %v2168_v56, %v2170_v51  ;;  %v11462_v38 = vmax.f32 %v2169_v58, %v2171_v21  ;;  %v2175_v7 = vld [vmem:[#allocation3 + $0x88] sm:$0xff] }
 0x188   :  { %v11452_v30 = vmul.f32 %v9484_v15, %v11011_v6  ;;  %1262 = vst.msk [vmem:[#allocation2 + $0x2d2] sm:$0xff] %vm1183_vm2, %v11440_v20  ;;  %v15616_v6 = vld [vmem:[#allocation83_spill] sm:$0xff]  ;;  %v15620_v28 = vld [vmem:[#allocation96_spill] sm:$0xff]  ;;  %v9748_v9 = vld [vmem:[%s15322_s3 + $0x8] sm:$0xf] }
 0x189   :  { %1862 = vst.msk [vmem:[#allocation3 + $0xb8] sm:$0xff] %vm1183_vm2, %v1797_v31  ;;  %v2296_v31 = vmax.f32 %v11142_v44, %v2166_v5  ;;  %1879 = vst.msk [vmem:[#allocation3 + $0x180] sm:$0xff] %vm1183_vm2, %v1814_v62  ;;  %v9486_v44 = vpop.eup %9485  ;;  %v15618_v5 = vld [vmem:[#allocation103_spill] sm:$0xff]  ;;  %v2363_v50 = vmax.f32 %v15620_v28, %v11445_v42  ;;  %v2174_v62 = vld [vmem:[#allocation3 + $0x80] sm:$0xff] }
 0x18a   :  { %v11469_v45 = vmul.f32 %v9486_v44, %v15616_v6  ;;  %8843 = vmatmul.mubr.msk.f32.vlgmr.msra.gmra.mxu1 %vm1183_vm2, %v15618_v5  ;;  %v15619_v37 = vld [vmem:[#allocation99_spill] sm:$0xff]  ;;  %1233 = vst.msk [vmem:[#allocation2 + $0x172] sm:$0xff] %vm1183_vm2, %v11452_v30  ;;  %v2365_v44 = vmax.f32 %v11211_v43, %v11462_v38  ;;  %v2176_v6 = vld [vmem:[#allocation3 + $0x90] sm:$0xff]  ;;  %v11494_v33 = vmax.f32 %v2172_v8, %v2174_v62  ;;  %v2178_v54 = vld [vmem:[#allocation3 + $0xa0] sm:$0xff] }
 0x18b   :  { %v2360_v61 = vmax.f32 %v15615_v22, %v2296_v31  ;;  %v2362_v55 = vmax.f32 %v15619_v37, %v11442_v53  ;;  %v2173_v58 = vld [vmem:[#allocation3 + $0x78] sm:$0xff]  ;;  %9037 = vmatpush3.msk.msra.mxu1 %vm2680_vm3, %v9748_v9  ;;  %v2364_v49 = vmax.f32 %v2296_v31, %v11460_v40  ;;  %v11486_v22 = vmax.f32 %v2170_v51, %v2172_v8  ;;  %v11512_v41 = vld [vmem:[#allocation2 + $0x150] sm:$0xff]  ;;  %v11618_v16 = vld [vmem:[#allocation3 + $0xc0] sm:$0xff] }
 0x18c   :  { %15617 = vst [vmem:[#allocation49_spill] sm:$0xff] %v11469_v45  ;;  %v11488_v5 = vld [vmem:[#allocation3 + $0x98] sm:$0xff]  ;;  %1265 = vst.msk [vmem:[#allocation2 + $0x2f2] sm:$0xff] %vm1183_vm2, %v11469_v45  ;;  %v2427_v28 = vmax.f32 %v2363_v50, %v2171_v21  ;;  %v11492_v29 = vmax.f32 %v2171_v21, %v2173_v58  ;;  %v9488_v21 = vpop.eup %9487  ;;  %v11592_v57 = vmax.f32 %v2176_v6, %v2178_v54  ;;  %v15667_v60 = vld [vmem:[#allocation24_spill] sm:$0xff] }
 0x18d   :  { %v2424_v15 = vmax.f32 %v2360_v61, %v2168_v56  ;;  %v2426_v37 = vmax.f32 %v2362_v55, %v2170_v51  ;;  %v11496_v56 = vld [vmem:[#allocation2 + $0x15a] sm:$0xff]  ;;  %v2428_v43 = vmax.f32 %v2364_v49, %v2172_v8  ;;  %v11502_v61 = vmax.f32 %v2365_v44, %v2173_v58  ;;  %v11514_v35 = vld [vmem:[#allocation2 + $0x151] sm:$0xff]  ;;  %v9490_v49 = vpop.eup %9489 }
 0x18e   :  { %v11498_v31 = vld [vmem:[#allocation2 + $0x15b] sm:$0xff]  ;;  %v2366_v9 = vmax.f32 %v11442_v53, %v11486_v22  ;;  %v11506_v51 = vmax.f32 %v2173_v58, %v2175_v7  ;;  %3654 = vst.msk [vmem:[#allocation2 + $0x3a] sm:$0xff] %vm1183_vm2, %v2427_v28  ;;  %v2367_v53 = vmax.f32 %v11445_v42, %v11492_v29  ;;  %v2368_v8 = vmax.f32 %v11460_v40, %v11494_v33  ;;  %v1422_v44 = vld [vmem:[#allocation2 + $0x152] sm:$0xff] }
 0x18f   :  { %8845 = vmatprep.mubr.msk.f32.mxu1 %vm1183_vm2, %v2424_v15  ;;  %3651 = vst.msk [vmem:[#allocation2 + $0x1a] sm:$0xff] %vm1183_vm2, %v2424_v15  ;;  %v11508_v55 = vld [vmem:[#allocation2 + $0x2da] sm:$0xff]  ;;  %3653 = vst.msk [vmem:[#allocation2 + $0x32] sm:$0xff] %vm1183_vm2, %v2426_v37  ;;  %v11523_v58 = vmax.f32 %v2174_v62, %v2176_v6  ;;  %v11526_v15 = vmax.f32 %v2175_v7, %v11488_v5  ;;  %v1614_v10 = vmax.f32 %v11512_v41, %v11514_v35  ;;  %v11620_v46 = vld [vmem:[#allocation2 + $0x2d0] sm:$0xff] }
 0x190   :  { %15621 = vst [vmem:[#allocation50_spill] sm:$0xff] %v11508_v55  ;;  %v11510_v50 = vld [vmem:[#allocation2 + $0x2db] sm:$0xff]  ;;  %8846 = vmatmul.mubr.msk.f32.gmra.mxu1 %vm1183_vm2, %v2425_v59  ;;  %v11534_v59 = vmax.f32 %v1612_v48, %v1676_v4  ;;  %v1486_v12 = vld [vmem:[#allocation2 + $0x153] sm:$0xff]  ;;  %3655 = vst.msk [vmem:[#allocation2 + $0x4a] sm:$0xff] %vm1183_vm2, %v2428_v43  ;;  %v11541_v40 = vmax.f32 %v2366_v9, %v2174_v62  ;;  %v2369_v17 = vmax.f32 %v11462_v38, %v11506_v51 }
 0x191   :  { %15622 = vst [vmem:[#allocation64_spill] sm:$0xff] %v11510_v50  ;;  %v15623_v42 = vld [vmem:[#allocation87_spill] sm:$0xff]  ;;  %8848 = vmatprep.mubr.msk.f32.mxu1 %vm1183_vm2, %v2426_v37  ;;  %3656 = vst.msk [vmem:[#allocation2 + $0x52] sm:$0xff] %vm1183_vm2, %v11502_v61  ;;  %v15624_v48 = vld [vmem:[#allocation88_spill] sm:$0xff]  ;;  %v1678_v9 = vmax.f32 %v1422_v44, %v1486_v12  ;;  %v11565_v35 = vmax.f32 %v2368_v8, %v2176_v6  ;;  %v15626_v12 = vmax.f32 %v11402_v0, %v11404_v47 }
 0x192   :  { %v1084_v19 = vmul.f32 %v9488_v21, %v15623_v42  ;;  %v11550_v4 = vmul.f32 %v9490_v49, %v15624_v48  ;;  %v11552_v37 = vld [vmem:[#allocation2 + $0xa] sm:$0xff]  ;;  %v11556_v42 = vmax.f32 %v2367_v53, %v2175_v7  ;;  %v11559_v38 = vld [vmem:[#allocation2] sm:$0xff]  ;;  %3657 = vst.msk [vmem:[#allocation2 + $0x62] sm:$0xff] %vm1183_vm2, %v11541_v40  ;;  %v11568_v41 = vmax.f32 %v2369_v17, %v11488_v5  ;;  %v11581_v44 = vld [vmem:[#allocation2 + $0x158] sm:$0xff] }
 0x193   :  { %v11554_v21 = vld [vmem:[#allocation2 + $0xb] sm:$0xff]  ;;  %v11561_v13 = vld [vmem:[#allocation2 + $0x1] sm:$0xff]  ;;  %v2370_v7 = vmax.f32 %v11486_v22, %v11523_v58  ;;  %v11579_v49 = vmax.f32 %v15626_v12, %v1708_v14  ;;  %v11583_v8 = vld [vmem:[#allocation2 + $0x159] sm:$0xff]  ;;  %v15627_v47 = vmax.f32 %v11340_v26, %v11347_v18  ;;  %3659 = vst.msk [vmem:[#allocation2 + $0x7a] sm:$0xff] %vm1183_vm2, %v11565_v35  ;;  %v2372_v48 = vmax.f32 %v11494_v33, %v11592_v57 }
 0x194   :  { %15625 = vst [vmem:[#allocation65_spill] sm:$0xff] %v11550_v4  ;;  %v2179_v62 = vld [vmem:[#allocation3 + $0xa8] sm:$0xff]  ;;  %1232 = vst.msk [vmem:[#allocation2 + $0x16a] sm:$0xff] %vm1183_vm2, %v1084_v19  ;;  %v2180_v53 = vld [vmem:[#allocation3 + $0xb0] sm:$0xff]  ;;  %8985 = vmatprep.mubr.msk.f32.mxu0 %vm1183_vm2, %v1084_v19  ;;  %8849 = vmatmul.mubr.msk.f32.gmra.mxu1 %vm1183_vm2, %v2427_v28  ;;  %v2371_v19 = vmax.f32 %v11492_v29, %v11526_v15  ;;  %v4098_v28 = vmax.f32 %v11552_v37, %v11554_v21 }
 0x195   :  { %1264 = vst.msk [vmem:[#allocation2 + $0x2ea] sm:$0xff] %vm1183_vm2, %v11550_v4  ;;  %3658 = vst.msk [vmem:[#allocation2 + $0x6a] sm:$0xff] %vm1183_vm2, %v11556_v42  ;;  %v11594_v0 = vld [vmem:[#allocation3 + $0xb8] sm:$0xff]  ;;  %v11602_v14 = vmax.f32 %v15628_v3, %v15627_v47  ;;  %8851 = vmatprep.mubr.msk.f32.mxu1 %vm1183_vm2, %v2428_v43  ;;  %v11613_v26 = vmax.f32 %v2370_v7, %v2178_v54  ;;  %v11616_v18 = vmax.f32 %v11488_v5, %v2179_v62  ;;  %v11636_v37 = vld [vmem:[#allocation3 + $0xc8] sm:$0xff] }
 0x196   :  { %3660 = vst.msk [vmem:[#allocation2 + $0x82] sm:$0xff] %vm1183_vm2, %v11568_v41  ;;  %v11622_v29 = vld [vmem:[#allocation2 + $0x2d1] sm:$0xff]  ;;  %v4033_v43 = vmax.f32 %v11559_v38, %v11561_v13  ;;  %v11628_v17 = vmax.f32 %v2371_v19, %v2179_v62  ;;  %8986 = vmatmul.mubr.msk.f32.gmra.mxu0 %vm1183_vm2, %v11452_v30  ;;  %v11634_v5 = vmax.f32 %v2178_v54, %v2180_v53  ;;  %v3841_v13 = vld [vmem:[#allocation2 + $0x2] sm:$0xff] }
 0x197   :  { %v11624_v6 = vld [vmem:[#allocation2 + $0x2d2] sm:$0xff]  ;;  %v11640_v7 = vmax.f32 %v1614_v10, %v1678_v9  ;;  %v3905_v38 = vld [vmem:[#allocation2 + $0x3] sm:$0xff]  ;;  %3661 = vst.msk [vmem:[#allocation2 + $0x92] sm:$0xff] %vm1183_vm2, %v11613_v26  ;;  %v2373_v33 = vmax.f32 %v11506_v51, %v11616_v18  ;;  %v11651_v54 = vmax.f32 %v2179_v62, %v11594_v0  ;;  %v11657_v9 = vmax.f32 %v2372_v48, %v2180_v53 }
 0x198   :  { %v11642_v12 = vld [vmem:[#allocation2 + $0x2d3] sm:$0xff]  ;;  %v15629_v30 = vld [vmem:[#allocation5_spill] sm:$0xff]  ;;  %v4097_v19 = vmax.f32 %v3841_v13, %v3905_v38  ;;  %8852 = vmatmul.mubr.msk.f32.gmra.mxu1 %vm1183_vm2, %v11502_v61  ;;  %3662 = vst.msk [vmem:[#allocation2 + $0x9a] sm:$0xff] %vm1183_vm2, %v11628_v17  ;;  %v2374_v51 = vmax.f32 %v11523_v58, %v11634_v5  ;;  %v1646_v61 = vmax.f32 %v11620_v46, %v11622_v29 }
 0x199   :  { %8988 = vmatprep.mubr.msk.f32.mxu0 %vm1183_vm2, %v15629_v30  ;;  %v3714_v47 = vld [vmem:[#allocation2 + $0x8] sm:$0xff]  ;;  %v11661_v3 = vld [vmem:[#allocation3 + $0xd0] sm:$0xff]  ;;  %v11664_v30 = vmax.f32 %v2180_v53, %v11618_v16  ;;  %v11666_v62 = vld [vmem:[#allocation2 + $0x2d8] sm:$0xff]  ;;  %8854 = vmatprep.mubr.msk.f32.mxu1 %vm1183_vm2, %v11541_v40  ;;  %v11683_v53 = vmax.f32 %v2373_v33, %v11594_v0  ;;  %v2375_v45 = vmax.f32 %v11526_v15, %v11651_v54 }
 0x19a   :  { %v3778_v10 = vld [vmem:[#allocation2 + $0x9] sm:$0xff]  ;;  %15630 = vst [vmem:[#allocation69_spill] sm:$0xff] %v11666_v62  ;;  %v11668_v13 = vld [vmem:[#allocation2 + $0x2d9] sm:$0xff]  ;;  %v1710_v29 = vmax.f32 %v11624_v6, %v11642_v12  ;;  %3663 = vst.msk [vmem:[#allocation2 + $0xaa] sm:$0xff] %vm1183_vm2, %v11657_v9  ;;  %v11694_v40 = vmax.f32 %v2374_v51, %v11618_v16  ;;  %v11709_v51 = vmax.f32 %v11594_v0, %v11636_v37 }
 0x19b   :  { %15631 = vst [vmem:[#allocation70_spill] sm:$0xff] %v11668_v13  ;;  %v11672_v38 = vld [vmem:[#allocation2 + $0x172] sm:$0xff]  ;;  %v3969_v48 = vld [vmem:[#allocation2 + $0x4] sm:$0xff]  ;;  %v4034_v21 = vmax.f32 %v3714_v47, %v3778_v10  ;;  %v4161_v10 = vmax.f32 %v4033_v43, %v4097_v19  ;;  %v2376_v15 = vmax.f32 %v11592_v57, %v11664_v30  ;;  %3664 = vst.msk [vmem:[#allocation2 + $0xb2] sm:$0xff] %vm1183_vm2, %v11683_v53 }
 0x19c   :  { %v11674_v22 = vld [vmem:[#allocation2 + $0x173] sm:$0xff]  ;;  %v1549_v46 = vld [vmem:[#allocation2 + $0x144] sm:$0xff]  ;;  %v11703_v43 = vmax.f32 %v2375_v45, %v11636_v37  ;;  %8855 = vmatmul.mubr.msk.f32.gmra.mxu1 %vm1183_vm2, %v11556_v42  ;;  %3665 = vst.msk [vmem:[#allocation2 + $0xc2] sm:$0xff] %vm1183_vm2, %v11694_v40 }
 0x19d   :  { %v11676_v25 = vld [vmem:[#allocation2 + $0x18] sm:$0xff]  ;;  %v1296_v4 = vld [vmem:[#allocation2 + $0x168] sm:$0xff]  ;;  %v11689_v50 = vld [vmem:[#allocation2 + $0x170] sm:$0xff]  ;;  %v4162_v11 = vmax.f32 %v4034_v21, %v4098_v28  ;;  %v4225_v23 = vmax.f32 %v4161_v10, %v3969_v48  ;;  %v11717_v45 = vmax.f32 %v2376_v15, %v11661_v3  ;;  %8857 = vmatprep.mubr.msk.f32.mxu1 %vm1183_vm2, %v11565_v35  ;;  %v1681_v35 = vmax.f32 %v11672_v38, %v11674_v22 }
 0x19e   :  { %v11678_v58 = vld [vmem:[#allocation2 + $0x19] sm:$0xff]  ;;  %v1360_v47 = vld [vmem:[#allocation2 + $0x169] sm:$0xff]  ;;  %v1361_v55 = vld [vmem:[#allocation2 + $0x171] sm:$0xff]  ;;  %3666 = vst.msk [vmem:[#allocation2 + $0xca] sm:$0xff] %vm1183_vm2, %v11703_v43 }
 0x19f   :  { %v15632_v33 = vld [vmem:[#allocation4_spill] sm:$0xff]  ;;  %v1424_v52 = vld [vmem:[#allocation2 + $0x16a] sm:$0xff]  ;;  %v1616_v12 = vmax.f32 %v1296_v4, %v1360_v47  ;;  %v1617_v57 = vmax.f32 %v11689_v50, %v1361_v55  ;;  %v1550_v0 = vld [vmem:[#allocation2 + $0x154] sm:$0xff]  ;;  %v4035_v55 = vmax.f32 %v11676_v25, %v11678_v58  ;;  %v1805_v50 = vmax.f32 %v11602_v14, %v1549_v46  ;;  %4289 = vst.msk [vmem:[#allocation3 + $0x20] sm:$0xff] %vm1183_vm2, %v4225_v23 }
 0x1a0   :  { %8989 = vmatmul.mubr.msk.f32.gmra.mxu0 %vm1183_vm2, %v15632_v33  ;;  %v1488_v6 = vld [vmem:[#allocation2 + $0x16b] sm:$0xff]  ;;  %v15633_v19 = vld [vmem:[#allocation8_spill] sm:$0xff]  ;;  %3667 = vst.msk [vmem:[#allocation2 + $0xda] sm:$0xff] %vm1183_vm2, %v11717_v45  ;;  %v1806_v14 = vmax.f32 %v11640_v7, %v1550_v0  ;;  %v15637_v7 = vmax.f32 %v11496_v56, %v11498_v31  ;;  %8858 = vmatmul.mubr.msk.f32.gmra.mxu1 %vm1183_vm2, %v11568_v41 }
 0x1a1   :  { %8991 = vmatprep.mubr.msk.f32.mxu0 %vm1183_vm2, %v15633_v19  ;;  %v1548_v33 = vld [vmem:[#allocation2 + $0x13c] sm:$0xff]  ;;  %v1680_v1 = vmax.f32 %v1424_v52, %v1488_v6  ;;  %v3970_v4 = vld [vmem:[#allocation2 + $0xc] sm:$0xff]  ;;  %v11747_v6 = vld [vmem:[#allocation2 + $0x1a4] sm:$0xff]  ;;  %v11749_v19 = vmax.f32 %v1646_v61, %v1710_v29  ;;  %1870 = vst.msk [vmem:[#allocation3 + $0xf8] sm:$0xff] %vm1183_vm2, %v1805_v50  ;;  %v15638_v61 = vmax.f32 %v11581_v44, %v11583_v8 }
 0x1a2   :  { %v3843_v28 = vld [vmem:[#allocation2 + $0x1a] sm:$0xff]  ;;  %v4226_v47 = vmax.f32 %v4162_v11, %v3970_v4  ;;  %v1804_v52 = vmax.f32 %v11534_v59, %v1548_v33  ;;  %v11729_v42 = vld [vmem:[#allocation3 + $0x150] sm:$0xff]  ;;  %1871 = vst.msk [vmem:[#allocation3 + $0x100] sm:$0xff] %vm1183_vm2, %v1806_v14  ;;  %v1745_v31 = vmax.f32 %v1617_v57, %v1681_v35  ;;  %8860 = vmatprep.mubr.msk.f32.mxu1 %vm1183_vm2, %v11613_v26  ;;  %v15642_v26 = vld [vmem:[#allocation17_spill] sm:$0xff] }
 0x1a3   :  { %v11719_v21 = vld [vmem:[#allocation3 + $0x140] sm:$0xff]  ;;  %v11733_v10 = vld [vmem:[#allocation2 + $0x18c] sm:$0xff]  ;;  %v1744_v58 = vmax.f32 %v1616_v12, %v1680_v1  ;;  %15635 = vst [vmem:[#allocation60_spill] sm:$0xff] %v11749_v19  ;;  %v1553_v33 = vld [vmem:[#allocation2 + $0x174] sm:$0xff]  ;;  %v1743_v29 = vmax.f32 %v15638_v61, %v15637_v7 }
 0x1a4   :  { %v11731_v48 = vld [vmem:[#allocation3 + $0x160] sm:$0xff]  ;;  %v15634_v59 = vld [vmem:[#allocation6_spill] sm:$0xff]  ;;  %4290 = vst.msk [vmem:[#allocation3 + $0x28] sm:$0xff] %vm1183_vm2, %v4226_v47  ;;  %1869 = vst.msk [vmem:[#allocation3 + $0xf0] sm:$0xff] %vm1183_vm2, %v1804_v52  ;;  %v11770_v52 = vmax.f32 %v11618_v16, %v11661_v3  ;;  %v2262_v41 = vmax.f32 %v11719_v21, %v11729_v42  ;;  %v1809_v57 = vmax.f32 %v1745_v31, %v1553_v33  ;;  %8861 = vmatmul.mubr.msk.f32.gmra.mxu1 %vm1183_vm2, %v11628_v17 }
 0x1a5   :  { %v1551_v11 = vld [vmem:[#allocation2 + $0x15c] sm:$0xff]  ;;  %8992 = vmatmul.mubr.msk.f32.gmra.mxu0 %vm1183_vm2, %v15634_v59  ;;  %v11745_v46 = vld [vmem:[#allocation3 + $0x170] sm:$0xff]  ;;  %v3972_v16 = vld [vmem:[#allocation2 + $0x24] sm:$0xff]  ;;  %8863 = vmatprep.mubr.msk.f32.mxu1 %vm1183_vm2, %v11657_v9 }
 0x1a6   :  { %v3907_v15 = vld [vmem:[#allocation2 + $0x1b] sm:$0xff]  ;;  %v1552_v22 = vld [vmem:[#allocation2 + $0x16c] sm:$0xff]  ;;  %v11799_v13 = vld [vmem:[#allocation2 + $0x1e4] sm:$0xff]  ;;  %1874 = vst.msk [vmem:[#allocation3 + $0x118] sm:$0xff] %vm1183_vm2, %v1809_v57 }
 0x1a7   :  { %v4099_v23 = vmax.f32 %v3843_v28, %v3907_v15  ;;  %v3716_v1 = vld [vmem:[#allocation2 + $0x20] sm:$0xff]  ;;  %v1808_v56 = vmax.f32 %v1744_v58, %v1552_v22  ;;  %v11773_v50 = vld [vmem:[#allocation2 + $0x1cc] sm:$0xff]  ;;  %v3718_v14 = vld [vmem:[#allocation2 + $0x38] sm:$0xff] }
 0x1a8   :  { %v3780_v38 = vld [vmem:[#allocation2 + $0x21] sm:$0xff]  ;;  %v3781_v7 = vld [vmem:[#allocation2 + $0x31] sm:$0xff]  ;;  %v3782_v12 = vld [vmem:[#allocation2 + $0x39] sm:$0xff]  ;;  %8864 = vmatmul.mubr.msk.f32.gmra.mxu1 %vm1183_vm2, %v11683_v53 }
 0x1a9   :  { %v15636_v4 = vld [vmem:[#allocation12_spill] sm:$0xff]  ;;  %v4036_v59 = vmax.f32 %v3716_v1, %v3780_v38  ;;  %v4163_v44 = vmax.f32 %v4035_v55, %v4099_v23  ;;  %v3845_v61 = vld [vmem:[#allocation2 + $0x32] sm:$0xff]  ;;  %v1807_v1 = vmax.f32 %v1743_v29, %v1551_v11  ;;  %v15639_v58 = vld [vmem:[#allocation9_spill] sm:$0xff]  ;;  %1873 = vst.msk [vmem:[#allocation3 + $0x110] sm:$0xff] %vm1183_vm2, %v1808_v56  ;;  %v11784_v55 = vmax.f32 %v11731_v48, %v11745_v46 }
 0x1aa   :  { %8994 = vmatprep.mubr.msk.f32.mxu0 %vm1183_vm2, %v15636_v4  ;;  %v11764_v28 = vld [vmem:[#allocation2 + $0x1bc] sm:$0xff]  ;;  %v3717_v4 = vld [vmem:[#allocation2 + $0x30] sm:$0xff]  ;;  %8866 = vmatprep.mubr.msk.f32.mxu1 %vm1183_vm2, %v11694_v40  ;;  %v15659_v53 = vld [vmem:[#allocation41_spill] sm:$0xff] }
 0x1ab   :  { %v3971_v0 = vld [vmem:[#allocation2 + $0x1c] sm:$0xff]  ;;  %v3909_v38 = vld [vmem:[#allocation2 + $0x33] sm:$0xff]  ;;  %v4037_v25 = vmax.f32 %v3717_v4, %v3781_v7  ;;  %8995 = vmatmul.mubr.msk.f32.gmra.mxu0 %vm1183_vm2, %v15639_v58  ;;  %15640 = vst [vmem:[#allocation76_spill] sm:$0xff] %v11784_v55  ;;  %1872 = vst.msk [vmem:[#allocation3 + $0x108] sm:$0xff] %vm1183_vm2, %v1807_v1 }
 0x1ac   :  { %v3844_v47 = vld [vmem:[#allocation2 + $0x22] sm:$0xff]  ;;  %v15641_v35 = vld [vmem:[#allocation15_spill] sm:$0xff]  ;;  %v15644_v22 = vld [vmem:[#allocation18_spill] sm:$0xff]  ;;  %v4227_v4 = vmax.f32 %v4163_v44, %v3971_v0  ;;  %v4101_v58 = vmax.f32 %v3845_v61, %v3909_v38  ;;  %8867 = vmatmul.mubr.msk.f32.gmra.mxu1 %vm1183_vm2, %v11703_v43 }
 0x1ad   :  { %v3908_v15 = vld [vmem:[#allocation2 + $0x23] sm:$0xff]  ;;  %v15643_v11 = vmax.f32 %v15641_v35, %v15642_v26  ;;  %v15645_v23 = vld [vmem:[#allocation19_spill] sm:$0xff]  ;;  %v15647_v31 = vld [vmem:[#allocation14_spill] sm:$0xff]  ;;  %8869 = vmatprep.mubr.msk.f32.mxu1 %vm1183_vm2, %v11717_v45 }
 0x1ae   :  { %v4100_v8 = vmax.f32 %v3844_v47, %v3908_v15  ;;  %v15646_v21 = vmax.f32 %v15644_v22, %v15645_v23  ;;  %v1940_v47 = vld [vmem:[#allocation3 + $0x148] sm:$0xff]  ;;  %v11792_v15 = vld [vmem:[#allocation3 + $0x158] sm:$0xff]  ;;  %8997 = vmatprep.mubr.msk.f32.mxu0 %vm1183_vm2, %v15647_v31  ;;  %v15648_v35 = vld [vmem:[#allocation16_spill] sm:$0xff]  ;;  %v4038_v23 = vmax.f32 %v3718_v14, %v3782_v12  ;;  %4291 = vst.msk [vmem:[#allocation3 + $0x30] sm:$0xff] %vm1183_vm2, %v4227_v4 }
 0x1af   :  { %v3846_v56 = vld [vmem:[#allocation2 + $0x3a] sm:$0xff]  ;;  %v1811_v26 = vmax.f32 %v15648_v35, %v11733_v10  ;;  %v3783_v44 = vld [vmem:[#allocation2 + $0x49] sm:$0xff]  ;;  %v4165_v12 = vmax.f32 %v4037_v25, %v4101_v58 }
 0x1b0   :  { %v1751_v29 = vmax.f32 %v15646_v21, %v15643_v11  ;;  %v4164_v7 = vmax.f32 %v4036_v59, %v4100_v8  ;;  %v3910_v33 = vld [vmem:[#allocation2 + $0x3b] sm:$0xff]  ;;  %v3719_v59 = vld [vmem:[#allocation2 + $0x48] sm:$0xff]  ;;  %v3720_v4 = vld [vmem:[#allocation2 + $0x50] sm:$0xff] }
 0x1b1   :  { %v11801_v11 = vld [vmem:[#allocation2 + $0x1fc] sm:$0xff]  ;;  %v3973_v22 = vld [vmem:[#allocation2 + $0x34] sm:$0xff]  ;;  %v4102_v0 = vmax.f32 %v3846_v56, %v3910_v33  ;;  %v3847_v21 = vld [vmem:[#allocation2 + $0x4a] sm:$0xff]  ;;  %v4039_v33 = vmax.f32 %v3719_v59, %v3783_v44  ;;  %1876 = vst.msk [vmem:[#allocation3 + $0x168] sm:$0xff] %vm1183_vm2, %v1811_v26 }
 0x1b2   :  { %v15649_v61 = vld [vmem:[#allocation20_spill] sm:$0xff]  ;;  %v11810_v1 = vld [vmem:[#allocation2 + $0x1d4] sm:$0xff]  ;;  %v4228_v38 = vmax.f32 %v4164_v7, %v3972_v16  ;;  %v3911_v56 = vld [vmem:[#allocation2 + $0x4b] sm:$0xff]  ;;  %v1815_v17 = vmax.f32 %v1751_v29, %v11764_v28  ;;  %v11824_v7 = vmax.f32 %v2262_v41, %v11784_v55 }
 0x1b3   :  { %v1813_v10 = vmax.f32 %v15649_v61, %v11747_v6  ;;  %v3974_v14 = vld [vmem:[#allocation2 + $0x3c] sm:$0xff]  ;;  %v11817_v57 = vld [vmem:[#allocation2 + $0x1ec] sm:$0xff]  ;;  %v4166_v31 = vmax.f32 %v4038_v23, %v4102_v0  ;;  %v4103_v35 = vmax.f32 %v3847_v21, %v3911_v56  ;;  %v11829_v29 = vld [vmem:[#allocation2 + $0x214] sm:$0xff]  ;;  %v4229_v23 = vmax.f32 %v4165_v12, %v3973_v22 }
 0x1b4   :  { %v11819_v6 = vld [vmem:[#allocation3 + $0x28] sm:$0xff]  ;;  %v3784_v16 = vld [vmem:[#allocation2 + $0x51] sm:$0xff]  ;;  %4292 = vst.msk [vmem:[#allocation3 + $0x38] sm:$0xff] %vm1183_vm2, %v4228_v38  ;;  %1880 = vst.msk [vmem:[#allocation3 + $0x188] sm:$0xff] %vm1183_vm2, %v1815_v17 }
 0x1b5   :  { %v15650_v25 = vld [vmem:[#allocation13_spill] sm:$0xff]  ;;  %1878 = vst.msk [vmem:[#allocation3 + $0x178] sm:$0xff] %vm1183_vm2, %v1813_v10  ;;  %v15651_v9 = vld [vmem:[#allocation34_spill] sm:$0xff]  ;;  %v11831_v58 = vld [vmem:[#allocation3 + $0x18] sm:$0xff]  ;;  %v4040_v41 = vmax.f32 %v3720_v4, %v3784_v16  ;;  %v4230_v21 = vmax.f32 %v4166_v31, %v3974_v14  ;;  %v4167_v56 = vmax.f32 %v4039_v33, %v4103_v35 }
 0x1b6   :  { %8998 = vmatmul.mubr.msk.f32.gmra.mxu0 %vm1183_vm2, %v15650_v25  ;;  %v1816_v28 = vmax.f32 %v15651_v9, %v11773_v50  ;;  %v3975_v0 = vld [vmem:[#allocation2 + $0x4c] sm:$0xff]  ;;  %v11840_v50 = vmax.f32 %v1940_v47, %v11792_v15  ;;  %v11842_v10 = vld [vmem:[#allocation2 + $0x204] sm:$0xff]  ;;  %4293 = vst.msk [vmem:[#allocation3 + $0x40] sm:$0xff] %vm1183_vm2, %v4229_v23  ;;  %v3976_v14 = vld [vmem:[#allocation2 + $0x54] sm:$0xff] }
 0x1b7   :  { %v3848_v59 = vld [vmem:[#allocation2 + $0x52] sm:$0xff]  ;;  %v15652_v61 = vld [vmem:[#allocation25_spill] sm:$0xff]  ;;  %v3721_v9 = vld [vmem:[#allocation2 + $0x60] sm:$0xff]  ;;  %4294 = vst.msk [vmem:[#allocation3 + $0x48] sm:$0xff] %vm1183_vm2, %v4230_v21 }
 0x1b8   :  { %v3912_v44 = vld [vmem:[#allocation2 + $0x53] sm:$0xff]  ;;  %9000 = vmatprep.mubr.msk.f32.mxu0 %vm1183_vm2, %v15652_v61  ;;  %v3785_v38 = vld [vmem:[#allocation2 + $0x61] sm:$0xff]  ;;  %1881 = vst.msk [vmem:[#allocation3 + $0x190] sm:$0xff] %vm1183_vm2, %v1816_v28  ;;  %v1818_v28 = vmax.f32 %v15659_v53, %v11799_v13  ;;  %v3786_v62 = vld [vmem:[#allocation2 + $0x69] sm:$0xff] }
 0x1b9   :  { %v4104_v25 = vmax.f32 %v3848_v59, %v3912_v44  ;;  %v3849_v22 = vld [vmem:[#allocation2 + $0x62] sm:$0xff]  ;;  %v15654_v4 = vld [vmem:[#allocation22_spill] sm:$0xff]  ;;  %v4041_v31 = vmax.f32 %v3721_v9, %v3785_v38  ;;  %v15660_v59 = vld [vmem:[#allocation31_spill] sm:$0xff]  ;;  %v4231_v9 = vmax.f32 %v4167_v56, %v3975_v0 }
 0x1ba   :  { %v15653_v12 = vld [vmem:[#allocation21_spill] sm:$0xff]  ;;  %v15656_v17 = vld [vmem:[#allocation28_spill] sm:$0xff]  ;;  %9001 = vmatmul.mubr.msk.f32.gmra.mxu0 %vm1183_vm2, %v15667_v60  ;;  %v3723_v0 = vld [vmem:[#allocation2 + $0x78] sm:$0xff]  ;;  %1883 = vst.msk [vmem:[#allocation3 + $0x1a0] sm:$0xff] %vm1183_vm2, %v1818_v28 }
 0x1bb   :  { %v15655_v16 = vmax.f32 %v15653_v12, %v15654_v4  ;;  %v15657_v61 = vld [vmem:[#allocation29_spill] sm:$0xff]  ;;  %v15661_v44 = vld [vmem:[#allocation32_spill] sm:$0xff]  ;;  %v15663_v4 = vld [vmem:[#allocation35_spill] sm:$0xff]  ;;  %v4168_v38 = vmax.f32 %v4040_v41, %v4104_v25  ;;  %4295 = vst.msk [vmem:[#allocation3 + $0x50] sm:$0xff] %vm1183_vm2, %v4231_v9 }
 0x1bc   :  { %v15658_v47 = vmax.f32 %v15656_v17, %v15657_v61  ;;  %v11853_v26 = vld [vmem:[#allocation2 + $0x22c] sm:$0xff]  ;;  %v3913_v33 = vld [vmem:[#allocation2 + $0x63] sm:$0xff]  ;;  %v15662_v12 = vmax.f32 %v15660_v59, %v15661_v44  ;;  %v11874_v59 = vld [vmem:[#allocation2 + $0x234] sm:$0xff] }
 0x1bd   :  { %v3722_v35 = vld [vmem:[#allocation2 + $0x68] sm:$0xff]  ;;  %v15664_v17 = vld [vmem:[#allocation36_spill] sm:$0xff]  ;;  %v4105_v55 = vmax.f32 %v3849_v22, %v3913_v33  ;;  %v15668_v56 = vld [vmem:[#allocation27_spill] sm:$0xff] }
 0x1be   :  { %v1753_v8 = vmax.f32 %v15658_v47, %v15655_v16  ;;  %v15665_v16 = vmax.f32 %v15663_v4, %v15664_v17  ;;  %v15666_v47 = vld [vmem:[#allocation51_spill] sm:$0xff]  ;;  %v3850_v40 = vld [vmem:[#allocation2 + $0x6a] sm:$0xff]  ;;  %9003 = vmatprep.mubr.msk.f32.mxu0 %vm1183_vm2, %v15668_v56  ;;  %v15673_v33 = vld [vmem:[#allocation44_spill] sm:$0xff] }
 0x1bf   :  { %v1820_v23 = vmax.f32 %v15666_v47, %v11801_v11  ;;  %v3914_v19 = vld [vmem:[#allocation2 + $0x6b] sm:$0xff]  ;;  %v11872_v53 = vld [vmem:[#allocation2 + $0x21c] sm:$0xff] }
 0x1c0   :  { %v1755_v61 = vmax.f32 %v15665_v16, %v15662_v12  ;;  %v1817_v13 = vmax.f32 %v1753_v8, %v11810_v1  ;;  %v11876_v44 = vld [vmem:[#allocation2 + $0x244] sm:$0xff]  ;;  %v4042_v12 = vmax.f32 %v3722_v35, %v3786_v62  ;;  %v4106_v21 = vmax.f32 %v3850_v40, %v3914_v19  ;;  %v3787_v41 = vld [vmem:[#allocation2 + $0x79] sm:$0xff]  ;;  %v15669_v8 = vld [vmem:[#allocation38_spill] sm:$0xff] }
 0x1c1   :  { %v3977_v11 = vld [vmem:[#allocation2 + $0x64] sm:$0xff]  ;;  %1885 = vst.msk [vmem:[#allocation3 + $0x1b0] sm:$0xff] %vm1183_vm2, %v1820_v23  ;;  %v15670_v1 = vld [vmem:[#allocation39_spill] sm:$0xff]  ;;  %v4232_v62 = vmax.f32 %v4168_v38, %v3976_v14  ;;  %v4169_v19 = vmax.f32 %v4041_v31, %v4105_v55  ;;  %v3978_v35 = vld [vmem:[#allocation2 + $0x6c] sm:$0xff]  ;;  %v4043_v40 = vmax.f32 %v3723_v0, %v3787_v41 }
 0x1c2   :  { %v1819_v60 = vmax.f32 %v1755_v61, %v11817_v57  ;;  %v15671_v25 = vmax.f32 %v15669_v8, %v15670_v1  ;;  %v15672_v22 = vld [vmem:[#allocation43_spill] sm:$0xff]  ;;  %1882 = vst.msk [vmem:[#allocation3 + $0x198] sm:$0xff] %vm1183_vm2, %v1817_v13  ;;  %v15675_v57 = vld [vmem:[#allocation62_spill] sm:$0xff]  ;;  %v4170_v23 = vmax.f32 %v4042_v12, %v4106_v21  ;;  %v3724_v8 = vld [vmem:[#allocation2 + $0x80] sm:$0xff] }
 0x1c3   :  { %v15674_v4 = vmax.f32 %v15672_v22, %v15673_v33  ;;  %v3851_v16 = vld [vmem:[#allocation2 + $0x7a] sm:$0xff]  ;;  %v1822_v28 = vmax.f32 %v15675_v57, %v11829_v29  ;;  %v3852_v14 = vld [vmem:[#allocation2 + $0x82] sm:$0xff]  ;;  %v15679_v13 = vld [vmem:[#allocation10_spill] sm:$0xff]  ;;  %4296 = vst.msk [vmem:[#allocation3 + $0x58] sm:$0xff] %vm1183_vm2, %v4232_v62  ;;  %v4233_v12 = vmax.f32 %v4169_v19, %v3977_v11 }
 0x1c4   :  { %v3915_v47 = vld [vmem:[#allocation2 + $0x7b] sm:$0xff]  ;;  %1884 = vst.msk [vmem:[#allocation3 + $0x1a8] sm:$0xff] %vm1183_vm2, %v1819_v60  ;;  %v15682_v33 = vld [vmem:[#allocation26_spill] sm:$0xff]  ;;  %v15683_v45 = vld [vmem:[#allocation73_spill] sm:$0xff]  ;;  %v4234_v19 = vmax.f32 %v4170_v23, %v3978_v35 }
 0x1c5   :  { %v1757_v17 = vmax.f32 %v15674_v4, %v15671_v25  ;;  %v11895_v61 = vld [vmem:[#allocation2 + $0x25c] sm:$0xff]  ;;  %v4107_v56 = vmax.f32 %v3851_v16, %v3915_v47  ;;  %9004 = vmatmul.mubr.msk.f32.gmra.mxu0 %vm1183_vm2, %v15682_v33  ;;  %1887 = vst.msk [vmem:[#allocation3 + $0x1c0] sm:$0xff] %vm1183_vm2, %v1822_v28  ;;  %v15684_v60 = vld [vmem:[#allocation57_spill] sm:$0xff]  ;;  %v15685_v4 = vld [vmem:[#allocation58_spill] sm:$0xff] }
 0x1c6   :  { %v3788_v9 = vld [vmem:[#allocation2 + $0x81] sm:$0xff]  ;;  %v15676_v43 = vld [vmem:[#allocation47_spill] sm:$0xff]  ;;  %v11919_v62 = vld [vmem:[#allocation2 + $0x24c] sm:$0xff]  ;;  %4297 = vst.msk [vmem:[#allocation3 + $0x60] sm:$0xff] %vm1183_vm2, %v4233_v12 }
 0x1c7   :  { %v1821_v55 = vmax.f32 %v1757_v17, %v11842_v10  ;;  %v15677_v31 = vld [vmem:[#allocation48_spill] sm:$0xff]  ;;  %v15680_v0 = vld [vmem:[#allocation11_spill] sm:$0xff]  ;;  %v4044_v22 = vmax.f32 %v3724_v8, %v3788_v9  ;;  %v1824_v10 = vmax.f32 %v15683_v45, %v11853_v26  ;;  %v15686_v17 = vmax.f32 %v15684_v60, %v15685_v4  ;;  %v15687_v16 = vld [vmem:[#allocation61_spill] sm:$0xff]  ;;  %4298 = vst.msk [vmem:[#allocation3 + $0x68] sm:$0xff] %vm1183_vm2, %v4234_v19 }
 0x1c8   :  { %v15678_v38 = vmax.f32 %v15676_v43, %v15677_v31  ;;  %v15681_v29 = vmax.f32 %v15679_v13, %v15680_v0  ;;  %v4360_v1 = vld [vmem:[#allocation3 + $0x38] sm:$0xff]  ;;  %v3916_v25 = vld [vmem:[#allocation2 + $0x83] sm:$0xff]  ;;  %v4171_v8 = vmax.f32 %v4043_v40, %v4107_v56  ;;  %v3725_v31 = vld [vmem:[#allocation2 + $0x90] sm:$0xff] }
 0x1c9   :  { %v3979_v21 = vld [vmem:[#allocation2 + $0x7c] sm:$0xff]  ;;  %v11922_v11 = vmax.f32 %v11819_v6, %v4360_v1  ;;  %v4108_v9 = vmax.f32 %v3852_v14, %v3916_v25  ;;  %v3789_v28 = vld [vmem:[#allocation2 + $0x91] sm:$0xff]  ;;  %v15690_v13 = vld [vmem:[#allocation33_spill] sm:$0xff]  ;;  %1886 = vst.msk [vmem:[#allocation3 + $0x1b8] sm:$0xff] %vm1183_vm2, %v1821_v55 }
 0x1ca   :  { %v1759_v41 = vmax.f32 %v15681_v29, %v15678_v38  ;;  %v15688_v47 = vld [vmem:[#allocation63_spill] sm:$0xff]  ;;  %9006 = vmatprep.mubr.msk.f32.mxu0 %vm1183_vm2, %v15690_v13  ;;  %v3980_v26 = vld [vmem:[#allocation2 + $0x84] sm:$0xff]  ;;  %v4045_v29 = vmax.f32 %v3725_v31, %v3789_v28  ;;  %1889 = vst.msk [vmem:[#allocation3 + $0x1d0] sm:$0xff] %vm1183_vm2, %v1824_v10  ;;  %v15692_v56 = vld [vmem:[#allocation94_spill] sm:$0xff]  ;;  %v4235_v55 = vmax.f32 %v4171_v8, %v3979_v21 }
 0x1cb   :  { %v15689_v57 = vmax.f32 %v15687_v16, %v15688_v47  ;;  %v3853_v38 = vld [vmem:[#allocation2 + $0x92] sm:$0xff]  ;;  %v15691_v40 = vld [vmem:[#allocation80_spill] sm:$0xff]  ;;  %v4802_v14 = vmax.f32 %v15692_v56, %v11922_v11  ;;  %v11935_v25 = vld [vmem:[#allocation3 + $0x48] sm:$0xff]  ;;  %v4172_v12 = vmax.f32 %v4044_v22, %v4108_v9 }
 0x1cc   :  { %v3917_v0 = vld [vmem:[#allocation2 + $0x93] sm:$0xff]  ;;  %v1823_v45 = vmax.f32 %v1759_v41, %v11872_v53  ;;  %v1826_v23 = vmax.f32 %v15691_v40, %v11876_v44  ;;  %v11939_v53 = vmax.f32 %v4360_v1, %v11935_v25  ;;  %v3727_v16 = vld [vmem:[#allocation2 + $0xa8] sm:$0xff]  ;;  %4299 = vst.msk [vmem:[#allocation3 + $0x70] sm:$0xff] %vm1183_vm2, %v4235_v55  ;;  %v15702_v40 = vmax.f32 %v11831_v58, %v11819_v6 }
 0x1cd   :  { %v1761_v43 = vmax.f32 %v15689_v57, %v15686_v17  ;;  %v3726_v33 = vld [vmem:[#allocation2 + $0x98] sm:$0xff]  ;;  %v4109_v60 = vmax.f32 %v3853_v38, %v3917_v0  ;;  %v15693_v44 = vld [vmem:[#allocation30_spill] sm:$0xff]  ;;  %v15700_v8 = vld [vmem:[#allocation89_spill] sm:$0xff]  ;;  %v11955_v31 = vmax.f32 %v4802_v14, %v11935_v25  ;;  %v4236_v28 = vmax.f32 %v4172_v12, %v3980_v26 }
 0x1ce   :  { %v3790_v4 = vld [vmem:[#allocation2 + $0x99] sm:$0xff]  ;;  %9007 = vmatmul.mubr.msk.f32.gmra.mxu0 %vm1183_vm2, %v15693_v44  ;;  %1888 = vst.msk [vmem:[#allocation3 + $0x1c8] sm:$0xff] %vm1183_vm2, %v1823_v45  ;;  %1891 = vst.msk [vmem:[#allocation3 + $0x1e0] sm:$0xff] %vm1183_vm2, %v1826_v23  ;;  %v15694_v21 = vld [vmem:[#allocation66_spill] sm:$0xff]  ;;  %v1828_v9 = vmax.f32 %v15700_v8, %v11895_v61  ;;  %v4804_v23 = vmax.f32 %v15702_v40, %v11939_v53  ;;  %v15703_v6 = vmax.f32 %v11616_v18, %v11709_v51 }
 0x1cf   :  { %v1825_v35 = vmax.f32 %v1761_v43, %v11874_v59  ;;  %v3854_v17 = vld [vmem:[#allocation2 + $0x9a] sm:$0xff]  ;;  %v4046_v10 = vmax.f32 %v3726_v33, %v3790_v4  ;;  %v15697_v57 = vld [vmem:[#allocation74_spill] sm:$0xff]  ;;  %v4173_v38 = vmax.f32 %v4045_v29, %v4109_v60  ;;  %5576 = vst.msk [vmem:[#allocation2 + $0xa] sm:$0xff] %vm1183_vm2, %v11955_v31  ;;  %4300 = vst.msk [vmem:[#allocation3 + $0x78] sm:$0xff] %vm1183_vm2, %v4236_v28 }
 0x1d0   :  { %v3981_v41 = vld [vmem:[#allocation2 + $0x94] sm:$0xff]  ;;  %v3791_v0 = vld [vmem:[#allocation2 + $0xa9] sm:$0xff]  ;;  %v3982_v61 = vld [vmem:[#allocation2 + $0x9c] sm:$0xff]  ;;  %1893 = vst.msk [vmem:[#allocation3 + $0x1f0] sm:$0xff] %vm1183_vm2, %v1828_v9 }
 0x1d1   :  { %v3918_v59 = vld [vmem:[#allocation2 + $0x9b] sm:$0xff]  ;;  %1890 = vst.msk [vmem:[#allocation3 + $0x1d8] sm:$0xff] %vm1183_vm2, %v1825_v35  ;;  %v3855_v33 = vld [vmem:[#allocation2 + $0xaa] sm:$0xff]  ;;  %v4047_v56 = vmax.f32 %v3727_v16, %v3791_v0  ;;  %v4237_v12 = vmax.f32 %v4173_v38, %v3981_v41 }
 0x1d2   :  { %v15695_v22 = vld [vmem:[#allocation67_spill] sm:$0xff]  ;;  %v4110_v13 = vmax.f32 %v3854_v17, %v3918_v59  ;;  %v3919_v45 = vld [vmem:[#allocation2 + $0xab] sm:$0xff]  ;;  %v3793_v8 = vld [vmem:[#allocation2 + $0xc1] sm:$0xff] }
 0x1d3   :  { %v15696_v47 = vmax.f32 %v15694_v21, %v15695_v22  ;;  %v15698_v43 = vld [vmem:[#allocation75_spill] sm:$0xff]  ;;  %v15701_v35 = vld [vmem:[#allocation53_spill] sm:$0xff]  ;;  %v4111_v14 = vmax.f32 %v3855_v33, %v3919_v45  ;;  %v3728_v55 = vld [vmem:[#allocation2 + $0xb0] sm:$0xff]  ;;  %4301 = vst.msk [vmem:[#allocation3 + $0x80] sm:$0xff] %vm1183_vm2, %v4237_v12 }
 0x1d4   :  { %v15699_v1 = vmax.f32 %v15697_v57, %v15698_v43  ;;  %9009 = vmatprep.mubr.msk.f32.mxu0 %vm1183_vm2, %v15701_v35  ;;  %v11964_v4 = vld [vmem:[#allocation3 + $0xd8] sm:$0xff]  ;;  %v4174_v60 = vmax.f32 %v4046_v10, %v4110_v13  ;;  %v3983_v21 = vld [vmem:[#allocation2 + $0xac] sm:$0xff]  ;;  %v2186_v10 = vld [vmem:[#allocation3 + $0xe0] sm:$0xff]  ;;  %v15705_v43 = vmax.f32 %v11634_v5, %v11770_v52 }
 0x1d5   :  { %v4488_v29 = vld [vmem:[#allocation3 + $0x58] sm:$0xff]  ;;  %v2441_v58 = vmax.f32 %v15703_v6, %v11964_v4  ;;  %v4175_v22 = vmax.f32 %v4047_v56, %v4111_v14  ;;  %v15704_v57 = vld [vmem:[#allocation52_spill] sm:$0xff]  ;;  %v4490_v13 = vld [vmem:[#allocation3 + $0x68] sm:$0xff]  ;;  %v11999_v5 = vmax.f32 %v11661_v3, %v2186_v10 }
 0x1d6   :  { %v1763_v19 = vmax.f32 %v15699_v1, %v15696_v47  ;;  %v3792_v17 = vld [vmem:[#allocation2 + $0xb1] sm:$0xff]  ;;  %v4742_v16 = vmax.f32 %v11935_v25, %v4488_v29  ;;  %v11980_v44 = vmax.f32 %v4804_v23, %v4488_v29  ;;  %9010 = vmatmul.mubr.msk.f32.gmra.mxu0 %vm1183_vm2, %v15704_v57  ;;  %v4238_v18 = vmax.f32 %v4174_v60, %v3982_v61  ;;  %v3857_v9 = vld [vmem:[#allocation2 + $0xc2] sm:$0xff] }
 0x1d7   :  { %v3856_v59 = vld [vmem:[#allocation2 + $0xb2] sm:$0xff]  ;;  %v4048_v41 = vmax.f32 %v3728_v55, %v3792_v17  ;;  %8870 = vmatmul.mubr.msk.f32.gmra.mxu1 %vm1183_vm2, %v2441_v58  ;;  %3668 = vst.msk [vmem:[#allocation2 + $0xe2] sm:$0xff] %vm1183_vm2, %v2441_v58  ;;  %v2442_v1 = vmax.f32 %v15705_v43, %v2186_v10  ;;  %v11993_v38 = vld [vmem:[#allocation2 + $0x264] sm:$0xff]  ;;  %v4239_v33 = vmax.f32 %v4175_v22, %v3983_v21 }
 0x1d8   :  { %v1827_v26 = vmax.f32 %v1763_v19, %v11919_v62  ;;  %v11977_v62 = vmax.f32 %v11636_v37, %v11964_v4  ;;  %v3920_v47 = vld [vmem:[#allocation2 + $0xb3] sm:$0xff]  ;;  %v3729_v19 = vld [vmem:[#allocation2 + $0xc0] sm:$0xff]  ;;  %5578 = vst.msk [vmem:[#allocation2 + $0x22] sm:$0xff] %vm1183_vm2, %v11980_v44  ;;  %v4806_v0 = vmax.f32 %v11922_v11, %v4742_v16  ;;  %v4744_v23 = vmax.f32 %v4488_v29, %v4490_v13  ;;  %v2187_v56 = vld [vmem:[#allocation3 + $0xe8] sm:$0xff] }
 0x1d9   :  { %v4112_v37 = vmax.f32 %v3856_v59, %v3920_v47  ;;  %v3921_v45 = vld [vmem:[#allocation2 + $0xc3] sm:$0xff]  ;;  %v4049_v35 = vmax.f32 %v3729_v19, %v3793_v8  ;;  %v15706_v40 = vld [vmem:[#allocation7_spill] sm:$0xff]  ;;  %4302 = vst.msk [vmem:[#allocation3 + $0x88] sm:$0xff] %vm1183_vm2, %v4238_v18  ;;  %8872 = vmatprep.mubr.msk.f32.mxu1 %vm1183_vm2, %v2442_v1  ;;  %3669 = vst.msk [vmem:[#allocation2 + $0xf2] sm:$0xff] %vm1183_vm2, %v2442_v1 }
 0x1da   :  { %1892 = vst.msk [vmem:[#allocation3 + $0x1e8] sm:$0xff] %vm1183_vm2, %v1827_v26  ;;  %v2379_v28 = vmax.f32 %v11651_v54, %v11977_v62  ;;  %9012 = vmatprep.mubr.msk.f32.mxu0 %vm1183_vm2, %v15706_v40  ;;  %v4113_v61 = vmax.f32 %v3857_v9, %v3921_v45  ;;  %v3730_v11 = vld [vmem:[#allocation2 + $0xc8] sm:$0xff]  ;;  %v15707_v55 = vld [vmem:[#allocation78_spill] sm:$0xff]  ;;  %v15708_v26 = vld [vmem:[#allocation79_spill] sm:$0xff]  ;;  %v12014_v29 = vmax.f32 %v4806_v0, %v4490_v13 }
 0x1db   :  { %v4176_v54 = vmax.f32 %v4048_v41, %v4112_v37  ;;  %v3794_v14 = vld [vmem:[#allocation2 + $0xc9] sm:$0xff]  ;;  %v15709_v12 = vmax.f32 %v15707_v55, %v15708_v26  ;;  %v12012_v17 = vld [vmem:[#allocation2 + $0x274] sm:$0xff]  ;;  %4303 = vst.msk [vmem:[#allocation3 + $0x90] sm:$0xff] %vm1183_vm2, %v4239_v33  ;;  %v2380_v41 = vmax.f32 %v11664_v30, %v11999_v5  ;;  %v4808_v18 = vmax.f32 %v11939_v53, %v4744_v23  ;;  %v15714_v13 = vld [vmem:[#allocation56_spill] sm:$0xff] }
 0x1dc   :  { %v15710_v3 = vld [vmem:[#allocation81_spill] sm:$0xff]  ;;  %v15711_v60 = vld [vmem:[#allocation82_spill] sm:$0xff]  ;;  %v2443_v16 = vmax.f32 %v2379_v28, %v2187_v56  ;;  %v4050_v47 = vmax.f32 %v3730_v11, %v3794_v14  ;;  %v4177_v1 = vmax.f32 %v4049_v35, %v4113_v61  ;;  %v3731_v9 = vld [vmem:[#allocation2 + $0xd8] sm:$0xff]  ;;  %5580 = vst.msk [vmem:[#allocation2 + $0x3a] sm:$0xff] %vm1183_vm2, %v12014_v29  ;;  %v12029_v33 = vmax.f32 %v11964_v4, %v2187_v56 }
 0x1dd   :  { %v15712_v6 = vmax.f32 %v15710_v3, %v15711_v60  ;;  %v3984_v59 = vld [vmem:[#allocation2 + $0xb4] sm:$0xff]  ;;  %v3858_v21 = vld [vmem:[#allocation2 + $0xca] sm:$0xff]  ;;  %v12037_v14 = vld [vmem:[#allocation3 + $0x100] sm:$0xff] }
 0x1de   :  { %v3922_v22 = vld [vmem:[#allocation2 + $0xcb] sm:$0xff]  ;;  %v4240_v37 = vmax.f32 %v4176_v54, %v3984_v59  ;;  %v4492_v28 = vld [vmem:[#allocation3 + $0x78] sm:$0xff]  ;;  %8873 = vmatmul.mubr.msk.f32.gmra.mxu1 %vm1183_vm2, %v2443_v16  ;;  %3670 = vst.msk [vmem:[#allocation2 + $0xfa] sm:$0xff] %vm1183_vm2, %v2443_v16  ;;  %v3732_v59 = vld [vmem:[#allocation2 + $0xe0] sm:$0xff] }
 0x1df   :  { %v1765_v58 = vmax.f32 %v15712_v6, %v15709_v12  ;;  %v15713_v57 = vld [vmem:[#allocation54_spill] sm:$0xff]  ;;  %v3985_v43 = vld [vmem:[#allocation2 + $0xc4] sm:$0xff]  ;;  %v4114_v19 = vmax.f32 %v3858_v21, %v3922_v22  ;;  %v3795_v0 = vld [vmem:[#allocation2 + $0xd9] sm:$0xff]  ;;  %v12034_v40 = vmax.f32 %v4808_v18, %v4492_v28 }
 0x1e0   :  { %9013 = vmatmul.mubr.msk.f32.gmra.mxu0 %vm1183_vm2, %v15713_v57  ;;  %v2188_v8 = vld [vmem:[#allocation3 + $0xf0] sm:$0xff]  ;;  %v3859_v53 = vld [vmem:[#allocation2 + $0xda] sm:$0xff]  ;;  %4304 = vst.msk [vmem:[#allocation3 + $0x98] sm:$0xff] %vm1183_vm2, %v4240_v37  ;;  %v4241_v23 = vmax.f32 %v4177_v1, %v3985_v43  ;;  %v4051_v61 = vmax.f32 %v3731_v9, %v3795_v0  ;;  %v12039_v55 = vld [vmem:[#allocation3 + $0x108] sm:$0xff] }
 0x1e1   :  { %9015 = vmatprep.mubr.msk.f32.mxu0 %vm1183_vm2, %v15714_v13  ;;  %v2444_v30 = vmax.f32 %v2380_v41, %v2188_v8  ;;  %v12031_v45 = vmax.f32 %v2186_v10, %v2188_v8  ;;  %v1829_v35 = vmax.f32 %v1765_v58, %v11993_v38  ;;  %15715 = vst [vmem:[#allocation77_spill] sm:$0xff] %v12034_v40  ;;  %v2189_v11 = vld [vmem:[#allocation3 + $0xf8] sm:$0xff]  ;;  %v12041_v26 = vld [vmem:[#allocation2 + $0x28c] sm:$0xff]  ;;  %5582 = vst.msk [vmem:[#allocation2 + $0x52] sm:$0xff] %vm1183_vm2, %v12034_v40 }
 0x1e2   :  { %v4178_v54 = vmax.f32 %v4050_v47, %v4114_v19  ;;  %v3986_v4 = vld [vmem:[#allocation2 + $0xcc] sm:$0xff]  ;;  %v3923_v10 = vld [vmem:[#allocation2 + $0xdb] sm:$0xff]  ;;  %v2381_v38 = vmax.f32 %v11709_v51, %v12029_v33  ;;  %v12049_v3 = vmax.f32 %v2187_v56, %v2189_v11  ;;  %v12052_v60 = vmax.f32 %v2188_v8, %v12037_v14  ;;  %4305 = vst.msk [vmem:[#allocation3 + $0xa0] sm:$0xff] %vm1183_vm2, %v4241_v23  ;;  %v3924_v18 = vld [vmem:[#allocation2 + $0xe3] sm:$0xff] }
 0x1e3   :  { %8875 = vmatprep.mubr.msk.f32.mxu1 %vm1183_vm2, %v2444_v30  ;;  %3671 = vst.msk [vmem:[#allocation2 + $0x10a] sm:$0xff] %vm1183_vm2, %v2444_v30  ;;  %v2382_v12 = vmax.f32 %v11770_v52, %v12031_v45  ;;  %1894 = vst.msk [vmem:[#allocation3 + $0x1f8] sm:$0xff] %vm1183_vm2, %v1829_v35  ;;  %v4115_v58 = vmax.f32 %v3859_v53, %v3923_v10  ;;  %v3796_v16 = vld [vmem:[#allocation2 + $0xe1] sm:$0xff]  ;;  %v12059_v21 = vmax.f32 %v2189_v11, %v12039_v55  ;;  %v15716_v56 = vld [vmem:[#allocation55_spill] sm:$0xff] }
 0x1e4   :  { %v4242_v6 = vmax.f32 %v4178_v54, %v3986_v4  ;;  %v3860_v51 = vld [vmem:[#allocation2 + $0xe2] sm:$0xff]  ;;  %9016 = vmatmul.mubr.msk.f32.gmra.mxu0 %vm1183_vm2, %v15716_v56  ;;  %v2445_v57 = vmax.f32 %v2381_v38, %v2189_v11  ;;  %v4052_v37 = vmax.f32 %v3732_v59, %v3796_v16  ;;  %v2383_v1 = vmax.f32 %v11977_v62, %v12049_v3  ;;  %v3733_v28 = vld [vmem:[#allocation2 + $0xf0] sm:$0xff] }
 0x1e5   :  { %v12061_v52 = vld [vmem:[#allocation3 + $0x120] sm:$0xff]  ;;  %v2446_v43 = vmax.f32 %v2382_v12, %v12037_v14  ;;  %v12072_v19 = vld [vmem:[#allocation3 + $0x128] sm:$0xff]  ;;  %v4179_v13 = vmax.f32 %v4051_v61, %v4115_v58  ;;  %v3797_v30 = vld [vmem:[#allocation2 + $0xf1] sm:$0xff]  ;;  %v2384_v0 = vmax.f32 %v11999_v5, %v12052_v60  ;;  %v2385_v53 = vmax.f32 %v12029_v33, %v12059_v21 }
 0x1e6   :  { %v15717_v22 = vld [vmem:[#allocation100_spill] sm:$0xff]  ;;  %4306 = vst.msk [vmem:[#allocation3 + $0xa8] sm:$0xff] %vm1183_vm2, %v4242_v6  ;;  %8876 = vmatmul.mubr.msk.f32.gmra.mxu1 %vm1183_vm2, %v2445_v57  ;;  %3672 = vst.msk [vmem:[#allocation2 + $0x112] sm:$0xff] %vm1183_vm2, %v2445_v57  ;;  %v3861_v62 = vld [vmem:[#allocation2 + $0xf2] sm:$0xff]  ;;  %v4053_v35 = vmax.f32 %v3733_v28, %v3797_v30  ;;  %v2447_v23 = vmax.f32 %v2383_v1, %v12039_v55  ;;  %v1832_v6 = vmax.f32 %v11371_v27, %v12041_v26 }
 0x1e7   :  { %v1830_v47 = vmax.f32 %v15717_v22, %v12012_v17  ;;  %v12067_v41 = vld [vmem:[#allocation2 + $0x27c] sm:$0xff]  ;;  %v4116_v17 = vmax.f32 %v3860_v51, %v3924_v18  ;;  %3673 = vst.msk [vmem:[#allocation2 + $0x122] sm:$0xff] %vm1183_vm2, %v2446_v43  ;;  %v2192_v54 = vld [vmem:[#allocation3 + $0x110] sm:$0xff]  ;;  %v15720_v4 = vld [vmem:[#allocation85_spill] sm:$0xff]  ;;  %8878 = vmatprep.mubr.msk.f32.mxu1 %vm1183_vm2, %v2446_v43 }
 0x1e8   :  { %v15718_v8 = vld [vmem:[#allocation68_spill] sm:$0xff]  ;;  %v2193_v61 = vld [vmem:[#allocation3 + $0x118] sm:$0xff]  ;;  %v15723_v38 = vld [vmem:[#allocation93_spill] sm:$0xff]  ;;  %v2448_v56 = vmax.f32 %v2384_v0, %v2192_v54  ;;  %3674 = vst.msk [vmem:[#allocation2 + $0x12a] sm:$0xff] %vm1183_vm2, %v2447_v23  ;;  %v2324_v26 = vmax.f32 %v2192_v54, %v12061_v52 }
 0x1e9   :  { %9018 = vmatprep.mubr.msk.f32.mxu0 %vm1183_vm2, %v15718_v8  ;;  %v3987_v9 = vld [vmem:[#allocation2 + $0xdc] sm:$0xff]  ;;  %1895 = vst.msk [vmem:[#allocation3 + $0x200] sm:$0xff] %vm1183_vm2, %v1830_v47  ;;  %v4180_v59 = vmax.f32 %v4052_v37, %v4116_v17  ;;  %v3925_v16 = vld [vmem:[#allocation2 + $0xf3] sm:$0xff]  ;;  %v12095_v22 = vmax.f32 %v2385_v53, %v2193_v61  ;;  %v3988_v47 = vld [vmem:[#allocation2 + $0xe4] sm:$0xff]  ;;  %v2322_v8 = vmax.f32 %v12037_v14, %v2192_v54 }
 0x1ea   :  { %v15719_v11 = vld [vmem:[#allocation84_spill] sm:$0xff]  ;;  %v4243_v58 = vmax.f32 %v4179_v13, %v3987_v9  ;;  %v3734_v51 = vld [vmem:[#allocation2 + $0xf8] sm:$0xff]  ;;  %v4117_v57 = vmax.f32 %v3861_v62, %v3925_v16  ;;  %v2323_v28 = vmax.f32 %v12039_v55, %v2193_v61  ;;  %v12100_v27 = vld [vmem:[#allocation3 + $0x130] sm:$0xff]  ;;  %1897 = vst.msk [vmem:[#allocation3 + $0x210] sm:$0xff] %vm1183_vm2, %v1832_v6  ;;  %v2325_v0 = vmax.f32 %v2193_v61, %v12072_v19 }
 0x1eb   :  { %v15721_v5 = vmax.f32 %v15719_v11, %v15720_v4  ;;  %v15722_v10 = vld [vmem:[#allocation92_spill] sm:$0xff]  ;;  %v12103_v37 = vld [vmem:[#allocation3 + $0x138] sm:$0xff]  ;;  %v12108_v9 = vld [vmem:[#allocation2 + $0x2e8] sm:$0xff]  ;;  %v4244_v14 = vmax.f32 %v4180_v59, %v3988_v47  ;;  %3675 = vst.msk [vmem:[#allocation2 + $0x13a] sm:$0xff] %vm1183_vm2, %v2448_v56  ;;  %8879 = vmatmul.mubr.msk.f32.gmra.mxu1 %vm1183_vm2, %v2447_v23  ;;  %v2388_v6 = vmax.f32 %v12052_v60, %v2324_v26 }
 0x1ec   :  { %v15724_v33 = vmax.f32 %v15722_v10, %v15723_v38  ;;  %v3798_v18 = vld [vmem:[#allocation2 + $0xf9] sm:$0xff]  ;;  %v12110_v13 = vld [vmem:[#allocation2 + $0x2e9] sm:$0xff]  ;;  %4307 = vst.msk [vmem:[#allocation3 + $0xb0] sm:$0xff] %vm1183_vm2, %v4243_v58  ;;  %3676 = vst.msk [vmem:[#allocation2 + $0x142] sm:$0xff] %vm1183_vm2, %v12095_v22  ;;  %v4181_v11 = vmax.f32 %v4053_v35, %v4117_v57  ;;  %v2386_v38 = vmax.f32 %v12031_v45, %v2322_v8  ;;  %8881 = vmatprep.mubr.msk.f32.mxu1 %vm1183_vm2, %v2448_v56 }
 0x1ed   :  { %v3862_v1 = vld [vmem:[#allocation2 + $0xfa] sm:$0xff]  ;;  %v4054_v55 = vmax.f32 %v3734_v51, %v3798_v18  ;;  %v12114_v30 = vld [vmem:[#allocation2 + $0x108] sm:$0xff]  ;;  %v15726_v53 = vld [vmem:[#allocation90_spill] sm:$0xff]  ;;  %4308 = vst.msk [vmem:[#allocation3 + $0xb8] sm:$0xff] %vm1183_vm2, %v4244_v14  ;;  %v2264_v45 = vmax.f32 %v11729_v42, %v11731_v48  ;;  %v2452_v8 = vmax.f32 %v2388_v6, %v12100_v27  ;;  %v15732_v6 = vmax.f32 %v11244_v2, %v11248_v39 }
 0x1ee   :  { %v1767_v12 = vmax.f32 %v15724_v33, %v15721_v5  ;;  %v15725_v43 = vld [vmem:[#allocation59_spill] sm:$0xff]  ;;  %v3799_v5 = vld [vmem:[#allocation2 + $0x109] sm:$0xff]  ;;  %v2387_v33 = vmax.f32 %v12049_v3, %v2323_v28  ;;  %v12130_v35 = vld [vmem:[#allocation3 + $0x180] sm:$0xff]  ;;  %v2450_v51 = vmax.f32 %v2386_v38, %v12061_v52 }
 0x1ef   :  { %9019 = vmatmul.mubr.msk.f32.gmra.mxu0 %vm1183_vm2, %v15725_v43  ;;  %v3926_v17 = vld [vmem:[#allocation2 + $0xfb] sm:$0xff]  ;;  %v3863_v10 = vld [vmem:[#allocation2 + $0x10a] sm:$0xff]  ;;  %v4055_v61 = vmax.f32 %v12114_v30, %v3799_v5  ;;  %v12139_v3 = vld [vmem:[#allocation2 + $0x2f2] sm:$0xff]  ;;  %v12161_v26 = vmax.f32 %v11824_v7, %v12130_v35  ;;  %8882 = vmatmul.mubr.msk.f32.gmra.mxu1 %vm1183_vm2, %v12095_v22  ;;  %3679 = vst.msk [vmem:[#allocation2 + $0x16a] sm:$0xff] %vm1183_vm2, %v2452_v8 }
 0x1f0   :  { %9021 = vmatprep.mubr.msk.f32.mxu0 %vm1183_vm2, %v15726_v53  ;;  %v1831_v62 = vmax.f32 %v1767_v12, %v12067_v41  ;;  %v3989_v54 = vld [vmem:[#allocation2 + $0xf4] sm:$0xff]  ;;  %v4118_v4 = vmax.f32 %v3862_v1, %v3926_v17  ;;  %v2389_v41 = vmax.f32 %v12059_v21, %v2325_v0  ;;  %v12132_v23 = vld [vmem:[#allocation3 + $0x168] sm:$0xff]  ;;  %v2451_v56 = vmax.f32 %v2387_v33, %v12072_v19  ;;  %v3990_v57 = vld [vmem:[#allocation2 + $0xfc] sm:$0xff] }
 0x1f1   :  { %v12134_v12 = vld [vmem:[#allocation3 + $0x178] sm:$0xff]  ;;  %v12143_v59 = vld [vmem:[#allocation2 + $0x2ea] sm:$0xff]  ;;  %v4245_v21 = vmax.f32 %v4181_v11, %v3989_v54  ;;  %3677 = vst.msk [vmem:[#allocation2 + $0x152] sm:$0xff] %vm1183_vm2, %v2450_v51  ;;  %v12180_v54 = vmax.f32 %v11745_v46, %v12130_v35  ;;  %8884 = vmatprep.mubr.msk.f32.mxu1 %vm1183_vm2, %v2450_v51  ;;  %v3801_v5 = vld [vmem:[#allocation2 + $0x121] sm:$0xff] }
 0x1f2   :  { %1896 = vst.msk [vmem:[#allocation3 + $0x208] sm:$0xff] %vm1183_vm2, %v1831_v62  ;;  %v12141_v58 = vld [vmem:[#allocation2 + $0x2f3] sm:$0xff]  ;;  %v12145_v60 = vld [vmem:[#allocation2 + $0x2eb] sm:$0xff]  ;;  %v4182_v16 = vmax.f32 %v4054_v55, %v4118_v4  ;;  %v12157_v28 = vmax.f32 %v2389_v41, %v12103_v37  ;;  %v12165_v43 = vmax.f32 %v12132_v23, %v12134_v12  ;;  %v1648_v55 = vmax.f32 %v12108_v9, %v12110_v13  ;;  %v3737_v4 = vld [vmem:[#allocation2 + $0x120] sm:$0xff] }
 0x1f3   :  { %v15727_v47 = vld [vmem:[#allocation86_spill] sm:$0xff]  ;;  %v15728_v14 = vld [vmem:[#allocation95_spill] sm:$0xff]  ;;  %4309 = vst.msk [vmem:[#allocation3 + $0xc0] sm:$0xff] %vm1183_vm2, %v4245_v21  ;;  %3678 = vst.msk [vmem:[#allocation2 + $0x15a] sm:$0xff] %vm1183_vm2, %v2451_v56  ;;  %v1712_v21 = vmax.f32 %v12143_v59, %v12145_v60  ;;  %v1713_v39 = vmax.f32 %v12139_v3, %v12141_v58  ;;  %8885 = vmatmul.mubr.msk.f32.gmra.mxu1 %vm1183_vm2, %v2451_v56 }
 0x1f4   :  { %9022 = vmatmul.mubr.msk.f32.gmra.mxu0 %vm1183_vm2, %v15727_v47  ;;  %v12151_v42 = vld [vmem:[#allocation2 + $0x2f0] sm:$0xff]  ;;  %v4246_v30 = vmax.f32 %v4182_v16, %v3990_v57  ;;  %v12182_v11 = vld [vmem:[#allocation2 + $0x2a4] sm:$0xff]  ;;  %3680 = vst.msk [vmem:[#allocation2 + $0x172] sm:$0xff] %vm1183_vm2, %v12157_v28  ;;  %3681 = vst.msk [vmem:[#allocation2 + $0x182] sm:$0xff] %vm1183_vm2, %v12161_v26  ;;  %v2391_v46 = vmax.f32 %v11840_v50, %v12165_v43  ;;  %v4057_v57 = vmax.f32 %v3737_v4, %v3801_v5 }
 0x1f5   :  { %v12153_v48 = vld [vmem:[#allocation2 + $0x2f1] sm:$0xff]  ;;  %9024 = vmatprep.mubr.msk.f32.mxu0 %vm1183_vm2, %v15728_v14  ;;  %v12190_v22 = vld [vmem:[#allocation3 + $0x188] sm:$0xff]  ;;  %v12210_v2 = vld [vmem:[#allocation2 + $0x2bc] sm:$0xff]  ;;  %8887 = vmatprep.mubr.msk.f32.mxu1 %vm1183_vm2, %v2452_v8  ;;  %v1834_v8 = vmax.f32 %v11398_v36, %v12182_v11  ;;  %v2265_v36 = vmax.f32 %v11792_v15, %v12132_v23 }
 0x1f6   :  { %v3927_v18 = vld [vmem:[#allocation2 + $0x10b] sm:$0xff]  ;;  %v12169_v17 = vld [vmem:[#allocation2 + $0x294] sm:$0xff]  ;;  %4310 = vst.msk [vmem:[#allocation3 + $0xc8] sm:$0xff] %vm1183_vm2, %v4246_v30  ;;  %v3865_v51 = vld [vmem:[#allocation2 + $0x122] sm:$0xff]  ;;  %v1836_v15 = vmax.f32 %v11579_v49, %v12210_v2  ;;  %v12281_v49 = vmax.f32 %v12134_v12, %v12190_v22 }
 0x1f7   :  { %v3736_v1 = vld [vmem:[#allocation2 + $0x110] sm:$0xff]  ;;  %v4119_v0 = vmax.f32 %v3863_v10, %v3927_v18  ;;  %v15730_v38 = vld [vmem:[#allocation101_spill] sm:$0xff]  ;;  %v15733_v14 = vld [vmem:[#allocation91_spill] sm:$0xff]  ;;  %8888 = vmatmul.mubr.msk.f32.gmra.mxu1 %vm1183_vm2, %v12157_v28  ;;  %1899 = vst.msk [vmem:[#allocation3 + $0x220] sm:$0xff] %vm1183_vm2, %v1834_v8 }
 0x1f8   :  { %v3800_v7 = vld [vmem:[#allocation2 + $0x111] sm:$0xff]  ;;  %v3929_v47 = vld [vmem:[#allocation2 + $0x123] sm:$0xff]  ;;  %9025 = vmatmul.mubr.msk.f32.gmra.mxu0 %vm1183_vm2, %v15733_v14  ;;  %8890 = vmatprep.mubr.msk.f32.mxu1 %vm1183_vm2, %v12161_v26  ;;  %1901 = vst.msk [vmem:[#allocation3 + $0x230] sm:$0xff] %vm1183_vm2, %v1836_v15 }
 0x1f9   :  { %v3864_v53 = vld [vmem:[#allocation2 + $0x112] sm:$0xff]  ;;  %v4056_v9 = vmax.f32 %v3736_v1, %v3800_v7  ;;  %v4183_v16 = vmax.f32 %v4055_v61, %v4119_v0  ;;  %v2392_v1 = vmax.f32 %v2264_v45, %v12180_v54  ;;  %v4121_v61 = vmax.f32 %v3865_v51, %v3929_v47  ;;  %v3738_v30 = vld [vmem:[#allocation2 + $0x128] sm:$0xff]  ;;  %v15738_v23 = vld [vmem:[#allocation40_spill] sm:$0xff] }
 0x1fa   :  { %v3928_v62 = vld [vmem:[#allocation2 + $0x113] sm:$0xff]  ;;  %v3802_v0 = vld [vmem:[#allocation2 + $0x129] sm:$0xff]  ;;  %v1649_v45 = vmax.f32 %v12151_v42, %v12153_v48  ;;  %v3740_v8 = vld [vmem:[#allocation2 + $0x140] sm:$0xff] }
 0x1fb   :  { %v4120_v13 = vmax.f32 %v3864_v53, %v3928_v62  ;;  %v15729_v10 = vld [vmem:[#allocation98_spill] sm:$0xff]  ;;  %v12215_v53 = vmax.f32 %v2391_v46, %v12190_v22  ;;  %v4185_v51 = vmax.f32 %v4057_v57, %v4121_v61  ;;  %v3739_v14 = vld [vmem:[#allocation2 + $0x138] sm:$0xff]  ;;  %v15735_v57 = vld [vmem:[#allocation97_spill] sm:$0xff] }
 0x1fc   :  { %v15731_v33 = vmax.f32 %v15729_v10, %v15730_v38  ;;  %v12203_v18 = vld [vmem:[#allocation3 + $0x190] sm:$0xff]  ;;  %v15745_v12 = vld [vmem:[#allocation60_spill] sm:$0xff] }
 0x1fd   :  { %v12208_v7 = vld [vmem:[#allocation2 + $0x2ac] sm:$0xff]  ;;  %v4184_v60 = vmax.f32 %v4056_v9, %v4120_v13  ;;  %v3992_v5 = vld [vmem:[#allocation2 + $0x114] sm:$0xff]  ;;  %v12223_v9 = vmax.f32 %v2392_v1, %v12203_v18  ;;  %v12225_v13 = vld [vmem:[#allocation2 + $0x2c4] sm:$0xff]  ;;  %3682 = vst.msk [vmem:[#allocation2 + $0x18a] sm:$0xff] %vm1183_vm2, %v12215_v53  ;;  %8891 = vmatmul.mubr.msk.f32.gmra.mxu1 %vm1183_vm2, %v12215_v53 }
 0x1fe   :  { %v1769_v41 = vmax.f32 %v15732_v6, %v15731_v33  ;;  %v3991_v59 = vld [vmem:[#allocation2 + $0x10c] sm:$0xff]  ;;  %v4058_v33 = vmax.f32 %v3738_v30, %v3802_v0  ;;  %v12227_v46 = vld [vmem:[#allocation2 + $0x2d4] sm:$0xff]  ;;  %v3993_v1 = vld [vmem:[#allocation2 + $0x124] sm:$0xff] }
 0x1ff   :  { %v15734_v62 = vld [vmem:[#allocation102_spill] sm:$0xff]  ;;  %v4247_v4 = vmax.f32 %v4183_v16, %v3991_v59  ;;  %v4248_v6 = vmax.f32 %v4184_v60, %v3992_v5  ;;  %v3803_v16 = vld [vmem:[#allocation2 + $0x139] sm:$0xff]  ;;  %v12233_v59 = vmax.f32 %v1648_v55, %v1712_v21  ;;  %3683 = vst.msk [vmem:[#allocation2 + $0x19a] sm:$0xff] %vm1183_vm2, %v12223_v9  ;;  %v15737_v55 = vmax.f32 %v11334_v34, %v11336_v63  ;;  %v3932_v42 = vld [vmem:[#allocation2 + $0x143] sm:$0xff] }
 0x200   :  { %9027 = vmatprep.mubr.msk.f32.mxu0 %vm1183_vm2, %v15734_v62  ;;  %v3866_v10 = vld [vmem:[#allocation2 + $0x12a] sm:$0xff]  ;;  %v1833_v56 = vmax.f32 %v1769_v41, %v12169_v17  ;;  %v3867_v30 = vld [vmem:[#allocation2 + $0x13a] sm:$0xff]  ;;  %v4059_v62 = vmax.f32 %v3739_v14, %v3803_v16  ;;  %v15736_v17 = vmax.f32 %v11327_v24, %v11329_v32  ;;  %v4249_v61 = vmax.f32 %v4185_v51, %v3993_v1  ;;  %v3869_v34 = vld [vmem:[#allocation2 + $0x152] sm:$0xff] }
 0x201   :  { %v3930_v38 = vld [vmem:[#allocation2 + $0x12b] sm:$0xff]  ;;  %4311 = vst.msk [vmem:[#allocation3 + $0xd0] sm:$0xff] %vm1183_vm2, %v4247_v4  ;;  %v3931_v0 = vld [vmem:[#allocation2 + $0x13b] sm:$0xff]  ;;  %9028 = vmatmul.mubr.msk.f32.gmra.mxu0 %vm1183_vm2, %v15735_v57  ;;  %4312 = vst.msk [vmem:[#allocation3 + $0xd8] sm:$0xff] %vm1183_vm2, %v4248_v6  ;;  %8893 = vmatprep.mubr.msk.f32.mxu1 %vm1183_vm2, %v12223_v9 }
 0x202   :  { %v4122_v47 = vmax.f32 %v3866_v10, %v3930_v38  ;;  %v1771_v41 = vmax.f32 %v15737_v55, %v15736_v17  ;;  %v12248_v21 = vld [vmem:[#allocation2 + $0x2dc] sm:$0xff]  ;;  %v12250_v60 = vld [vmem:[#allocation2 + $0x2ec] sm:$0xff]  ;;  %v4123_v38 = vmax.f32 %v3867_v30, %v3931_v0  ;;  %9030 = vmatprep.mubr.msk.f32.mxu0 %vm1183_vm2, %v11440_v20  ;;  %1898 = vst.msk [vmem:[#allocation3 + $0x218] sm:$0xff] %vm1183_vm2, %v1833_v56  ;;  %v12258_v24 = vld [vmem:[#allocation2 + $0x2f4] sm:$0xff] }
 0x203   :  { %v3741_v5 = vld [vmem:[#allocation2 + $0x150] sm:$0xff]  ;;  %v3995_v63 = vld [vmem:[#allocation2 + $0x13c] sm:$0xff]  ;;  %v15741_v51 = vld [vmem:[#allocation45_spill] sm:$0xff]  ;;  %4313 = vst.msk [vmem:[#allocation3 + $0xe0] sm:$0xff] %vm1183_vm2, %v4249_v61 }
 0x204   :  { %v4186_v4 = vmax.f32 %v4058_v33, %v4122_v47  ;;  %v3805_v10 = vld [vmem:[#allocation2 + $0x151] sm:$0xff]  ;;  %v1835_v33 = vmax.f32 %v1771_v41, %v12208_v7  ;;  %v12273_v1 = vld [vmem:[#allocation2 + $0x168] sm:$0xff]  ;;  %v4187_v0 = vmax.f32 %v4059_v62, %v4123_v38  ;;  %v12285_v7 = vmax.f32 %v12130_v35, %v12203_v18  ;;  %v15747_v61 = vld [vmem:[#allocation64_spill] sm:$0xff] }
 0x205   :  { %v3994_v32 = vld [vmem:[#allocation2 + $0x12c] sm:$0xff]  ;;  %v4061_v11 = vmax.f32 %v3741_v5, %v3805_v10  ;;  %v3742_v17 = vld [vmem:[#allocation2 + $0x158] sm:$0xff]  ;;  %v1838_v62 = vmax.f32 %v15745_v12, %v12227_v46  ;;  %v1777_v46 = vmax.f32 %v1649_v45, %v1713_v39  ;;  %v2393_v39 = vmax.f32 %v2265_v36, %v12281_v49 }
 0x206   :  { %v15739_v20 = vld [vmem:[#allocation42_spill] sm:$0xff]  ;;  %v4250_v56 = vmax.f32 %v4186_v4, %v3994_v32  ;;  %v15744_v55 = vld [vmem:[#allocation37_spill] sm:$0xff]  ;;  %1900 = vst.msk [vmem:[#allocation3 + $0x228] sm:$0xff] %vm1183_vm2, %v1835_v33  ;;  %v4251_v32 = vmax.f32 %v4187_v0, %v3995_v63  ;;  %v3806_v33 = vld [vmem:[#allocation2 + $0x159] sm:$0xff] }
 0x207   :  { %v15740_v6 = vmax.f32 %v15738_v23, %v15739_v20  ;;  %v15742_v47 = vld [vmem:[#allocation46_spill] sm:$0xff]  ;;  %9031 = vmatmul.mubr.msk.f32.gmra.mxu0 %vm1183_vm2, %v15744_v55  ;;  %v15749_v4 = vld [vmem:[#allocation69_spill] sm:$0xff]  ;;  %v3870_v63 = vld [vmem:[#allocation2 + $0x15a] sm:$0xff]  ;;  %1903 = vst.msk [vmem:[#allocation3 + $0x240] sm:$0xff] %vm1183_vm2, %v1838_v62  ;;  %v4062_v48 = vmax.f32 %v3742_v17, %v3806_v33  ;;  %v1841_v53 = vmax.f32 %v1777_v46, %v12258_v24 }
 0x208   :  { %v15743_v14 = vmax.f32 %v15741_v51, %v15742_v47  ;;  %v12275_v28 = vld [vmem:[#allocation2 + $0x169] sm:$0xff]  ;;  %v3933_v30 = vld [vmem:[#allocation2 + $0x153] sm:$0xff]  ;;  %4314 = vst.msk [vmem:[#allocation3 + $0xe8] sm:$0xff] %vm1183_vm2, %v4250_v56  ;;  %v3804_v23 = vld [vmem:[#allocation2 + $0x141] sm:$0xff] }
 0x209   :  { %v3871_v2 = vld [vmem:[#allocation2 + $0x16a] sm:$0xff]  ;;  %v4125_v57 = vmax.f32 %v3869_v34, %v3933_v30  ;;  %v3868_v51 = vld [vmem:[#allocation2 + $0x142] sm:$0xff]  ;;  %v4060_v47 = vmax.f32 %v3740_v8, %v3804_v23  ;;  %v4063_v3 = vmax.f32 %v12273_v1, %v12275_v28  ;;  %4315 = vst.msk [vmem:[#allocation3 + $0xf0] sm:$0xff] %vm1183_vm2, %v4251_v32  ;;  %v3872_v58 = vld [vmem:[#allocation2 + $0x172] sm:$0xff] }
 0x20a   :  { %v1773_v16 = vmax.f32 %v15743_v14, %v15740_v6  ;;  %v15746_v41 = vld [vmem:[#allocation50_spill] sm:$0xff]  ;;  %v15752_v20 = vld [vmem:[#allocation65_spill] sm:$0xff]  ;;  %v15753_v56 = vld [vmem:[#allocation76_spill] sm:$0xff]  ;;  %1906 = vst.msk [vmem:[#allocation3 + $0x258] sm:$0xff] %vm1183_vm2, %v1841_v53 }
 0x20b   :  { %v15748_v35 = vmax.f32 %v15746_v41, %v15747_v61  ;;  %v15750_v5 = vld [vmem:[#allocation70_spill] sm:$0xff]  ;;  %9033 = vmatprep.mubr.msk.f32.mxu0 %vm1183_vm2, %v15752_v20  ;;  %v4189_v15 = vmax.f32 %v4061_v11, %v4125_v57  ;;  %v2394_v1 = vmax.f32 %v15753_v56, %v12285_v7  ;;  %v15754_v28 = vld [vmem:[#allocation49_spill] sm:$0xff]  ;;  %v12329_v9 = vld [vmem:[#allocation3 + $0xd8] sm:$0xff] }
 0x20c   :  { %v1837_v26 = vmax.f32 %v1773_v16, %v12225_v13  ;;  %v15751_v10 = vmax.f32 %v15749_v4, %v15750_v5  ;;  %v3744_v34 = vld [vmem:[#allocation2 + $0x170] sm:$0xff]  ;;  %v1840_v13 = vmax.f32 %v12233_v59, %v12250_v60  ;;  %v4124_v16 = vmax.f32 %v3868_v51, %v3932_v42  ;;  %9034 = vmatmul.mubr.msk.f32.gmra.mxu0 %vm1183_vm2, %v15754_v28  ;;  %v3996_v30 = vld [vmem:[#allocation2 + $0x144] sm:$0xff]  ;;  %v3998_v17 = vld [vmem:[#allocation2 + $0x15c] sm:$0xff] }
 0x20d   :  { %v3808_v6 = vld [vmem:[#allocation2 + $0x171] sm:$0xff]  ;;  %v12332_v24 = vld [vmem:[#allocation3 + $0xc8] sm:$0xff]  ;;  %v12334_v8 = vld [vmem:[#allocation3 + $0xe0] sm:$0xff] }
 0x20e   :  { %v1775_v38 = vmax.f32 %v15751_v10, %v15748_v35  ;;  %1902 = vst.msk [vmem:[#allocation3 + $0x238] sm:$0xff] %vm1183_vm2, %v1837_v26  ;;  %v3997_v60 = vld [vmem:[#allocation2 + $0x154] sm:$0xff]  ;;  %1905 = vst.msk [vmem:[#allocation3 + $0x250] sm:$0xff] %vm1183_vm2, %v1840_v13  ;;  %v3935_v11 = vld [vmem:[#allocation2 + $0x16b] sm:$0xff]  ;;  %v4064_v14 = vmax.f32 %v3744_v34, %v3808_v6  ;;  %v4188_v12 = vmax.f32 %v4060_v47, %v4124_v16 }
 0x20f   :  { %v4253_v45 = vmax.f32 %v4189_v15, %v3997_v60  ;;  %v3936_v36 = vld [vmem:[#allocation2 + $0x173] sm:$0xff]  ;;  %v4127_v57 = vmax.f32 %v3871_v2, %v3935_v11  ;;  %v2202_v35 = vld [vmem:[#allocation3 + $0x1a0] sm:$0xff]  ;;  %v12339_v2 = vld [vmem:[#allocation3 + $0xe8] sm:$0xff]  ;;  %v4698_v15 = vmax.f32 %v12332_v24, %v12329_v9 }
 0x210   :  { %v1839_v59 = vmax.f32 %v1775_v38, %v12248_v21  ;;  %v3934_v21 = vld [vmem:[#allocation2 + $0x15b] sm:$0xff]  ;;  %v3999_v55 = vld [vmem:[#allocation2 + $0x16c] sm:$0xff]  ;;  %v4128_v26 = vmax.f32 %v3872_v58, %v3936_v36  ;;  %v4252_v38 = vmax.f32 %v4188_v12, %v3996_v30  ;;  %v2458_v34 = vmax.f32 %v2394_v1, %v2202_v35  ;;  %v3937_v6 = vld [vmem:[#allocation2 + $0x183] sm:$0xff] }
 0x211   :  { %v4126_v0 = vmax.f32 %v3870_v63, %v3934_v21  ;;  %4317 = vst.msk [vmem:[#allocation3 + $0x100] sm:$0xff] %vm1183_vm2, %v4253_v45  ;;  %v4191_v41 = vmax.f32 %v4063_v3, %v4127_v57  ;;  %v2201_v61 = vld [vmem:[#allocation3 + $0x198] sm:$0xff]  ;;  %v3745_v4 = vld [vmem:[#allocation2 + $0x180] sm:$0xff]  ;;  %v12337_v5 = vld [vmem:[#allocation3 + $0xd0] sm:$0xff]  ;;  %v4700_v53 = vmax.f32 %v12329_v9, %v12339_v2 }
 0x212   :  { %1904 = vst.msk [vmem:[#allocation3 + $0x248] sm:$0xff] %vm1183_vm2, %v1839_v59  ;;  %v4192_v10 = vmax.f32 %v4064_v14, %v4128_v26  ;;  %v2457_v32 = vmax.f32 %v2393_v39, %v2201_v61  ;;  %v3809_v23 = vld [vmem:[#allocation2 + $0x181] sm:$0xff]  ;;  %v4000_v20 = vld [vmem:[#allocation2 + $0x174] sm:$0xff]  ;;  %4316 = vst.msk [vmem:[#allocation3 + $0xf8] sm:$0xff] %vm1183_vm2, %v4252_v38  ;;  %v12350_v3 = vmax.f32 %v12190_v22, %v2201_v61 }
 0x213   :  { %v4190_v62 = vmax.f32 %v4062_v48, %v4126_v0  ;;  %v3873_v33 = vld [vmem:[#allocation2 + $0x182] sm:$0xff]  ;;  %v4255_v46 = vmax.f32 %v4191_v41, %v3999_v55  ;;  %v4065_v51 = vmax.f32 %v3745_v4, %v3809_v23  ;;  %v12343_v47 = vld [vmem:[#allocation3 + $0xf0] sm:$0xff]  ;;  %3685 = vst.msk [vmem:[#allocation2 + $0x1b2] sm:$0xff] %vm1183_vm2, %v2458_v34  ;;  %v12353_v48 = vmax.f32 %v12203_v18, %v2202_v35  ;;  %v3747_v36 = vld [vmem:[#allocation2 + $0x198] sm:$0xff] }
 0x214   :  { %v2203_v63 = vld [vmem:[#allocation3 + $0x1a8] sm:$0xff]  ;;  %v4256_v59 = vmax.f32 %v4192_v10, %v4000_v20  ;;  %8894 = vmatmul.mubr.msk.f32.gmra.mxu1 %vm1183_vm2, %v2457_v32  ;;  %3684 = vst.msk [vmem:[#allocation2 + $0x1a2] sm:$0xff] %vm1183_vm2, %v2457_v32  ;;  %v4129_v60 = vmax.f32 %v3873_v33, %v3937_v6  ;;  %v4699_v39 = vmax.f32 %v12337_v5, %v12334_v8  ;;  %v2204_v1 = vld [vmem:[#allocation3 + $0x1b0] sm:$0xff]  ;;  %v3811_v30 = vld [vmem:[#allocation2 + $0x199] sm:$0xff] }
 0x215   :  { %v4254_v13 = vmax.f32 %v4190_v62, %v3998_v17  ;;  %v3746_v58 = vld [vmem:[#allocation2 + $0x188] sm:$0xff]  ;;  %4319 = vst.msk [vmem:[#allocation3 + $0x110] sm:$0xff] %vm1183_vm2, %v4255_v46  ;;  %8896 = vmatprep.mubr.msk.f32.mxu1 %vm1183_vm2, %v2458_v34  ;;  %v12362_v14 = vmax.f32 %v2201_v61, %v2203_v63  ;;  %v2395_v16 = vmax.f32 %v12165_v43, %v12350_v3  ;;  %v2205_v26 = vld [vmem:[#allocation3 + $0x1b8] sm:$0xff]  ;;  %v12378_v10 = vld [vmem:[#allocation3 + $0x1d0] sm:$0xff] }
 0x216   :  { %v3810_v42 = vld [vmem:[#allocation2 + $0x189] sm:$0xff]  ;;  %4320 = vst.msk [vmem:[#allocation3 + $0x118] sm:$0xff] %vm1183_vm2, %v4256_v59  ;;  %v4193_v18 = vmax.f32 %v4065_v51, %v4129_v60  ;;  %v2396_v28 = vmax.f32 %v12180_v54, %v12353_v48  ;;  %v4701_v57 = vmax.f32 %v12334_v8, %v12343_v47  ;;  %v4067_v55 = vmax.f32 %v3747_v36, %v3811_v30  ;;  %v2206_v54 = vld [vmem:[#allocation3 + $0x1c0] sm:$0xff] }
 0x217   :  { %4318 = vst.msk [vmem:[#allocation3 + $0x108] sm:$0xff] %vm1183_vm2, %v4254_v13  ;;  %v4001_v45 = vld [vmem:[#allocation2 + $0x184] sm:$0xff]  ;;  %v4066_v11 = vmax.f32 %v3746_v58, %v3810_v42  ;;  %v4002_v17 = vld [vmem:[#allocation2 + $0x18c] sm:$0xff]  ;;  %v2397_v12 = vmax.f32 %v12281_v49, %v12362_v14  ;;  %v12373_v62 = vmax.f32 %v2202_v35, %v2204_v1  ;;  %v2459_v61 = vmax.f32 %v2395_v16, %v2203_v63  ;;  %v3875_v8 = vld [vmem:[#allocation2 + $0x19a] sm:$0xff] }
 0x218   :  { %v3874_v22 = vld [vmem:[#allocation2 + $0x18a] sm:$0xff]  ;;  %v4447_v0 = vld [vmem:[#allocation3 + $0x100] sm:$0xff]  ;;  %v4257_v41 = vmax.f32 %v4193_v18, %v4001_v45  ;;  %v2460_v38 = vmax.f32 %v2396_v28, %v2204_v1  ;;  %v12382_v23 = vmax.f32 %v2203_v63, %v2205_v26  ;;  %v12384_v49 = vld [vmem:[#allocation3 + $0x1d8] sm:$0xff]  ;;  %v12389_v20 = vmax.f32 %v2204_v1, %v2206_v54 }
 0x219   :  { %v3938_v21 = vld [vmem:[#allocation2 + $0x18b] sm:$0xff]  ;;  %v4703_v43 = vmax.f32 %v12343_v47, %v4447_v0  ;;  %v2461_v32 = vmax.f32 %v2397_v12, %v2205_v26  ;;  %v2398_v34 = vmax.f32 %v12285_v7, %v12373_v62  ;;  %8897 = vmatmul.mubr.msk.f32.gmra.mxu1 %vm1183_vm2, %v2459_v61  ;;  %3686 = vst.msk [vmem:[#allocation2 + $0x1ba] sm:$0xff] %vm1183_vm2, %v2459_v61  ;;  %v12394_v46 = vld [vmem:[#allocation3 + $0xf8] sm:$0xff] }
 0x21a   :  { %v4130_v56 = vmax.f32 %v3874_v22, %v3938_v21  ;;  %v12376_v5 = vld [vmem:[#allocation3 + $0x1c8] sm:$0xff]  ;;  %4321 = vst.msk [vmem:[#allocation3 + $0x160] sm:$0xff] %vm1183_vm2, %v4257_v41  ;;  %8899 = vmatprep.mubr.msk.f32.mxu1 %vm1183_vm2, %v2460_v38  ;;  %3687 = vst.msk [vmem:[#allocation2 + $0x1ca] sm:$0xff] %vm1183_vm2, %v2460_v38  ;;  %v2399_v51 = vmax.f32 %v12350_v3, %v12382_v23  ;;  %v12402_v63 = vmax.f32 %v2206_v54, %v12378_v10  ;;  %v3813_v24 = vld [vmem:[#allocation2 + $0x1b1] sm:$0xff] }
 0x21b   :  { %v4827_v35 = vmax.f32 %v4699_v39, %v4703_v43  ;;  %v12392_v13 = vmax.f32 %v2205_v26, %v12376_v5  ;;  %v3939_v7 = vld [vmem:[#allocation2 + $0x19b] sm:$0xff]  ;;  %3688 = vst.msk [vmem:[#allocation2 + $0x1d2] sm:$0xff] %vm1183_vm2, %v2461_v32  ;;  %v2462_v6 = vmax.f32 %v2398_v34, %v2206_v54  ;;  %v12406_v47 = vmax.f32 %v12376_v5, %v12384_v49  ;;  %v12926_v40 = vld [vmem:[#allocation3 + $0x248] sm:$0xff] }
 0x21c   :  { %v4194_v4 = vmax.f32 %v4066_v11, %v4130_v56  ;;  %v4511_v60 = vld [vmem:[#allocation3 + $0x110] sm:$0xff]  ;;  %v4702_v58 = vmax.f32 %v12339_v2, %v12394_v46  ;;  %v4131_v42 = vmax.f32 %v3875_v8, %v3939_v7  ;;  %v3748_v39 = vld [vmem:[#allocation2 + $0x1a0] sm:$0xff]  ;;  %v2400_v45 = vmax.f32 %v12353_v48, %v12389_v20 }
 0x21d   :  { %v2401_v3 = vmax.f32 %v12362_v14, %v12392_v13  ;;  %v4512_v22 = vld [vmem:[#allocation3 + $0x118] sm:$0xff]  ;;  %v4765_v11 = vmax.f32 %v4447_v0, %v4511_v60  ;;  %v4767_v18 = vmax.f32 %v4511_v60, %v12061_v52  ;;  %v12417_v16 = vmax.f32 %v4827_v35, %v4511_v60  ;;  %v3812_v1 = vld [vmem:[#allocation2 + $0x1a1] sm:$0xff]  ;;  %3689 = vst.msk [vmem:[#allocation2 + $0x1e2] sm:$0xff] %vm1183_vm2, %v2462_v6 }
 0x21e   :  { %v4258_v33 = vmax.f32 %v4194_v4, %v4002_v17  ;;  %v4448_v59 = vld [vmem:[#allocation3 + $0x108] sm:$0xff]  ;;  %v4003_v56 = vld [vmem:[#allocation2 + $0x19c] sm:$0xff]  ;;  %v4768_v36 = vmax.f32 %v4512_v22, %v12072_v19  ;;  %v4826_v48 = vmax.f32 %v4698_v15, %v4702_v58  ;;  %v4195_v30 = vmax.f32 %v4067_v55, %v4131_v42  ;;  %8900 = vmatmul.mubr.msk.f32.gmra.mxu1 %vm1183_vm2, %v2461_v32  ;;  %v3749_v4 = vld [vmem:[#allocation2 + $0x1b0] sm:$0xff] }
 0x21f   :  { %v4704_v21 = vmax.f32 %v12394_v46, %v4448_v59  ;;  %15755 = vst [vmem:[#allocation71_spill] sm:$0xff] %v12417_v16  ;;  %v4766_v28 = vmax.f32 %v4448_v59, %v4512_v22  ;;  %v3876_v17 = vld [vmem:[#allocation2 + $0x1a2] sm:$0xff]  ;;  %v4829_v12 = vmax.f32 %v4701_v57, %v4765_v11  ;;  %v4831_v41 = vmax.f32 %v4703_v43, %v4767_v18  ;;  %v3877_v15 = vld [vmem:[#allocation2 + $0x1b2] sm:$0xff] }
 0x220   :  { %4322 = vst.msk [vmem:[#allocation3 + $0x168] sm:$0xff] %vm1183_vm2, %v4258_v33  ;;  %v3940_v0 = vld [vmem:[#allocation2 + $0x1a3] sm:$0xff]  ;;  %5601 = vst.msk [vmem:[#allocation2 + $0x13a] sm:$0xff] %vm1183_vm2, %v12417_v16  ;;  %v4068_v61 = vmax.f32 %v3748_v39, %v3812_v1  ;;  %8902 = vmatprep.mubr.msk.f32.mxu1 %vm1183_vm2, %v2462_v6  ;;  %v12431_v38 = vmax.f32 %v4826_v48, %v4448_v59  ;;  %v4259_v8 = vmax.f32 %v4195_v30, %v4003_v56  ;;  %v3941_v43 = vld [vmem:[#allocation2 + $0x1b3] sm:$0xff] }
 0x221   :  { %v4828_v26 = vmax.f32 %v4700_v53, %v4704_v21  ;;  %v4830_v55 = vmax.f32 %v4702_v58, %v4766_v28  ;;  %v4832_v54 = vmax.f32 %v4704_v21, %v4768_v36  ;;  %v12436_v9 = vmax.f32 %v4829_v12, %v12061_v52  ;;  %v4004_v53 = vld [vmem:[#allocation2 + $0x1a4] sm:$0xff]  ;;  %v3750_v34 = vld [vmem:[#allocation2 + $0x1b8] sm:$0xff]  ;;  %v4619_v16 = vld [vmem:[#allocation3 + $0x90] sm:$0xff] }
 0x222   :  { %15756 = vst [vmem:[#allocation23_spill] sm:$0xff] %v12431_v38  ;;  %v12439_v2 = vmax.f32 %v4831_v41, %v12100_v27  ;;  %v4132_v57 = vmax.f32 %v3876_v17, %v3940_v0  ;;  %5600 = vst.msk [vmem:[#allocation2 + $0x12a] sm:$0xff] %vm1183_vm2, %v12431_v38  ;;  %v4069_v52 = vmax.f32 %v3749_v4, %v3813_v24  ;;  %v3814_v6 = vld [vmem:[#allocation2 + $0x1b9] sm:$0xff]  ;;  %v3751_v21 = vld [vmem:[#allocation2 + $0x1c8] sm:$0xff] }
 0x223   :  { %v12433_v32 = vmax.f32 %v4828_v26, %v4512_v22  ;;  %15758 = vst [vmem:[#allocation83_spill] sm:$0xff] %v12436_v9  ;;  %v12442_v35 = vmax.f32 %v4830_v55, %v12072_v19  ;;  %v12445_v33 = vmax.f32 %v4832_v54, %v12103_v37  ;;  %4323 = vst.msk [vmem:[#allocation3 + $0x170] sm:$0xff] %vm1183_vm2, %v4259_v8  ;;  %v3878_v27 = vld [vmem:[#allocation2 + $0x1ba] sm:$0xff]  ;;  %v12459_v11 = vld [vmem:[#allocation3 + $0x1e8] sm:$0xff] }
 0x224   :  { %15759 = vst [vmem:[#allocation103_spill] sm:$0xff] %v12439_v2  ;;  %v4133_v7 = vmax.f32 %v3877_v15, %v3941_v43  ;;  %v3942_v59 = vld [vmem:[#allocation2 + $0x1bb] sm:$0xff]  ;;  %5603 = vst.msk [vmem:[#allocation2 + $0x152] sm:$0xff] %vm1183_vm2, %v12436_v9  ;;  %v4196_v19 = vmax.f32 %v4068_v61, %v4132_v57  ;;  %v2463_v58 = vmax.f32 %v2399_v51, %v12376_v5  ;;  %v3815_v1 = vld [vmem:[#allocation2 + $0x1c9] sm:$0xff] }
 0x225   :  { %15757 = vst [vmem:[#allocation72_spill] sm:$0xff] %v12433_v32  ;;  %15760 = vst [vmem:[#allocation99_spill] sm:$0xff] %v12442_v35  ;;  %v12450_v60 = vld [vmem:[#allocation3 + $0x1e0] sm:$0xff]  ;;  %v4005_v37 = vld [vmem:[#allocation2 + $0x1b4] sm:$0xff]  ;;  %v4070_v39 = vmax.f32 %v3750_v34, %v3814_v6  ;;  %v4134_v22 = vmax.f32 %v3878_v27, %v3942_v59  ;;  %v2464_v56 = vmax.f32 %v2400_v45, %v12378_v10 }
 0x226   :  { %15761 = vst [vmem:[#allocation96_spill] sm:$0xff] %v12445_v33  ;;  %5602 = vst.msk [vmem:[#allocation2 + $0x142] sm:$0xff] %vm1183_vm2, %v12433_v32  ;;  %v4006_v42 = vld [vmem:[#allocation2 + $0x1bc] sm:$0xff]  ;;  %v4197_v18 = vmax.f32 %v4069_v52, %v4133_v7  ;;  %v3879_v28 = vld [vmem:[#allocation2 + $0x1ca] sm:$0xff]  ;;  %v2465_v5 = vmax.f32 %v2401_v3, %v12384_v49  ;;  %v4260_v30 = vmax.f32 %v4196_v19, %v4004_v53  ;;  %8903 = vmatmul.mubr.msk.f32.gmra.mxu1 %vm1183_vm2, %v2463_v58 }
 0x227   :  { %5605 = vst.msk [vmem:[#allocation2 + $0x16a] sm:$0xff] %vm1183_vm2, %v12439_v2  ;;  %5604 = vst.msk [vmem:[#allocation2 + $0x15a] sm:$0xff] %vm1183_vm2, %v12442_v35  ;;  %v3943_v36 = vld [vmem:[#allocation2 + $0x1cb] sm:$0xff]  ;;  %v4198_v17 = vmax.f32 %v4070_v39, %v4134_v22  ;;  %v4071_v0 = vmax.f32 %v3751_v21, %v3815_v1  ;;  %v4353_v41 = vld [vmem:[#allocation3] sm:$0xff]  ;;  %8905 = vmatprep.mubr.msk.f32.mxu1 %vm1183_vm2, %v2464_v56  ;;  %v2402_v15 = vmax.f32 %v12373_v62, %v12402_v63 }
 0x228   :  { %5606 = vst.msk [vmem:[#allocation2 + $0x172] sm:$0xff] %vm1183_vm2, %v12445_v33  ;;  %v12470_v51 = vld [vmem:[#allocation3 + $0x1f0] sm:$0xff]  ;;  %v12472_v48 = vld [vmem:[#allocation3 + $0x168] sm:$0xff]  ;;  %3690 = vst.msk [vmem:[#allocation2 + $0x1ea] sm:$0xff] %vm1183_vm2, %v2463_v58  ;;  %v4135_v45 = vmax.f32 %v3879_v28, %v3943_v36  ;;  %v4261_v61 = vmax.f32 %v4197_v18, %v4005_v37  ;;  %v2403_v55 = vmax.f32 %v12382_v23, %v12406_v47 }
 0x229   :  { %v3752_v26 = vld [vmem:[#allocation2 + $0x1d0] sm:$0xff]  ;;  %3691 = vst.msk [vmem:[#allocation2 + $0x1fa] sm:$0xff] %vm1183_vm2, %v2464_v56  ;;  %3692 = vst.msk [vmem:[#allocation2 + $0x202] sm:$0xff] %vm1183_vm2, %v2465_v5  ;;  %v4262_v54 = vmax.f32 %v4198_v17, %v4006_v42  ;;  %v12486_v57 = vmax.f32 %v12378_v10, %v12450_v60  ;;  %v12490_v34 = vld [vmem:[#allocation3 + $0x20] sm:$0xff]  ;;  %v2466_v6 = vmax.f32 %v2402_v15, %v12450_v60 }
 0x22a   :  { %v3816_v12 = vld [vmem:[#allocation2 + $0x1d1] sm:$0xff]  ;;  %4324 = vst.msk [vmem:[#allocation3 + $0x178] sm:$0xff] %vm1183_vm2, %v4260_v30  ;;  %v4199_v8 = vmax.f32 %v4071_v0, %v4135_v45  ;;  %4325 = vst.msk [vmem:[#allocation3 + $0x180] sm:$0xff] %vm1183_vm2, %v4261_v61  ;;  %v2467_v27 = vmax.f32 %v2403_v55, %v12459_v11  ;;  %v12503_v10 = vmax.f32 %v12384_v49, %v12459_v11  ;;  %8906 = vmatmul.mubr.msk.f32.gmra.mxu1 %vm1183_vm2, %v2465_v5  ;;  %v12509_v42 = vld [vmem:[#allocation3 + $0x200] sm:$0xff] }
 0x22b   :  { %v4007_v14 = vld [vmem:[#allocation2 + $0x1cc] sm:$0xff]  ;;  %v4072_v24 = vmax.f32 %v3752_v26, %v3816_v12  ;;  %v12492_v7 = vld [vmem:[#allocation3 + $0x158] sm:$0xff]  ;;  %4326 = vst.msk [vmem:[#allocation3 + $0x188] sm:$0xff] %vm1183_vm2, %v4262_v54  ;;  %v2404_v58 = vmax.f32 %v12389_v20, %v12486_v57  ;;  %v12513_v39 = vmax.f32 %v12450_v60, %v12470_v51  ;;  %v4361_v22 = vld [vmem:[#allocation3 + $0x40] sm:$0xff]  ;;  %8908 = vmatprep.mubr.msk.f32.mxu1 %vm1183_vm2, %v2466_v6 }
 0x22c   :  { %v3880_v3 = vld [vmem:[#allocation2 + $0x1d2] sm:$0xff]  ;;  %v4708_v62 = vmax.f32 %v12492_v7, %v12472_v48  ;;  %v4263_v19 = vmax.f32 %v4199_v8, %v4007_v14  ;;  %3693 = vst.msk [vmem:[#allocation2 + $0x212] sm:$0xff] %vm1183_vm2, %v2466_v6  ;;  %v12519_v1 = vld [vmem:[#allocation2 + $0x1e0] sm:$0xff]  ;;  %3694 = vst.msk [vmem:[#allocation2 + $0x21a] sm:$0xff] %vm1183_vm2, %v2467_v27  ;;  %v2405_v20 = vmax.f32 %v12392_v13, %v12503_v10 }
 0x22d   :  { %v3944_v4 = vld [vmem:[#allocation2 + $0x1d3] sm:$0xff]  ;;  %v5666_v49 = vld [vmem:[#allocation2 + $0x140] sm:$0xff]  ;;  %v2468_v12 = vmax.f32 %v2404_v58, %v12470_v51  ;;  %v2406_v13 = vmax.f32 %v12402_v63, %v12513_v39 }
 0x22e   :  { %v4136_v53 = vmax.f32 %v3880_v3, %v3944_v4  ;;  %v12488_v43 = vld [vmem:[#allocation3 + $0x10] sm:$0xff]  ;;  %v12499_v59 = vld [vmem:[#allocation3 + $0x1f8] sm:$0xff]  ;;  %v5730_v18 = vld [vmem:[#allocation2 + $0x141] sm:$0xff]  ;;  %4327 = vst.msk [vmem:[#allocation3 + $0x190] sm:$0xff] %vm1183_vm2, %v4263_v19  ;;  %8909 = vmatmul.mubr.msk.f32.gmra.mxu1 %vm1183_vm2, %v2467_v27 }
 0x22f   :  { %v4359_v52 = vld [vmem:[#allocation3 + $0x30] sm:$0xff]  ;;  %v5794_v56 = vld [vmem:[#allocation2 + $0x142] sm:$0xff]  ;;  %v12527_v60 = vmax.f32 %v4353_v41, %v12488_v43  ;;  %v4675_v36 = vmax.f32 %v12488_v43, %v12490_v34  ;;  %v5668_v30 = vld [vmem:[#allocation2 + $0x158] sm:$0xff]  ;;  %v5986_v45 = vmax.f32 %v5666_v49, %v5730_v18  ;;  %v2469_v4 = vmax.f32 %v2405_v20, %v12499_v59  ;;  %3695 = vst.msk [vmem:[#allocation2 + $0x22a] sm:$0xff] %vm1183_vm2, %v2468_v12 }
 0x230   :  { %v4008_v23 = vld [vmem:[#allocation2 + $0x1d4] sm:$0xff]  ;;  %v4200_v37 = vmax.f32 %v4072_v24, %v4136_v53  ;;  %v12521_v28 = vld [vmem:[#allocation2 + $0x1e1] sm:$0xff]  ;;  %v12532_v5 = vmax.f32 %v12490_v34, %v4359_v52  ;;  %v12539_v24 = vmax.f32 %v4359_v52, %v4361_v22  ;;  %v2470_v63 = vmax.f32 %v2406_v13, %v12509_v42  ;;  %8911 = vmatprep.mubr.msk.f32.mxu1 %vm1183_vm2, %v2468_v12 }
 0x231   :  { %v12515_v21 = vld [vmem:[#allocation3 + $0x50] sm:$0xff]  ;;  %v5732_v0 = vld [vmem:[#allocation2 + $0x159] sm:$0xff]  ;;  %v5858_v55 = vld [vmem:[#allocation2 + $0x143] sm:$0xff]  ;;  %v12552_v52 = vmax.f32 %v12459_v11, %v12499_v59  ;;  %3696 = vst.msk [vmem:[#allocation2 + $0x232] sm:$0xff] %vm1183_vm2, %v2469_v4 }
 0x232   :  { %v5670_v17 = vld [vmem:[#allocation2 + $0x170] sm:$0xff]  ;;  %v4264_v26 = vmax.f32 %v4200_v37, %v4008_v23  ;;  %v5796_v61 = vld [vmem:[#allocation2 + $0x15a] sm:$0xff]  ;;  %v5988_v3 = vmax.f32 %v5668_v30, %v5732_v0  ;;  %v12542_v15 = vmax.f32 %v4361_v22, %v12515_v21  ;;  %v4801_v34 = vmax.f32 %v12527_v60, %v12532_v5  ;;  %v3881_v37 = vld [vmem:[#allocation2 + $0x1e2] sm:$0xff]  ;;  %3697 = vst.msk [vmem:[#allocation2 + $0x242] sm:$0xff] %vm1183_vm2, %v2470_v63 }
 0x233   :  { %v5734_v41 = vld [vmem:[#allocation2 + $0x171] sm:$0xff]  ;;  %v5860_v54 = vld [vmem:[#allocation2 + $0x15b] sm:$0xff]  ;;  %v6050_v23 = vmax.f32 %v5794_v56, %v5858_v55  ;;  %v4803_v27 = vmax.f32 %v4675_v36, %v12539_v24  ;;  %v5922_v58 = vld [vmem:[#allocation2 + $0x144] sm:$0xff]  ;;  %v2407_v36 = vmax.f32 %v12406_v47, %v12552_v52  ;;  %8912 = vmatmul.mubr.msk.f32.gmra.mxu1 %vm1183_vm2, %v2469_v4 }
 0x234   :  { %v5798_v14 = vld [vmem:[#allocation2 + $0x172] sm:$0xff]  ;;  %v5990_v53 = vmax.f32 %v5670_v17, %v5734_v41  ;;  %4328 = vst.msk [vmem:[#allocation3 + $0x198] sm:$0xff] %vm1183_vm2, %v4264_v26  ;;  %v6052_v6 = vmax.f32 %v5796_v61, %v5860_v54  ;;  %v5924_v49 = vld [vmem:[#allocation2 + $0x15c] sm:$0xff]  ;;  %v4073_v17 = vmax.f32 %v12519_v1, %v12521_v28  ;;  %v4805_v56 = vmax.f32 %v12532_v5, %v12542_v15  ;;  %v12566_v26 = vld [vmem:[#allocation3 + $0x208] sm:$0xff] }
 0x235   :  { %v5862_v8 = vld [vmem:[#allocation2 + $0x173] sm:$0xff]  ;;  %v3945_v30 = vld [vmem:[#allocation2 + $0x1e3] sm:$0xff]  ;;  %v12564_v0 = vmax.f32 %v4801_v34, %v4361_v22  ;;  %v6114_v12 = vmax.f32 %v5986_v45, %v6050_v23  ;;  %v12580_v47 = vmax.f32 %v4803_v27, %v12515_v21  ;;  %8914 = vmatprep.mubr.msk.f32.mxu1 %vm1183_vm2, %v2470_v63 }
 0x236   :  { %v6054_v19 = vmax.f32 %v5798_v14, %v5862_v8  ;;  %v5926_v18 = vld [vmem:[#allocation2 + $0x174] sm:$0xff]  ;;  %v12560_v11 = vld [vmem:[#allocation3 + $0x60] sm:$0xff]  ;;  %v6116_v13 = vmax.f32 %v5988_v3, %v6052_v6  ;;  %v12573_v1 = vld [vmem:[#allocation3 + $0x188] sm:$0xff]  ;;  %v4137_v5 = vmax.f32 %v3881_v37, %v3945_v30 }
 0x237   :  { %v4392_v20 = vld [vmem:[#allocation3 + $0x178] sm:$0xff]  ;;  %v3754_v28 = vld [vmem:[#allocation2 + $0x1e8] sm:$0xff]  ;;  %5575 = vst.msk [vmem:[#allocation2 + $0x2] sm:$0xff] %vm1183_vm2, %v12564_v0  ;;  %v6178_v45 = vmax.f32 %v6114_v12, %v5922_v58  ;;  %5577 = vst.msk [vmem:[#allocation2 + $0x1a] sm:$0xff] %vm1183_vm2, %v12580_v47  ;;  %v2471_v12 = vmax.f32 %v2407_v36, %v12566_v26 }
 0x238   :  { %v6118_v41 = vmax.f32 %v5990_v53, %v6054_v19  ;;  %v12571_v61 = vmax.f32 %v12472_v48, %v4392_v20  ;;  %v3818_v14 = vld [vmem:[#allocation2 + $0x1e9] sm:$0xff]  ;;  %v12576_v55 = vmax.f32 %v4392_v20, %v12573_v1  ;;  %v6180_v3 = vmax.f32 %v6116_v13, %v5924_v49  ;;  %v3755_v19 = vld [vmem:[#allocation2 + $0x1f8] sm:$0xff] }
 0x239   :  { %v4009_v22 = vld [vmem:[#allocation2 + $0x1e4] sm:$0xff]  ;;  %v4074_v34 = vmax.f32 %v3754_v28, %v3818_v14  ;;  %v4010_v6 = vld [vmem:[#allocation2 + $0x1ec] sm:$0xff]  ;;  %v3819_v37 = vld [vmem:[#allocation2 + $0x1f9] sm:$0xff]  ;;  %v4201_v27 = vmax.f32 %v4073_v17, %v4137_v5  ;;  %6242 = vst.msk [vmem:[#allocation3 + $0xf8] sm:$0xff] %vm1183_vm2, %v6178_v45  ;;  %v12602_v17 = vmax.f32 %v4805_v56, %v12560_v11  ;;  %8915 = vmatmul.mubr.msk.f32.gmra.mxu1 %vm1183_vm2, %v2471_v12 }
 0x23a   :  { %v3882_v54 = vld [vmem:[#allocation2 + $0x1ea] sm:$0xff]  ;;  %v6182_v53 = vmax.f32 %v6118_v41, %v5926_v18  ;;  %v4834_v23 = vmax.f32 %v11840_v50, %v12571_v61  ;;  %v3883_v20 = vld [vmem:[#allocation2 + $0x1fa] sm:$0xff]  ;;  %v4836_v4 = vmax.f32 %v4708_v62, %v12576_v55  ;;  %v4075_v49 = vmax.f32 %v3755_v19, %v3819_v37  ;;  %6244 = vst.msk [vmem:[#allocation3 + $0x108] sm:$0xff] %vm1183_vm2, %v6180_v3  ;;  %v3884_v63 = vld [vmem:[#allocation2 + $0x202] sm:$0xff] }
 0x23b   :  { %v3946_v8 = vld [vmem:[#allocation2 + $0x1eb] sm:$0xff]  ;;  %v3947_v28 = vld [vmem:[#allocation2 + $0x1fb] sm:$0xff]  ;;  %v4265_v41 = vmax.f32 %v4201_v27, %v4009_v22  ;;  %v3948_v5 = vld [vmem:[#allocation2 + $0x203] sm:$0xff]  ;;  %5579 = vst.msk [vmem:[#allocation2 + $0x32] sm:$0xff] %vm1183_vm2, %v12602_v17 }
 0x23c   :  { %v4138_v30 = vmax.f32 %v3882_v54, %v3946_v8  ;;  %v4011_v58 = vld [vmem:[#allocation2 + $0x1fc] sm:$0xff]  ;;  %6246 = vst.msk [vmem:[#allocation3 + $0x118] sm:$0xff] %vm1183_vm2, %v6182_v53  ;;  %v12597_v50 = vmax.f32 %v4834_v23, %v12573_v1  ;;  %v4139_v7 = vmax.f32 %v3883_v20, %v3947_v28  ;;  %v4012_v54 = vld [vmem:[#allocation2 + $0x204] sm:$0xff]  ;;  %v3757_v8 = vld [vmem:[#allocation2 + $0x210] sm:$0xff]  ;;  %v4140_v53 = vmax.f32 %v3884_v63, %v3948_v5 }
 0x23d   :  { %v3756_v18 = vld [vmem:[#allocation2 + $0x200] sm:$0xff]  ;;  %v12599_v48 = vld [vmem:[#allocation3 + $0x198] sm:$0xff]  ;;  %3698 = vst.msk [vmem:[#allocation2 + $0x24a] sm:$0xff] %vm1183_vm2, %v2471_v12  ;;  %4329 = vst.msk [vmem:[#allocation3 + $0x1a0] sm:$0xff] %vm1183_vm2, %v4265_v41 }
 0x23e   :  { %15762 = vst [vmem:[#allocation87_spill] sm:$0xff] %v12597_v50  ;;  %v3820_v62 = vld [vmem:[#allocation2 + $0x201] sm:$0xff]  ;;  %v12606_v13 = vmax.f32 %v4836_v4, %v12599_v48  ;;  %v4202_v14 = vmax.f32 %v4074_v34, %v4138_v30  ;;  %5608 = vst.msk [vmem:[#allocation2 + $0x18a] sm:$0xff] %vm1183_vm2, %v12597_v50  ;;  %v4203_v45 = vmax.f32 %v4075_v49, %v4139_v7  ;;  %v3821_v23 = vld [vmem:[#allocation2 + $0x211] sm:$0xff] }
 0x23f   :  { %v4076_v3 = vmax.f32 %v3756_v18, %v3820_v62  ;;  %v3885_v19 = vld [vmem:[#allocation2 + $0x212] sm:$0xff]  ;;  %v4077_v34 = vmax.f32 %v3757_v8, %v3821_v23  ;;  %v5639_v28 = vld [vmem:[#allocation2] sm:$0xff]  ;;  %v12619_v7 = vmax.f32 %v12515_v21, %v12560_v11  ;;  %v12623_v63 = vmax.f32 %v12573_v1, %v12599_v48 }
 0x240   :  { %15763 = vst [vmem:[#allocation88_spill] sm:$0xff] %v12606_v13  ;;  %v3949_v56 = vld [vmem:[#allocation2 + $0x213] sm:$0xff]  ;;  %5610 = vst.msk [vmem:[#allocation2 + $0x1a2] sm:$0xff] %vm1183_vm2, %v12606_v13  ;;  %v4266_v36 = vmax.f32 %v4202_v14, %v4010_v6  ;;  %v4267_v27 = vmax.f32 %v4203_v45, %v4011_v58  ;;  %v5703_v49 = vld [vmem:[#allocation2 + $0x1] sm:$0xff] }
 0x241   :  { %v4013_v22 = vld [vmem:[#allocation2 + $0x214] sm:$0xff]  ;;  %v4141_v37 = vmax.f32 %v3885_v19, %v3949_v56  ;;  %v4204_v30 = vmax.f32 %v4076_v3, %v4140_v53  ;;  %v5767_v18 = vld [vmem:[#allocation2 + $0x2] sm:$0xff]  ;;  %v5959_v41 = vmax.f32 %v5639_v28, %v5703_v49  ;;  %v4807_v53 = vmax.f32 %v12539_v24, %v12619_v7 }
 0x242   :  { %v3758_v20 = vld [vmem:[#allocation2 + $0x218] sm:$0xff]  ;;  %v4615_v62 = vld [vmem:[#allocation3 + $0x70] sm:$0xff]  ;;  %4330 = vst.msk [vmem:[#allocation3 + $0x1a8] sm:$0xff] %vm1183_vm2, %v4266_v36  ;;  %v5831_v12 = vld [vmem:[#allocation2 + $0x3] sm:$0xff]  ;;  %v4838_v24 = vmax.f32 %v12571_v61, %v12623_v63 }
 0x243   :  { %v3822_v4 = vld [vmem:[#allocation2 + $0x219] sm:$0xff]  ;;  %v4205_v6 = vmax.f32 %v4077_v34, %v4141_v37  ;;  %4331 = vst.msk [vmem:[#allocation3 + $0x1b0] sm:$0xff] %vm1183_vm2, %v4267_v27  ;;  %v4268_v58 = vmax.f32 %v4204_v30, %v4012_v54  ;;  %v6023_v3 = vmax.f32 %v5767_v18, %v5831_v12  ;;  %v5895_v19 = vld [vmem:[#allocation2 + $0x4] sm:$0xff]  ;;  %v12631_v34 = vmax.f32 %v12470_v51, %v12509_v42  ;;  %v5707_v49 = vld [vmem:[#allocation2 + $0x31] sm:$0xff] }
 0x244   :  { %v3886_v14 = vld [vmem:[#allocation2 + $0x21a] sm:$0xff]  ;;  %v4078_v21 = vmax.f32 %v3758_v20, %v3822_v4  ;;  %v5640_v28 = vld [vmem:[#allocation2 + $0x8] sm:$0xff]  ;;  %v12634_v4 = vmax.f32 %v4807_v53, %v4615_v62  ;;  %v5771_v18 = vld [vmem:[#allocation2 + $0x32] sm:$0xff] }
 0x245   :  { %v5641_v5 = vld [vmem:[#allocation2 + $0x18] sm:$0xff]  ;;  %v4269_v23 = vmax.f32 %v4205_v6, %v4013_v22  ;;  %4332 = vst.msk [vmem:[#allocation3 + $0x1b8] sm:$0xff] %vm1183_vm2, %v4268_v58  ;;  %v6087_v37 = vmax.f32 %v5959_v41, %v6023_v3  ;;  %v5642_v20 = vld [vmem:[#allocation2 + $0x20] sm:$0xff]  ;;  %v5643_v22 = vld [vmem:[#allocation2 + $0x30] sm:$0xff] }
 0x246   :  { %v5705_v8 = vld [vmem:[#allocation2 + $0x19] sm:$0xff]  ;;  %15764 = vst [vmem:[#allocation5_spill] sm:$0xff] %v12634_v4  ;;  %v5768_v51 = vld [vmem:[#allocation2 + $0xa] sm:$0xff]  ;;  %v5770_v6 = vld [vmem:[#allocation2 + $0x22] sm:$0xff] }
 0x247   :  { %v5769_v45 = vld [vmem:[#allocation2 + $0x1a] sm:$0xff]  ;;  %v5961_v56 = vmax.f32 %v5641_v5, %v5705_v8  ;;  %4333 = vst.msk [vmem:[#allocation3 + $0x1c0] sm:$0xff] %vm1183_vm2, %v4269_v23  ;;  %v5963_v5 = vmax.f32 %v5643_v22, %v5707_v49  ;;  %v6151_v8 = vmax.f32 %v6087_v37, %v5895_v19  ;;  %5581 = vst.msk [vmem:[#allocation2 + $0x4a] sm:$0xff] %vm1183_vm2, %v12634_v4  ;;  %v5704_v3 = vld [vmem:[#allocation2 + $0x9] sm:$0xff] }
 0x248   :  { %v5833_v1 = vld [vmem:[#allocation2 + $0x1b] sm:$0xff]  ;;  %v5835_v12 = vld [vmem:[#allocation2 + $0x33] sm:$0xff]  ;;  %v2408_v23 = vmax.f32 %v12486_v57, %v12631_v34  ;;  %v5834_v57 = vld [vmem:[#allocation2 + $0x23] sm:$0xff] }
 0x249   :  { %v3950_v36 = vld [vmem:[#allocation2 + $0x21b] sm:$0xff]  ;;  %v6025_v54 = vmax.f32 %v5769_v45, %v5833_v1  ;;  %v6027_v62 = vmax.f32 %v5771_v18, %v5835_v12  ;;  %v12645_v1 = vmax.f32 %v12499_v59, %v12566_v26  ;;  %6215 = vst.msk [vmem:[#allocation3 + $0x20] sm:$0xff] %vm1183_vm2, %v6151_v8  ;;  %v12655_v8 = vld [vmem:[#allocation3 + $0x88] sm:$0xff] }
 0x24a   :  { %v4014_v27 = vld [vmem:[#allocation2 + $0x21c] sm:$0xff]  ;;  %v4142_v30 = vmax.f32 %v3886_v14, %v3950_v36  ;;  %v4398_v36 = vld [vmem:[#allocation3 + $0x1a8] sm:$0xff]  ;;  %v5899_v59 = vld [vmem:[#allocation2 + $0x34] sm:$0xff] }
 0x24b   :  { %v5897_v58 = vld [vmem:[#allocation2 + $0x1c] sm:$0xff]  ;;  %v6089_v41 = vmax.f32 %v5961_v56, %v6025_v54  ;;  %v5832_v56 = vld [vmem:[#allocation2 + $0xb] sm:$0xff]  ;;  %v5960_v54 = vmax.f32 %v5640_v28, %v5704_v3  ;;  %v12651_v49 = vmax.f32 %v4838_v24, %v4398_v36  ;;  %v6091_v18 = vmax.f32 %v5963_v5, %v6027_v62 }
 0x24c   :  { %v4206_v14 = vmax.f32 %v4078_v21, %v4142_v30  ;;  %v5644_v45 = vld [vmem:[#allocation2 + $0x38] sm:$0xff]  ;;  %v5706_v61 = vld [vmem:[#allocation2 + $0x21] sm:$0xff]  ;;  %v12649_v30 = vmax.f32 %v12599_v48, %v4398_v36  ;;  %v5896_v24 = vld [vmem:[#allocation2 + $0xc] sm:$0xff] }
 0x24d   :  { %v5708_v53 = vld [vmem:[#allocation2 + $0x39] sm:$0xff]  ;;  %v6153_v22 = vmax.f32 %v6089_v41, %v5897_v58  ;;  %v5962_v37 = vmax.f32 %v5642_v20, %v5706_v61  ;;  %15765 = vst [vmem:[#allocation4_spill] sm:$0xff] %v12651_v49  ;;  %v6024_v58 = vmax.f32 %v5768_v51, %v5832_v56  ;;  %5612 = vst.msk [vmem:[#allocation2 + $0x1ba] sm:$0xff] %vm1183_vm2, %v12651_v49  ;;  %v5898_v5 = vld [vmem:[#allocation2 + $0x24] sm:$0xff] }
 0x24e   :  { %v4270_v21 = vmax.f32 %v4206_v14, %v4014_v27  ;;  %v5772_v19 = vld [vmem:[#allocation2 + $0x3a] sm:$0xff]  ;;  %v5964_v13 = vmax.f32 %v5644_v45, %v5708_v53  ;;  %v6026_v27 = vmax.f32 %v5770_v6, %v5834_v57  ;;  %v4840_v28 = vmax.f32 %v12576_v55, %v12649_v30  ;;  %v12666_v3 = vld [vmem:[#allocation3 + $0x8] sm:$0xff]  ;;  %v12668_v61 = vld [vmem:[#allocation3 + $0x210] sm:$0xff] }
 0x24f   :  { %v5836_v12 = vld [vmem:[#allocation2 + $0x3b] sm:$0xff]  ;;  %6217 = vst.msk [vmem:[#allocation3 + $0x30] sm:$0xff] %vm1183_vm2, %v6153_v22  ;;  %v6155_v20 = vmax.f32 %v6091_v18, %v5899_v59  ;;  %v6088_v51 = vmax.f32 %v5960_v54, %v6024_v58  ;;  %v3759_v53 = vld [vmem:[#allocation2 + $0x228] sm:$0xff]  ;;  %v2472_v55 = vmax.f32 %v2408_v23, %v12668_v61 }
 0x250   :  { %4334 = vst.msk [vmem:[#allocation3 + $0x1c8] sm:$0xff] %vm1183_vm2, %v4270_v21  ;;  %v6028_v41 = vmax.f32 %v5772_v19, %v5836_v12  ;;  %v12659_v48 = vld [vmem:[#allocation3 + $0x1b8] sm:$0xff]  ;;  %v6090_v6 = vmax.f32 %v5962_v37, %v6026_v27  ;;  %v3823_v21 = vld [vmem:[#allocation2 + $0x229] sm:$0xff]  ;;  %v12687_v58 = vld [vmem:[#allocation3 + $0x20] sm:$0xff] }
 0x251   :  { %v5900_v14 = vld [vmem:[#allocation2 + $0x3c] sm:$0xff]  ;;  %v12664_v45 = vmax.f32 %v4398_v36, %v12659_v48  ;;  %v12671_v22 = vmax.f32 %v4840_v28, %v12659_v48  ;;  %6219 = vst.msk [vmem:[#allocation3 + $0x40] sm:$0xff] %vm1183_vm2, %v6155_v20  ;;  %v3887_v19 = vld [vmem:[#allocation2 + $0x22a] sm:$0xff]  ;;  %v2409_v36 = vmax.f32 %v12503_v10, %v12645_v1  ;;  %v6152_v37 = vmax.f32 %v6088_v51, %v5896_v24 }
 0x252   :  { %v6092_v62 = vmax.f32 %v5964_v13, %v6028_v41  ;;  %v3951_v56 = vld [vmem:[#allocation2 + $0x22b] sm:$0xff]  ;;  %v12679_v13 = vmax.f32 %v12509_v42, %v12668_v61  ;;  %v6154_v18 = vmax.f32 %v6090_v6, %v5898_v5  ;;  %v12683_v12 = vld [vmem:[#allocation3 + $0x18] sm:$0xff]  ;;  %8917 = vmatprep.mubr.msk.f32.mxu1 %vm1183_vm2, %v2472_v55  ;;  %3699 = vst.msk [vmem:[#allocation2 + $0x25a] sm:$0xff] %vm1183_vm2, %v2472_v55  ;;  %v3825_v49 = vld [vmem:[#allocation2 + $0x241] sm:$0xff] }
 0x253   :  { %15766 = vst [vmem:[#allocation8_spill] sm:$0xff] %v12671_v22  ;;  %v4842_v54 = vmax.f32 %v12623_v63, %v12664_v45  ;;  %v5645_v59 = vld [vmem:[#allocation2 + $0x48] sm:$0xff]  ;;  %5614 = vst.msk [vmem:[#allocation2 + $0x1d2] sm:$0xff] %vm1183_vm2, %v12671_v22  ;;  %v4079_v10 = vmax.f32 %v3759_v53, %v3823_v21  ;;  %v4143_v42 = vmax.f32 %v3887_v19, %v3951_v56  ;;  %v12696_v5 = vld [vmem:[#allocation3 + $0x218] sm:$0xff] }
 0x254   :  { %v6156_v57 = vmax.f32 %v6092_v62, %v5900_v14  ;;  %v5709_v23 = vld [vmem:[#allocation2 + $0x49] sm:$0xff]  ;;  %6216 = vst.msk [vmem:[#allocation3 + $0x28] sm:$0xff] %vm1183_vm2, %v6152_v37  ;;  %6218 = vst.msk [vmem:[#allocation3 + $0x38] sm:$0xff] %vm1183_vm2, %v6154_v18  ;;  %v12698_v6 = vld [vmem:[#allocation3 + $0x78] sm:$0xff]  ;;  %v2473_v37 = vmax.f32 %v2409_v36, %v12696_v5  ;;  %v15769_v33 = vmax.f32 %v12666_v3, %v12683_v12 }
 0x255   :  { %v5773_v27 = vld [vmem:[#allocation2 + $0x4a] sm:$0xff]  ;;  %v5965_v41 = vmax.f32 %v5645_v59, %v5709_v23  ;;  %v4207_v19 = vmax.f32 %v4079_v10, %v4143_v42  ;;  %v12710_v59 = vmax.f32 %v12566_v26, %v12696_v5  ;;  %v6601_v10 = vmax.f32 %v12488_v43, %v12687_v58  ;;  %v3888_v42 = vld [vmem:[#allocation2 + $0x232] sm:$0xff] }
 0x256   :  { %v5837_v63 = vld [vmem:[#allocation2 + $0x4b] sm:$0xff]  ;;  %6220 = vst.msk [vmem:[#allocation3 + $0x48] sm:$0xff] %vm1183_vm2, %v6156_v57  ;;  %v2410_v57 = vmax.f32 %v12513_v39, %v12679_v13  ;;  %v3952_v36 = vld [vmem:[#allocation2 + $0x233] sm:$0xff]  ;;  %8918 = vmatmul.mubr.msk.f32.gmra.mxu1 %vm1183_vm2, %v2473_v37  ;;  %3700 = vst.msk [vmem:[#allocation2 + $0x262] sm:$0xff] %vm1183_vm2, %v2473_v37 }
 0x257   :  { %v4015_v20 = vld [vmem:[#allocation2 + $0x22c] sm:$0xff]  ;;  %v6029_v24 = vmax.f32 %v5773_v27, %v5837_v63  ;;  %v4144_v28 = vmax.f32 %v3888_v42, %v3952_v36  ;;  %v12742_v36 = vld [vmem:[#allocation3 + $0x220] sm:$0xff] }
 0x258   :  { %v3760_v14 = vld [vmem:[#allocation2 + $0x230] sm:$0xff]  ;;  %v9751_v51 = vld [vmem:[#allocation3 + $0x68] sm:$0xff]  ;;  %v4271_v53 = vmax.f32 %v4207_v19, %v4015_v20  ;;  %v12728_v22 = vld [vmem:[#allocation3 + $0x40] sm:$0xff] }
 0x259   :  { %v4746_v62 = vmax.f32 %v9751_v51, %v12698_v6  ;;  %v6471_v55 = vld [vmem:[#allocation3 + $0x30] sm:$0xff]  ;;  %v12703_v21 = vld [vmem:[#allocation3 + $0x1c8] sm:$0xff]  ;;  %v6093_v63 = vmax.f32 %v5965_v41, %v6029_v24 }
 0x25a   :  { %v5901_v56 = vld [vmem:[#allocation2 + $0x4c] sm:$0xff]  ;;  %v12713_v23 = vmax.f32 %v12687_v58, %v6471_v55  ;;  %v12716_v27 = vmax.f32 %v4842_v54, %v12703_v21  ;;  %v4016_v51 = vld [vmem:[#allocation2 + $0x234] sm:$0xff]  ;;  %v12722_v39 = vmax.f32 %v12659_v48, %v12703_v21  ;;  %4335 = vst.msk [vmem:[#allocation3 + $0x1d0] sm:$0xff] %vm1183_vm2, %v4271_v53  ;;  %v12740_v37 = vmax.f32 %v6471_v55, %v12728_v22  ;;  %v3953_v50 = vld [vmem:[#allocation2 + $0x243] sm:$0xff] }
 0x25b   :  { %v3824_v18 = vld [vmem:[#allocation2 + $0x231] sm:$0xff]  ;;  %v6157_v48 = vmax.f32 %v6093_v63, %v5901_v56  ;;  %v2474_v63 = vmax.f32 %v2410_v57, %v12742_v36  ;;  %v12749_v53 = vmax.f32 %v12668_v61, %v12742_v36  ;;  %v12753_v55 = vld [vmem:[#allocation3 + $0x28] sm:$0xff] }
 0x25c   :  { %15767 = vst [vmem:[#allocation6_spill] sm:$0xff] %v12716_v27  ;;  %v4080_v26 = vmax.f32 %v3760_v14, %v3824_v18  ;;  %v12726_v54 = vld [vmem:[#allocation3 + $0x58] sm:$0xff]  ;;  %v5646_v41 = vld [vmem:[#allocation2 + $0x50] sm:$0xff]  ;;  %v6727_v43 = vmax.f32 %v12527_v60, %v12713_v23  ;;  %5616 = vst.msk [vmem:[#allocation2 + $0x1ea] sm:$0xff] %vm1183_vm2, %v12716_v27  ;;  %v2411_v14 = vmax.f32 %v12552_v52, %v12710_v59 }
 0x25d   :  { %v5710_v24 = vld [vmem:[#allocation2 + $0x51] sm:$0xff]  ;;  %v4682_v58 = vmax.f32 %v11935_v25, %v12726_v54  ;;  %v3761_v27 = vld [vmem:[#allocation2 + $0x240] sm:$0xff]  ;;  %6221 = vst.msk [vmem:[#allocation3 + $0x50] sm:$0xff] %vm1183_vm2, %v6157_v48  ;;  %v12764_v61 = vmax.f32 %v6601_v10, %v12740_v37  ;;  %3701 = vst.msk [vmem:[#allocation2 + $0x272] sm:$0xff] %vm1183_vm2, %v2474_v63  ;;  %8920 = vmatprep.mubr.msk.f32.mxu1 %vm1183_vm2, %v2474_v63 }
 0x25e   :  { %v5774_v20 = vld [vmem:[#allocation2 + $0x52] sm:$0xff]  ;;  %v4208_v18 = vmax.f32 %v4080_v26, %v4144_v28  ;;  %v5966_v42 = vmax.f32 %v5646_v41, %v5710_v24  ;;  %v6791_v56 = vmax.f32 %v6727_v43, %v12728_v22  ;;  %v3889_v52 = vld [vmem:[#allocation2 + $0x242] sm:$0xff]  ;;  %v12751_v28 = vpop.f32.mrf.mxu0  ;;  %v4081_v57 = vmax.f32 %v3761_v27, %v3825_v49 }
 0x25f   :  { %v5838_v19 = vld [vmem:[#allocation2 + $0x53] sm:$0xff]  ;;  %v4810_v25 = vmax.f32 %v4682_v58, %v4746_v62  ;;  %v12755_v41 = vld [vmem:[#allocation3 + $0x48] sm:$0xff]  ;;  %v4617_v48 = vld [vmem:[#allocation3 + $0x80] sm:$0xff] }
 0x260   :  { %v6030_v60 = vmax.f32 %v5774_v20, %v5838_v19  ;;  %v6472_v26 = vld [vmem:[#allocation3 + $0x38] sm:$0xff]  ;;  %v4272_v24 = vmax.f32 %v4208_v18, %v4016_v51  ;;  %9136 = vmatprep.mubr.msk.f32.mxu0 %vm1183_vm2, %v6791_v56  ;;  %v6602_v51 = vmax.f32 %v12683_v12, %v12753_v55  ;;  %v4553_v18 = vld [vmem:[#allocation3 + $0x70] sm:$0xff]  ;;  %v12772_v49 = vld [vmem:[#allocation3 + $0x228] sm:$0xff] }
 0x261   :  { %v12761_v58 = vmax.f32 %v12753_v55, %v6472_v26  ;;  %v12767_v20 = vmax.f32 %v4810_v25, %v12655_v8  ;;  %v5902_v19 = vld [vmem:[#allocation2 + $0x54] sm:$0xff]  ;;  %v12777_v10 = vmax.f32 %v12560_v11, %v4553_v18  ;;  %v3762_v56 = vld [vmem:[#allocation2 + $0x248] sm:$0xff]  ;;  %v12810_v35 = vmax.f32 %v12696_v5, %v12772_v49 }
 0x262   :  { %v6094_v43 = vmax.f32 %v5966_v42, %v6030_v60  ;;  %4336 = vst.msk [vmem:[#allocation3 + $0x1d8] sm:$0xff] %vm1183_vm2, %v4272_v24  ;;  %v4145_v42 = vmax.f32 %v3889_v52, %v3953_v50  ;;  %v2475_v60 = vmax.f32 %v2411_v14, %v12772_v49  ;;  %v3826_v25 = vld [vmem:[#allocation2 + $0x249] sm:$0xff]  ;;  %v12780_v55 = vld [vmem:[#allocation3 + $0x98] sm:$0xff]  ;;  %v12787_v24 = vmax.f32 %v6472_v26, %v12755_v41 }
 0x263   :  { %15768 = vst [vmem:[#allocation12_spill] sm:$0xff] %v12767_v20  ;;  %v3890_v62 = vld [vmem:[#allocation2 + $0x24a] sm:$0xff]  ;;  %v6728_v2 = vmax.f32 %v15769_v33, %v12761_v58  ;;  %5584 = vst.msk [vmem:[#allocation2 + $0x6a] sm:$0xff] %vm1183_vm2, %v12767_v20  ;;  %v4082_v63 = vmax.f32 %v3762_v56, %v3826_v25  ;;  %v2412_v52 = vmax.f32 %v12631_v34, %v12749_v53  ;;  %v3763_v56 = vld [vmem:[#allocation2 + $0x258] sm:$0xff] }
 0x264   :  { %v6158_v27 = vmax.f32 %v6094_v43, %v5902_v19  ;;  %v4017_v11 = vld [vmem:[#allocation2 + $0x244] sm:$0xff]  ;;  %v12795_v43 = vpop.f32.mrf.mxu0  ;;  %v4209_v3 = vmax.f32 %v4081_v57, %v4145_v42  ;;  %v4809_v33 = vmax.f32 %v12542_v15, %v12777_v10  ;;  %8921 = vmatmul.mubr.msk.f32.gmra.mxu1 %vm1183_vm2, %v2475_v60  ;;  %3702 = vst.msk [vmem:[#allocation2 + $0x27a] sm:$0xff] %vm1183_vm2, %v2475_v60  ;;  %v12804_v19 = vld [vmem:[#allocation3 + $0x230] sm:$0xff]  ;;  %v3827_v34 = vld [vmem:[#allocation2 + $0x259] sm:$0xff] }
 0x265   :  { %v3954_v50 = vld [vmem:[#allocation2 + $0x24b] sm:$0xff]  ;;  %15770 = vst [vmem:[#allocation9_spill] sm:$0xff] %v12795_v43  ;;  %v6792_v25 = vmax.f32 %v6728_v2, %v12755_v41  ;;  %v2476_v57 = vmax.f32 %v2412_v52, %v12804_v19  ;;  %v3955_v42 = vld [vmem:[#allocation2 + $0x25b] sm:$0xff]  ;;  %v4083_v15 = vmax.f32 %v3763_v56, %v3827_v34  ;;  %v15772_v2 = vmax.f32 %v12698_v6, %v12655_v8 }
 0x266   :  { %v12791_v14 = vld [vmem:[#allocation3 + $0x68] sm:$0xff]  ;;  %6222 = vst.msk [vmem:[#allocation3 + $0x58] sm:$0xff] %vm1183_vm2, %v6158_v27  ;;  %v4146_v12 = vmax.f32 %v3890_v62, %v3954_v50  ;;  %v3891_v27 = vld [vmem:[#allocation2 + $0x25a] sm:$0xff]  ;;  %v12814_v60 = vld [vmem:[#allocation3 + $0x50] sm:$0xff]  ;;  %v12816_v50 = vmax.f32 %v4809_v33, %v4617_v48  ;;  %v6730_v56 = vmax.f32 %v6602_v51, %v12787_v24 }
 0x267   :  { %v4684_v26 = vmax.f32 %v12726_v54, %v12791_v14  ;;  %v4018_v43 = vld [vmem:[#allocation2 + $0x24c] sm:$0xff]  ;;  %v4273_v54 = vmax.f32 %v4209_v3, %v4017_v11  ;;  %v12821_v52 = vld [vmem:[#allocation3 + $0x80] sm:$0xff]  ;;  %9137 = vmatmul.mubr.msk.f32.vlgmr.msra.gmra.mxu0 %vm1183_vm2, %v6792_v25  ;;  %v6793_v5 = vmax.f32 %v12764_v61, %v12814_v60  ;;  %8923 = vmatprep.mubr.msk.f32.mxu1 %vm1183_vm2, %v2476_v57  ;;  %v12829_v11 = vld [vmem:[#allocation3 + $0x238] sm:$0xff]  ;;  %v12831_v3 = vpop.f32.mrf.mxu0 }
 0x268   :  { %v12812_v62 = vld [vmem:[#allocation3 + $0xa8] sm:$0xff]  ;;  %15771 = vst [vmem:[#allocation15_spill] sm:$0xff] %v12816_v50  ;;  %v4210_v9 = vmax.f32 %v4082_v63, %v4146_v12  ;;  %3703 = vst.msk [vmem:[#allocation2 + $0x28a] sm:$0xff] %vm1183_vm2, %v2476_v57  ;;  %v4147_v48 = vmax.f32 %v3891_v27, %v3955_v42  ;;  %v3764_v63 = vld [vmem:[#allocation2 + $0x260] sm:$0xff]  ;;  %v12840_v12 = vmax.f32 %v4553_v18, %v12821_v52 }
 0x269   :  { %v4812_v32 = vmax.f32 %v4684_v26, %v15772_v2  ;;  %v3828_v6 = vld [vmem:[#allocation2 + $0x261] sm:$0xff]  ;;  %15773 = vst [vmem:[#allocation17_spill] sm:$0xff] %v12831_v3  ;;  %4337 = vst.msk [vmem:[#allocation3 + $0x1e0] sm:$0xff] %vm1183_vm2, %v4273_v54  ;;  %v2413_v26 = vmax.f32 %v12645_v1, %v12810_v35  ;;  %v12844_v57 = vld [vmem:[#allocation3 + $0xb8] sm:$0xff]  ;;  %9139 = vmatprep.mubr.msk.f32.mxu0 %vm1183_vm2, %v6793_v5  ;;  %v4750_v18 = vmax.f32 %v12655_v8, %v12780_v55  ;;  %v12879_v38 = vpop.f32.mrf.mxu0 }
 0x26a   :  { %5583 = vst.msk [vmem:[#allocation2 + $0x62] sm:$0xff] %vm1183_vm2, %v12816_v50  ;;  %v4274_v33 = vmax.f32 %v4210_v9, %v4018_v43  ;;  %v4019_v51 = vld [vmem:[#allocation2 + $0x25c] sm:$0xff]  ;;  %v4211_v42 = vmax.f32 %v4083_v15, %v4147_v48  ;;  %v4084_v9 = vmax.f32 %v3764_v63, %v3828_v6  ;;  %v15775_v1 = vmax.f32 %v12649_v30, %v12722_v39  ;;  %v12864_v15 = vld [vmem:[#allocation2 + $0x6a] sm:$0xff] }
 0x26b   :  { %v12837_v61 = vmax.f32 %v4812_v32, %v12780_v55  ;;  %v3892_v34 = vld [vmem:[#allocation2 + $0x262] sm:$0xff]  ;;  %v12847_v27 = vld [vmem:[#allocation3 + $0x1d8] sm:$0xff]  ;;  %v12866_v5 = vld [vmem:[#allocation2 + $0x6b] sm:$0xff]  ;;  %v4811_v8 = vmax.f32 %v12619_v7, %v12840_v12  ;;  %15777 = vst [vmem:[#allocation14_spill] sm:$0xff] %v12879_v38 }
 0x26c   :  { %v3956_v25 = vld [vmem:[#allocation2 + $0x263] sm:$0xff]  ;;  %v12849_v32 = vld [vmem:[#allocation3 + $0x78] sm:$0xff]  ;;  %v12855_v54 = vmax.f32 %v12703_v21, %v12847_v27  ;;  %v12861_v2 = vmax.f32 %v15775_v1, %v12847_v27  ;;  %4338 = vst.msk [vmem:[#allocation3 + $0x1e8] sm:$0xff] %vm1183_vm2, %v4274_v33  ;;  %v2477_v21 = vmax.f32 %v2413_v26, %v12829_v11  ;;  %v4275_v30 = vmax.f32 %v4211_v42, %v4019_v51 }
 0x26d   :  { %15774 = vst [vmem:[#allocation18_spill] sm:$0xff] %v12837_v61  ;;  %v4148_v43 = vmax.f32 %v3892_v34, %v3956_v25  ;;  %5586 = vst.msk [vmem:[#allocation2 + $0x82] sm:$0xff] %vm1183_vm2, %v12837_v61  ;;  %v4020_v48 = vld [vmem:[#allocation2 + $0x264] sm:$0xff]  ;;  %v12873_v63 = vld [vmem:[#allocation3 + $0x58] sm:$0xff]  ;;  %v4686_v33 = vmax.f32 %v12791_v14, %v12849_v32  ;;  %v12886_v51 = vmax.f32 %v4811_v8, %v4619_v16 }
 0x26e   :  { %15776 = vst [vmem:[#allocation19_spill] sm:$0xff] %v12861_v2  ;;  %v3765_v34 = vld [vmem:[#allocation2 + $0x270] sm:$0xff]  ;;  %5618 = vst.msk [vmem:[#allocation2 + $0x202] sm:$0xff] %vm1183_vm2, %v12861_v2  ;;  %v6794_v7 = vmax.f32 %v6730_v56, %v12873_v63  ;;  %8924 = vmatmul.mubr.msk.f32.gmra.mxu1 %vm1183_vm2, %v2477_v21  ;;  %v12893_v38 = vld [vmem:[#allocation3 + $0x240] sm:$0xff]  ;;  %v12897_v56 = vmax.f32 %v12742_v36, %v12804_v19 }
 0x26f   :  { %v4212_v6 = vmax.f32 %v4084_v9, %v4148_v43  ;;  %v3829_v25 = vld [vmem:[#allocation2 + $0x271] sm:$0xff]  ;;  %15778 = vst [vmem:[#allocation16_spill] sm:$0xff] %v12886_v51  ;;  %3704 = vst.msk [vmem:[#allocation2 + $0x292] sm:$0xff] %vm1183_vm2, %v2477_v21  ;;  %v4814_v1 = vmax.f32 %v4686_v33, %v4750_v18  ;;  %v12901_v21 = vpop.f32.mrf.mxu0  ;;  %v4621_v2 = vld [vmem:[#allocation3 + $0xa0] sm:$0xff] }
 0x270   :  { %v3893_v14 = vld [vmem:[#allocation2 + $0x272] sm:$0xff]  ;;  %4339 = vst.msk [vmem:[#allocation3 + $0x1f0] sm:$0xff] %vm1183_vm2, %v4275_v30  ;;  %v4085_v16 = vmax.f32 %v3765_v34, %v3829_v25  ;;  %15779 = vst [vmem:[#allocation20_spill] sm:$0xff] %v12901_v21  ;;  %9140 = vmatmul.mubr.msk.f32.gmra.mxu0 %vm1183_vm2, %v6794_v7  ;;  %v4846_v30 = vmax.f32 %v12664_v45, %v12855_v54  ;;  %v3894_v33 = vld [vmem:[#allocation2 + $0x27a] sm:$0xff] }
 0x271   :  { %v3957_v42 = vld [vmem:[#allocation2 + $0x273] sm:$0xff]  ;;  %v4276_v43 = vmax.f32 %v4212_v6, %v4020_v48  ;;  %5585 = vst.msk [vmem:[#allocation2 + $0x7a] sm:$0xff] %vm1183_vm2, %v12886_v51  ;;  %v12914_v48 = vmax.f32 %v12772_v49, %v12829_v11  ;;  %v3958_v34 = vld [vmem:[#allocation2 + $0x27b] sm:$0xff]  ;;  %v12918_v45 = vmax.f32 %v4814_v1, %v12812_v62  ;;  %v12922_v61 = vpop.f32.mrf.mxu0  ;;  %v5839_v51 = vld [vmem:[#allocation2 + $0x63] sm:$0xff] }
 0x272   :  { %v12899_v8 = vld [vmem:[#allocation3 + $0x90] sm:$0xff]  ;;  %v3766_v26 = vld [vmem:[#allocation2 + $0x278] sm:$0xff]  ;;  %v4149_v18 = vmax.f32 %v3893_v14, %v3957_v42  ;;  %v5647_v25 = vld [vmem:[#allocation2 + $0x60] sm:$0xff]  ;;  %v2414_v14 = vmax.f32 %v12679_v13, %v12897_v56  ;;  %v4150_v9 = vmax.f32 %v3894_v33, %v3958_v34  ;;  %15781 = vst [vmem:[#allocation34_spill] sm:$0xff] %v12922_v61 }
 0x273   :  { %v12910_v36 = vmax.f32 %v12821_v52, %v12899_v8  ;;  %v3830_v6 = vld [vmem:[#allocation2 + $0x279] sm:$0xff]  ;;  %v5711_v7 = vld [vmem:[#allocation2 + $0x61] sm:$0xff]  ;;  %4340 = vst.msk [vmem:[#allocation3 + $0x1f8] sm:$0xff] %vm1183_vm2, %v4276_v43  ;;  %15780 = vst [vmem:[#allocation13_spill] sm:$0xff] %v12918_v45  ;;  %v2415_v1 = vmax.f32 %v12710_v59, %v12914_v48 }
 0x274   :  { %v4021_v42 = vld [vmem:[#allocation2 + $0x274] sm:$0xff]  ;;  %v4086_v52 = vmax.f32 %v3766_v26, %v3830_v6  ;;  %v5775_v49 = vld [vmem:[#allocation2 + $0x62] sm:$0xff]  ;;  %v5967_v21 = vmax.f32 %v5647_v25, %v5711_v7  ;;  %v4213_v20 = vmax.f32 %v4085_v16, %v4149_v18  ;;  %5588 = vst.msk [vmem:[#allocation2 + $0x9a] sm:$0xff] %vm1183_vm2, %v12918_v45  ;;  %v2478_v26 = vmax.f32 %v2414_v14, %v12893_v38  ;;  %v5904_v14 = vld [vmem:[#allocation2 + $0x6c] sm:$0xff] }
 0x275   :  { %v4813_v50 = vmax.f32 %v12777_v10, %v12910_v36  ;;  %v6031_v43 = vmax.f32 %v5775_v49, %v5839_v51  ;;  %v4406_v4 = vld [vmem:[#allocation3 + $0x1e8] sm:$0xff]  ;;  %v12935_v16 = vmax.f32 %v12804_v19, %v12893_v38  ;;  %v12937_v10 = vpop.f32.mrf.mxu0  ;;  %v12971_v49 = vld [vmem:[#allocation3 + $0x250] sm:$0xff] }
 0x276   :  { %v5648_v13 = vld [vmem:[#allocation2 + $0x68] sm:$0xff]  ;;  %v4214_v6 = vmax.f32 %v4086_v52, %v4150_v9  ;;  %v12940_v33 = vmax.f32 %v12847_v27, %v4406_v4  ;;  %v12942_v59 = vmax.f32 %v4846_v30, %v4406_v4  ;;  %v4277_v25 = vmax.f32 %v4213_v20, %v4021_v42  ;;  %8926 = vmatprep.mubr.msk.f32.mxu1 %vm1183_vm2, %v2478_v26 }
 0x277   :  { %v5712_v3 = vld [vmem:[#allocation2 + $0x69] sm:$0xff]  ;;  %v6095_v7 = vmax.f32 %v5967_v21, %v6031_v43  ;;  %v12948_v9 = vmax.f32 %v12728_v22, %v12814_v60  ;;  %3705 = vst.msk [vmem:[#allocation2 + $0x2a2] sm:$0xff] %vm1183_vm2, %v2478_v26  ;;  %v12954_v27 = vmax.f32 %v4813_v50, %v4621_v2  ;;  %v2479_v30 = vmax.f32 %v2415_v1, %v12926_v40  ;;  %v12959_v20 = vpop.f32.mrf.mxu0 }
 0x278   :  { %v5903_v18 = vld [vmem:[#allocation2 + $0x64] sm:$0xff]  ;;  %15782 = vst [vmem:[#allocation25_spill] sm:$0xff] %v12942_v59  ;;  %v5968_v51 = vmax.f32 %v5648_v13, %v5712_v3  ;;  %v4022_v3 = vld [vmem:[#allocation2 + $0x27c] sm:$0xff]  ;;  %15784 = vst [vmem:[#allocation22_spill] sm:$0xff] %v12959_v20  ;;  %v15785_v22 = vmax.f32 %v12864_v15, %v12866_v5  ;;  %v4848_v42 = vmax.f32 %v12722_v39, %v12940_v33 }
 0x279   :  { %v12944_v34 = vld [vmem:[#allocation2 + $0x82] sm:$0xff]  ;;  %15783 = vst [vmem:[#allocation21_spill] sm:$0xff] %v12954_v27  ;;  %5620 = vst.msk [vmem:[#allocation2 + $0x21a] sm:$0xff] %vm1183_vm2, %v12942_v59  ;;  %v4278_v50 = vmax.f32 %v4214_v6, %v4022_v3  ;;  %v6159_v13 = vmax.f32 %v6095_v7, %v5903_v18  ;;  %v12979_v15 = vmax.f32 %v12755_v41, %v12873_v63  ;;  %v5649_v5 = vld [vmem:[#allocation2 + $0x78] sm:$0xff]  ;;  %8927 = vmatmul.mubr.msk.f32.gmra.mxu1 %vm1183_vm2, %v2479_v30  ;;  %v12991_v18 = vpop.f32.mrf.mxu0 }
 0x27a   :  { %v12950_v19 = vld [vmem:[#allocation2 + $0x83] sm:$0xff]  ;;  %v6096_v21 = vmax.f32 %v5968_v51, %v15785_v22  ;;  %4341 = vst.msk [vmem:[#allocation3 + $0x200] sm:$0xff] %vm1183_vm2, %v4277_v25  ;;  %v5713_v26 = vld [vmem:[#allocation2 + $0x79] sm:$0xff]  ;;  %5587 = vst.msk [vmem:[#allocation2 + $0x92] sm:$0xff] %vm1183_vm2, %v12954_v27  ;;  %v12989_v6 = vmax.f32 %v12829_v11, %v12926_v40 }
 0x27b   :  { %v12957_v52 = vld [vmem:[#allocation3 + $0x88] sm:$0xff]  ;;  %v5777_v39 = vld [vmem:[#allocation2 + $0x7a] sm:$0xff]  ;;  %3706 = vst.msk [vmem:[#allocation2 + $0x2aa] sm:$0xff] %vm1183_vm2, %v2479_v30  ;;  %v5969_v25 = vmax.f32 %v5649_v5, %v5713_v26  ;;  %v6034_v3 = vmax.f32 %v12944_v34, %v12950_v19  ;;  %4342 = vst.msk [vmem:[#allocation3 + $0x208] sm:$0xff] %vm1183_vm2, %v4278_v50  ;;  %v15786_v30 = vmax.f32 %v12780_v55, %v12812_v62  ;;  %v13009_v19 = vpop.f32.mrf.mxu0 }
 0x27c   :  { %v4688_v2 = vmax.f32 %v12849_v32, %v12957_v52  ;;  %v12973_v1 = vld [vmem:[#allocation2 + $0x288] sm:$0xff]  ;;  %v2416_v32 = vmax.f32 %v12749_v53, %v12935_v16  ;;  %v6160_v41 = vmax.f32 %v6096_v21, %v5904_v14  ;;  %v5841_v51 = vld [vmem:[#allocation2 + $0x7b] sm:$0xff]  ;;  %6223 = vst.msk [vmem:[#allocation3 + $0x60] sm:$0xff] %vm1183_vm2, %v6159_v13  ;;  %15788 = vst [vmem:[#allocation29_spill] sm:$0xff] %v13009_v19 }
 0x27d   :  { %v12975_v43 = vld [vmem:[#allocation2 + $0x289] sm:$0xff]  ;;  %v12993_v7 = vld [vmem:[#allocation3 + $0x1f8] sm:$0xff]  ;;  %v6033_v11 = vmax.f32 %v5777_v39, %v5841_v51  ;;  %v5650_v21 = vld [vmem:[#allocation2 + $0x80] sm:$0xff]  ;;  %v6731_v39 = vmax.f32 %v12713_v23, %v12948_v9  ;;  %v13035_v23 = vpop.f32.mrf.mxu0 }
 0x27e   :  { %v4816_v53 = vmax.f32 %v4688_v2, %v15786_v30  ;;  %v13003_v22 = vmax.f32 %v4406_v4, %v12993_v7  ;;  %v13006_v14 = vmax.f32 %v4848_v42, %v12993_v7  ;;  %v5714_v5 = vld [vmem:[#allocation2 + $0x81] sm:$0xff]  ;;  %v2480_v26 = vmax.f32 %v2416_v32, %v12971_v49  ;;  %v3895_v34 = vld [vmem:[#allocation2 + $0x28a] sm:$0xff]  ;;  %6224 = vst.msk [vmem:[#allocation3 + $0x68] sm:$0xff] %vm1183_vm2, %v6160_v41 }
 0x27f   :  { %v5905_v55 = vld [vmem:[#allocation2 + $0x7c] sm:$0xff]  ;;  %v5970_v50 = vmax.f32 %v5650_v21, %v5714_v5  ;;  %v4087_v4 = vmax.f32 %v12973_v1, %v12975_v43  ;;  %v2417_v42 = vmax.f32 %v12810_v35, %v12989_v6  ;;  %v6732_v32 = vmax.f32 %v12761_v58, %v12979_v15  ;;  %v5906_v51 = vld [vmem:[#allocation2 + $0x84] sm:$0xff]  ;;  %15790 = vst [vmem:[#allocation31_spill] sm:$0xff] %v13035_v23  ;;  %v4623_v58 = vld [vmem:[#allocation3 + $0xb0] sm:$0xff]  ;;  %v13050_v59 = vpop.f32.mrf.mxu0 }
 0x280   :  { %15787 = vst [vmem:[#allocation28_spill] sm:$0xff] %v13006_v14  ;;  %v13013_v2 = vmax.f32 %v4816_v53, %v12844_v57  ;;  %v13015_v13 = vld [vmem:[#allocation2 + $0x9a] sm:$0xff]  ;;  %v6097_v41 = vmax.f32 %v5969_v25, %v6033_v11  ;;  %5622 = vst.msk [vmem:[#allocation2 + $0x232] sm:$0xff] %vm1183_vm2, %v13006_v14  ;;  %8929 = vmatprep.mubr.msk.f32.mxu1 %vm1183_vm2, %v2480_v26  ;;  %v3959_v1 = vld [vmem:[#allocation2 + $0x28b] sm:$0xff]  ;;  %v2354_v35 = vmax.f32 %v12893_v38, %v12971_v49 }
 0x281   :  { %v13027_v30 = vld [vmem:[#allocation2 + $0x9b] sm:$0xff]  ;;  %3707 = vst.msk [vmem:[#allocation2 + $0x2ba] sm:$0xff] %vm1183_vm2, %v2480_v26  ;;  %v6098_v25 = vmax.f32 %v5970_v50, %v6034_v3  ;;  %v4850_v53 = vmax.f32 %v12855_v54, %v13003_v22  ;;  %v4151_v11 = vmax.f32 %v3895_v34, %v3959_v1  ;;  %v3768_v26 = vld [vmem:[#allocation2 + $0x290] sm:$0xff]  ;;  %15791 = vst [vmem:[#allocation32_spill] sm:$0xff] %v13050_v59 }
 0x282   :  { %15789 = vst [vmem:[#allocation41_spill] sm:$0xff] %v13013_v2  ;;  %v13031_v43 = vld [vmem:[#allocation3 + $0xa0] sm:$0xff]  ;;  %5590 = vst.msk [vmem:[#allocation2 + $0xb2] sm:$0xff] %vm1183_vm2, %v13013_v2  ;;  %v13045_v5 = vld [vmem:[#allocation3 + $0x258] sm:$0xff]  ;;  %v6161_v38 = vmax.f32 %v6097_v41, %v5905_v55 }
 0x283   :  { %v13043_v21 = vmax.f32 %v12899_v8, %v13031_v43  ;;  %v3832_v19 = vld [vmem:[#allocation2 + $0x291] sm:$0xff]  ;;  %v2481_v61 = vmax.f32 %v2417_v42, %v13045_v5  ;;  %v2355_v54 = vmax.f32 %v12926_v40, %v13045_v5  ;;  %v6162_v34 = vmax.f32 %v6098_v25, %v5906_v51  ;;  %v13055_v23 = vld [vmem:[#allocation3 + $0x208] sm:$0xff]  ;;  %v13063_v51 = vpop.f32.mrf.mxu0 }
 0x284   :  { %v4023_v20 = vld [vmem:[#allocation2 + $0x28c] sm:$0xff]  ;;  %v4088_v14 = vmax.f32 %v3768_v26, %v3832_v19  ;;  %v4215_v45 = vmax.f32 %v4087_v4, %v4151_v11  ;;  %6225 = vst.msk [vmem:[#allocation3 + $0x70] sm:$0xff] %vm1183_vm2, %v6161_v38  ;;  %v6036_v40 = vmax.f32 %v13015_v13, %v13027_v30  ;;  %v2418_v19 = vmax.f32 %v12897_v56, %v2354_v35  ;;  %v5652_v30 = vld [vmem:[#allocation2 + $0x98] sm:$0xff] }
 0x285   :  { %v3896_v3 = vld [vmem:[#allocation2 + $0x292] sm:$0xff]  ;;  %v4815_v27 = vmax.f32 %v12840_v12, %v13043_v21  ;;  %8930 = vmatmul.mubr.msk.f32.gmra.mxu1 %vm1183_vm2, %v2481_v61  ;;  %3708 = vst.msk [vmem:[#allocation2 + $0x2c2] sm:$0xff] %vm1183_vm2, %v2481_v61  ;;  %v2419_v4 = vmax.f32 %v12914_v48, %v2355_v54  ;;  %15792 = vst [vmem:[#allocation35_spill] sm:$0xff] %v13063_v51  ;;  %v13065_v12 = vld [vmem:[#allocation3 + $0x60] sm:$0xff]  ;;  %v13070_v11 = vmax.f32 %v12993_v7, %v13055_v23 }
 0x286   :  { %v3960_v50 = vld [vmem:[#allocation2 + $0x293] sm:$0xff]  ;;  %6226 = vst.msk [vmem:[#allocation3 + $0x78] sm:$0xff] %vm1183_vm2, %v6162_v34  ;;  %v13073_v13 = vmax.f32 %v4850_v53, %v13055_v23  ;;  %v4279_v26 = vmax.f32 %v4215_v45, %v4023_v20  ;;  %v6795_v56 = vmax.f32 %v6731_v39, %v13065_v12  ;;  %v13076_v48 = vld [vmem:[#allocation3 + $0x68] sm:$0xff]  ;;  %v13080_v35 = vmax.f32 %v12814_v60, %v13065_v12 }
 0x287   :  { %v5651_v1 = vld [vmem:[#allocation2 + $0x90] sm:$0xff]  ;;  %v4152_v55 = vmax.f32 %v3896_v3, %v3960_v50  ;;  %v5716_v61 = vld [vmem:[#allocation2 + $0x99] sm:$0xff]  ;;  %v13086_v50 = vpop.f32.mrf.mxu0  ;;  %v6796_v53 = vmax.f32 %v6732_v32, %v13076_v48  ;;  %v13091_v45 = vmax.f32 %v12873_v63, %v13076_v48  ;;  %v3833_v39 = vld [vmem:[#allocation2 + $0x2a1] sm:$0xff] }
 0x288   :  { %v5715_v8 = vld [vmem:[#allocation2 + $0x91] sm:$0xff]  ;;  %15793 = vst [vmem:[#allocation36_spill] sm:$0xff] %v13073_v13  ;;  %v5972_v38 = vmax.f32 %v5652_v30, %v5716_v61  ;;  %15794 = vst [vmem:[#allocation51_spill] sm:$0xff] %v13086_v50  ;;  %9142 = vmatprep.mubr.msk.f32.mxu0 %vm1183_vm2, %v6795_v56  ;;  %v5908_v32 = vld [vmem:[#allocation2 + $0x9c] sm:$0xff] }
 0x289   :  { %v5779_v2 = vld [vmem:[#allocation2 + $0x92] sm:$0xff]  ;;  %v5971_v41 = vmax.f32 %v5651_v1, %v5715_v8  ;;  %5624 = vst.msk [vmem:[#allocation2 + $0x24a] sm:$0xff] %vm1183_vm2, %v13073_v13  ;;  %4343 = vst.msk [vmem:[#allocation3 + $0x210] sm:$0xff] %vm1183_vm2, %v4279_v26  ;;  %v4216_v60 = vmax.f32 %v4088_v14, %v4152_v55  ;;  %v13103_v1 = vld [vmem:[#allocation3 + $0x260] sm:$0xff]  ;;  %v13109_v55 = vpop.f32.mrf.mxu0  ;;  %9143 = vmatmul.mubr.msk.f32.gmra.mxu0 %vm1183_vm2, %v6796_v53 }
 0x28a   :  { %v5843_v42 = vld [vmem:[#allocation2 + $0x93] sm:$0xff]  ;;  %v6100_v34 = vmax.f32 %v5972_v38, %v6036_v40  ;;  %v13105_v8 = vld [vmem:[#allocation3 + $0xc8] sm:$0xff]  ;;  %15795 = vst [vmem:[#allocation24_spill] sm:$0xff] %v13109_v55  ;;  %v4625_v26 = vld [vmem:[#allocation3 + $0xc0] sm:$0xff]  ;;  %v15796_v38 = vmax.f32 %v12812_v62, %v12844_v57  ;;  %v2482_v14 = vmax.f32 %v2418_v19, %v13103_v1 }
 0x28b   :  { %v6035_v25 = vmax.f32 %v5779_v2, %v5843_v42  ;;  %v13082_v2 = vmax.f32 %v4815_v27, %v4623_v58  ;;  %v4024_v3 = vld [vmem:[#allocation2 + $0x294] sm:$0xff]  ;;  %v3769_v27 = vld [vmem:[#allocation2 + $0x2a0] sm:$0xff]  ;;  %v6733_v58 = vmax.f32 %v12740_v37, %v13080_v35  ;;  %v6734_v37 = vmax.f32 %v12787_v24, %v13091_v45 }
 0x28c   :  { %v13084_v7 = vld [vmem:[#allocation3 + $0x98] sm:$0xff]  ;;  %v3897_v30 = vld [vmem:[#allocation2 + $0x2a2] sm:$0xff]  ;;  %v6164_v56 = vmax.f32 %v6100_v34, %v5908_v32  ;;  %v4089_v24 = vmax.f32 %v3769_v27, %v3833_v39  ;;  %v13130_v40 = vld [vmem:[#allocation3 + $0x70] sm:$0xff]  ;;  %v2356_v34 = vmax.f32 %v12971_v49, %v13103_v1  ;;  %8932 = vmatprep.mubr.msk.f32.mxu1 %vm1183_vm2, %v2482_v14  ;;  %3709 = vst.msk [vmem:[#allocation2 + $0x2d2] sm:$0xff] %vm1183_vm2, %v2482_v14 }
 0x28d   :  { %v6099_v20 = vmax.f32 %v5971_v41, %v6035_v25  ;;  %v5907_v54 = vld [vmem:[#allocation2 + $0x94] sm:$0xff]  ;;  %5589 = vst.msk [vmem:[#allocation2 + $0xaa] sm:$0xff] %vm1183_vm2, %v13082_v2  ;;  %v4690_v63 = vmax.f32 %v12957_v52, %v13084_v7  ;;  %v4280_v41 = vmax.f32 %v4216_v60, %v4024_v3  ;;  %v3961_v61 = vld [vmem:[#allocation2 + $0x2a3] sm:$0xff]  ;;  %v15799_v55 = vmax.f32 %v12844_v57, %v13105_v8 }
 0x28e   :  { %v13116_v52 = vld [vmem:[#allocation2 + $0xb2] sm:$0xff]  ;;  %v13126_v3 = vld [vmem:[#allocation3 + $0x268] sm:$0xff]  ;;  %v4153_v32 = vmax.f32 %v3897_v30, %v3961_v61  ;;  %6228 = vst.msk [vmem:[#allocation3 + $0x88] sm:$0xff] %vm1183_vm2, %v6164_v56 }
 0x28f   :  { %v6163_v42 = vmax.f32 %v6099_v20, %v5907_v54  ;;  %v13118_v25 = vld [vmem:[#allocation2 + $0xb3] sm:$0xff]  ;;  %v4818_v53 = vmax.f32 %v4690_v63, %v15796_v38  ;;  %v3770_v60 = vld [vmem:[#allocation2 + $0x2a8] sm:$0xff]  ;;  %v13128_v54 = vpop.f32.mrf.mxu0  ;;  %4344 = vst.msk [vmem:[#allocation3 + $0x218] sm:$0xff] %vm1183_vm2, %v4280_v41  ;;  %v2483_v19 = vmax.f32 %v2419_v4, %v13126_v3  ;;  %v6797_v63 = vmax.f32 %v6733_v58, %v13130_v40 }
 0x290   :  { %v13124_v20 = vld [vmem:[#allocation3 + $0xb0] sm:$0xff]  ;;  %15797 = vst [vmem:[#allocation27_spill] sm:$0xff] %v13128_v54  ;;  %v13142_v38 = vld [vmem:[#allocation3 + $0x78] sm:$0xff]  ;;  %v4025_v4 = vld [vmem:[#allocation2 + $0x2a4] sm:$0xff]  ;;  %v4217_v61 = vmax.f32 %v4089_v24, %v4153_v32 }
 0x291   :  { %6227 = vst.msk [vmem:[#allocation3 + $0x80] sm:$0xff] %vm1183_vm2, %v6163_v42  ;;  %v13136_v62 = vmax.f32 %v13031_v43, %v13124_v20  ;;  %v3834_v27 = vld [vmem:[#allocation2 + $0x2a9] sm:$0xff]  ;;  %v13146_v42 = vmax.f32 %v13065_v12, %v13130_v40  ;;  %v13150_v43 = vmax.f32 %v4818_v53, %v13105_v8  ;;  %v13154_v30 = vpop.f32.mrf.mxu0  ;;  %v6798_v58 = vmax.f32 %v6734_v37, %v13142_v38  ;;  %v13177_v32 = vld [vmem:[#allocation2 + $0x2b8] sm:$0xff] }
 0x292   :  { %v3898_v39 = vld [vmem:[#allocation2 + $0x2aa] sm:$0xff]  ;;  %v4090_v49 = vmax.f32 %v3770_v60, %v3834_v27  ;;  %15798 = vst [vmem:[#allocation38_spill] sm:$0xff] %v13154_v30  ;;  %v13159_v12 = vmax.f32 %v13076_v48, %v13142_v38  ;;  %8933 = vmatmul.mubr.msk.f32.gmra.mxu1 %vm1183_vm2, %v2483_v19  ;;  %3710 = vst.msk [vmem:[#allocation2 + $0x2da] sm:$0xff] %vm1183_vm2, %v2483_v19  ;;  %9145 = vmatprep.mubr.msk.f32.mxu0 %vm1183_vm2, %v6797_v63  ;;  %v13179_v19 = vld [vmem:[#allocation2 + $0x2b9] sm:$0xff] }
 0x293   :  { %v3962_v41 = vld [vmem:[#allocation2 + $0x2ab] sm:$0xff]  ;;  %v4817_v56 = vmax.f32 %v12910_v36, %v13136_v62  ;;  %v6038_v37 = vmax.f32 %v13116_v52, %v13118_v25  ;;  %5592 = vst.msk [vmem:[#allocation2 + $0xca] sm:$0xff] %vm1183_vm2, %v13150_v43  ;;  %v2420_v60 = vmax.f32 %v12935_v16, %v2356_v34  ;;  %9146 = vmatmul.mubr.msk.f32.gmra.mxu0 %vm1183_vm2, %v6798_v58  ;;  %v13192_v51 = vpop.f32.mrf.mxu0 }
 0x294   :  { %v13165_v14 = vld [vmem:[#allocation3 + $0xa8] sm:$0xff]  ;;  %v13167_v53 = vld [vmem:[#allocation3 + $0x270] sm:$0xff]  ;;  %v4154_v24 = vmax.f32 %v3898_v39, %v3962_v41  ;;  %v6735_v27 = vmax.f32 %v12948_v9, %v13146_v42  ;;  %v6736_v52 = vmax.f32 %v12979_v15, %v13159_v12  ;;  %v4281_v41 = vmax.f32 %v4217_v61, %v4025_v4  ;;  %v3899_v9 = vld [vmem:[#allocation2 + $0x2ba] sm:$0xff]  ;;  %15800 = vst [vmem:[#allocation39_spill] sm:$0xff] %v13192_v51 }
 0x295   :  { %v4026_v48 = vld [vmem:[#allocation2 + $0x2ac] sm:$0xff]  ;;  %v4692_v36 = vmax.f32 %v13084_v7, %v13165_v14  ;;  %v13186_v30 = vmax.f32 %v4817_v56, %v4625_v26  ;;  %v2484_v50 = vmax.f32 %v2420_v60, %v13167_v53  ;;  %v3963_v26 = vld [vmem:[#allocation2 + $0x2bb] sm:$0xff] }
 0x296   :  { %v5653_v25 = vld [vmem:[#allocation2 + $0xa8] sm:$0xff]  ;;  %v5654_v34 = vld [vmem:[#allocation2 + $0xb0] sm:$0xff]  ;;  %v4218_v54 = vmax.f32 %v4090_v49, %v4154_v24  ;;  %4345 = vst.msk [vmem:[#allocation3 + $0x220] sm:$0xff] %vm1183_vm2, %v4281_v41  ;;  %v13199_v61 = vld [vmem:[#allocation3 + $0x218] sm:$0xff] }
 0x297   :  { %v5717_v63 = vld [vmem:[#allocation2 + $0xa9] sm:$0xff]  ;;  %v4820_v58 = vmax.f32 %v4692_v36, %v15799_v55  ;;  %v5718_v59 = vld [vmem:[#allocation2 + $0xb1] sm:$0xff]  ;;  %5591 = vst.msk [vmem:[#allocation2 + $0xc2] sm:$0xff] %vm1183_vm2, %v13186_v30  ;;  %8935 = vmatprep.mubr.msk.f32.mxu1 %vm1183_vm2, %v2484_v50  ;;  %3711 = vst.msk [vmem:[#allocation2 + $0x2ea] sm:$0xff] %vm1183_vm2, %v2484_v50  ;;  %v4091_v36 = vmax.f32 %v13177_v32, %v13179_v19  ;;  %v15801_v50 = vmax.f32 %v12940_v33, %v13070_v11 }
 0x298   :  { %v5781_v39 = vld [vmem:[#allocation2 + $0xaa] sm:$0xff]  ;;  %v5973_v16 = vmax.f32 %v5653_v25, %v5717_v63  ;;  %v13197_v4 = vld [vmem:[#allocation3 + $0x80] sm:$0xff]  ;;  %v5974_v57 = vmax.f32 %v5654_v34, %v5718_v59  ;;  %v4282_v55 = vmax.f32 %v4218_v54, %v4026_v48  ;;  %v13201_v56 = vld [vmem:[#allocation3 + $0xd8] sm:$0xff]  ;;  %v4155_v54 = vmax.f32 %v3899_v9, %v3963_v26 }
 0x299   :  { %v5845_v7 = vld [vmem:[#allocation2 + $0xab] sm:$0xff]  ;;  %v13204_v24 = vmax.f32 %v4820_v58, %v13201_v56  ;;  %v6799_v60 = vmax.f32 %v6735_v27, %v13197_v4  ;;  %v2357_v48 = vmax.f32 %v13045_v5, %v13126_v3  ;;  %v13224_v32 = vmax.f32 %v15801_v50, %v13199_v61  ;;  %v3965_v5 = vld [vmem:[#allocation2 + $0x2d3] sm:$0xff]  ;;  %v4027_v26 = vld [vmem:[#allocation2 + $0x2bc] sm:$0xff] }
 0x29a   :  { %v6037_v15 = vmax.f32 %v5781_v39, %v5845_v7  ;;  %v5909_v49 = vld [vmem:[#allocation2 + $0xac] sm:$0xff]  ;;  %v13218_v7 = vmax.f32 %v13055_v23, %v13199_v61  ;;  %v6102_v19 = vmax.f32 %v5974_v57, %v6038_v37  ;;  %4346 = vst.msk [vmem:[#allocation3 + $0x228] sm:$0xff] %vm1183_vm2, %v4282_v55  ;;  %v5910_v34 = vld [vmem:[#allocation2 + $0xb4] sm:$0xff]  ;;  %v13241_v9 = vmax.f32 %v13130_v40, %v13197_v4  ;;  %v13253_v40 = vld [vmem:[#allocation2 + $0x2c0] sm:$0xff] }
 0x29b   :  { %v13211_v25 = vld [vmem:[#allocation3 + $0x88] sm:$0xff]  ;;  %v3773_v39 = vld [vmem:[#allocation2 + $0x2d0] sm:$0xff]  ;;  %15802 = vst [vmem:[#allocation43_spill] sm:$0xff] %v13224_v32  ;;  %5594 = vst.msk [vmem:[#allocation2 + $0xe2] sm:$0xff] %vm1183_vm2, %v13204_v24  ;;  %9148 = vmatprep.mubr.msk.f32.mxu0 %vm1183_vm2, %v6799_v60  ;;  %v4219_v60 = vmax.f32 %v4091_v36, %v4155_v54 }
 0x29c   :  { %v6101_v63 = vmax.f32 %v5973_v16, %v6037_v15  ;;  %v3837_v59 = vld [vmem:[#allocation2 + $0x2d1] sm:$0xff]  ;;  %v6800_v41 = vmax.f32 %v6736_v52, %v13211_v25  ;;  %v13229_v16 = vld [vmem:[#allocation3 + $0xc0] sm:$0xff]  ;;  %v13231_v52 = vpop.f32.mrf.mxu0  ;;  %5626 = vst.msk [vmem:[#allocation2 + $0x262] sm:$0xff] %vm1183_vm2, %v13224_v32  ;;  %v6166_v15 = vmax.f32 %v6102_v19, %v5910_v34  ;;  %v4854_v36 = vmax.f32 %v13003_v22, %v13218_v7 }
 0x29d   :  { %v3901_v27 = vld [vmem:[#allocation2 + $0x2d2] sm:$0xff]  ;;  %15803 = vst [vmem:[#allocation44_spill] sm:$0xff] %v13231_v52  ;;  %v13234_v58 = vld [vmem:[#allocation2 + $0xca] sm:$0xff]  ;;  %v4093_v37 = vmax.f32 %v3773_v39, %v3837_v59  ;;  %v2421_v39 = vmax.f32 %v12989_v6, %v2357_v48  ;;  %v4283_v34 = vmax.f32 %v4219_v60, %v4027_v26  ;;  %v6737_v22 = vmax.f32 %v13080_v35, %v13241_v9 }
 0x29e   :  { %v6165_v23 = vmax.f32 %v6101_v63, %v5909_v49  ;;  %v13236_v33 = vld [vmem:[#allocation2 + $0xcb] sm:$0xff]  ;;  %9149 = vmatmul.mubr.msk.f32.gmra.mxu0 %vm1183_vm2, %v6800_v41  ;;  %v4157_v57 = vmax.f32 %v3901_v27, %v3965_v5  ;;  %v13245_v55 = vld [vmem:[#allocation3 + $0x278] sm:$0xff]  ;;  %v13250_v63 = vmax.f32 %v13124_v20, %v13229_v16  ;;  %6230 = vst.msk [vmem:[#allocation3 + $0x98] sm:$0xff] %vm1183_vm2, %v6166_v15  ;;  %v5655_v50 = vld [vmem:[#allocation2 + $0xc0] sm:$0xff]  ;;  %v13264_v6 = vpop.f32.mrf.mxu0 }
 0x29f   :  { %v4029_v49 = vld [vmem:[#allocation2 + $0x2d4] sm:$0xff]  ;;  %v6674_v41 = vmax.f32 %v13142_v38, %v13211_v25  ;;  %v5719_v19 = vld [vmem:[#allocation2 + $0xc1] sm:$0xff]  ;;  %v6040_v20 = vmax.f32 %v13234_v58, %v13236_v33  ;;  %15804 = vst [vmem:[#allocation62_spill] sm:$0xff] %v13264_v6  ;;  %v2485_v38 = vmax.f32 %v2421_v39, %v13245_v55  ;;  %v5720_v58 = vld [vmem:[#allocation2 + $0xc9] sm:$0xff] }
 0x2a0   :  { %6229 = vst.msk [vmem:[#allocation3 + $0x90] sm:$0xff] %vm1183_vm2, %v6165_v23  ;;  %v13255_v59 = vld [vmem:[#allocation2 + $0x2d8] sm:$0xff]  ;;  %v4221_v54 = vmax.f32 %v4093_v37, %v4157_v57  ;;  %v3836_v27 = vld [vmem:[#allocation2 + $0x2c1] sm:$0xff]  ;;  %v5975_v23 = vmax.f32 %v5655_v50, %v5719_v19  ;;  %v4819_v15 = vmax.f32 %v13043_v21, %v13250_v63  ;;  %v8844_v57 = vpop.f32.mrf.mxu1  ;;  %v13271_v6 = vpop.f32.mrf.mxu0  ;;  %4347 = vst.msk [vmem:[#allocation3 + $0x230] sm:$0xff] %vm1183_vm2, %v4283_v34 }
 0x2a1   :  { %v5783_v48 = vld [vmem:[#allocation2 + $0xc2] sm:$0xff]  ;;  %v3838_v52 = vld [vmem:[#allocation2 + $0x2d9] sm:$0xff]  ;;  %15805 = vst [vmem:[#allocation47_spill] sm:$0xff] %v13271_v6  ;;  %v9755_v21 = vld [vmem:[#allocation3 + $0xd0] sm:$0xff]  ;;  %8936 = vmatmul.mubr.msk.f32.gmra.mxu1 %vm1183_vm2, %v2485_v38  ;;  %v4092_v35 = vmax.f32 %v13253_v40, %v3836_v27  ;;  %v6738_v39 = vmax.f32 %v13091_v45, %v6674_v41 }
 0x2a2   :  { %v5847_v5 = vld [vmem:[#allocation2 + $0xc3] sm:$0xff]  ;;  %v4285_v33 = vmax.f32 %v4221_v54, %v4029_v49  ;;  %v13276_v60 = vmax.f32 %v4819_v15, %v9755_v21  ;;  %3712 = vst.msk [vmem:[#allocation2 + $0x2f2] sm:$0xff] %vm1183_vm2, %v2485_v38  ;;  %v13282_v49 = vadd.f32 %v12751_v28, %v8844_v57  ;;  %v3902_v54 = vld [vmem:[#allocation2 + $0x2da] sm:$0xff]  ;;  %v4094_v34 = vmax.f32 %v13255_v59, %v3838_v52  ;;  %v13292_v40 = vpop.f32.mrf.mxu1  ;;  %v13294_v28 = vpop.f32.mrf.mxu0 }
 0x2a3   :  { %v6039_v51 = vmax.f32 %v5783_v48, %v5847_v5  ;;  %v5656_v32 = vld [vmem:[#allocation2 + $0xc8] sm:$0xff]  ;;  %v3966_v5 = vld [vmem:[#allocation2 + $0x2db] sm:$0xff]  ;;  %9038 = vmatprep.mubr.msk.f32.mxu1 %vm1183_vm2, %v12564_v0  ;;  %15807 = vst [vmem:[#allocation10_spill] sm:$0xff] %v13292_v40  ;;  %15808 = vst [vmem:[#allocation11_spill] sm:$0xff] %v13294_v28  ;;  %v4758_v52 = vmax.f32 %v13105_v8, %v13201_v56 }
 0x2a4   :  { %v3900_v37 = vld [vmem:[#allocation2 + $0x2c2] sm:$0xff]  ;;  %v5976_v26 = vmax.f32 %v5656_v32, %v5720_v58  ;;  %15806 = vst [vmem:[#allocation48_spill] sm:$0xff] %v13282_v49  ;;  %v5912_v32 = vld [vmem:[#allocation2 + $0xcc] sm:$0xff]  ;;  %4349 = vst.msk [vmem:[#allocation3 + $0x240] sm:$0xff] %vm1183_vm2, %v4285_v33  ;;  %v4158_v27 = vmax.f32 %v3902_v54, %v3966_v5  ;;  %v13307_v33 = vpop.f32.mrf.mxu1  ;;  %v13309_v57 = vpop.f32.mrf.mxu0 }
 0x2a5   :  { %v13273_v13 = vld [vmem:[#allocation3 + $0x228] sm:$0xff]  ;;  %v6103_v50 = vmax.f32 %v5975_v23, %v6039_v51  ;;  %5593 = vst.msk [vmem:[#allocation2 + $0xda] sm:$0xff] %vm1183_vm2, %v13276_v60  ;;  %v4376_v23 = vld [vmem:[#allocation3 + $0xb8] sm:$0xff]  ;;  %15809 = vst [vmem:[#allocation26_spill] sm:$0xff] %v13309_v57  ;;  %9039 = vmatmul.mubr.msk.f32.vlgmr.msra.gmra.mxu1 %vm1183_vm2, %v11955_v31 }
 0x2a6   :  { %v13286_v19 = vmax.f32 %v4854_v36, %v13273_v13  ;;  %v3964_v48 = vld [vmem:[#allocation2 + $0x2c3] sm:$0xff]  ;;  %v6104_v51 = vmax.f32 %v5976_v26, %v6040_v20  ;;  %v13312_v26 = vld [vmem:[#allocation3 + $0x98] sm:$0xff]  ;;  %v4565_v57 = vld [vmem:[#allocation3 + $0xd0] sm:$0xff]  ;;  %9041 = vmatprep.mubr.msk.f32.mxu1 %vm1183_vm2, %v12580_v47 }
 0x2a7   :  { %v5911_v45 = vld [vmem:[#allocation2 + $0xc4] sm:$0xff]  ;;  %v4156_v36 = vmax.f32 %v3900_v37, %v3964_v48  ;;  %v13302_v59 = vld [vmem:[#allocation3 + $0x90] sm:$0xff]  ;;  %v4030_v54 = vld [vmem:[#allocation2 + $0x2dc] sm:$0xff]  ;;  %v4694_v48 = vmax.f32 %v13165_v14, %v4376_v23  ;;  %v6802_v5 = vmax.f32 %v6738_v39, %v13312_v26  ;;  %v6676_v31 = vmax.f32 %v13211_v25, %v13312_v26 }
 0x2a8   :  { %v13296_v41 = vld [vmem:[#allocation2 + $0x2e8] sm:$0xff]  ;;  %v6167_v0 = vmax.f32 %v6103_v50, %v5911_v45  ;;  %5628 = vst.msk [vmem:[#allocation2 + $0x27a] sm:$0xff] %vm1183_vm2, %v13286_v19  ;;  %v6801_v37 = vmax.f32 %v6737_v22, %v13302_v59  ;;  %v6168_v8 = vmax.f32 %v6104_v51, %v5912_v32  ;;  %v4222_v45 = vmax.f32 %v4094_v34, %v4158_v27  ;;  %v13323_v32 = vpop.f32.mrf.mxu1  ;;  %v15826_v49 = vld [vmem:[#allocation20_spill] sm:$0xff] }
 0x2a9   :  { %v4028_v15 = vld [vmem:[#allocation2 + $0x2c4] sm:$0xff]  ;;  %v4220_v50 = vmax.f32 %v4092_v35, %v4156_v36  ;;  %15810 = vst [vmem:[#allocation73_spill] sm:$0xff] %v13323_v32  ;;  %v13325_v35 = vpop.f32.mrf.mxu0  ;;  %v13334_v34 = vmax.f32 %v13199_v61, %v13273_v13  ;;  %v3776_v51 = vld [vmem:[#allocation2 + $0x2f0] sm:$0xff]  ;;  %9042 = vmatmul.mubr.msk.f32.gmra.mxu1 %vm1183_vm2, %v11980_v44  ;;  %v6740_v44 = vmax.f32 %v13159_v12, %v6676_v31 }
 0x2aa   :  { %v4440_v38 = vld [vmem:[#allocation3 + $0xc8] sm:$0xff]  ;;  %6231 = vst.msk [vmem:[#allocation3 + $0xa0] sm:$0xff] %vm1183_vm2, %v6167_v0  ;;  %15811 = vst [vmem:[#allocation57_spill] sm:$0xff] %v13325_v35  ;;  %9151 = vmatprep.mubr.msk.f32.mxu0 %vm1183_vm2, %v6801_v37  ;;  %v3840_v36 = vld [vmem:[#allocation2 + $0x2f1] sm:$0xff]  ;;  %v4286_v27 = vmax.f32 %v4222_v45, %v4030_v54  ;;  %v13341_v37 = vpop.f32.mrf.mxu1  ;;  %9044 = vmatprep.mubr.msk.f32.mxu1 %vm1183_vm2, %v12602_v17 }
 0x2ab   :  { %v9756_v20 = vld [vmem:[#allocation3 + $0xe8] sm:$0xff]  ;;  %v4696_v22 = vmax.f32 %v4376_v23, %v4440_v38  ;;  %6232 = vst.msk [vmem:[#allocation3 + $0xa8] sm:$0xff] %vm1183_vm2, %v6168_v8  ;;  %v4284_v39 = vmax.f32 %v4220_v50, %v4028_v15  ;;  %9152 = vmatmul.mubr.msk.f32.gmra.mxu0 %vm1183_vm2, %v6802_v5  ;;  %v13339_v38 = vld [vmem:[#allocation3 + $0xe0] sm:$0xff]  ;;  %v3904_v15 = vld [vmem:[#allocation2 + $0x2f2] sm:$0xff]  ;;  %v13362_v45 = vpop.f32.mrf.mxu0  ;;  %v4856_v12 = vmax.f32 %v13070_v11, %v13334_v34 }
 0x2ac   :  { %v4760_v58 = vmax.f32 %v13201_v56, %v9756_v20  ;;  %v3839_v21 = vld [vmem:[#allocation2 + $0x2e9] sm:$0xff]  ;;  %v6675_v56 = vmax.f32 %v13197_v4, %v13302_v59  ;;  %v4822_v4 = vmax.f32 %v4694_v48, %v4758_v52  ;;  %v5721_v54 = vld [vmem:[#allocation2 + $0xd9] sm:$0xff]  ;;  %v4096_v48 = vmax.f32 %v3776_v51, %v3840_v36  ;;  %4350 = vst.msk [vmem:[#allocation3 + $0x248] sm:$0xff] %vm1183_vm2, %v4286_v27 }
 0x2ad   :  { %v3903_v14 = vld [vmem:[#allocation2 + $0x2ea] sm:$0xff]  ;;  %v4095_v47 = vmax.f32 %v13296_v41, %v3839_v21  ;;  %v13337_v0 = vld [vmem:[#allocation2 + $0xe2] sm:$0xff]  ;;  %4348 = vst.msk [vmem:[#allocation3 + $0x238] sm:$0xff] %vm1183_vm2, %v4284_v39  ;;  %v13349_v41 = vmax.f32 %v13229_v16, %v4565_v57  ;;  %v5657_v21 = vld [vmem:[#allocation2 + $0xd8] sm:$0xff]  ;;  %v13360_v16 = vpop.f32.mrf.mxu1  ;;  %9045 = vmatmul.mubr.msk.f32.gmra.mxu1 %vm1183_vm2, %v12014_v29  ;;  %v13404_v29 = vpop.f32.mrf.mxu0 }
 0x2ae   :  { %v4824_v23 = vmax.f32 %v4696_v22, %v4760_v58  ;;  %v3967_v52 = vld [vmem:[#allocation2 + $0x2eb] sm:$0xff]  ;;  %v13344_v8 = vmax.f32 %v4822_v4, %v9756_v20  ;;  %v13346_v61 = vld [vmem:[#allocation2 + $0xe3] sm:$0xff]  ;;  %v6739_v58 = vmax.f32 %v13146_v42, %v6675_v56  ;;  %v5785_v50 = vld [vmem:[#allocation2 + $0xda] sm:$0xff]  ;;  %15812 = vst [vmem:[#allocation58_spill] sm:$0xff] %v13360_v16  ;;  %v5977_v56 = vmax.f32 %v5657_v21, %v5721_v54 }
 0x2af   :  { %v4159_v5 = vmax.f32 %v3903_v14, %v3967_v52  ;;  %15813 = vst [vmem:[#allocation61_spill] sm:$0xff] %v13362_v45  ;;  %v5849_v42 = vld [vmem:[#allocation2 + $0xdb] sm:$0xff]  ;;  %v3968_v22 = vld [vmem:[#allocation2 + $0x2f3] sm:$0xff]  ;;  %v4821_v14 = vmax.f32 %v13136_v62, %v13349_v41  ;;  %v6042_v21 = vmax.f32 %v13337_v0, %v13346_v61  ;;  %v15814_v11 = vld [vmem:[#allocation17_spill] sm:$0xff] }
 0x2b0   :  { %v13356_v20 = vmax.f32 %v4824_v23, %v12394_v46  ;;  %5596 = vst.msk [vmem:[#allocation2 + $0xfa] sm:$0xff] %vm1183_vm2, %v13344_v8  ;;  %v4759_v46 = vmax.f32 %v4565_v57, %v13339_v38  ;;  %v13370_v39 = vld [vmem:[#allocation3 + $0xf0] sm:$0xff]  ;;  %v13372_v17 = vld [vmem:[#allocation3 + $0x240] sm:$0xff]  ;;  %v6041_v4 = vmax.f32 %v5785_v50, %v5849_v42  ;;  %v4160_v36 = vmax.f32 %v3904_v15, %v3968_v22  ;;  %v13378_v23 = vpop.f32.mrf.mxu1 }
 0x2b1   :  { %v4031_v51 = vld [vmem:[#allocation2 + $0x2ec] sm:$0xff]  ;;  %v4223_v27 = vmax.f32 %v4095_v47, %v4159_v5  ;;  %v5658_v31 = vld [vmem:[#allocation2 + $0xe0] sm:$0xff]  ;;  %v4032_v57 = vld [vmem:[#allocation2 + $0x2f4] sm:$0xff]  ;;  %v13391_v15 = vadd.f32 %v15814_v11, %v13307_v33  ;;  %v4761_v61 = vmax.f32 %v13339_v38, %v13370_v39  ;;  %15818 = vst [vmem:[#allocation80_spill] sm:$0xff] %v13404_v29 }
 0x2b2   :  { %5598 = vst.msk [vmem:[#allocation2 + $0x112] sm:$0xff] %vm1183_vm2, %v13356_v20  ;;  %v13380_v62 = vld [vmem:[#allocation3 + $0xa0] sm:$0xff]  ;;  %v4823_v47 = vmax.f32 %v13250_v63, %v4759_v46  ;;  %v13394_v42 = vld [vmem:[#allocation3 + $0xa8] sm:$0xff]  ;;  %v13396_v22 = vld [vmem:[#allocation3 + $0x230] sm:$0xff]  ;;  %v6105_v45 = vmax.f32 %v5977_v56, %v6041_v4  ;;  %v4224_v0 = vmax.f32 %v4096_v48, %v4160_v36  ;;  %v13402_v63 = vpop.f32.mrf.mxu1 }
 0x2b3   :  { %v5722_v52 = vld [vmem:[#allocation2 + $0xe1] sm:$0xff]  ;;  %15815 = vst [vmem:[#allocation63_spill] sm:$0xff] %v13391_v15  ;;  %v6803_v5 = vmax.f32 %v6739_v58, %v13380_v62  ;;  %15817 = vst [vmem:[#allocation33_spill] sm:$0xff] %v13402_v63  ;;  %v13406_v33 = vld [vmem:[#allocation3 + $0x210] sm:$0xff]  ;;  %v6804_v58 = vmax.f32 %v6740_v44, %v13394_v42  ;;  %v13411_v46 = vmax.f32 %v13396_v22, %v13372_v17 }
 0x2b4   :  { %v9757_v54 = vld [vmem:[#allocation3 + $0xe0] sm:$0xff]  ;;  %v4287_v48 = vmax.f32 %v4223_v27, %v4031_v51  ;;  %v5978_v4 = vmax.f32 %v5658_v31, %v5722_v52  ;;  %v5665_v38 = vld [vmem:[#allocation2 + $0x138] sm:$0xff]  ;;  %v4288_v44 = vmax.f32 %v4224_v0, %v4032_v57  ;;  %v13422_v27 = vpop.f32.mrf.mxu1  ;;  %v13437_v0 = vmax.f32 %v13312_v26, %v13394_v42 }
 0x2b5   :  { %v13384_v50 = vmax.f32 %v4821_v14, %v9757_v54  ;;  %v15816_v14 = vld [vmem:[#allocation5_spill] sm:$0xff]  ;;  %v5913_v56 = vld [vmem:[#allocation2 + $0xdc] sm:$0xff]  ;;  %9154 = vmatprep.mubr.msk.f32.mxu0 %vm1183_vm2, %v6803_v5  ;;  %v13418_v54 = vmax.f32 %v13302_v59, %v13380_v62  ;;  %v13481_v15 = vld [vmem:[#allocation2 + $0x152] sm:$0xff] }
 0x2b6   :  { %9047 = vmatprep.mubr.msk.f32.mxu1 %vm1183_vm2, %v15816_v14  ;;  %v5729_v39 = vld [vmem:[#allocation2 + $0x139] sm:$0xff]  ;;  %v6169_v36 = vmax.f32 %v6105_v45, %v5913_v56  ;;  %v9758_v14 = vld [vmem:[#allocation3 + $0xf0] sm:$0xff]  ;;  %9155 = vmatmul.mubr.msk.f32.gmra.mxu0 %vm1183_vm2, %v6804_v58  ;;  %4351 = vst.msk [vmem:[#allocation3 + $0x250] sm:$0xff] %vm1183_vm2, %v4287_v48  ;;  %v13428_v45 = vld [vmem:[#allocation3 + $0x248] sm:$0xff] }
 0x2b7   :  { %5595 = vst.msk [vmem:[#allocation2 + $0xf2] sm:$0xff] %vm1183_vm2, %v13384_v50  ;;  %v4416_v11 = vld [vmem:[#allocation3 + $0x238] sm:$0xff]  ;;  %v13420_v29 = vmax.f32 %v4823_v47, %v9758_v14  ;;  %v13424_v31 = vld [vmem:[#allocation3 + $0x220] sm:$0xff]  ;;  %v6106_v47 = vmax.f32 %v5978_v4, %v6042_v21  ;;  %4352 = vst.msk [vmem:[#allocation3 + $0x258] sm:$0xff] %vm1183_vm2, %v4288_v44  ;;  %v5985_v4 = vmax.f32 %v5665_v38, %v5729_v39  ;;  %v13455_v44 = vpop.f32.mrf.mxu1  ;;  %v13457_v14 = vpop.f32.mrf.mxu0 }
 0x2b8   :  { %v5793_v35 = vld [vmem:[#allocation2 + $0x13a] sm:$0xff]  ;;  %v13431_v52 = vmax.f32 %v13273_v13, %v4416_v11  ;;  %v13433_v57 = vmax.f32 %v4856_v12, %v4416_v11  ;;  %v5914_v5 = vld [vmem:[#allocation2 + $0xe4] sm:$0xff]  ;;  %6233 = vst.msk [vmem:[#allocation3 + $0xb0] sm:$0xff] %vm1183_vm2, %v6169_v36  ;;  %v4731_v58 = vmax.f32 %v13406_v33, %v13424_v31  ;;  %v13444_v56 = vmax.f32 %v4416_v11, %v13428_v45 }
 0x2b9   :  { %v5857_v51 = vld [vmem:[#allocation2 + $0x13b] sm:$0xff]  ;;  %5597 = vst.msk [vmem:[#allocation2 + $0x10a] sm:$0xff] %vm1183_vm2, %v13420_v29  ;;  %v4825_v12 = vmax.f32 %v13349_v41, %v4761_v61  ;;  %v13449_v21 = vld [vmem:[#allocation2 + $0x12a] sm:$0xff]  ;;  %15821 = vst [vmem:[#allocation30_spill] sm:$0xff] %v13455_v44  ;;  %v6170_v28 = vmax.f32 %v6106_v47, %v5914_v5 }
 0x2ba   :  { %15819 = vst [vmem:[#allocation94_spill] sm:$0xff] %v13433_v57  ;;  %v6294_v13 = vld [vmem:[#allocation3 + $0x78] sm:$0xff]  ;;  %v13451_v48 = vld [vmem:[#allocation2 + $0x12b] sm:$0xff]  ;;  %15822 = vst [vmem:[#allocation66_spill] sm:$0xff] %v13457_v14  ;;  %v4858_v11 = vmax.f32 %v13218_v7, %v13431_v52  ;;  %v6049_v38 = vmax.f32 %v5793_v35, %v5857_v51  ;;  %v4733_v14 = vmax.f32 %v13424_v31, %v13396_v22  ;;  %v8859_v51 = vpop.f32.mrf.mxu1 }
 0x2bb   :  { %v15820_v36 = vld [vmem:[#allocation77_spill] sm:$0xff]  ;;  %5630 = vst.msk [vmem:[#allocation2 + $0x292] sm:$0xff] %vm1183_vm2, %v13433_v57  ;;  %v6614_v41 = vmax.f32 %v6294_v13, %v13211_v25  ;;  %v13464_v61 = vld [vmem:[#allocation2 + $0xfa] sm:$0xff]  ;;  %v6741_v7 = vmax.f32 %v13241_v9, %v13418_v54  ;;  %v4859_v5 = vmax.f32 %v4731_v58, %v13411_v46  ;;  %v13479_v13 = vld [vmem:[#allocation2 + $0x151] sm:$0xff]  ;;  %v4860_v63 = vmax.f32 %v13334_v34, %v13444_v56 }
 0x2bc   :  { %9048 = vmatmul.mubr.msk.f32.gmra.mxu1 %vm1183_vm2, %v15820_v36  ;;  %v13466_v6 = vld [vmem:[#allocation2 + $0xfb] sm:$0xff]  ;;  %v13470_v36 = vld [vmem:[#allocation2 + $0x150] sm:$0xff]  ;;  %6234 = vst.msk [vmem:[#allocation3 + $0xb8] sm:$0xff] %vm1183_vm2, %v6170_v28  ;;  %v6113_v44 = vmax.f32 %v5985_v4, %v6049_v38  ;;  %v13510_v4 = vadd.f32 %v12937_v10, %v13378_v23  ;;  %v13512_v34 = vpop.f32.mrf.mxu1  ;;  %v13514_v38 = vpop.f32.mrf.mxu0 }
 0x2bd   :  { %v15823_v39 = vld [vmem:[#allocation15_spill] sm:$0xff]  ;;  %v9759_v47 = vld [vmem:[#allocation3 + $0x100] sm:$0xff]  ;;  %v13488_v22 = vmax.f32 %v6614_v41, %v13437_v0  ;;  %v6044_v28 = vmax.f32 %v13464_v61, %v13466_v6  ;;  %15829 = vst [vmem:[#allocation89_spill] sm:$0xff] %v13512_v34  ;;  %15830 = vst [vmem:[#allocation53_spill] sm:$0xff] %v13514_v38 }
 0x2be   :  { %9050 = vmatprep.mubr.msk.f32.mxu1 %vm1183_vm2, %v15823_v39  ;;  %v13477_v25 = vmax.f32 %v4825_v12, %v9759_v47  ;;  %v5859_v35 = vld [vmem:[#allocation2 + $0x153] sm:$0xff]  ;;  %v13484_v39 = vmax.f32 %v4858_v11, %v13428_v45  ;;  %v5921_v47 = vld [vmem:[#allocation2 + $0x13c] sm:$0xff]  ;;  %v13506_v12 = vadd.f32 %v15826_v49, %v13341_v37  ;;  %15828 = vst [vmem:[#allocation75_spill] sm:$0xff] %v13510_v4 }
 0x2bf   :  { %v13490_v9 = vld [vmem:[#allocation2 + $0x112] sm:$0xff]  ;;  %v15825_v41 = vld [vmem:[#allocation12_spill] sm:$0xff]  ;;  %v6177_v57 = vmax.f32 %v6113_v44, %v5921_v47  ;;  %v6051_v49 = vmax.f32 %v13481_v15, %v5859_v35  ;;  %v13532_v47 = vpop.f32.mrf.mxu1 }
 0x2c0   :  { %15824 = vst [vmem:[#allocation67_spill] sm:$0xff] %v13484_v39  ;;  %v13492_v58 = vld [vmem:[#allocation2 + $0x113] sm:$0xff]  ;;  %5599 = vst.msk [vmem:[#allocation2 + $0x122] sm:$0xff] %vm1183_vm2, %v13477_v25  ;;  %9051 = vmatmul.mubr.msk.f32.gmra.mxu1 %vm1183_vm2, %v15825_v41  ;;  %v5987_v41 = vmax.f32 %v13470_v36, %v13479_v13  ;;  %v15831_v37 = vld [vmem:[#allocation16_spill] sm:$0xff] }
 0x2c1   :  { %v5659_v16 = vld [vmem:[#allocation2 + $0xf0] sm:$0xff]  ;;  %15827 = vst [vmem:[#allocation74_spill] sm:$0xff] %v13506_v12  ;;  %5632 = vst.msk [vmem:[#allocation2 + $0x2aa] sm:$0xff] %vm1183_vm2, %v13484_v39  ;;  %v5660_v40 = vld [vmem:[#allocation2 + $0xf8] sm:$0xff]  ;;  %9053 = vmatprep.mubr.msk.f32.mxu1 %vm1183_vm2, %v15831_v37  ;;  %v13527_v12 = vadd.f32 %v12991_v18, %v13422_v27 }
 0x2c2   :  { %v5723_v11 = vld [vmem:[#allocation2 + $0xf1] sm:$0xff]  ;;  %v5724_v4 = vld [vmem:[#allocation2 + $0xf9] sm:$0xff]  ;;  %15835 = vst [vmem:[#allocation78_spill] sm:$0xff] %v13532_v47  ;;  %6241 = vst.msk [vmem:[#allocation3 + $0xf0] sm:$0xff] %vm1183_vm2, %v6177_v57 }
 0x2c3   :  { %v5787_v32 = vld [vmem:[#allocation2 + $0xf2] sm:$0xff]  ;;  %v5979_v61 = vmax.f32 %v5659_v16, %v5723_v11  ;;  %15832 = vst [vmem:[#allocation52_spill] sm:$0xff] %v13527_v12  ;;  %v5980_v11 = vmax.f32 %v5660_v40, %v5724_v4  ;;  %v13548_v38 = vld [vmem:[#allocation2 + $0x109] sm:$0xff]  ;;  %v13554_v40 = vpop.f32.mrf.mxu1 }
 0x2c4   :  { %v5851_v6 = vld [vmem:[#allocation2 + $0xf3] sm:$0xff]  ;;  %15840 = vst [vmem:[#allocation54_spill] sm:$0xff] %v13554_v40  ;;  %v13561_v12 = vld [vmem:[#allocation2 + $0x168] sm:$0xff] }
 0x2c5   :  { %v4543_v10 = vld [vmem:[#allocation3 + $0x250] sm:$0xff]  ;;  %v6043_v23 = vmax.f32 %v5787_v32, %v5851_v6  ;;  %v15833_v16 = vld [vmem:[#allocation31_spill] sm:$0xff]  ;;  %v13540_v6 = vld [vmem:[#allocation2 + $0x108] sm:$0xff]  ;;  %v13576_v40 = vpop.f32.mrf.mxu1 }
 0x2c6   :  { %v13530_v44 = vadd.f32 %v15833_v16, %v8859_v51  ;;  %v13534_v36 = vld [vmem:[#allocation3 + $0xb0] sm:$0xff]  ;;  %v4544_v15 = vld [vmem:[#allocation3 + $0x258] sm:$0xff]  ;;  %v4797_v13 = vmax.f32 %v13372_v17, %v4543_v10  ;;  %v4799_v32 = vmax.f32 %v4543_v10, %v13103_v1  ;;  %v13538_v35 = vmax.f32 %v4859_v5, %v4543_v10  ;;  %v13552_v5 = vpop.f32.mrf.mxu0  ;;  %15842 = vst [vmem:[#allocation56_spill] sm:$0xff] %v13576_v40  ;;  %v15847_v40 = vld [vmem:[#allocation13_spill] sm:$0xff] }
 0x2c7   :  { %v6805_v18 = vmax.f32 %v6741_v7, %v13534_v36  ;;  %v4798_v27 = vmax.f32 %v13428_v45, %v4544_v15  ;;  %v4800_v51 = vmax.f32 %v4544_v15, %v13126_v3  ;;  %v13546_v37 = vmax.f32 %v4860_v63, %v4544_v15  ;;  %v5915_v16 = vld [vmem:[#allocation2 + $0xf4] sm:$0xff]  ;;  %15839 = vst [vmem:[#allocation82_spill] sm:$0xff] %v13552_v5  ;;  %v5916_v7 = vld [vmem:[#allocation2 + $0xfc] sm:$0xff]  ;;  %v5789_v63 = vld [vmem:[#allocation2 + $0x10a] sm:$0xff] }
 0x2c8   :  { %15834 = vst [vmem:[#allocation7_spill] sm:$0xff] %v13530_v44  ;;  %15836 = vst [vmem:[#allocation79_spill] sm:$0xff] %v13538_v35  ;;  %v15838_v17 = vld [vmem:[#allocation18_spill] sm:$0xff]  ;;  %v4861_v4 = vmax.f32 %v4733_v14, %v4797_v13  ;;  %v4863_v57 = vmax.f32 %v13411_v46, %v4799_v32  ;;  %v6107_v45 = vmax.f32 %v5979_v61, %v6043_v23  ;;  %v15841_v5 = vld [vmem:[#allocation21_spill] sm:$0xff] }
 0x2c9   :  { %15837 = vst [vmem:[#allocation81_spill] sm:$0xff] %v13546_v37  ;;  %9054 = vmatmul.mubr.msk.f32.gmra.mxu1 %vm1183_vm2, %v15838_v17  ;;  %5633 = vst.msk [vmem:[#allocation2 + $0x2ba] sm:$0xff] %vm1183_vm2, %v13538_v35  ;;  %v5853_v10 = vld [vmem:[#allocation2 + $0x10b] sm:$0xff]  ;;  %v13559_v44 = vmax.f32 %v5987_v41, %v6051_v49  ;;  %9157 = vmatprep.mubr.msk.f32.mxu0 %vm1183_vm2, %v6805_v18  ;;  %v4862_v46 = vmax.f32 %v13431_v52, %v4798_v27  ;;  %v13572_v61 = vld [vmem:[#allocation3 + $0xb8] sm:$0xff] }
 0x2ca   :  { %v5662_v15 = vld [vmem:[#allocation2 + $0x110] sm:$0xff]  ;;  %9056 = vmatprep.mubr.msk.f32.mxu1 %vm1183_vm2, %v15841_v5  ;;  %v4864_v14 = vmax.f32 %v13444_v56, %v4800_v51  ;;  %5634 = vst.msk [vmem:[#allocation2 + $0x2c2] sm:$0xff] %vm1183_vm2, %v13546_v37  ;;  %v6295_v41 = vld [vmem:[#allocation3 + $0x80] sm:$0xff]  ;;  %v6108_v49 = vmax.f32 %v5980_v11, %v6044_v28  ;;  %v5981_v23 = vmax.f32 %v13540_v6, %v13548_v38 }
 0x2cb   :  { %v13563_v17 = vld [vmem:[#allocation2 + $0x169] sm:$0xff]  ;;  %v5726_v13 = vld [vmem:[#allocation2 + $0x111] sm:$0xff]  ;;  %v13579_v18 = vmax.f32 %v4861_v4, %v13103_v1  ;;  %v13582_v52 = vmax.f32 %v4863_v57, %v13167_v53  ;;  %v6806_v56 = vmax.f32 %v13488_v22, %v13572_v61  ;;  %v6171_v27 = vmax.f32 %v6107_v45, %v5915_v16  ;;  %v5663_v51 = vld [vmem:[#allocation2 + $0x120] sm:$0xff]  ;;  %v13598_v22 = vpop.f32.mrf.mxu0 }
 0x2cc   :  { %v5797_v32 = vld [vmem:[#allocation2 + $0x16a] sm:$0xff]  ;;  %v5727_v5 = vld [vmem:[#allocation2 + $0x121] sm:$0xff]  ;;  %v13587_v11 = vmax.f32 %v4862_v46, %v13126_v3  ;;  %v13590_v38 = vmax.f32 %v4864_v14, %v13245_v55  ;;  %v13594_v1 = vmax.f32 %v13380_v62, %v13534_v36  ;;  %v6172_v6 = vmax.f32 %v6108_v49, %v5916_v7  ;;  %15848 = vst [vmem:[#allocation85_spill] sm:$0xff] %v13598_v22  ;;  %v5923_v7 = vld [vmem:[#allocation2 + $0x154] sm:$0xff] }
 0x2cd   :  { %15843 = vst [vmem:[#allocation55_spill] sm:$0xff] %v13579_v18  ;;  %15844 = vst [vmem:[#allocation100_spill] sm:$0xff] %v13582_v52  ;;  %v5791_v28 = vld [vmem:[#allocation2 + $0x122] sm:$0xff]  ;;  %v5861_v57 = vld [vmem:[#allocation2 + $0x16b] sm:$0xff]  ;;  %9057 = vmatmul.mubr.msk.f32.gmra.mxu1 %vm1183_vm2, %v15847_v40  ;;  %9158 = vmatmul.mubr.msk.f32.gmra.mxu0 %vm1183_vm2, %v6806_v56  ;;  %v6615_v3 = vmax.f32 %v6295_v41, %v13302_v59  ;;  %v6045_v55 = vmax.f32 %v5789_v63, %v5853_v10  ;;  %v13607_v40 = vpop.f32.mrf.mxu1 }
 0x2ce   :  { %15845 = vst [vmem:[#allocation68_spill] sm:$0xff] %v13587_v11  ;;  %15846 = vst [vmem:[#allocation84_spill] sm:$0xff] %v13590_v38  ;;  %v5855_v53 = vld [vmem:[#allocation2 + $0x123] sm:$0xff]  ;;  %v5982_v62 = vmax.f32 %v5662_v15, %v5726_v13  ;;  %v5983_v16 = vmax.f32 %v5663_v51, %v5727_v5  ;;  %v5918_v46 = vld [vmem:[#allocation2 + $0x114] sm:$0xff]  ;;  %v6179_v59 = vmax.f32 %v13559_v44, %v5923_v7  ;;  %9059 = vmatprep.mubr.msk.f32.mxu1 %vm1183_vm2, %v13082_v2 }
 0x2cf   :  { %v5664_v4 = vld [vmem:[#allocation2 + $0x128] sm:$0xff]  ;;  %5635 = vst.msk [vmem:[#allocation2 + $0x2d2] sm:$0xff] %vm1183_vm2, %v13579_v18  ;;  %5637 = vst.msk [vmem:[#allocation2 + $0x2ea] sm:$0xff] %vm1183_vm2, %v13582_v52  ;;  %v6047_v14 = vmax.f32 %v5791_v28, %v5855_v53  ;;  %v5989_v63 = vmax.f32 %v13561_v12, %v13563_v17  ;;  %v6109_v41 = vmax.f32 %v5981_v23, %v6045_v55  ;;  %v4385_v28 = vld [vmem:[#allocation3 + $0x140] sm:$0xff]  ;;  %v13637_v53 = vpop.f32.mrf.mxu0 }
 0x2d0   :  { %6235 = vst.msk [vmem:[#allocation3 + $0xc0] sm:$0xff] %vm1183_vm2, %v6171_v27  ;;  %v5728_v45 = vld [vmem:[#allocation2 + $0x129] sm:$0xff]  ;;  %15849 = vst [vmem:[#allocation92_spill] sm:$0xff] %v13607_v40  ;;  %v15850_v13 = vmax.f32 %v13490_v9, %v13492_v58  ;;  %v6053_v5 = vmax.f32 %v5797_v32, %v5861_v57  ;;  %v13627_v12 = vmax.f32 %v13394_v42, %v13572_v61  ;;  %v4389_v23 = vld [vmem:[#allocation3 + $0x160] sm:$0xff] }
 0x2d1   :  { %5636 = vst.msk [vmem:[#allocation2 + $0x2da] sm:$0xff] %vm1183_vm2, %v13587_v11  ;;  %5638 = vst.msk [vmem:[#allocation2 + $0x2f2] sm:$0xff] %vm1183_vm2, %v13590_v38  ;;  %v5984_v49 = vmax.f32 %v5664_v4, %v5728_v45  ;;  %v6296_v10 = vld [vmem:[#allocation3 + $0x88] sm:$0xff]  ;;  %v6111_v44 = vmax.f32 %v5983_v16, %v6047_v14  ;;  %v15851_v2 = vmax.f32 %v13449_v21, %v13451_v48  ;;  %v13635_v58 = vld [vmem:[#allocation3 + $0x150] sm:$0xff]  ;;  %v13644_v48 = vpop.f32.mrf.mxu1 }
 0x2d2   :  { %6236 = vst.msk [vmem:[#allocation3 + $0xc8] sm:$0xff] %vm1183_vm2, %v6172_v6  ;;  %v5917_v15 = vld [vmem:[#allocation2 + $0x10c] sm:$0xff]  ;;  %v6110_v56 = vmax.f32 %v5982_v62, %v15850_v13  ;;  %v5919_v27 = vld [vmem:[#allocation2 + $0x124] sm:$0xff]  ;;  %v13623_v6 = vmax.f32 %v6615_v3, %v13594_v1  ;;  %6243 = vst.msk [vmem:[#allocation3 + $0x100] sm:$0xff] %vm1183_vm2, %v6179_v59  ;;  %v6117_v62 = vmax.f32 %v5989_v63, %v6053_v5 }
 0x2d3   :  { %v5920_v51 = vld [vmem:[#allocation2 + $0x12c] sm:$0xff]  ;;  %v6112_v17 = vmax.f32 %v5984_v49, %v15851_v2  ;;  %15853 = vst [vmem:[#allocation93_spill] sm:$0xff] %v13637_v53  ;;  %v5698_v4 = vld [vmem:[#allocation2 + $0x2c0] sm:$0xff]  ;;  %v6173_v3 = vmax.f32 %v6109_v41, %v5917_v15  ;;  %v13642_v21 = vmax.f32 %v4385_v28, %v13635_v58  ;;  %15854 = vst [vmem:[#allocation59_spill] sm:$0xff] %v13644_v48 }
 0x2d4   :  { %v15852_v9 = vld [vmem:[#allocation41_spill] sm:$0xff]  ;;  %v4391_v32 = vld [vmem:[#allocation3 + $0x170] sm:$0xff]  ;;  %v6174_v55 = vmax.f32 %v6110_v56, %v5918_v46  ;;  %v6616_v7 = vmax.f32 %v6296_v10, %v13312_v26  ;;  %v6175_v14 = vmax.f32 %v6111_v44, %v5919_v27  ;;  %v4393_v13 = vld [vmem:[#allocation3 + $0x180] sm:$0xff]  ;;  %v4707_v15 = vmax.f32 %v13635_v58, %v4389_v23  ;;  %v13664_v44 = vpop.f32.mrf.mxu0 }
 0x2d5   :  { %9060 = vmatmul.mubr.msk.f32.gmra.mxu1 %vm1183_vm2, %v15852_v9  ;;  %v5762_v57 = vld [vmem:[#allocation2 + $0x2c1] sm:$0xff]  ;;  %v6176_v49 = vmax.f32 %v6112_v17, %v5920_v51  ;;  %v5925_v59 = vld [vmem:[#allocation2 + $0x16c] sm:$0xff]  ;;  %6237 = vst.msk [vmem:[#allocation3 + $0xd0] sm:$0xff] %vm1183_vm2, %v6173_v3  ;;  %v4709_v41 = vmax.f32 %v4389_v23, %v4391_v32  ;;  %v4711_v10 = vmax.f32 %v4391_v32, %v4393_v13  ;;  %15855 = vst [vmem:[#allocation90_spill] sm:$0xff] %v13664_v44 }
 0x2d6   :  { %v5826_v42 = vld [vmem:[#allocation2 + $0x2c2] sm:$0xff]  ;;  %9062 = vmatprep.mubr.msk.f32.mxu1 %vm1183_vm2, %v13186_v30  ;;  %v6018_v45 = vmax.f32 %v5698_v4, %v5762_v57  ;;  %6238 = vst.msk [vmem:[#allocation3 + $0xd8] sm:$0xff] %vm1183_vm2, %v6174_v55  ;;  %v6181_v46 = vmax.f32 %v6117_v62, %v5925_v59  ;;  %v4581_v30 = vld [vmem:[#allocation3 + $0x190] sm:$0xff]  ;;  %v6744_v26 = vmax.f32 %v6616_v7, %v13627_v12  ;;  %6239 = vst.msk [vmem:[#allocation3 + $0xe0] sm:$0xff] %vm1183_vm2, %v6175_v14 }
 0x2d7   :  { %v5890_v16 = vld [vmem:[#allocation2 + $0x2c3] sm:$0xff]  ;;  %v4647_v56 = vld [vmem:[#allocation3 + $0x1b0] sm:$0xff]  ;;  %6240 = vst.msk [vmem:[#allocation3 + $0xe8] sm:$0xff] %vm1183_vm2, %v6176_v49  ;;  %v13657_v27 = vmax.f32 %v4393_v13, %v4581_v30  ;;  %v13794_v53 = vld [vmem:[#allocation2 + $0x1ba] sm:$0xff] }
 0x2d8   :  { %v6082_v2 = vmax.f32 %v5826_v42, %v5890_v16  ;;  %v13649_v63 = vld [vmem:[#allocation3 + $0x1a0] sm:$0xff]  ;;  %v5700_v17 = vld [vmem:[#allocation2 + $0x2d8] sm:$0xff]  ;;  %v5702_v9 = vld [vmem:[#allocation2 + $0x2f0] sm:$0xff]  ;;  %6245 = vst.msk [vmem:[#allocation3 + $0x110] sm:$0xff] %vm1183_vm2, %v6181_v46  ;;  %v13676_v42 = vpop.f32.mrf.mxu1 }
 0x2d9   :  { %v5954_v5 = vld [vmem:[#allocation2 + $0x2c4] sm:$0xff]  ;;  %9063 = vmatmul.mubr.msk.f32.gmra.mxu1 %vm1183_vm2, %v13150_v43  ;;  %v13662_v51 = vmax.f32 %v4581_v30, %v13649_v63  ;;  %v5764_v23 = vld [vmem:[#allocation2 + $0x2d9] sm:$0xff]  ;;  %v4833_v43 = vmax.f32 %v13642_v21, %v4709_v41  ;;  %15856 = vst [vmem:[#allocation86_spill] sm:$0xff] %v13676_v42  ;;  %v5766_v3 = vld [vmem:[#allocation2 + $0x2f1] sm:$0xff] }
 0x2da   :  { %v13652_v28 = vld [vmem:[#allocation3 + $0xc0] sm:$0xff]  ;;  %v6146_v4 = vmax.f32 %v6018_v45, %v6082_v2  ;;  %9065 = vmatprep.mubr.msk.f32.mxu1 %vm1183_vm2, %v13276_v60  ;;  %v5830_v62 = vld [vmem:[#allocation2 + $0x2f2] sm:$0xff]  ;;  %v6020_v16 = vmax.f32 %v5700_v17, %v5764_v23  ;;  %v4835_v45 = vmax.f32 %v4707_v15, %v4711_v10  ;;  %v6022_v49 = vmax.f32 %v5702_v9, %v5766_v3  ;;  %v6552_v15 = vld [vmem:[#allocation3 + $0xc8] sm:$0xff] }
 0x2db   :  { %v6807_v57 = vmax.f32 %v13623_v6, %v13652_v28  ;;  %v13670_v32 = vmax.f32 %v13534_v36, %v13652_v28  ;;  %v5828_v55 = vld [vmem:[#allocation2 + $0x2da] sm:$0xff]  ;;  %v4837_v6 = vmax.f32 %v4709_v41, %v13657_v27  ;;  %v4839_v7 = vmax.f32 %v4711_v10, %v13662_v51  ;;  %v13683_v2 = vld [vmem:[#allocation3 + $0xf0] sm:$0xff] }
 0x2dc   :  { %v5892_v36 = vld [vmem:[#allocation2 + $0x2db] sm:$0xff]  ;;  %v5894_v14 = vld [vmem:[#allocation2 + $0x2f3] sm:$0xff]  ;;  %v6210_v59 = vmax.f32 %v6146_v4, %v5954_v5  ;;  %v13685_v46 = vmax.f32 %v4833_v43, %v4393_v13  ;;  %v13689_v41 = vmax.f32 %v4835_v45, %v4581_v30  ;;  %v13696_v5 = vpop.f32.mrf.mxu0  ;;  %v6808_v13 = vmax.f32 %v6744_v26, %v6552_v15  ;;  %v13712_v26 = vld [vmem:[#allocation3 + $0x108] sm:$0xff] }
 0x2dd   :  { %9160 = vmatprep.mubr.msk.f32.mxu0 %vm1183_vm2, %v6807_v57  ;;  %v6745_v60 = vmax.f32 %v13418_v54, %v13670_v32  ;;  %v6084_v44 = vmax.f32 %v5828_v55, %v5892_v36  ;;  %v6086_v17 = vmax.f32 %v5830_v62, %v5894_v14  ;;  %v13687_v23 = vld [vmem:[#allocation3 + $0x100] sm:$0xff]  ;;  %v13692_v10 = vmax.f32 %v4837_v6, %v13649_v63  ;;  %v5958_v54 = vld [vmem:[#allocation2 + $0x2f4] sm:$0xff] }
 0x2de   :  { %9066 = vmatmul.mubr.msk.f32.gmra.mxu1 %vm1183_vm2, %v13204_v24  ;;  %15857 = vst [vmem:[#allocation95_spill] sm:$0xff] %v13696_v5  ;;  %6274 = vst.msk [vmem:[#allocation3 + $0x238] sm:$0xff] %vm1183_vm2, %v6210_v59  ;;  %v13700_v9 = vmax.f32 %v13572_v61, %v6552_v15  ;;  %v13702_v4 = vld [vmem:[#allocation3 + $0xf8] sm:$0xff]  ;;  %v13706_v30 = vmax.f32 %v4839_v7, %v4647_v56  ;;  %v13710_v24 = vpop.f32.mrf.mxu1  ;;  %v6553_v3 = vld [vmem:[#allocation3 + $0xd0] sm:$0xff]  ;;  %v13716_v61 = vmax.f32 %v13683_v2, %v13687_v23 }
 0x2df   :  { %5607 = vst.msk [vmem:[#allocation2 + $0x182] sm:$0xff] %vm1183_vm2, %v13685_v46  ;;  %9068 = vmatprep.mubr.msk.f32.mxu1 %vm1183_vm2, %v13384_v50  ;;  %15858 = vst [vmem:[#allocation98_spill] sm:$0xff] %v13710_v24  ;;  %v6148_v57 = vmax.f32 %v6020_v16, %v6084_v44  ;;  %v6150_v43 = vmax.f32 %v6022_v49, %v6086_v17  ;;  %v6554_v55 = vld [vmem:[#allocation3 + $0xd8] sm:$0xff]  ;;  %9161 = vmatmul.mubr.msk.f32.gmra.mxu0 %vm1183_vm2, %v6808_v13  ;;  %v6555_v62 = vld [vmem:[#allocation3 + $0xe0] sm:$0xff] }
 0x2e0   :  { %5609 = vst.msk [vmem:[#allocation2 + $0x19a] sm:$0xff] %vm1183_vm2, %v13689_v41  ;;  %5611 = vst.msk [vmem:[#allocation2 + $0x1b2] sm:$0xff] %vm1183_vm2, %v13692_v10  ;;  %v5956_v56 = vld [vmem:[#allocation2 + $0x2dc] sm:$0xff]  ;;  %v6809_v50 = vmax.f32 %v6745_v60, %v6553_v3  ;;  %v6746_v44 = vmax.f32 %v13437_v0, %v13700_v9  ;;  %v13726_v16 = vmax.f32 %v13652_v28, %v6553_v3  ;;  %v6556_v45 = vld [vmem:[#allocation3 + $0xe8] sm:$0xff]  ;;  %v13732_v7 = vpop.f32.mrf.mxu1  ;;  %v13742_v0 = vpop.f32.mrf.mxu0 }
 0x2e1   :  { %v13728_v6 = vmax.f32 %v6552_v15, %v6554_v55  ;;  %5613 = vst.msk [vmem:[#allocation2 + $0x1ca] sm:$0xff] %vm1183_vm2, %v13706_v30  ;;  %15859 = vst [vmem:[#allocation101_spill] sm:$0xff] %v13732_v7  ;;  %v6212_v36 = vmax.f32 %v6148_v57, %v5956_v56  ;;  %v6214_v14 = vmax.f32 %v6150_v43, %v5958_v54  ;;  %v13738_v60 = vld [vmem:[#allocation3 + $0x118] sm:$0xff]  ;;  %v13752_v13 = vld [vmem:[#allocation3 + $0x128] sm:$0xff] }
 0x2e2   :  { %v13734_v49 = vmax.f32 %v6553_v3, %v6555_v62  ;;  %v13736_v59 = vmax.f32 %v6554_v55, %v6556_v45  ;;  %9069 = vmatmul.mubr.msk.f32.gmra.mxu1 %vm1183_vm2, %v13344_v8  ;;  %15860 = vst [vmem:[#allocation91_spill] sm:$0xff] %v13742_v0  ;;  %9163 = vmatprep.mubr.msk.f32.mxu0 %vm1183_vm2, %v6809_v50  ;;  %v13754_v57 = vld [vmem:[#allocation2 + $0x18a] sm:$0xff]  ;;  %v13756_v43 = vld [vmem:[#allocation2 + $0x1a2] sm:$0xff]  ;;  %v13777_v50 = vpop.f32.mrf.mxu1 }
 0x2e3   :  { %v6810_v28 = vmax.f32 %v6746_v44, %v6554_v55  ;;  %v6747_v17 = vmax.f32 %v13594_v1, %v13726_v16  ;;  %v6748_v15 = vmax.f32 %v13627_v12, %v13728_v6  ;;  %v13750_v54 = vmax.f32 %v6555_v62, %v13683_v2  ;;  %6276 = vst.msk [vmem:[#allocation3 + $0x248] sm:$0xff] %vm1183_vm2, %v6212_v36  ;;  %v13765_v12 = vld [vmem:[#allocation3 + $0x110] sm:$0xff]  ;;  %v13773_v56 = vld [vmem:[#allocation2 + $0x1a3] sm:$0xff] }
 0x2e4   :  { %6278 = vst.msk [vmem:[#allocation3 + $0x258] sm:$0xff] %vm1183_vm2, %v6214_v14  ;;  %v6749_v8 = vmax.f32 %v13670_v32, %v13734_v49  ;;  %v13763_v1 = vmax.f32 %v6556_v45, %v13702_v4  ;;  %v13769_v3 = vmax.f32 %v13702_v4, %v13712_v26  ;;  %v13771_v55 = vld [vmem:[#allocation2 + $0x18b] sm:$0xff]  ;;  %9071 = vmatprep.mubr.msk.f32.mxu1 %vm1183_vm2, %v13420_v29  ;;  %15861 = vst [vmem:[#allocation102_spill] sm:$0xff] %v13777_v50  ;;  %v13788_v5 = vld [vmem:[#allocation3 + $0x120] sm:$0xff] }
 0x2e5   :  { %9164 = vmatmul.mubr.msk.f32.gmra.mxu0 %vm1183_vm2, %v6810_v28  ;;  %v6811_v32 = vmax.f32 %v6747_v17, %v6555_v62  ;;  %v6750_v44 = vmax.f32 %v13700_v9, %v13736_v59  ;;  %v6751_v36 = vmax.f32 %v13726_v16, %v13750_v54  ;;  %v6753_v14 = vmax.f32 %v13734_v49, %v13716_v61  ;;  %v13796_v16 = vld [vmem:[#allocation2 + $0x1bb] sm:$0xff]  ;;  %v13798_v22 = vld [vmem:[#allocation3 + $0x1b0] sm:$0xff]  ;;  %v13804_v49 = vpop.f32.mrf.mxu1 }
 0x2e6   :  { %v6752_v0 = vmax.f32 %v13728_v6, %v13763_v1  ;;  %v5671_v28 = vld [vmem:[#allocation2 + $0x180] sm:$0xff]  ;;  %9072 = vmatmul.mubr.msk.f32.gmra.mxu1 %vm1183_vm2, %v13356_v20  ;;  %v13802_v6 = vpop.f32.mrf.mxu0  ;;  %15863 = vst [vmem:[#allocation40_spill] sm:$0xff] %v13804_v49  ;;  %v6812_v29 = vmax.f32 %v6748_v15, %v6556_v45  ;;  %v6691_v62 = vmax.f32 %v13687_v23, %v13765_v12  ;;  %v13813_v20 = vld [vmem:[#allocation2 + $0x1d2] sm:$0xff] }
 0x2e7   :  { %v5735_v17 = vld [vmem:[#allocation2 + $0x181] sm:$0xff]  ;;  %15862 = vst [vmem:[#allocation97_spill] sm:$0xff] %v13802_v6  ;;  %9166 = vmatprep.mubr.msk.f32.mxu0 %vm1183_vm2, %v6811_v32  ;;  %v5673_v50 = vld [vmem:[#allocation2 + $0x198] sm:$0xff]  ;;  %v5675_v7 = vld [vmem:[#allocation2 + $0x1b0] sm:$0xff]  ;;  %v6813_v49 = vmax.f32 %v6749_v8, %v13683_v2  ;;  %9074 = vmatprep.mubr.msk.f32.mxu1 %vm1183_vm2, %v13477_v25  ;;  %v6814_v48 = vmax.f32 %v6750_v44, %v13702_v4 }
 0x2e8   :  { %v5799_v9 = vld [vmem:[#allocation2 + $0x182] sm:$0xff]  ;;  %v5737_v24 = vld [vmem:[#allocation2 + $0x199] sm:$0xff]  ;;  %v5739_v15 = vld [vmem:[#allocation2 + $0x1b1] sm:$0xff]  ;;  %v5991_v47 = vmax.f32 %v5671_v28, %v5735_v17  ;;  %v6815_v42 = vmax.f32 %v6751_v36, %v13687_v23  ;;  %v13826_v38 = vmax.f32 %v6753_v14, %v13765_v12  ;;  %v13832_v44 = vpop.f32.mrf.mxu0  ;;  %v13834_v23 = vpop.f32.mrf.mxu1  ;;  %v13837_v14 = vmax.f32 %v13750_v54, %v6691_v62 }
 0x2e9   :  { %v13815_v6 = vld [vmem:[#allocation2 + $0x1d3] sm:$0xff]  ;;  %v5993_v34 = vmax.f32 %v5673_v50, %v5737_v24  ;;  %9167 = vmatmul.mubr.msk.f32.gmra.mxu0 %vm1183_vm2, %v6812_v29  ;;  %v5863_v2 = vld [vmem:[#allocation2 + $0x183] sm:$0xff]  ;;  %v5865_v8 = vld [vmem:[#allocation2 + $0x19b] sm:$0xff]  ;;  %v5995_v52 = vmax.f32 %v5675_v7, %v5739_v15  ;;  %v13830_v24 = vmax.f32 %v6752_v0, %v13712_v26  ;;  %15864 = vst [vmem:[#allocation42_spill] sm:$0xff] %v13832_v44 }
 0x2ea   :  { %v5801_v32 = vld [vmem:[#allocation2 + $0x19a] sm:$0xff]  ;;  %v5803_v40 = vld [vmem:[#allocation2 + $0x1b2] sm:$0xff]  ;;  %9169 = vmatprep.mubr.msk.f32.mxu0 %vm1183_vm2, %v6813_v49  ;;  %v5927_v50 = vld [vmem:[#allocation2 + $0x184] sm:$0xff]  ;;  %v6055_v29 = vmax.f32 %v5799_v9, %v5863_v2  ;;  %15865 = vst [vmem:[#allocation45_spill] sm:$0xff] %v13834_v23  ;;  %v6060_v11 = vmax.f32 %v13794_v53, %v13796_v16  ;;  %v6062_v18 = vmax.f32 %v13813_v20, %v13815_v6  ;;  %v13859_v39 = vpop.f32.mrf.mxu0 }
 0x2eb   :  { %v5867_v45 = vld [vmem:[#allocation2 + $0x1b3] sm:$0xff]  ;;  %v5929_v25 = vld [vmem:[#allocation2 + $0x19c] sm:$0xff]  ;;  %v6057_v17 = vmax.f32 %v5801_v32, %v5865_v8  ;;  %v5672_v49 = vld [vmem:[#allocation2 + $0x188] sm:$0xff]  ;;  %15869 = vst [vmem:[#allocation37_spill] sm:$0xff] %v13859_v39 }
 0x2ec   :  { %v5931_v28 = vld [vmem:[#allocation2 + $0x1b4] sm:$0xff]  ;;  %v6059_v4 = vmax.f32 %v5803_v40, %v5867_v45  ;;  %v4649_v36 = vld [vmem:[#allocation3 + $0x1c0] sm:$0xff]  ;;  %v13845_v40 = vmax.f32 %v13649_v63, %v13798_v22  ;;  %v6119_v32 = vmax.f32 %v5991_v47, %v6055_v29  ;;  %v5736_v2 = vld [vmem:[#allocation2 + $0x189] sm:$0xff]  ;;  %v13853_v63 = vpop.f32.mrf.mxu1 }
 0x2ed   :  { %v5674_v0 = vld [vmem:[#allocation2 + $0x1a0] sm:$0xff]  ;;  %v5676_v15 = vld [vmem:[#allocation2 + $0x1b8] sm:$0xff]  ;;  %v6121_v54 = vmax.f32 %v5993_v34, %v6057_v17  ;;  %v5928_v44 = vld [vmem:[#allocation2 + $0x18c] sm:$0xff]  ;;  %15868 = vst [vmem:[#allocation46_spill] sm:$0xff] %v13853_v63  ;;  %9170 = vmatmul.mubr.msk.f32.gmra.mxu0 %vm1183_vm2, %v6814_v48  ;;  %v5992_v16 = vmax.f32 %v5672_v49, %v5736_v2 }
 0x2ee   :  { %v4587_v9 = vld [vmem:[#allocation3 + $0x1c0] sm:$0xff]  ;;  %v15866_v45 = vld [vmem:[#allocation23_spill] sm:$0xff]  ;;  %v6123_v62 = vmax.f32 %v5995_v52, %v6059_v4  ;;  %v5677_v34 = vld [vmem:[#allocation2 + $0x1c8] sm:$0xff]  ;;  %v4841_v17 = vmax.f32 %v13657_v27, %v13845_v40  ;;  %9172 = vmatprep.mubr.msk.f32.mxu0 %vm1183_vm2, %v6815_v42  ;;  %v6183_v4 = vmax.f32 %v6119_v32, %v5927_v50  ;;  %v13861_v48 = vpop.f32.mrf.mxu1  ;;  %v15871_v27 = vmax.f32 %v13756_v43, %v13773_v56 }
 0x2ef   :  { %9075 = vmatmul.mubr.msk.f32.gmra.mxu1 %vm1183_vm2, %v15866_v45  ;;  %v5738_v8 = vld [vmem:[#allocation2 + $0x1a1] sm:$0xff]  ;;  %v5740_v7 = vld [vmem:[#allocation2 + $0x1b9] sm:$0xff]  ;;  %v5741_v52 = vld [vmem:[#allocation2 + $0x1c9] sm:$0xff]  ;;  %v6185_v6 = vmax.f32 %v6121_v54, %v5929_v25 }
 0x2f0   :  { %v5930_v23 = vld [vmem:[#allocation2 + $0x1a4] sm:$0xff]  ;;  %v15867_v53 = vld [vmem:[#allocation71_spill] sm:$0xff]  ;;  %v5994_v45 = vmax.f32 %v5674_v0, %v5738_v8  ;;  %v5996_v47 = vmax.f32 %v5676_v15, %v5740_v7  ;;  %v6187_v20 = vmax.f32 %v6123_v62, %v5931_v28  ;;  %v5997_v35 = vmax.f32 %v5677_v34, %v5741_v52  ;;  %v5678_v63 = vld [vmem:[#allocation2 + $0x1d0] sm:$0xff]  ;;  %6247 = vst.msk [vmem:[#allocation3 + $0x160] sm:$0xff] %vm1183_vm2, %v6183_v4  ;;  %v13885_v54 = vpop.f32.mrf.mxu1 }
 0x2f1   :  { %9077 = vmatprep.mubr.msk.f32.mxu1 %vm1183_vm2, %v15867_v53  ;;  %v5805_v29 = vld [vmem:[#allocation2 + $0x1ca] sm:$0xff]  ;;  %v5932_v37 = vld [vmem:[#allocation2 + $0x1bc] sm:$0xff]  ;;  %v15870_v7 = vmax.f32 %v13754_v57, %v13771_v55  ;;  %v15873_v15 = vmax.f32 %v13736_v59, %v13769_v3  ;;  %6249 = vst.msk [vmem:[#allocation3 + $0x170] sm:$0xff] %vm1183_vm2, %v6185_v6  ;;  %v13878_v43 = vmax.f32 %v4841_v17, %v4649_v36  ;;  %v14123_v39 = vld [vmem:[#allocation2 + $0x293] sm:$0xff] }
 0x2f2   :  { %v5869_v53 = vld [vmem:[#allocation2 + $0x1cb] sm:$0xff]  ;;  %v6122_v0 = vmax.f32 %v5994_v45, %v15871_v27  ;;  %v6124_v42 = vmax.f32 %v5996_v47, %v6060_v11  ;;  %v15872_v28 = vld [vmem:[#allocation72_spill] sm:$0xff]  ;;  %6251 = vst.msk [vmem:[#allocation3 + $0x180] sm:$0xff] %vm1183_vm2, %v6187_v20  ;;  %v13881_v11 = vmax.f32 %v13798_v22, %v4587_v9  ;;  %v15874_v56 = vld [vmem:[#allocation83_spill] sm:$0xff]  ;;  %9173 = vmatmul.mubr.msk.f32.gmra.mxu0 %vm1183_vm2, %v13830_v24  ;;  %v13901_v24 = vpop.f32.mrf.mxu0 }
 0x2f3   :  { %v6120_v49 = vmax.f32 %v5992_v16, %v15870_v7  ;;  %v6061_v50 = vmax.f32 %v5805_v29, %v5869_v53  ;;  %v5742_v25 = vld [vmem:[#allocation2 + $0x1d1] sm:$0xff]  ;;  %9078 = vmatmul.mubr.msk.f32.gmra.mxu1 %vm1183_vm2, %v15872_v28  ;;  %v6818_v32 = vmax.f32 %v15873_v15, %v13738_v60  ;;  %v4653_v36 = vld [vmem:[#allocation3 + $0x1e0] sm:$0xff]  ;;  %9175 = vmatprep.mubr.msk.f32.mxu0 %vm1183_vm2, %v13826_v38 }
 0x2f4   :  { %v5998_v57 = vmax.f32 %v5678_v63, %v5742_v25  ;;  %v4589_v55 = vld [vmem:[#allocation3 + $0x1d0] sm:$0xff]  ;;  %9080 = vmatprep.mubr.msk.f32.mxu1 %vm1183_vm2, %v15874_v56  ;;  %v6186_v2 = vmax.f32 %v6122_v0, %v5930_v23  ;;  %v6188_v8 = vmax.f32 %v6124_v42, %v5932_v37  ;;  %v4591_v63 = vld [vmem:[#allocation3 + $0x1e0] sm:$0xff]  ;;  %v15875_v22 = vmax.f32 %v13712_v26, %v13738_v60  ;;  %v15878_v29 = vld [vmem:[#allocation99_spill] sm:$0xff] }
 0x2f5   :  { %v4651_v59 = vld [vmem:[#allocation3 + $0x1d0] sm:$0xff]  ;;  %v6184_v62 = vmax.f32 %v6120_v49, %v5928_v44  ;;  %v6125_v16 = vmax.f32 %v5997_v35, %v6061_v50  ;;  %5615 = vst.msk [vmem:[#allocation2 + $0x1e2] sm:$0xff] %vm1183_vm2, %v13878_v43  ;;  %v4843_v37 = vmax.f32 %v13662_v51, %v13881_v11  ;;  %v4781_v35 = vmax.f32 %v4587_v9, %v4589_v55  ;;  %v13903_v44 = vpop.f32.mrf.mxu1  ;;  %v13920_v17 = vld [vmem:[#allocation3 + $0x158] sm:$0xff]  ;;  %v4595_v20 = vld [vmem:[#allocation3 + $0x200] sm:$0xff] }
 0x2f6   :  { %v13895_v45 = vmax.f32 %v13763_v1, %v15875_v22  ;;  %v5933_v47 = vld [vmem:[#allocation2 + $0x1cc] sm:$0xff]  ;;  %v6126_v34 = vmax.f32 %v5998_v57, %v6062_v18  ;;  %15876 = vst [vmem:[#allocation60_spill] sm:$0xff] %v13901_v24  ;;  %v6819_v26 = vmax.f32 %v13837_v14, %v13788_v5  ;;  %v15877_v1 = vmax.f32 %v13765_v12, %v13788_v5  ;;  %v5934_v23 = vld [vmem:[#allocation2 + $0x1d4] sm:$0xff]  ;;  %v4657_v7 = vld [vmem:[#allocation3 + $0x200] sm:$0xff]  ;;  %v13956_v57 = vpop.f32.mrf.mxu0 }
 0x2f7   :  { %v4655_v38 = vld [vmem:[#allocation3 + $0x1f0] sm:$0xff]  ;;  %6248 = vst.msk [vmem:[#allocation3 + $0x168] sm:$0xff] %vm1183_vm2, %v6184_v62  ;;  %6250 = vst.msk [vmem:[#allocation3 + $0x178] sm:$0xff] %vm1183_vm2, %v6186_v2  ;;  %v6189_v51 = vmax.f32 %v6125_v16, %v5933_v47  ;;  %v4783_v9 = vmax.f32 %v4589_v55, %v4591_v63  ;;  %9081 = vmatmul.mubr.msk.f32.gmra.mxu1 %vm1183_vm2, %v15878_v29  ;;  %v13918_v14 = vld [vmem:[#allocation3 + $0x148] sm:$0xff]  ;;  %v4845_v12 = vmax.f32 %v13845_v40, %v4781_v35  ;;  %v13929_v53 = vpop.f32.mrf.mxu1 }
 0x2f8   :  { %v13911_v18 = vmax.f32 %v13716_v61, %v15877_v1  ;;  %6252 = vst.msk [vmem:[#allocation3 + $0x188] sm:$0xff] %vm1183_vm2, %v6188_v8  ;;  %v4593_v52 = vld [vmem:[#allocation3 + $0x1f0] sm:$0xff]  ;;  %v6190_v5 = vmax.f32 %v6126_v34, %v5934_v23  ;;  %v13922_v61 = vmax.f32 %v4843_v37, %v4651_v59  ;;  %v15879_v6 = vld [vmem:[#allocation103_spill] sm:$0xff]  ;;  %9176 = vmatmul.mubr.msk.f32.gmra.mxu0 %vm1183_vm2, %v6818_v32  ;;  %15881 = vst [vmem:[#allocation50_spill] sm:$0xff] %v13956_v57 }
 0x2f9   :  { %v13925_v4 = vmax.f32 %v4591_v63, %v4593_v52  ;;  %9083 = vmatprep.mubr.msk.f32.mxu1 %vm1183_vm2, %v15879_v6  ;;  %v6565_v49 = vld [vmem:[#allocation3 + $0x130] sm:$0xff]  ;;  %6253 = vst.msk [vmem:[#allocation3 + $0x190] sm:$0xff] %vm1183_vm2, %v6189_v51  ;;  %v4847_v27 = vmax.f32 %v13881_v11, %v4783_v9  ;;  %v13934_v0 = vmax.f32 %v4593_v52, %v4595_v20  ;;  %v13939_v40 = vld [vmem:[#allocation3 + $0x138] sm:$0xff]  ;;  %v13958_v11 = vpop.f32.mrf.mxu1  ;;  %v13962_v56 = vld [vmem:[#allocation3 + $0x180] sm:$0xff] }
 0x2fa   :  { %v13936_v42 = vld [vmem:[#allocation3 + $0x210] sm:$0xff]  ;;  %9178 = vmatprep.mubr.msk.f32.mxu0 %vm1183_vm2, %v6819_v26  ;;  %v15880_v50 = vmax.f32 %v13738_v60, %v13752_v13  ;;  %6254 = vst.msk [vmem:[#allocation3 + $0x198] sm:$0xff] %vm1183_vm2, %v6190_v5  ;;  %5617 = vst.msk [vmem:[#allocation2 + $0x1fa] sm:$0xff] %vm1183_vm2, %v13922_v61  ;;  %v13950_v28 = vmax.f32 %v4845_v12, %v4653_v36  ;;  %v6820_v60 = vmax.f32 %v13895_v45, %v13752_v13  ;;  %v13970_v8 = vld [vmem:[#allocation2 + $0x202] sm:$0xff] }
 0x2fb   :  { %v4849_v15 = vmax.f32 %v4781_v35, %v13925_v4  ;;  %v13954_v32 = vmax.f32 %v4595_v20, %v13936_v42  ;;  %v6503_v55 = vld [vmem:[#allocation3 + $0x170] sm:$0xff]  ;;  %v6632_v59 = vmax.f32 %v13918_v14, %v13920_v17  ;;  %v13972_v16 = vld [vmem:[#allocation2 + $0x203] sm:$0xff]  ;;  %v13974_v63 = vmax.f32 %v4847_v27, %v4655_v38  ;;  %v13987_v34 = vld [vmem:[#allocation2 + $0x21a] sm:$0xff]  ;;  %v13997_v26 = vpop.f32.mrf.mxu1 }
 0x2fc   :  { %v13945_v25 = vmax.f32 %v13769_v3, %v15880_v50  ;;  %v6439_v3 = vld [vmem:[#allocation3 + $0x160] sm:$0xff]  ;;  %v13966_v62 = vld [vmem:[#allocation2 + $0x1ea] sm:$0xff]  ;;  %v4851_v36 = vmax.f32 %v4783_v9, %v13934_v0  ;;  %v6821_v22 = vmax.f32 %v13911_v18, %v6565_v49  ;;  %v13983_v47 = vmax.f32 %v6503_v55, %v13962_v56  ;;  %5619 = vst.msk [vmem:[#allocation2 + $0x212] sm:$0xff] %vm1183_vm2, %v13950_v28  ;;  %v14003_v9 = vld [vmem:[#allocation2 + $0x232] sm:$0xff] }
 0x2fd   :  { %v13968_v2 = vld [vmem:[#allocation2 + $0x1eb] sm:$0xff]  ;;  %v15882_v13 = vld [vmem:[#allocation96_spill] sm:$0xff]  ;;  %v13980_v45 = vmax.f32 %v6439_v3, %v6503_v55  ;;  %v13991_v35 = vmax.f32 %v4849_v15, %v4657_v7  ;;  %9179 = vmatmul.mubr.msk.f32.gmra.mxu0 %vm1183_vm2, %v6820_v60  ;;  %v6633_v1 = vmax.f32 %v13635_v58, %v6439_v3  ;;  %5621 = vst.msk [vmem:[#allocation2 + $0x22a] sm:$0xff] %vm1183_vm2, %v13974_v63  ;;  %v14023_v20 = vpop.f32.mrf.mxu1 }
 0x2fe   :  { %9084 = vmatmul.mubr.msk.f32.gmra.mxu1 %vm1183_vm2, %v15882_v13  ;;  %v13989_v37 = vld [vmem:[#allocation2 + $0x21b] sm:$0xff]  ;;  %v14006_v52 = vmax.f32 %v4851_v36, %v13406_v33  ;;  %9181 = vmatprep.mubr.msk.f32.mxu0 %vm1183_vm2, %v6821_v22  ;;  %v6822_v58 = vmax.f32 %v13945_v25, %v13939_v40  ;;  %v6440_v5 = vld [vmem:[#allocation3 + $0x168] sm:$0xff]  ;;  %v14033_v40 = vld [vmem:[#allocation2 + $0x233] sm:$0xff]  ;;  %v6064_v36 = vmax.f32 %v13966_v62, %v13968_v2 }
 0x2ff   :  { %9086 = vmatprep.mubr.msk.f32.mxu1 %vm1183_vm2, %v13685_v46  ;;  %v13995_v38 = vld [vmem:[#allocation3 + $0x220] sm:$0xff]  ;;  %v4853_v46 = vmax.f32 %v13925_v4, %v13954_v32  ;;  %v6759_v14 = vmax.f32 %v13642_v21, %v13980_v45  ;;  %v6504_v12 = vld [vmem:[#allocation3 + $0x178] sm:$0xff]  ;;  %v14017_v6 = vld [vmem:[#allocation3 + $0x188] sm:$0xff]  ;;  %5623 = vst.msk [vmem:[#allocation2 + $0x242] sm:$0xff] %vm1183_vm2, %v13991_v35  ;;  %v14021_v4 = vpop.f32.mrf.mxu0  ;;  %v14028_v49 = vmax.f32 %v6633_v1, %v13983_v47 }
 0x300   :  { %v5679_v18 = vld [vmem:[#allocation2 + $0x1e0] sm:$0xff]  ;;  %v4791_v29 = vmax.f32 %v13936_v42, %v13995_v38  ;;  %15883 = vst [vmem:[#allocation64_spill] sm:$0xff] %v14021_v4  ;;  %v14025_v7 = vmax.f32 %v6440_v5, %v6504_v12  ;;  %v14031_v27 = vmax.f32 %v6504_v12, %v14017_v6  ;;  %v5680_v42 = vld [vmem:[#allocation2 + $0x1e8] sm:$0xff]  ;;  %5625 = vst.msk [vmem:[#allocation2 + $0x25a] sm:$0xff] %vm1183_vm2, %v14006_v52 }
 0x301   :  { %v5743_v51 = vld [vmem:[#allocation2 + $0x1e1] sm:$0xff]  ;;  %v14038_v50 = vmax.f32 %v4853_v46, %v13424_v31  ;;  %v15884_v25 = vld [vmem:[#allocation87_spill] sm:$0xff]  ;;  %v6823_v15 = vmax.f32 %v6759_v14, %v13962_v56  ;;  %v14043_v60 = vld [vmem:[#allocation3 + $0x190] sm:$0xff]  ;;  %v6066_v13 = vmax.f32 %v13970_v8, %v13972_v16  ;;  %v14051_v31 = vpop.f32.mrf.mxu1  ;;  %9182 = vmatmul.mubr.msk.f32.gmra.mxu0 %vm1183_vm2, %v6822_v58  ;;  %v6634_v1 = vmax.f32 %v13920_v17, %v6440_v5  ;;  %v14066_v14 = vpop.f32.mrf.mxu0 }
 0x302   :  { %v5807_v23 = vld [vmem:[#allocation2 + $0x1e2] sm:$0xff]  ;;  %v5999_v33 = vmax.f32 %v5679_v18, %v5743_v51  ;;  %9087 = vmatmul.mubr.msk.f32.gmra.mxu1 %vm1183_vm2, %v15884_v25  ;;  %v6760_v22 = vmax.f32 %v6632_v59, %v14025_v7  ;;  %v5681_v51 = vld [vmem:[#allocation2 + $0x1f8] sm:$0xff]  ;;  %v4855_v2 = vmax.f32 %v13934_v0, %v4791_v29  ;;  %15885 = vst [vmem:[#allocation69_spill] sm:$0xff] %v14066_v14 }
 0x303   :  { %v5871_v21 = vld [vmem:[#allocation2 + $0x1e3] sm:$0xff]  ;;  %9089 = vmatprep.mubr.msk.f32.mxu1 %vm1183_vm2, %v13689_v41  ;;  %5627 = vst.msk [vmem:[#allocation2 + $0x272] sm:$0xff] %vm1183_vm2, %v14038_v50  ;;  %9184 = vmatprep.mubr.msk.f32.mxu0 %vm1183_vm2, %v6823_v15  ;;  %v14062_v41 = vld [vmem:[#allocation3 + $0x198] sm:$0xff]  ;;  %v14068_v5 = vpop.f32.mrf.mxu1  ;;  %v6825_v0 = vmax.f32 %v14028_v49, %v14043_v60  ;;  %v14074_v29 = vmax.f32 %v6634_v1, %v14031_v27  ;;  %v5683_v15 = vld [vmem:[#allocation2 + $0x210] sm:$0xff] }
 0x304   :  { %v6063_v3 = vmax.f32 %v5807_v23, %v5871_v21  ;;  %v5744_v55 = vld [vmem:[#allocation2 + $0x1e9] sm:$0xff]  ;;  %v5745_v23 = vld [vmem:[#allocation2 + $0x1f9] sm:$0xff]  ;;  %v6824_v12 = vmax.f32 %v6760_v22, %v14017_v6  ;;  %v5746_v25 = vld [vmem:[#allocation2 + $0x201] sm:$0xff]  ;;  %v14084_v22 = vmax.f32 %v13962_v56, %v14043_v60 }
 0x305   :  { %v5935_v18 = vld [vmem:[#allocation2 + $0x1e4] sm:$0xff]  ;;  %v6000_v16 = vmax.f32 %v5680_v42, %v5744_v55  ;;  %v5809_v59 = vld [vmem:[#allocation2 + $0x1fa] sm:$0xff]  ;;  %v6001_v17 = vmax.f32 %v5681_v51, %v5745_v23  ;;  %v5747_v58 = vld [vmem:[#allocation2 + $0x211] sm:$0xff] }
 0x306   :  { %v6127_v8 = vmax.f32 %v5999_v33, %v6063_v3  ;;  %v5873_v46 = vld [vmem:[#allocation2 + $0x1fb] sm:$0xff]  ;;  %v5936_v33 = vld [vmem:[#allocation2 + $0x1ec] sm:$0xff]  ;;  %v14088_v14 = vld [vmem:[#allocation2 + $0x263] sm:$0xff]  ;;  %9185 = vmatmul.mubr.msk.f32.gmra.mxu0 %vm1183_vm2, %v6824_v12  ;;  %v6003_v4 = vmax.f32 %v5683_v15, %v5747_v58 }
 0x307   :  { %v6065_v21 = vmax.f32 %v5809_v59, %v5873_v46  ;;  %v5682_v42 = vld [vmem:[#allocation2 + $0x200] sm:$0xff]  ;;  %v14076_v3 = vld [vmem:[#allocation2 + $0x24a] sm:$0xff]  ;;  %v6128_v49 = vmax.f32 %v6000_v16, %v6064_v36  ;;  %v5811_v62 = vld [vmem:[#allocation2 + $0x212] sm:$0xff]  ;;  %9187 = vmatprep.mubr.msk.f32.mxu0 %vm1183_vm2, %v6825_v0  ;;  %v6826_v0 = vmax.f32 %v14074_v29, %v14062_v41 }
 0x308   :  { %v14078_v55 = vld [vmem:[#allocation2 + $0x24b] sm:$0xff]  ;;  %v15886_v51 = vld [vmem:[#allocation88_spill] sm:$0xff]  ;;  %v6191_v23 = vmax.f32 %v6127_v8, %v5935_v18  ;;  %v6002_v1 = vmax.f32 %v5682_v42, %v5746_v25  ;;  %v5875_v59 = vld [vmem:[#allocation2 + $0x213] sm:$0xff] }
 0x309   :  { %9090 = vmatmul.mubr.msk.f32.gmra.mxu1 %vm1183_vm2, %v15886_v51  ;;  %v14086_v46 = vld [vmem:[#allocation2 + $0x262] sm:$0xff]  ;;  %v6129_v18 = vmax.f32 %v6001_v17, %v6065_v21  ;;  %v6067_v56 = vmax.f32 %v5811_v62, %v5875_v59  ;;  %v5684_v57 = vld [vmem:[#allocation2 + $0x218] sm:$0xff]  ;;  %v9760_v16 = vld [vmem:[#allocation3 + $0x230] sm:$0xff]  ;;  %v6192_v25 = vmax.f32 %v6128_v49, %v5936_v33  ;;  %v14107_v59 = vpop.f32.mrf.mxu1 }
 0x30a   :  { %9092 = vmatprep.mubr.msk.f32.mxu1 %vm1183_vm2, %v13692_v10  ;;  %v5937_v51 = vld [vmem:[#allocation2 + $0x1fc] sm:$0xff]  ;;  %v5938_v8 = vld [vmem:[#allocation2 + $0x204] sm:$0xff]  ;;  %v14093_v42 = vmax.f32 %v4855_v2, %v9760_v16  ;;  %6255 = vst.msk [vmem:[#allocation3 + $0x1a0] sm:$0xff] %vm1183_vm2, %v6191_v23  ;;  %v14099_v10 = vmax.f32 %v14017_v6, %v14062_v41  ;;  %v6130_v12 = vmax.f32 %v6002_v1, %v6066_v13  ;;  %v14105_v2 = vpop.f32.mrf.mxu0  ;;  %v5939_v23 = vld [vmem:[#allocation2 + $0x214] sm:$0xff] }
 0x30b   :  { %v5748_v36 = vld [vmem:[#allocation2 + $0x219] sm:$0xff]  ;;  %v5685_v17 = vld [vmem:[#allocation2 + $0x228] sm:$0xff]  ;;  %15887 = vst [vmem:[#allocation70_spill] sm:$0xff] %v14105_v2  ;;  %v6193_v33 = vmax.f32 %v6129_v18, %v5937_v51  ;;  %v6131_v6 = vmax.f32 %v6003_v4, %v6067_v56  ;;  %v5686_v1 = vld [vmem:[#allocation2 + $0x230] sm:$0xff]  ;;  %v15889_v2 = vmax.f32 %v13987_v34, %v13989_v37  ;;  %9188 = vmatmul.mubr.msk.f32.gmra.mxu0 %vm1183_vm2, %v6826_v0 }
 0x30c   :  { %v6004_v24 = vmax.f32 %v5684_v57, %v5748_v36  ;;  %v5749_v21 = vld [vmem:[#allocation2 + $0x229] sm:$0xff]  ;;  %v14101_v62 = vld [vmem:[#allocation2 + $0x27a] sm:$0xff]  ;;  %5629 = vst.msk [vmem:[#allocation2 + $0x28a] sm:$0xff] %vm1183_vm2, %v14093_v42  ;;  %6256 = vst.msk [vmem:[#allocation3 + $0x1a8] sm:$0xff] %vm1183_vm2, %v6192_v25  ;;  %v6194_v16 = vmax.f32 %v6130_v12, %v5938_v8 }
 0x30d   :  { %v5813_v58 = vld [vmem:[#allocation2 + $0x22a] sm:$0xff]  ;;  %v14103_v15 = vld [vmem:[#allocation2 + $0x27b] sm:$0xff]  ;;  %v6005_v57 = vmax.f32 %v5685_v17, %v5749_v21  ;;  %v6072_v17 = vmax.f32 %v14076_v3, %v14078_v55  ;;  %v14121_v21 = vld [vmem:[#allocation2 + $0x292] sm:$0xff]  ;;  %6257 = vst.msk [vmem:[#allocation3 + $0x1b0] sm:$0xff] %vm1183_vm2, %v6193_v33  ;;  %v6195_v34 = vmax.f32 %v6131_v6, %v5939_v23  ;;  %v6074_v3 = vmax.f32 %v14086_v46, %v14088_v14  ;;  %v14134_v6 = vpop.f32.mrf.mxu0 }
 0x30e   :  { %v5940_v49 = vld [vmem:[#allocation2 + $0x21c] sm:$0xff]  ;;  %v5877_v13 = vld [vmem:[#allocation2 + $0x22b] sm:$0xff]  ;;  %v6132_v29 = vmax.f32 %v6004_v24, %v15889_v2  ;;  %v6763_v55 = vmax.f32 %v13980_v45, %v14084_v22  ;;  %6258 = vst.msk [vmem:[#allocation3 + $0x1b8] sm:$0xff] %vm1183_vm2, %v6194_v16  ;;  %v5942_v2 = vld [vmem:[#allocation2 + $0x234] sm:$0xff]  ;;  %v15890_v45 = vmax.f32 %v14003_v9, %v14033_v40 }
 0x30f   :  { %v15888_v36 = vld [vmem:[#allocation4_spill] sm:$0xff]  ;;  %v6069_v51 = vmax.f32 %v5813_v58, %v5877_v13  ;;  %v5750_v18 = vld [vmem:[#allocation2 + $0x231] sm:$0xff]  ;;  %v5688_v13 = vld [vmem:[#allocation2 + $0x248] sm:$0xff]  ;;  %6259 = vst.msk [vmem:[#allocation3 + $0x1c0] sm:$0xff] %vm1183_vm2, %v6195_v34 }
 0x310   :  { %9093 = vmatmul.mubr.msk.f32.gmra.mxu1 %vm1183_vm2, %v15888_v36  ;;  %v5687_v4 = vld [vmem:[#allocation2 + $0x240] sm:$0xff]  ;;  %v5941_v24 = vld [vmem:[#allocation2 + $0x22c] sm:$0xff]  ;;  %v6006_v37 = vmax.f32 %v5686_v1, %v5750_v18  ;;  %v6196_v58 = vmax.f32 %v6132_v29, %v5940_v49  ;;  %v5689_v23 = vld [vmem:[#allocation2 + $0x258] sm:$0xff]  ;;  %v14136_v1 = vpop.f32.mrf.mxu1  ;;  %v6764_v36 = vmax.f32 %v14025_v7, %v14099_v10 }
 0x311   :  { %v5751_v56 = vld [vmem:[#allocation2 + $0x241] sm:$0xff]  ;;  %9095 = vmatprep.mubr.msk.f32.mxu1 %vm1183_vm2, %v13706_v30  ;;  %v6133_v30 = vmax.f32 %v6005_v57, %v6069_v51  ;;  %v5752_v33 = vld [vmem:[#allocation2 + $0x249] sm:$0xff]  ;;  %v5753_v49 = vld [vmem:[#allocation2 + $0x259] sm:$0xff] }
 0x312   :  { %v5815_v8 = vld [vmem:[#allocation2 + $0x242] sm:$0xff]  ;;  %v6007_v12 = vmax.f32 %v5687_v4, %v5751_v56  ;;  %v6134_v14 = vmax.f32 %v6006_v37, %v15890_v45  ;;  %v6008_v46 = vmax.f32 %v5688_v13, %v5752_v33  ;;  %v5817_v57 = vld [vmem:[#allocation2 + $0x25a] sm:$0xff]  ;;  %6260 = vst.msk [vmem:[#allocation3 + $0x1c8] sm:$0xff] %vm1183_vm2, %v6196_v58  ;;  %v5944_v56 = vld [vmem:[#allocation2 + $0x24c] sm:$0xff]  ;;  %v6009_v34 = vmax.f32 %v5689_v23, %v5753_v49  ;;  %v14151_v37 = vpop.f32.mrf.mxu1 }
 0x313   :  { %v5879_v25 = vld [vmem:[#allocation2 + $0x243] sm:$0xff]  ;;  %v5881_v16 = vld [vmem:[#allocation2 + $0x25b] sm:$0xff]  ;;  %v6197_v18 = vmax.f32 %v6133_v30, %v5941_v24  ;;  %v5755_v29 = vld [vmem:[#allocation2 + $0x271] sm:$0xff]  ;;  %v6078_v24 = vmax.f32 %v14121_v21, %v14123_v39 }
 0x314   :  { %v6071_v0 = vmax.f32 %v5815_v8, %v5879_v25  ;;  %v15891_v51 = vld [vmem:[#allocation8_spill] sm:$0xff]  ;;  %v6073_v8 = vmax.f32 %v5817_v57, %v5881_v16  ;;  %v6198_v13 = vmax.f32 %v6134_v14, %v5942_v2  ;;  %v6136_v33 = vmax.f32 %v6008_v46, %v6072_v17  ;;  %v5819_v49 = vld [vmem:[#allocation2 + $0x272] sm:$0xff]  ;;  %v14159_v2 = vpop.f32.mrf.mxu0  ;;  %v6572_v17 = vld [vmem:[#allocation3 + $0x1a8] sm:$0xff] }
 0x315   :  { %9096 = vmatmul.mubr.msk.f32.gmra.mxu1 %vm1183_vm2, %v15891_v51  ;;  %v5943_v7 = vld [vmem:[#allocation2 + $0x244] sm:$0xff]  ;;  %v5691_v51 = vld [vmem:[#allocation2 + $0x270] sm:$0xff]  ;;  %6261 = vst.msk [vmem:[#allocation3 + $0x1d0] sm:$0xff] %vm1183_vm2, %v6197_v18  ;;  %v6828_v18 = vmax.f32 %v6764_v36, %v6572_v17 }
 0x316   :  { %v6135_v4 = vmax.f32 %v6007_v12, %v6071_v0  ;;  %v5690_v9 = vld [vmem:[#allocation2 + $0x260] sm:$0xff]  ;;  %9098 = vmatprep.mubr.msk.f32.mxu1 %vm1183_vm2, %v13878_v43  ;;  %v6137_v43 = vmax.f32 %v6009_v34, %v6073_v8  ;;  %v5883_v57 = vld [vmem:[#allocation2 + $0x273] sm:$0xff]  ;;  %6262 = vst.msk [vmem:[#allocation3 + $0x1d8] sm:$0xff] %vm1183_vm2, %v6198_v13  ;;  %v6200_v14 = vmax.f32 %v6136_v33, %v5944_v56  ;;  %v5757_v56 = vld [vmem:[#allocation2 + $0x289] sm:$0xff]  ;;  %v14171_v8 = vpop.f32.mrf.mxu1 }
 0x317   :  { %v5754_v40 = vld [vmem:[#allocation2 + $0x261] sm:$0xff]  ;;  %v6011_v16 = vmax.f32 %v5691_v51, %v5755_v29  ;;  %v14168_v34 = vmax.f32 %v14062_v41, %v6572_v17  ;;  %v6574_v13 = vld [vmem:[#allocation3 + $0x1b8] sm:$0xff] }
 0x318   :  { %v6571_v25 = vld [vmem:[#allocation3 + $0x1a0] sm:$0xff]  ;;  %v6010_v45 = vmax.f32 %v5690_v9, %v5754_v40  ;;  %v6199_v30 = vmax.f32 %v6135_v4, %v5943_v7  ;;  %v5692_v9 = vld [vmem:[#allocation2 + $0x278] sm:$0xff]  ;;  %v15892_v40 = vld [vmem:[#allocation6_spill] sm:$0xff]  ;;  %6264 = vst.msk [vmem:[#allocation3 + $0x1e8] sm:$0xff] %vm1183_vm2, %v6200_v14  ;;  %v14186_v14 = vpop.f32.mrf.mxu1 }
 0x319   :  { %v6827_v12 = vmax.f32 %v6763_v55, %v6571_v25  ;;  %v14156_v58 = vmax.f32 %v14043_v60, %v6571_v25  ;;  %v5945_v0 = vld [vmem:[#allocation2 + $0x25c] sm:$0xff]  ;;  %v5946_v23 = vld [vmem:[#allocation2 + $0x264] sm:$0xff]  ;;  %v6075_v55 = vmax.f32 %v5819_v49, %v5883_v57  ;;  %9099 = vmatmul.mubr.msk.f32.gmra.mxu1 %vm1183_vm2, %v15892_v40  ;;  %v6573_v7 = vld [vmem:[#allocation3 + $0x1b0] sm:$0xff]  ;;  %v14184_v57 = vpop.f32.mrf.mxu0 }
 0x31a   :  { %v6138_v46 = vmax.f32 %v6010_v45, %v6074_v3  ;;  %v5756_v60 = vld [vmem:[#allocation2 + $0x279] sm:$0xff]  ;;  %6263 = vst.msk [vmem:[#allocation3 + $0x1e0] sm:$0xff] %vm1183_vm2, %v6199_v30  ;;  %v6201_v3 = vmax.f32 %v6137_v43, %v5945_v0  ;;  %v5693_v29 = vld [vmem:[#allocation2 + $0x288] sm:$0xff]  ;;  %v14173_v33 = vmax.f32 %v6571_v25, %v6573_v7  ;;  %9101 = vmatprep.mubr.msk.f32.mxu1 %vm1183_vm2, %v13922_v61  ;;  %v5694_v49 = vld [vmem:[#allocation2 + $0x290] sm:$0xff] }
 0x31b   :  { %9190 = vmatprep.mubr.msk.f32.mxu0 %vm1183_vm2, %v6827_v12  ;;  %v6765_v4 = vmax.f32 %v13983_v47, %v14156_v58  ;;  %v6139_v45 = vmax.f32 %v6011_v16, %v6075_v55  ;;  %v6012_v51 = vmax.f32 %v5692_v9, %v5756_v60  ;;  %v5821_v12 = vld [vmem:[#allocation2 + $0x28a] sm:$0xff]  ;;  %v6766_v30 = vmax.f32 %v14031_v27, %v14168_v34  ;;  %v6575_v0 = vld [vmem:[#allocation3 + $0x1c0] sm:$0xff]  ;;  %v5947_v25 = vld [vmem:[#allocation2 + $0x274] sm:$0xff] }
 0x31c   :  { %v6202_v36 = vmax.f32 %v6138_v46, %v5946_v23  ;;  %v5885_v47 = vld [vmem:[#allocation2 + $0x28b] sm:$0xff]  ;;  %9191 = vmatmul.mubr.msk.f32.gmra.mxu0 %vm1183_vm2, %v6828_v18  ;;  %v14181_v43 = vmax.f32 %v6572_v17, %v6574_v13  ;;  %6265 = vst.msk [vmem:[#allocation3 + $0x1f0] sm:$0xff] %vm1183_vm2, %v6201_v3  ;;  %v6013_v23 = vmax.f32 %v5693_v29, %v5757_v56  ;;  %v15894_v60 = vld [vmem:[#allocation19_spill] sm:$0xff]  ;;  %v14203_v29 = vpop.f32.mrf.mxu1 }
 0x31d   :  { %v6829_v41 = vmax.f32 %v6765_v4, %v6573_v7  ;;  %v6767_v61 = vmax.f32 %v14084_v22, %v14173_v33  ;;  %v6576_v46 = vld [vmem:[#allocation3 + $0x1c8] sm:$0xff]  ;;  %v14190_v16 = vmax.f32 %v6573_v7, %v6575_v0  ;;  %v6203_v27 = vmax.f32 %v6139_v45, %v5947_v25  ;;  %v5758_v9 = vld [vmem:[#allocation2 + $0x291] sm:$0xff]  ;;  %9102 = vmatmul.mubr.msk.f32.gmra.mxu1 %vm1183_vm2, %v15894_v60  ;;  %v5948_v7 = vld [vmem:[#allocation2 + $0x27c] sm:$0xff] }
 0x31e   :  { %6266 = vst.msk [vmem:[#allocation3 + $0x1f8] sm:$0xff] %vm1183_vm2, %v6202_v36  ;;  %v15893_v17 = vmax.f32 %v14101_v62, %v14103_v15  ;;  %v6830_v40 = vmax.f32 %v6766_v30, %v6574_v13  ;;  %v6768_v22 = vmax.f32 %v14099_v10, %v14181_v43  ;;  %v14201_v18 = vmax.f32 %v6574_v13, %v6576_v46  ;;  %v4601_v3 = vld [vmem:[#allocation3 + $0x230] sm:$0xff]  ;;  %v6578_v10 = vld [vmem:[#allocation3 + $0x1d8] sm:$0xff]  ;;  %v15895_v60 = vld [vmem:[#allocation25_spill] sm:$0xff] }
 0x31f   :  { %9193 = vmatprep.mubr.msk.f32.mxu0 %vm1183_vm2, %v6829_v41  ;;  %v6077_v4 = vmax.f32 %v5821_v12, %v5885_v47  ;;  %v6831_v56 = vmax.f32 %v6767_v61, %v6575_v0  ;;  %v6577_v62 = vld [vmem:[#allocation3 + $0x1d0] sm:$0xff]  ;;  %v6769_v15 = vmax.f32 %v14156_v58, %v14190_v16  ;;  %6267 = vst.msk [vmem:[#allocation3 + $0x200] sm:$0xff] %vm1183_vm2, %v6203_v27  ;;  %v14213_v12 = vpop.f32.mrf.mxu0  ;;  %v6580_v21 = vld [vmem:[#allocation3 + $0x1e8] sm:$0xff] }
 0x320   :  { %v6140_v55 = vmax.f32 %v6012_v51, %v15893_v17  ;;  %v6014_v45 = vmax.f32 %v5694_v49, %v5758_v9  ;;  %9104 = vmatprep.mubr.msk.f32.mxu1 %vm1183_vm2, %v13950_v28  ;;  %9194 = vmatmul.mubr.msk.f32.gmra.mxu0 %vm1183_vm2, %v6830_v40  ;;  %v14211_v13 = vmax.f32 %v6575_v0, %v6577_v62  ;;  %v5949_v58 = vld [vmem:[#allocation2 + $0x28c] sm:$0xff]  ;;  %v5950_v30 = vld [vmem:[#allocation2 + $0x294] sm:$0xff]  ;;  %v14223_v0 = vpop.f32.mrf.mxu1 }
 0x321   :  { %v6141_v51 = vmax.f32 %v6013_v23, %v6077_v4  ;;  %9196 = vmatprep.mubr.msk.f32.mxu0 %vm1183_vm2, %v6831_v56  ;;  %v6579_v47 = vld [vmem:[#allocation3 + $0x1e0] sm:$0xff]  ;;  %v14216_v41 = vmax.f32 %v6576_v46, %v6578_v10  ;;  %v4793_v25 = vmax.f32 %v13995_v38, %v4601_v3  ;;  %v6832_v23 = vmax.f32 %v6768_v22, %v6576_v46  ;;  %v5697_v17 = vld [vmem:[#allocation2 + $0x2b8] sm:$0xff]  ;;  %v5699_v22 = vld [vmem:[#allocation2 + $0x2d0] sm:$0xff]  ;;  %v14238_v3 = vpop.f32.mrf.mxu0 }
 0x322   :  { %v6204_v36 = vmax.f32 %v6140_v55, %v5948_v7  ;;  %v6142_v28 = vmax.f32 %v6014_v45, %v6078_v24  ;;  %v6833_v49 = vmax.f32 %v6769_v15, %v6577_v62  ;;  %v6770_v61 = vmax.f32 %v14168_v34, %v14201_v18  ;;  %v5761_v55 = vld [vmem:[#allocation2 + $0x2b9] sm:$0xff]  ;;  %9105 = vmatmul.mubr.msk.f32.gmra.mxu1 %vm1183_vm2, %v15895_v60  ;;  %v5763_v7 = vld [vmem:[#allocation2 + $0x2d1] sm:$0xff]  ;;  %v5765_v15 = vld [vmem:[#allocation2 + $0x2e9] sm:$0xff] }
 0x323   :  { %v6205_v27 = vmax.f32 %v6141_v51, %v5949_v58  ;;  %v5825_v9 = vld [vmem:[#allocation2 + $0x2ba] sm:$0xff]  ;;  %v6771_v39 = vmax.f32 %v14173_v33, %v14211_v13  ;;  %v14231_v24 = vmax.f32 %v6577_v62, %v6579_v47  ;;  %v4857_v46 = vmax.f32 %v13954_v32, %v4793_v25  ;;  %9107 = vmatprep.mubr.msk.f32.mxu1 %vm1183_vm2, %v13974_v63  ;;  %v6581_v34 = vld [vmem:[#allocation3 + $0x1f0] sm:$0xff]  ;;  %v5701_v62 = vld [vmem:[#allocation2 + $0x2e8] sm:$0xff] }
 0x324   :  { %6268 = vst.msk [vmem:[#allocation3 + $0x208] sm:$0xff] %vm1183_vm2, %v6204_v36  ;;  %v6206_v38 = vmax.f32 %v6142_v28, %v5950_v30  ;;  %v5889_v40 = vld [vmem:[#allocation2 + $0x2bb] sm:$0xff]  ;;  %9197 = vmatmul.mubr.msk.f32.gmra.mxu0 %vm1183_vm2, %v6832_v23  ;;  %v5827_v4 = vld [vmem:[#allocation2 + $0x2d2] sm:$0xff]  ;;  %v6772_v33 = vmax.f32 %v14181_v43, %v14216_v41  ;;  %v14246_v36 = vpop.f32.mrf.mxu1  ;;  %v6834_v45 = vmax.f32 %v6770_v61, %v6578_v10  ;;  %v5829_v28 = vld [vmem:[#allocation2 + $0x2ea] sm:$0xff] }
 0x325   :  { %6269 = vst.msk [vmem:[#allocation3 + $0x210] sm:$0xff] %vm1183_vm2, %v6205_v27  ;;  %9199 = vmatprep.mubr.msk.f32.mxu0 %vm1183_vm2, %v6833_v49  ;;  %v9761_v32 = vld [vmem:[#allocation3 + $0x240] sm:$0xff]  ;;  %v5891_v63 = vld [vmem:[#allocation2 + $0x2d3] sm:$0xff]  ;;  %v14248_v51 = vmax.f32 %v6578_v10, %v6580_v21  ;;  %v6017_v58 = vmax.f32 %v5697_v17, %v5761_v55  ;;  %v6081_v30 = vmax.f32 %v5825_v9, %v5889_v40  ;;  %v5893_v25 = vld [vmem:[#allocation2 + $0x2eb] sm:$0xff] }
 0x326   :  { %6270 = vst.msk [vmem:[#allocation3 + $0x218] sm:$0xff] %vm1183_vm2, %v6206_v38  ;;  %v14244_v56 = vmax.f32 %v4857_v46, %v9761_v32  ;;  %v15896_v23 = vld [vmem:[#allocation28_spill] sm:$0xff]  ;;  %v6835_v43 = vmax.f32 %v6771_v39, %v6579_v47  ;;  %v6773_v49 = vmax.f32 %v14190_v16, %v14231_v24  ;;  %v6582_v27 = vld [vmem:[#allocation3 + $0x1f8] sm:$0xff]  ;;  %v14254_v60 = vmax.f32 %v6579_v47, %v6581_v34  ;;  %v14260_v10 = vpop.f32.mrf.mxu1  ;;  %v14265_v16 = vpop.f32.mrf.mxu0 }
 0x327   :  { %9108 = vmatmul.mubr.msk.f32.gmra.mxu1 %vm1183_vm2, %v15896_v23  ;;  %v6019_v61 = vmax.f32 %v5699_v22, %v5763_v7  ;;  %v14263_v17 = vld [vmem:[#allocation3 + $0x200] sm:$0xff]  ;;  %v6145_v55 = vmax.f32 %v6017_v58, %v6081_v30  ;;  %v6083_v9 = vmax.f32 %v5827_v4, %v5891_v63  ;;  %v6021_v39 = vmax.f32 %v5701_v62, %v5765_v15  ;;  %v5955_v15 = vld [vmem:[#allocation2 + $0x2d4] sm:$0xff] }
 0x328   :  { %5631 = vst.msk [vmem:[#allocation2 + $0x2a2] sm:$0xff] %vm1183_vm2, %v14244_v56  ;;  %9110 = vmatprep.mubr.msk.f32.mxu1 %vm1183_vm2, %v13991_v35  ;;  %9200 = vmatmul.mubr.msk.f32.gmra.mxu0 %vm1183_vm2, %v6834_v45  ;;  %v6836_v47 = vmax.f32 %v6772_v33, %v6580_v21  ;;  %v5953_v38 = vld [vmem:[#allocation2 + $0x2bc] sm:$0xff]  ;;  %v6085_v46 = vmax.f32 %v5829_v28, %v5893_v25  ;;  %v14268_v40 = vpop.f32.mrf.mxu1  ;;  %v5957_v45 = vld [vmem:[#allocation2 + $0x2ec] sm:$0xff] }
 0x329   :  { %9202 = vmatprep.mubr.msk.f32.mxu0 %vm1183_vm2, %v6835_v43  ;;  %v6774_v35 = vmax.f32 %v14201_v18, %v14248_v51  ;;  %v14272_v22 = vmax.f32 %v6580_v21, %v6582_v27  ;;  %v6209_v7 = vmax.f32 %v6145_v55, %v5953_v38  ;;  %v6147_v32 = vmax.f32 %v6019_v61, %v6083_v9  ;;  %v15897_v58 = vld [vmem:[#allocation36_spill] sm:$0xff]  ;;  %v5824_v21 = vld [vmem:[#allocation2 + $0x2aa] sm:$0xff] }
 0x32a   :  { %v6837_v4 = vmax.f32 %v6773_v49, %v6581_v34  ;;  %v6775_v63 = vmax.f32 %v14211_v13, %v14254_v60  ;;  %v14281_v62 = vmax.f32 %v6581_v34, %v14263_v17  ;;  %v6149_v30 = vmax.f32 %v6021_v39, %v6085_v46  ;;  %v14285_v18 = vpop.f32.mrf.mxu1  ;;  %v5888_v28 = vld [vmem:[#allocation2 + $0x2ab] sm:$0xff]  ;;  %v9014_v13 = vpop.f32.mrf.mxu0  ;;  %v15898_v39 = vld [vmem:[#allocation43_spill] sm:$0xff] }
 0x32b   :  { %9111 = vmatmul.mubr.msk.f32.gmra.mxu1 %vm1183_vm2, %v15897_v58  ;;  %v14278_v33 = vld [vmem:[#allocation3 + $0x208] sm:$0xff]  ;;  %6273 = vst.msk [vmem:[#allocation3 + $0x230] sm:$0xff] %vm1183_vm2, %v6209_v7  ;;  %v6211_v25 = vmax.f32 %v6147_v32, %v5955_v15  ;;  %v6838_v43 = vmax.f32 %v6774_v35, %v6582_v27  ;;  %v6776_v49 = vmax.f32 %v14216_v41, %v14272_v22 }
 0x32c   :  { %9113 = vmatprep.mubr.msk.f32.mxu1 %vm1183_vm2, %v14006_v52  ;;  %9203 = vmatmul.mubr.msk.f32.gmra.mxu0 %vm1183_vm2, %v6836_v47  ;;  %v6213_v23 = vmax.f32 %v6149_v30, %v5957_v45  ;;  %v14290_v34 = vpop.f32.mrf.mxu1  ;;  %v14295_v52 = vmax.f32 %v6582_v27, %v14278_v33  ;;  %v6839_v47 = vmax.f32 %v6775_v63, %v14263_v17  ;;  %v6585_v32 = vld [vmem:[#allocation3 + $0x210] sm:$0xff] }
 0x32d   :  { %9205 = vmatprep.mubr.msk.f32.mxu0 %vm1183_vm2, %v6837_v4  ;;  %6275 = vst.msk [vmem:[#allocation3 + $0x240] sm:$0xff] %vm1183_vm2, %v6211_v25  ;;  %v6777_v38 = vmax.f32 %v14231_v24, %v14281_v62  ;;  %v6080_v41 = vmax.f32 %v5824_v21, %v5888_v28  ;;  %v3570_v4 = vpop.f32.mrf.mxu0  ;;  %v6840_v15 = vmax.f32 %v6776_v49, %v14278_v33  ;;  %v6586_v28 = vld [vmem:[#allocation3 + $0x218] sm:$0xff] }
 0x32e   :  { %6277 = vst.msk [vmem:[#allocation3 + $0x250] sm:$0xff] %vm1183_vm2, %v6213_v23  ;;  %v2970_v27 = vpop.f32.mrf.mxu1  ;;  %v6778_v30 = vmax.f32 %v14248_v51, %v14295_v52 }
 0x32f   :  { %v5695_v61 = vld [vmem:[#allocation2 + $0x2a0] sm:$0xff]  ;;  %9114 = vmatmul.mubr.msk.f32.gmra.mxu1 %vm1183_vm2, %v15898_v39  ;;  %v5696_v7 = vld [vmem:[#allocation2 + $0x2a8] sm:$0xff]  ;;  %v14316_v49 = vpop.f32.mrf.mxu0 }
 0x330   :  { %v5759_v55 = vld [vmem:[#allocation2 + $0x2a1] sm:$0xff]  ;;  %9116 = vmatprep.mubr.msk.f32.mxu1 %vm1183_vm2, %v14038_v50  ;;  %9206 = vmatmul.mubr.msk.f32.gmra.mxu0 %vm1183_vm2, %v6838_v43  ;;  %v5760_v58 = vld [vmem:[#allocation2 + $0x2a9] sm:$0xff]  ;;  %v8913_v24 = vpop.f32.mrf.mxu1  ;;  %v6841_v50 = vmax.f32 %v6777_v38, %v6585_v32  ;;  %v6842_v39 = vmax.f32 %v6778_v30, %v6586_v28 }
 0x331   :  { %v5823_v9 = vld [vmem:[#allocation2 + $0x2a2] sm:$0xff]  ;;  %v6015_v35 = vmax.f32 %v5695_v61, %v5759_v55  ;;  %9208 = vmatprep.mubr.msk.f32.mxu0 %vm1183_vm2, %v6839_v47  ;;  %v6016_v63 = vmax.f32 %v5696_v7, %v5760_v58  ;;  %v5952_v55 = vld [vmem:[#allocation2 + $0x2ac] sm:$0xff] }
 0x332   :  { %v5887_v46 = vld [vmem:[#allocation2 + $0x2a3] sm:$0xff]  ;;  %v2980_v43 = vpop.f32.mrf.mxu1  ;;  %v15901_v47 = vld [vmem:[#allocation94_spill] sm:$0xff] }
 0x333   :  { %v6079_v45 = vmax.f32 %v5823_v9, %v5887_v46  ;;  %9117 = vmatmul.mubr.msk.f32.gmra.mxu1 %vm1183_vm2, %v13286_v19  ;;  %v5951_v25 = vld [vmem:[#allocation2 + $0x2a4] sm:$0xff]  ;;  %v6144_v23 = vmax.f32 %v6016_v63, %v6080_v41  ;;  %v14320_v9 = vadd.f32 %v14213_v12, %v2970_v27  ;;  %v14323_v19 = vadd.f32 %v14238_v3, %v8913_v24  ;;  %v15906_v41 = vld [vmem:[#allocation67_spill] sm:$0xff] }
 0x334   :  { %9119 = vmatprep.mubr.msk.f32.mxu1 %vm1183_vm2, %v14093_v42  ;;  %9209 = vmatmul.mubr.msk.f32.gmra.mxu0 %vm1183_vm2, %v6840_v15  ;;  %v6715_v42 = vmax.f32 %v14263_v17, %v6585_v32  ;;  %v14330_v38 = vadd.f32 %v14265_v16, %v2980_v43  ;;  %v8916_v46 = vpop.f32.mrf.mxu1  ;;  %v6716_v12 = vmax.f32 %v14278_v33, %v6586_v28  ;;  %v6589_v33 = vld [vmem:[#allocation3 + $0x230] sm:$0xff]  ;;  %v6591_v63 = vld [vmem:[#allocation3 + $0x240] sm:$0xff] }
 0x335   :  { %v6143_v21 = vmax.f32 %v6015_v35, %v6079_v45  ;;  %9211 = vmatprep.mubr.msk.f32.mxu0 %vm1183_vm2, %v6841_v50  ;;  %v6208_v51 = vmax.f32 %v6144_v23, %v5952_v55  ;;  %15899 = vst [vmem:[#allocation65_spill] sm:$0xff] %v14320_v9  ;;  %15900 = vst [vmem:[#allocation76_spill] sm:$0xff] %v14323_v19  ;;  %v14336_v3 = vadd.f32 %v9014_v13, %v8916_v46  ;;  %v14339_v35 = vpop.f32.mrf.mxu0  ;;  %v15907_v45 = vld [vmem:[#allocation79_spill] sm:$0xff]  ;;  %v15937_v19 = vld [vmem:[#allocation9_spill] sm:$0xff] }
 0x336   :  { %15902 = vst [vmem:[#allocation49_spill] sm:$0xff] %v14330_v38  ;;  %15904 = vst [vmem:[#allocation5_spill] sm:$0xff] %v14339_v35  ;;  %v2990_v17 = vpop.f32.mrf.mxu1  ;;  %v6779_v16 = vmax.f32 %v14254_v60, %v6715_v42  ;;  %v6780_v27 = vmax.f32 %v14272_v22, %v6716_v12  ;;  %v15910_v22 = vld [vmem:[#allocation55_spill] sm:$0xff]  ;;  %v6721_v55 = vmax.f32 %v6589_v33, %v6591_v63  ;;  %v15936_v38 = vld [vmem:[#allocation10_spill] sm:$0xff] }
 0x337   :  { %v6207_v61 = vmax.f32 %v6143_v21, %v5951_v25  ;;  %9120 = vmatmul.mubr.msk.f32.gmra.mxu1 %vm1183_vm2, %v15901_v47  ;;  %6272 = vst.msk [vmem:[#allocation3 + $0x228] sm:$0xff] %vm1183_vm2, %v6208_v51  ;;  %15903 = vst [vmem:[#allocation17_spill] sm:$0xff] %v14336_v3  ;;  %v14341_v7 = vadd.f32 %v3570_v4, %v2990_v17  ;;  %v14349_v13 = vpop.f32.mrf.mxu0  ;;  %v15909_v21 = vld [vmem:[#allocation81_spill] sm:$0xff]  ;;  %v3331_v9 = vadd.f32 %v15937_v19, %v15936_v38  ;;  %v15945_v19 = vld [vmem:[#allocation30_spill] sm:$0xff] }
 0x338   :  { %9122 = vmatprep.mubr.msk.f32.mxu1 %vm1183_vm2, %v14244_v56  ;;  %9212 = vmatmul.mubr.msk.f32.gmra.mxu0 %vm1183_vm2, %v6842_v39  ;;  %v6590_v56 = vld [vmem:[#allocation3 + $0x238] sm:$0xff]  ;;  %15908 = vst [vmem:[#allocation15_spill] sm:$0xff] %v14349_v13  ;;  %v6593_v39 = vld [vmem:[#allocation3 + $0x250] sm:$0xff]  ;;  %v15946_v38 = vld [vmem:[#allocation29_spill] sm:$0xff] }
 0x339   :  { %6271 = vst.msk [vmem:[#allocation3 + $0x220] sm:$0xff] %vm1183_vm2, %v6207_v61  ;;  %15905 = vst [vmem:[#allocation77_spill] sm:$0xff] %v14341_v7  ;;  %v6592_v61 = vld [vmem:[#allocation3 + $0x248] sm:$0xff]  ;;  %v14357_v51 = vpop.f32.mrf.mxu0  ;;  %v15966_v13 = vld [vmem:[#allocation44_spill] sm:$0xff] }
 0x33a   :  { %15911 = vst [vmem:[#allocation12_spill] sm:$0xff] %v14357_v51  ;;  %v15962_v51 = vld [vmem:[#allocation86_spill] sm:$0xff] }
 0x33b   :  { %9123 = vmatmul.mubr.msk.f32.gmra.mxu1 %vm1183_vm2, %v15906_v41  ;;  %v15913_v41 = vld [vmem:[#allocation100_spill] sm:$0xff] }
 0x33c   :  { %9125 = vmatprep.mubr.msk.f32.mxu1 %vm1183_vm2, %v15907_v45  ;;  %v6723_v45 = vmax.f32 %v6591_v63, %v6593_v39 }
 0x33e   :  { %v6588_v15 = vld [vmem:[#allocation3 + $0x228] sm:$0xff] }
 0x33f   :  { %9126 = vmatmul.mubr.msk.f32.gmra.mxu1 %vm1183_vm2, %v15909_v21  ;;  %v6844_v60 = vmax.f32 %v6780_v27, %v6588_v15  ;;  %v6718_v50 = vmax.f32 %v6586_v28, %v6588_v15  ;;  %v6720_v25 = vmax.f32 %v6588_v15, %v6590_v56  ;;  %v15912_v28 = vld [vmem:[#allocation68_spill] sm:$0xff]  ;;  %v6594_v27 = vld [vmem:[#allocation3 + $0x258] sm:$0xff] }
 0x340   :  { %v6587_v58 = vld [vmem:[#allocation3 + $0x220] sm:$0xff]  ;;  %9128 = vmatprep.mubr.msk.f32.mxu1 %vm1183_vm2, %v15910_v22 }
 0x341   :  { %v6843_v24 = vmax.f32 %v6779_v16, %v6587_v58  ;;  %v6717_v4 = vmax.f32 %v6585_v32, %v6587_v58  ;;  %v6719_v30 = vmax.f32 %v6587_v58, %v6589_v33  ;;  %v6782_v32 = vmax.f32 %v14295_v52, %v6718_v50  ;;  %v14366_v58 = vpop.f32.mrf.mxu0  ;;  %v6595_v52 = vld [vmem:[#allocation3 + $0x260] sm:$0xff] }
 0x342   :  { %v6784_v17 = vmax.f32 %v6716_v12, %v6720_v25  ;;  %v6722_v16 = vmax.f32 %v6590_v56, %v6592_v61  ;;  %15914 = vst [vmem:[#allocation20_spill] sm:$0xff] %v14366_v58  ;;  %v6725_v22 = vmax.f32 %v6593_v39, %v6595_v52 }
 0x343   :  { %9214 = vmatprep.mubr.msk.f32.mxu0 %vm1183_vm2, %v6843_v24  ;;  %v6781_v23 = vmax.f32 %v14281_v62, %v6717_v4  ;;  %v6783_v43 = vmax.f32 %v6715_v42, %v6719_v30  ;;  %9129 = vmatmul.mubr.msk.f32.gmra.mxu1 %vm1183_vm2, %v15912_v28  ;;  %v6846_v46 = vmax.f32 %v6782_v32, %v6590_v56 }
 0x344   :  { %9215 = vmatmul.mubr.msk.f32.gmra.mxu0 %vm1183_vm2, %v6844_v60  ;;  %9131 = vmatprep.mubr.msk.f32.mxu1 %vm1183_vm2, %v15913_v41  ;;  %v6785_v42 = vmax.f32 %v6717_v4, %v6721_v55  ;;  %v6848_v12 = vmax.f32 %v6784_v17, %v6592_v61  ;;  %v6786_v56 = vmax.f32 %v6718_v50, %v6722_v16  ;;  %v6596_v60 = vld [vmem:[#allocation3 + $0x268] sm:$0xff]  ;;  %v14372_v4 = vpop.f32.mrf.mxu0  ;;  %v6597_v50 = vld [vmem:[#allocation3 + $0x270] sm:$0xff]  ;;  %v14384_v41 = vpop.f32.mrf.mxu1 }
 0x345   :  { %v6845_v47 = vmax.f32 %v6781_v23, %v6589_v33  ;;  %v6847_v62 = vmax.f32 %v6783_v43, %v6591_v63  ;;  %v15915_v33 = vld [vmem:[#allocation84_spill] sm:$0xff]  ;;  %v6724_v24 = vmax.f32 %v6592_v61, %v6594_v27  ;;  %v6787_v21 = vmax.f32 %v6719_v30, %v6723_v45  ;;  %15916 = vst [vmem:[#allocation16_spill] sm:$0xff] %v14372_v4  ;;  %v15951_v4 = vld [vmem:[#allocation54_spill] sm:$0xff] }
 0x346   :  { %v6849_v15 = vmax.f32 %v6785_v42, %v6593_v39  ;;  %v6850_v63 = vmax.f32 %v6786_v56, %v6594_v27  ;;  %v6726_v43 = vmax.f32 %v6594_v27, %v6596_v60  ;;  %v14376_v28 = vpop.f32.mrf.mxu0 }
 0x347   :  { %9217 = vmatprep.mubr.msk.f32.mxu0 %vm1183_vm2, %v6845_v47  ;;  %9132 = vmatmul.mubr.msk.f32.gmra.mxu1 %vm1183_vm2, %v15915_v33  ;;  %v6788_v23 = vmax.f32 %v6720_v25, %v6724_v24  ;;  %v6851_v32 = vmax.f32 %v6787_v21, %v6595_v52  ;;  %v6789_v47 = vmax.f32 %v6721_v55, %v6725_v22 }
 0x348   :  { %9218 = vmatmul.mubr.msk.f32.gmra.mxu0 %vm1183_vm2, %v6846_v46  ;;  %15917 = vst [vmem:[#allocation31_spill] sm:$0xff] %v14376_v28  ;;  %v6790_v61 = vmax.f32 %v6722_v16, %v6726_v43  ;;  %v6598_v46 = vld [vmem:[#allocation3 + $0x278] sm:$0xff]  ;;  %v14380_v17 = vpop.f32.mrf.mxu0 }
 0x349   :  { %9220 = vmatprep.mubr.msk.f32.mxu0 %vm1183_vm2, %v6847_v62  ;;  %v6852_v30 = vmax.f32 %v6788_v23, %v6596_v60  ;;  %v6853_v39 = vmax.f32 %v6789_v47, %v6597_v50  ;;  %15918 = vst [vmem:[#allocation18_spill] sm:$0xff] %v14380_v17  ;;  %v14389_v62 = vpop.f32.mrf.mxu1 }
 0x34a   :  { %v6854_v25 = vmax.f32 %v6790_v61, %v6598_v46  ;;  %v14386_v55 = vpop.f32.mrf.mxu0 }
 0x34b   :  { %15919 = vst [vmem:[#allocation21_spill] sm:$0xff] %v14386_v55  ;;  %v14393_v16 = vpop.f32.mrf.mxu1  ;;  %v15942_v55 = vld [vmem:[#allocation34_spill] sm:$0xff] }
 0x34c   :  { %9221 = vmatmul.mubr.msk.f32.gmra.mxu0 %vm1183_vm2, %v6848_v12  ;;  %v14391_v42 = vpop.f32.mrf.mxu0  ;;  %15921 = vst [vmem:[#allocation41_spill] sm:$0xff] %v14393_v16  ;;  %v15969_v16 = vld [vmem:[#allocation62_spill] sm:$0xff] }
 0x34d   :  { %9223 = vmatprep.mubr.msk.f32.mxu0 %vm1183_vm2, %v6849_v15  ;;  %15920 = vst [vmem:[#allocation13_spill] sm:$0xff] %v14391_v42  ;;  %v14397_v45 = vpop.f32.mrf.mxu1  ;;  %v15940_v42 = vld [vmem:[#allocation14_spill] sm:$0xff] }
 0x34e   :  { %v14395_v27 = vpop.f32.mrf.mxu0  ;;  %15923 = vst [vmem:[#allocation71_spill] sm:$0xff] %v14397_v45  ;;  %v15965_v45 = vld [vmem:[#allocation98_spill] sm:$0xff] }
 0x34f   :  { %15922 = vst [vmem:[#allocation23_spill] sm:$0xff] %v14395_v27  ;;  %v14401_v33 = vpop.f32.mrf.mxu1 }
 0x350   :  { %9224 = vmatmul.mubr.msk.f32.gmra.mxu0 %vm1183_vm2, %v6850_v63  ;;  %v14399_v52 = vpop.f32.mrf.mxu0  ;;  %15925 = vst [vmem:[#allocation83_spill] sm:$0xff] %v14401_v33 }
 0x351   :  { %9226 = vmatprep.mubr.msk.f32.mxu0 %vm1183_vm2, %v6851_v32  ;;  %15924 = vst [vmem:[#allocation72_spill] sm:$0xff] %v14399_v52  ;;  %v14405_v56 = vpop.f32.mrf.mxu1  ;;  %v15938_v52 = vld [vmem:[#allocation48_spill] sm:$0xff] }
 0x352   :  { %v14403_v12 = vpop.f32.mrf.mxu0  ;;  %15927 = vst [vmem:[#allocation103_spill] sm:$0xff] %v14405_v56  ;;  %v15952_v56 = vld [vmem:[#allocation51_spill] sm:$0xff] }
 0x353   :  { %15926 = vst [vmem:[#allocation99_spill] sm:$0xff] %v14403_v12  ;;  %v14407_v15 = vpop.f32.mrf.mxu1  ;;  %v14459_v58 = vadd.f32 %v15952_v56, %v15951_v4  ;;  %v15960_v4 = vld [vmem:[#allocation38_spill] sm:$0xff] }
 0x354   :  { %9227 = vmatmul.mubr.msk.f32.gmra.mxu0 %vm1183_vm2, %v6852_v30  ;;  %v3640_v24 = vpop.f32.mrf.mxu0  ;;  %15928 = vst [vmem:[#allocation96_spill] sm:$0xff] %v14407_v15 }
 0x355   :  { %9229 = vmatprep.mubr.msk.f32.mxu0 %vm1183_vm2, %v6853_v39  ;;  %v14409_v60 = vpop.f32.mrf.mxu1 }
 0x356   :  { %v9138_v21 = vpop.f32.mrf.mxu0  ;;  %15929 = vst [vmem:[#allocation87_spill] sm:$0xff] %v14409_v60  ;;  %v14447_v60 = vadd.f32 %v15946_v38, %v15945_v19  ;;  %v15955_v38 = vld [vmem:[#allocation92_spill] sm:$0xff] }
 0x357   :  { %v14411_v63 = vpop.f32.mrf.mxu1 }
 0x358   :  { %9230 = vmatmul.mubr.msk.f32.gmra.mxu0 %vm1183_vm2, %v6854_v25  ;;  %v7118_v22 = vpop.f32.mrf.mxu0  ;;  %15930 = vst [vmem:[#allocation88_spill] sm:$0xff] %v14411_v63 }
 0x359   :  { %v14413_v43 = vpop.f32.mrf.mxu1 }
 0x35a   :  { %v9141_v23 = vpop.f32.mrf.mxu0  ;;  %15931 = vst [vmem:[#allocation4_spill] sm:$0xff] %v14413_v43  ;;  %v15941_v43 = vld [vmem:[#allocation58_spill] sm:$0xff] }
 0x35b   :  { %v14415_v47 = vpop.f32.mrf.mxu1  ;;  %v3351_v63 = vadd.f32 %v15942_v55, %v15941_v43  ;;  %v15949_v55 = vld [vmem:[#allocation78_spill] sm:$0xff]  ;;  %v15950_v43 = vld [vmem:[#allocation35_spill] sm:$0xff] }
 0x35c   :  { %v7128_v32 = vpop.f32.mrf.mxu0  ;;  %15932 = vst [vmem:[#allocation8_spill] sm:$0xff] %v14415_v47  ;;  %v15939_v47 = vld [vmem:[#allocation73_spill] sm:$0xff]  ;;  %v14455_v15 = vadd.f32 %v15950_v43, %v15949_v55  ;;  %v15959_v43 = vld [vmem:[#allocation59_spill] sm:$0xff] }
 0x35d   :  { %v14417_v30 = vpop.f32.mrf.mxu1  ;;  %v14477_v56 = vadd.f32 %v15960_v4, %v15959_v43  ;;  %v15971_v43 = vld [vmem:[#allocation102_spill] sm:$0xff]  ;;  %v15972_v4 = vld [vmem:[#allocation47_spill] sm:$0xff] }
 0x35e   :  { %v9144_v50 = vpop.f32.mrf.mxu0  ;;  %15933 = vst [vmem:[#allocation6_spill] sm:$0xff] %v14417_v30  ;;  %v3341_v30 = vadd.f32 %v15940_v42, %v15939_v47  ;;  %v15947_v42 = vld [vmem:[#allocation89_spill] sm:$0xff]  ;;  %v15948_v47 = vld [vmem:[#allocation32_spill] sm:$0xff] }
 0x35f   :  { %v14451_v28 = vadd.f32 %v15948_v47, %v15947_v42  ;;  %v15958_v47 = vld [vmem:[#allocation63_spill] sm:$0xff]  ;;  %15961 = vst [vmem:[#allocation36_spill] sm:$0xff] %v14477_v56 }
 0x360   :  { %v14419_v61 = vpop.f32.mrf.mxu0 }
 0x361   :  { %v14421_v39 = vpop.f32.mrf.mxu1 }
 0x362   :  { %15934 = vst [vmem:[#allocation19_spill] sm:$0xff] %v14421_v39  ;;  %v14423_v46 = vpop.f32.mrf.mxu0  ;;  %v14439_v39 = vld [vmem:[%s15324_s4] ss:$0 sm:$0xff] }
 0x363   :  { %v3060_v25 = vpop.f32.mrf.mxu1 }
 0x364   :  { %v14425_v7 = vadd.f32 %v3640_v24, %v3060_v25  ;;  %v14429_v12 = vpop.f32.mrf.mxu0  ;;  %v15943_v25 = vld [vmem:[#allocation33_spill] sm:$0xff] }
 0x365   :  { %v9040_v3 = vpop.f32.mrf.mxu1 }
 0x366   :  { %15935 = vst [vmem:[#allocation25_spill] sm:$0xff] %v14425_v7  ;;  %v5512_v27 = vadd.f32 %v9040_v3, %v15938_v52  ;;  %v15944_v7 = vld [vmem:[#allocation22_spill] sm:$0xff] }
 0x367   :  { %v5192_v24 = vpop.f32.mrf.mxu1  ;;  %v14443_v17 = vadd.f32 %v15944_v7, %v15943_v25  ;;  %v15953_v7 = vld [vmem:[#allocation56_spill] sm:$0xff] }
 0x368   :  { %v7438_v3 = vadd.f32 %v9138_v21, %v5512_v27  ;;  %v5511_v52 = vadd.f32 %v5192_v24, %v3331_v9  ;;  %v15954_v25 = vld [vmem:[#allocation24_spill] sm:$0xff]  ;;  %v15956_v27 = vld [vmem:[#allocation27_spill] sm:$0xff]  ;;  %v14469_v21 = vpop.f32.mrf.mxu0 }
 0x369   :  { %v14463_v33 = vadd.f32 %v15954_v25, %v15953_v7  ;;  %v9043_v19 = vpop.f32.mrf.mxu1  ;;  %v14467_v9 = vadd.f32 %v15956_v27, %v15955_v38  ;;  %v15963_v7 = vld [vmem:[#allocation39_spill] sm:$0xff]  ;;  %v14485_v38 = vadd.f32 %v15966_v13, %v15965_v45  ;;  %v15968_v27 = vld [vmem:[#allocation101_spill] sm:$0xff] }
 0x36a   :  { %v14472_v24 = vadd.f32 %v14439_v39, %v7438_v3  ;;  %v7437_v42 = vadd.f32 %v7118_v22, %v5511_v52  ;;  %v5514_v55 = vadd.f32 %v9043_v19, %v15958_v47  ;;  %v14481_v25 = vadd.f32 %v15963_v7, %v15962_v51  ;;  %v15973_v7 = vld [vmem:[#allocation40_spill] sm:$0xff]  ;;  %v15975_v45 = vld [vmem:[#allocation45_spill] sm:$0xff]  ;;  %v14511_v56 = vpop.f32.mrf.mxu0 }
 0x36b   :  { %15967 = vst [vmem:[#allocation94_spill] sm:$0xff] %v14485_v38  ;;  %v14489_v35 = vadd.f32 %v15969_v16, %v15968_v27  ;;  %v5202_v3 = vpop.f32.mrf.mxu1  ;;  %v14497_v51 = vadd.f32 %v15972_v4, %v15971_v43  ;;  %v15976_v38 = vld [vmem:[#allocation26_spill] sm:$0xff] }
 0x36c   :  { %15957 = vst [vmem:[#allocation28_spill] sm:$0xff] %v14472_v24  ;;  %15964 = vst [vmem:[#allocation43_spill] sm:$0xff] %v14481_v25  ;;  %v7573_v22 = vsub.f32 0.0, %v14472_v24  ;;  %v14493_v52 = vadd.f32 %v14439_v39, %v7437_v42  ;;  %v7440_v19 = vadd.f32 %v9141_v23, %v5514_v55  ;;  %v5513_v47 = vadd.f32 %v5202_v3, %v3341_v30  ;;  %v15974_v25 = vld [vmem:[#allocation11_spill] sm:$0xff]  ;;  %v15977_v27 = vld [vmem:[#allocation46_spill] sm:$0xff] }
 0x36d   :  { %15970 = vst [vmem:[#allocation67_spill] sm:$0xff] %v14489_v35  ;;  %v14501_v13 = vadd.f32 %v15974_v25, %v15973_v7  ;;  %v14505_v16 = vadd.f32 %v15976_v38, %v15975_v45  ;;  %v15978_v35 = vld [vmem:[#allocation57_spill] sm:$0xff]  ;;  %v9046_v42 = vpop.f32.mrf.mxu1  ;;  %v15981_v38 = vld [vmem:[#allocation80_spill] sm:$0xff]  ;;  %v15984_v45 = vld [vmem:[#allocation74_spill] sm:$0xff] }
 0x36e   :  { %v14509_v24 = vadd.f32 %v15978_v35, %v15977_v27  ;;  %v7638_v23 = vmul.f32 1.442695, %v7573_v22  ;;  %v7572_v30 = vsub.f32 0.0, %v14493_v52  ;;  %v14515_v55 = vadd.f32 %v14439_v39, %v7440_v19  ;;  %v15980_v25 = vld [vmem:[#allocation61_spill] sm:$0xff]  ;;  %v15982_v35 = vld [vmem:[#allocation66_spill] sm:$0xff] }
 0x36f   :  { %v7439_v3 = vadd.f32 %v7128_v32, %v5513_v47  ;;  %v14519_v43 = vadd.f32 %v15980_v25, %v13861_v48  ;;  %v14523_v4 = vadd.f32 %v15981_v38, %v13885_v54  ;;  %v14527_v7 = vadd.f32 %v15982_v35, %v13903_v44  ;;  %v5212_v27 = vpop.f32.mrf.mxu1  ;;  %v15985_v48 = vld [vmem:[#allocation53_spill] sm:$0xff]  ;;  %v15986_v54 = vld [vmem:[#allocation82_spill] sm:$0xff] }
 0x370   :  { %15979 = vst [vmem:[#allocation79_spill] sm:$0xff] %v14509_v24  ;;  %v5516_v22 = vadd.f32 %v9046_v42, %v15984_v45  ;;  %9491 = vpow2.f32 %v7638_v23  ;;  %v7636_v24 = vmul.f32 1.442695, %v7572_v30  ;;  %v7575_v19 = vsub.f32 0.0, %v14515_v55  ;;  %v15987_v42 = vld [vmem:[#allocation85_spill] sm:$0xff]  ;;  %v9153_v23 = vpop.f32.mrf.mxu0 }
 0x371   :  { %15983 = vst [vmem:[#allocation81_spill] sm:$0xff] %v14527_v7  ;;  %v14532_v32 = vadd.f32 %v14439_v39, %v7439_v3  ;;  %v14536_v47 = vadd.f32 %v15985_v48, %v13929_v53  ;;  %v14540_v25 = vadd.f32 %v15986_v54, %v13958_v11  ;;  %v5515_v38 = vadd.f32 %v5212_v27, %v3351_v63  ;;  %v15988_v7 = vld [vmem:[#allocation93_spill] sm:$0xff]  ;;  %v15989_v63 = vld [vmem:[#allocation75_spill] sm:$0xff] }
 0x372   :  { %v7442_v44 = vadd.f32 %v9144_v50, %v5516_v22  ;;  %v14544_v35 = vadd.f32 %v15987_v42, %v13997_v26  ;;  %9493 = vpow2.f32 %v7636_v24  ;;  %v7642_v30 = vmul.f32 1.442695, %v7575_v19  ;;  %v15990_v26 = vld [vmem:[#allocation90_spill] sm:$0xff]  ;;  %v15991_v24 = vld [vmem:[#allocation95_spill] sm:$0xff]  ;;  %v15993_v42 = vld [vmem:[#allocation97_spill] sm:$0xff] }
 0x373   :  { %v7574_v3 = vsub.f32 0.0, %v14532_v32  ;;  %v14549_v53 = vadd.f32 %v15988_v7, %v14023_v20  ;;  %v7441_v11 = vadd.f32 %v14419_v61, %v5515_v38  ;;  %v14558_v22 = vadd.f32 %v15990_v26, %v14051_v31  ;;  %v15992_v38 = vld [vmem:[#allocation91_spill] sm:$0xff] }
 0x374   :  { %v14552_v48 = vadd.f32 %v14439_v39, %v7442_v44  ;;  %v14562_v27 = vadd.f32 %v15991_v24, %v14068_v5  ;;  %9495 = vpow2.f32 %v7642_v30  ;;  %v14572_v31 = vadd.f32 %v15992_v38, %v14107_v59  ;;  %v15994_v30 = vld [vmem:[#allocation42_spill] sm:$0xff] }
 0x375   :  { %v7640_v19 = vmul.f32 1.442695, %v7574_v3  ;;  %v14566_v7 = vadd.f32 %v14439_v39, %v7441_v11  ;;  %v14576_v5 = vadd.f32 %v15993_v42, %v14136_v1  ;;  %v14580_v3 = vadd.f32 %v15994_v30, %v14151_v37  ;;  %v15996_v1 = vld [vmem:[#allocation60_spill] sm:$0xff]  ;;  %v15997_v37 = vld [vmem:[#allocation50_spill] sm:$0xff] }
 0x376   :  { %v7577_v20 = vsub.f32 0.0, %v14552_v48  ;;  %v14593_v24 = vadd.f32 %v15996_v1, %v14186_v14  ;;  %v16000_v14 = vld [vmem:[#allocation69_spill] sm:$0xff] }
 0x377   :  { %9497 = vpow2.f32 %v7640_v19  ;;  %v14597_v19 = vadd.f32 %v15997_v37, %v14203_v29  ;;  %v14610_v30 = vadd.f32 %v16000_v14, %v14246_v36  ;;  %v14622_v36 = vadd.f32 %v14134_v6, %v14268_v40 }
 0x37c   :  { %v9049_v45 = vpop.f32.mrf.mxu1 }
 0x37d   :  { %v5518_v50 = vadd.f32 %v9049_v45, %v15989_v63  ;;  %v7168_v45 = vpop.f32.mrf.mxu0  ;;  %v7646_v63 = vmul.f32 1.442695, %v7577_v20 }
 0x37e   :  { %v5222_v54 = vpop.f32.mrf.mxu1 }
 0x37f   :  { %v7444_v61 = vadd.f32 %v14423_v46, %v5518_v50  ;;  %v5517_v44 = vadd.f32 %v5222_v54, %v14443_v17  ;;  %v7576_v46 = vsub.f32 0.0, %v14566_v7  ;;  %v15995_v50 = vld [vmem:[#allocation37_spill] sm:$0xff]  ;;  %v15998_v54 = vld [vmem:[#allocation52_spill] sm:$0xff]  ;;  %9499 = vpow2.f32 %v7646_v63  ;;  %v9156_v29 = vpop.f32.mrf.mxu0 }
 0x380   :  { %v9052_v11 = vpop.f32.mrf.mxu1  ;;  %v14589_v26 = vadd.f32 %v15995_v50, %v14171_v8  ;;  %v15999_v8 = vld [vmem:[#allocation64_spill] sm:$0xff] }
 0x381   :  { %v14584_v17 = vadd.f32 %v14439_v39, %v7444_v61  ;;  %v7443_v59 = vadd.f32 %v14429_v12, %v5517_v44  ;;  %v5520_v20 = vadd.f32 %v9052_v11, %v15998_v54  ;;  %v7644_v61 = vmul.f32 1.442695, %v7576_v46  ;;  %v16002_v54 = vld [vmem:[#allocation70_spill] sm:$0xff]  ;;  %v7178_v14 = vpop.f32.mrf.mxu0 }
 0x382   :  { %v5232_v38 = vpop.f32.mrf.mxu1  ;;  %v14606_v44 = vadd.f32 %v15999_v8, %v14223_v0  ;;  %v14618_v0 = vadd.f32 %v16002_v54, %v14260_v10  ;;  %v14631_v10 = vadd.f32 %v14159_v2, %v14285_v18 }
 0x383   :  { %v7579_v42 = vsub.f32 0.0, %v14584_v17  ;;  %v14602_v12 = vadd.f32 %v14439_v39, %v7443_v59  ;;  %v7446_v50 = vadd.f32 %v14469_v21, %v5520_v20  ;;  %v5519_v11 = vadd.f32 %v5232_v38, %v14447_v60  ;;  %v16001_v59 = vld [vmem:[#allocation7_spill] sm:$0xff]  ;;  %v9492_v20 = vpop.eup %9491 }
 0x384   :  { %9501 = vpow2.f32 %v7644_v61  ;;  %16003 = vst [vmem:[#allocation55_spill] sm:$0xff] %v14631_v10  ;;  %v16026_v10 = vld [vmem:[#allocation18_spill] sm:$0xff] }
 0x385   :  { %v7650_v46 = vmul.f32 1.442695, %v7579_v42  ;;  %v7578_v1 = vsub.f32 0.0, %v14602_v12  ;;  %v14625_v8 = vadd.f32 %v14439_v39, %v7446_v50  ;;  %v7445_v60 = vadd.f32 %v14511_v56, %v5519_v11  ;;  %v9494_v56 = vpop.eup %9493 }
 0x387   :  { %9503 = vpow2.f32 %v7650_v46  ;;  %v7648_v38 = vmul.f32 1.442695, %v7578_v1  ;;  %v7581_v6 = vsub.f32 0.0, %v14625_v8  ;;  %v14635_v40 = vadd.f32 %v14439_v39, %v7445_v60 }
 0x388   :  { %v7764_v46 = vadd.f32 1.0, %v9494_v56 }
 0x389   :  { %v9055_v63 = vpop.f32.mrf.mxu1  ;;  %9505 = vpow2.f32 %v7648_v38  ;;  %v7654_v2 = vmul.f32 1.442695, %v7581_v6  ;;  %v7580_v18 = vsub.f32 0.0, %v14635_v40 }
 0x38a   :  { %v5522_v37 = vadd.f32 %v9055_v63, %v16001_v59  ;;  %v7765_v63 = vadd.f32 1.0, %v9492_v20  ;;  %v9496_v59 = vpop.eup %9495 }
 0x38b   :  { %v5242_v21 = vpop.f32.mrf.mxu1  ;;  %v7767_v20 = vadd.f32 1.0, %v9496_v59  ;;  %v7652_v38 = vmul.f32 1.442695, %v7580_v18 }
 0x38c   :  { %v7448_v61 = vadd.f32 %v9153_v23, %v5522_v37  ;;  %v5521_v42 = vadd.f32 %v5242_v21, %v14451_v28  ;;  %9507 = vrcp.f32 %v7765_v63 }
 0x38d   :  { %v9058_v50 = vpop.f32.mrf.mxu1  ;;  %9509 = vrcp.f32 %v7764_v46 }
 0x38e   :  { %v14638_v11 = vadd.f32 %v14439_v39, %v7448_v61  ;;  %v7447_v23 = vadd.f32 %v7168_v45, %v5521_v42  ;;  %v5524_v28 = vadd.f32 %v9058_v50, %v14455_v15  ;;  %v14649_v45 = vadd.f32 %v14184_v57, %v14290_v34  ;;  %v9159_v15 = vpop.f32.mrf.mxu0  ;;  %v9498_v42 = vpop.eup %9497 }
 0x38f   :  { %v5252_v1 = vpop.f32.mrf.mxu1  ;;  %9511 = vpow2.f32 %v7654_v2  ;;  %v9500_v46 = vpop.eup %9499  ;;  %v14660_v2 = vadd.f32 %v14316_v49, %v14384_v41 }
 0x390   :  { %v7583_v37 = vsub.f32 0.0, %v14638_v11  ;;  %v14644_v54 = vadd.f32 %v14439_v39, %v7447_v23  ;;  %v7450_v60 = vadd.f32 %v9156_v29, %v5524_v28  ;;  %v5523_v21 = vadd.f32 %v5252_v1, %v14459_v58  ;;  %16004 = vst [vmem:[#allocation68_spill] sm:$0xff] %v14649_v45  ;;  %v7188_v18 = vpop.f32.mrf.mxu0  ;;  %v16025_v45 = vld [vmem:[#allocation87_spill] sm:$0xff] }
 0x391   :  { %9513 = vrcp.f32 %v7767_v20  ;;  %v7766_v29 = vadd.f32 1.0, %v9498_v42  ;;  %16005 = vst [vmem:[#allocation100_spill] sm:$0xff] %v14660_v2  ;;  %v16006_v20 = vld [vmem:[#allocation5_spill] sm:$0xff]  ;;  %v16009_v42 = vld [vmem:[#allocation15_spill] sm:$0xff] }
 0x392   :  { %v7658_v63 = vmul.f32 1.442695, %v7583_v37  ;;  %v7582_v6 = vsub.f32 0.0, %v14644_v54  ;;  %v14653_v50 = vadd.f32 %v14439_v39, %v7450_v60  ;;  %v7449_v58 = vadd.f32 %v7178_v14, %v5523_v21  ;;  %v9502_v21 = vpop.eup %9501 }
 0x393   :  { %9515 = vpow2.f32 %v7652_v38 }
 0x394   :  { %v7656_v34 = vmul.f32 1.442695, %v7582_v6  ;;  %v7585_v23 = vsub.f32 0.0, %v14653_v50  ;;  %9517 = vrcp.f32 %v7766_v29  ;;  %v14663_v1 = vadd.f32 %v14439_v39, %v7449_v58  ;;  %v9504_v29 = vpop.eup %9503 }
 0x395   :  { %v9061_v61 = vpop.f32.mrf.mxu1  ;;  %9519 = vpow2.f32 %v7658_v63  ;;  %v7768_v63 = vadd.f32 1.0, %v9502_v21  ;;  %v16015_v21 = vld [vmem:[#allocation83_spill] sm:$0xff] }
 0x396   :  { %v5526_v56 = vadd.f32 %v9061_v61, %v14463_v33  ;;  %v7769_v33 = vadd.f32 1.0, %v9500_v46  ;;  %v7662_v37 = vmul.f32 1.442695, %v7585_v23  ;;  %9521 = vpow2.f32 %v7656_v34  ;;  %v16008_v61 = vld [vmem:[#allocation41_spill] sm:$0xff]  ;;  %v16012_v23 = vld [vmem:[#allocation71_spill] sm:$0xff] }
 0x397   :  { %v5262_v57 = vpop.f32.mrf.mxu1  ;;  %v7584_v49 = vsub.f32 0.0, %v14663_v1 }
 0x398   :  { %v5525_v28 = vadd.f32 %v5262_v57, %v14467_v9  ;;  %v7452_v14 = vadd.f32 %v9159_v15, %v5526_v56  ;;  %v14667_v9 = vadd.f32 %v16006_v20, %v14389_v62  ;;  %v14675_v15 = vadd.f32 %v16009_v42, %v16008_v61  ;;  %v16011_v56 = vld [vmem:[#allocation36_spill] sm:$0xff] }
 0x399   :  { %v9064_v59 = vpop.f32.mrf.mxu1  ;;  %9523 = vrcp.f32 %v7769_v33  ;;  %v7660_v62 = vmul.f32 1.442695, %v7584_v49  ;;  %v9506_v33 = vpop.eup %9505  ;;  %v16018_v49 = vld [vmem:[#allocation43_spill] sm:$0xff] }
 0x39a   :  { %v7451_v60 = vadd.f32 %v7188_v18, %v5525_v28  ;;  %16007 = vst [vmem:[#allocation84_spill] sm:$0xff] %v14667_v9  ;;  %v14671_v41 = vadd.f32 %v14439_v39, %v7452_v14  ;;  %16010 = vst [vmem:[#allocation10_spill] sm:$0xff] %v14675_v15  ;;  %9525 = vpow2.f32 %v7662_v37  ;;  %v5528_v57 = vadd.f32 %v9064_v59, %v16011_v56  ;;  %v16013_v28 = vld [vmem:[#allocation12_spill] sm:$0xff]  ;;  %v9508_v59 = vpop.eup %9507  ;;  %v16019_v56 = vld [vmem:[#allocation103_spill] sm:$0xff] }
 0x39b   :  { %v5272_v38 = vpop.f32.mrf.mxu1  ;;  %v14684_v46 = vadd.f32 %v16013_v28, %v16012_v23  ;;  %9527 = vrcp.f32 %v7768_v63  ;;  %v7771_v18 = vadd.f32 1.0, %v9504_v29  ;;  %v16020_v15 = vld [vmem:[#allocation16_spill] sm:$0xff]  ;;  %v7770_v63 = vadd.f32 1.0, %v9506_v33 }
 0x39c   :  { %v14678_v6 = vadd.f32 %v14439_v39, %v7451_v60  ;;  %v7587_v58 = vsub.f32 0.0, %v14671_v41  ;;  %v16016_v60 = vld [vmem:[#allocation20_spill] sm:$0xff]  ;;  %9529 = vpow2.f32 %v7660_v62  ;;  %v5527_v61 = vadd.f32 %v5272_v38, %v16018_v49  ;;  %v16024_v38 = vld [vmem:[#allocation31_spill] sm:$0xff] }
 0x39d   :  { %16014 = vst [vmem:[#allocation9_spill] sm:$0xff] %v14684_v46  ;;  %v14689_v20 = vadd.f32 %v16016_v60, %v16015_v21  ;;  %v14694_v9 = vadd.f32 %v16020_v15, %v16019_v56  ;;  %9531 = vrcp.f32 %v7771_v18  ;;  %v16021_v28 = vld [vmem:[#allocation28_spill] sm:$0xff]  ;;  %v16022_v21 = vld [vmem:[#allocation94_spill] sm:$0xff]  ;;  %v14704_v15 = vadd.f32 %v16026_v10, %v16025_v45  ;;  %v16028_v18 = vld [vmem:[#allocation21_spill] sm:$0xff] }
 0x39e   :  { %v9067_v34 = vpop.f32.mrf.mxu1  ;;  %v7586_v14 = vsub.f32 0.0, %v14678_v6  ;;  %v7666_v37 = vmul.f32 1.442695, %v7587_v58  ;;  %v7957_v46 = vmul.f32 %v9508_v59, %v16021_v28  ;;  %v9510_v58 = vpop.eup %9509  ;;  %v16027_v56 = vld [vmem:[#allocation88_spill] sm:$0xff] }
 0x39f   :  { %16017 = vst [vmem:[#allocation48_spill] sm:$0xff] %v14689_v20  ;;  %v9162_v23 = vpop.f32.mrf.mxu0  ;;  %v5530_v60 = vadd.f32 %v9067_v34, %v16022_v21  ;;  %v16023_v20 = vld [vmem:[#allocation96_spill] sm:$0xff]  ;;  %v14708_v33 = vadd.f32 %v16028_v18, %v16027_v56 }
 0x3a0   :  { %v5282_v42 = vpop.f32.mrf.mxu1  ;;  %v7664_v29 = vmul.f32 1.442695, %v7586_v14  ;;  %9533 = vpow2.f32 %v7666_v37  ;;  %v7454_v2 = vadd.f32 %v9162_v23, %v5528_v57  ;;  %v14700_v49 = vadd.f32 %v16024_v38, %v16023_v20  ;;  %v9512_v37 = vpop.eup %9511  ;;  %8021 = vst.msk [vmem:[%s15325_s5 + $0x8] sm:$0xff] %vm92_vm0, %v7957_v46  ;;  %v16029_v59 = vld [vmem:[#allocation4_spill] sm:$0xff]  ;;  %v16030_v23 = vld [vmem:[#allocation13_spill] sm:$0xff]  ;;  %v16031_v38 = vld [vmem:[#allocation67_spill] sm:$0xff] }
 0x3a1   :  { %v7198_v14 = vpop.f32.mrf.mxu0  ;;  %9535 = vrcp.f32 %v7770_v63  ;;  %v7956_v57 = vmul.f32 %v9510_v58, %v14493_v52  ;;  %v9514_v20 = vpop.eup %9513  ;;  %v14720_v28 = vadd.f32 %v16030_v23, %v16029_v59  ;;  %v7773_v21 = vadd.f32 1.0, %v9512_v37 }
 0x3a2   :  { %v9070_v62 = vpop.f32.mrf.mxu1  ;;  %9537 = vpow2.f32 %v7664_v29  ;;  %v14716_v34 = vadd.f32 %v14439_v39, %v7454_v2  ;;  %v7453_v10 = vadd.f32 %v7198_v14, %v5527_v61  ;;  %v5529_v56 = vadd.f32 %v5282_v42, %v16031_v38  ;;  %v9516_v46 = vpop.eup %9515 }
 0x3a3   :  { %v5532_v18 = vadd.f32 %v9070_v62, %v14497_v51  ;;  %8020 = vst.msk [vmem:[%s15325_s5] sm:$0xff] %vm92_vm0, %v7956_v57  ;;  %v7959_v52 = vmul.f32 %v9514_v20, %v14515_v55  ;;  %v9518_v14 = vpop.eup %9517  ;;  %9539 = vrcp.f32 %v7773_v21  ;;  %v7772_v42 = vadd.f32 1.0, %v9516_v46 }
 0x3a4   :  { %v5292_v45 = vpop.f32.mrf.mxu1  ;;  %v7589_v2 = vsub.f32 0.0, %v14716_v34  ;;  %v14731_v61 = vadd.f32 %v14439_v39, %v7453_v10  ;;  %v9520_v59 = vpop.eup %9519  ;;  %v7958_v55 = vmul.f32 %v9518_v14, %v14532_v32 }
 0x3a5   :  { %v9165_v63 = vpop.f32.mrf.mxu0  ;;  %v5531_v51 = vadd.f32 %v5292_v45, %v14501_v13  ;;  %8023 = vst.msk [vmem:[%s15325_s5 + $0x18] sm:$0xff] %vm92_vm0, %v7959_v52  ;;  %v9522_v23 = vpop.eup %9521  ;;  %9541 = vrcp.f32 %v7772_v42  ;;  %v7775_v13 = vadd.f32 1.0, %v9520_v59  ;;  %v16032_v45 = vld [vmem:[#allocation79_spill] sm:$0xff] }
 0x3a6   :  { %v7456_v29 = vadd.f32 %v9165_v63, %v5530_v60  ;;  %v9073_v58 = vpop.f32.mrf.mxu1  ;;  %v7670_v57 = vmul.f32 1.442695, %v7589_v2  ;;  %v7588_v60 = vsub.f32 0.0, %v14731_v61  ;;  %v9524_v38 = vpop.eup %9523  ;;  %8022 = vst.msk [vmem:[%s15325_s5 + $0x10] sm:$0xff] %vm92_vm0, %v7958_v55  ;;  %v7774_v32 = vadd.f32 1.0, %v9522_v23 }
 0x3a7   :  { %v7208_v37 = vpop.f32.mrf.mxu0  ;;  %v5534_v62 = vadd.f32 %v9073_v58, %v14505_v16  ;;  %v9526_v2 = vpop.eup %9525 }
 0x3a8   :  { %v14742_v10 = vadd.f32 %v14439_v39, %v7456_v29  ;;  %v5302_v20 = vpop.f32.mrf.mxu1  ;;  %v7455_v16 = vadd.f32 %v7208_v37, %v5529_v56  ;;  %9543 = vpow2.f32 %v7670_v57  ;;  %v7668_v46 = vmul.f32 1.442695, %v7588_v60  ;;  %v9528_v42 = vpop.eup %9527 }
 0x3a9   :  { %v9168_v63 = vpop.f32.mrf.mxu0  ;;  %v5533_v21 = vadd.f32 %v5302_v20, %v16032_v45  ;;  %v7961_v29 = vmul.f32 %v9524_v38, %v14552_v48  ;;  %9545 = vrcp.f32 %v7775_v13  ;;  %v7777_v59 = vadd.f32 1.0, %v9526_v2  ;;  %v9530_v23 = vpop.eup %9529 }
 0x3aa   :  { %v7591_v52 = vsub.f32 0.0, %v14742_v10  ;;  %v14752_v56 = vadd.f32 %v14439_v39, %v7455_v16  ;;  %v7458_v14 = vadd.f32 %v9168_v63, %v5532_v18  ;;  %9547 = vrcp.f32 %v7774_v32  ;;  %v9532_v13 = vpop.eup %9531 }
 0x3ab   :  { %v7218_v58 = vpop.f32.mrf.mxu0  ;;  %8025 = vst.msk [vmem:[%s15325_s5 + $0x28] sm:$0xff] %vm92_vm0, %v7961_v29  ;;  %v7960_v48 = vmul.f32 %v9528_v42, %v14566_v7  ;;  %9549 = vpow2.f32 %v7668_v46  ;;  %v7776_v16 = vadd.f32 1.0, %v9530_v23  ;;  %v7963_v7 = vmul.f32 %v9532_v13, %v14584_v17 }
 0x3ac   :  { %v7674_v20 = vmul.f32 1.442695, %v7591_v52  ;;  %v7457_v55 = vadd.f32 %v7218_v58, %v5531_v51  ;;  %v7590_v60 = vsub.f32 0.0, %v14752_v56  ;;  %v14761_v18 = vadd.f32 %v14439_v39, %v7458_v14 }
 0x3ad   :  { %v9171_v57 = vpop.f32.mrf.mxu0  ;;  %9551 = vrcp.f32 %v7777_v59  ;;  %v9534_v38 = vpop.eup %9533  ;;  %8024 = vst.msk [vmem:[%s15325_s5 + $0x20] sm:$0xff] %vm92_vm0, %v7960_v48  ;;  %8027 = vst.msk [vmem:[%s15325_s5 + $0x38] sm:$0xff] %vm92_vm0, %v7963_v7 }
 0x3ae   :  { %v14764_v51 = vadd.f32 %v14439_v39, %v7457_v55  ;;  %v7460_v45 = vadd.f32 %v9171_v57, %v5534_v62  ;;  %9553 = vpow2.f32 %v7674_v20  ;;  %v7672_v46 = vmul.f32 1.442695, %v7590_v60  ;;  %v9536_v29 = vpop.eup %9535 }
 0x3af   :  { %v9076_v37 = vpop.f32.mrf.mxu1  ;;  %v7228_v32 = vpop.f32.mrf.mxu0  ;;  %v7593_v52 = vsub.f32 0.0, %v14761_v18  ;;  %9555 = vrcp.f32 %v7776_v16  ;;  %v7779_v58 = vadd.f32 1.0, %v9534_v38  ;;  %v7962_v17 = vmul.f32 %v9536_v29, %v14602_v12 }
 0x3b0   :  { %v7592_v14 = vsub.f32 0.0, %v14764_v51  ;;  %v14774_v62 = vadd.f32 %v14439_v39, %v7460_v45  ;;  %v9538_v42 = vpop.eup %9537  ;;  %9557 = vpow2.f32 %v7672_v46  ;;  %v7459_v55 = vadd.f32 %v7228_v32, %v5533_v21  ;;  %v16033_v32 = vld [vmem:[#allocation81_spill] sm:$0xff] }
 0x3b1   :  { %v5312_v63 = vpop.f32.mrf.mxu1  ;;  %v7678_v20 = vmul.f32 1.442695, %v7593_v52  ;;  %9559 = vrcp.f32 %v7779_v58  ;;  %v7778_v48 = vadd.f32 1.0, %v9538_v42  ;;  %8026 = vst.msk [vmem:[%s15325_s5 + $0x30] sm:$0xff] %vm92_vm0, %v7962_v17  ;;  %v5536_v12 = vadd.f32 %v9076_v37, %v14519_v43  ;;  %v9540_v38 = vpop.eup %9539 }
 0x3b2   :  { %v9174_v59 = vpop.f32.mrf.mxu0  ;;  %v7676_v57 = vmul.f32 1.442695, %v7592_v14  ;;  %v7595_v60 = vsub.f32 0.0, %v14774_v62  ;;  %v14787_v16 = vadd.f32 %v14439_v39, %v7459_v55  ;;  %v5535_v21 = vadd.f32 %v5312_v63, %v14523_v4 }
 0x3b3   :  { %v9079_v2 = vpop.f32.mrf.mxu1  ;;  %9561 = vpow2.f32 %v7678_v20  ;;  %v7965_v29 = vmul.f32 %v9540_v38, %v14625_v8  ;;  %v7462_v42 = vadd.f32 %v9174_v59, %v5536_v12  ;;  %v9542_v20 = vpop.eup %9541 }
 0x3b4   :  { %v7238_v13 = vpop.f32.mrf.mxu0  ;;  %9563 = vrcp.f32 %v7778_v48  ;;  %v7682_v7 = vmul.f32 1.442695, %v7595_v60  ;;  %v5538_v46 = vadd.f32 %v9079_v2, %v16033_v32  ;;  %v7594_v14 = vsub.f32 0.0, %v14787_v16 }
 0x3b5   :  { %v5322_v23 = vpop.f32.mrf.mxu1  ;;  %9565 = vpow2.f32 %v7676_v57  ;;  %v7461_v43 = vadd.f32 %v7238_v13, %v5535_v21  ;;  %v9544_v63 = vpop.eup %9543  ;;  %8029 = vst.msk [vmem:[%s15325_s5 + $0x48] sm:$0xff] %vm92_vm0, %v7965_v29  ;;  %v14802_v55 = vadd.f32 %v14439_v39, %v7462_v42 }
 0x3b6   :  { %v5537_v52 = vadd.f32 %v5322_v23, %v14536_v47  ;;  %9567 = vpow2.f32 %v7682_v7  ;;  %v7964_v47 = vmul.f32 %v9542_v20, %v14635_v40  ;;  %v7680_v2 = vmul.f32 1.442695, %v7594_v14  ;;  %v9546_v48 = vpop.eup %9545 }
 0x3b7   :  { %v9082_v45 = vpop.f32.mrf.mxu1  ;;  %v7781_v57 = vadd.f32 1.0, %v9544_v63  ;;  %v9548_v12 = vpop.eup %9547  ;;  %v7967_v40 = vmul.f32 %v9546_v48, %v14638_v11 }
 0x3b8   :  { %v9177_v58 = vpop.f32.mrf.mxu0  ;;  %v5540_v37 = vadd.f32 %v9082_v45, %v14540_v25  ;;  %v14806_v25 = vadd.f32 %v14439_v39, %v7461_v43  ;;  %8028 = vst.msk [vmem:[%s15325_s5 + $0x40] sm:$0xff] %vm92_vm0, %v7964_v47  ;;  %9569 = vpow2.f32 %v7680_v2  ;;  %v9550_v7 = vpop.eup %9549  ;;  %v7966_v32 = vmul.f32 %v9548_v12, %v14644_v54 }
 0x3b9   :  { %v5332_v17 = vpop.f32.mrf.mxu1  ;;  %v7464_v4 = vadd.f32 %v9177_v58, %v5538_v46  ;;  %9571 = vrcp.f32 %v7781_v57  ;;  %8031 = vst.msk [vmem:[%s15325_s5 + $0x58] sm:$0xff] %vm92_vm0, %v7967_v40  ;;  %v7780_v58 = vadd.f32 1.0, %v9550_v7 }
 0x3ba   :  { %v7248_v8 = vpop.f32.mrf.mxu0  ;;  %v5539_v59 = vadd.f32 %v5332_v17, %v14544_v35  ;;  %v7597_v35 = vsub.f32 0.0, %v14802_v55  ;;  %v7596_v46 = vsub.f32 0.0, %v14806_v25  ;;  %v9552_v29 = vpop.eup %9551  ;;  %8030 = vst.msk [vmem:[%s15325_s5 + $0x50] sm:$0xff] %vm92_vm0, %v7966_v32 }
 0x3bb   :  { %v14809_v60 = vadd.f32 %v14439_v39, %v7464_v4  ;;  %v7463_v13 = vadd.f32 %v7248_v8, %v5537_v52  ;;  %v9554_v54 = vpop.eup %9553  ;;  %v7969_v20 = vmul.f32 %v9552_v29, %v14653_v50  ;;  %9573 = vrcp.f32 %v7780_v58  ;;  %v16035_v58 = vld [vmem:[#allocation23_spill] sm:$0xff] }
 0x3bc   :  { %v7686_v14 = vmul.f32 1.442695, %v7597_v35  ;;  %v7684_v43 = vmul.f32 1.442695, %v7596_v46  ;;  %v9556_v47 = vpop.eup %9555  ;;  %v7783_v2 = vadd.f32 1.0, %v9554_v54 }
 0x3bd   :  { %v9180_v21 = vpop.f32.mrf.mxu0  ;;  %v7599_v52 = vsub.f32 0.0, %v14809_v60  ;;  %v9558_v57 = vpop.eup %9557  ;;  %8033 = vst.msk [vmem:[%s15325_s5 + $0x68] sm:$0xff] %vm92_vm0, %v7969_v20  ;;  %v7968_v50 = vmul.f32 %v9556_v47, %v14663_v1 }
 0x3be   :  { %v9085_v23 = vpop.f32.mrf.mxu1  ;;  %v7466_v42 = vadd.f32 %v9180_v21, %v5540_v37  ;;  %9575 = vpow2.f32 %v7686_v14  ;;  %v9560_v12 = vpop.eup %9559  ;;  %v7782_v21 = vadd.f32 1.0, %v9558_v57 }
 0x3bf   :  { %v5542_v45 = vadd.f32 %v9085_v23, %v14549_v53  ;;  %v7258_v11 = vpop.f32.mrf.mxu0  ;;  %v14826_v53 = vadd.f32 %v14439_v39, %v7463_v13  ;;  %v7690_v4 = vmul.f32 1.442695, %v7599_v52  ;;  %9577 = vrcp.f32 %v7783_v2  ;;  %8032 = vst.msk [vmem:[%s15325_s5 + $0x60] sm:$0xff] %vm92_vm0, %v7968_v50 }
 0x3c0   :  { %v5342_v38 = vpop.f32.mrf.mxu1  ;;  %v7465_v63 = vadd.f32 %v7258_v11, %v5539_v59  ;;  %v14835_v37 = vadd.f32 %v14439_v39, %v7466_v42  ;;  %v9562_v46 = vpop.eup %9561  ;;  %v7971_v1 = vmul.f32 %v9560_v12, %v14671_v41  ;;  %9579 = vpow2.f32 %v7684_v43  ;;  %v16034_v11 = vld [vmem:[#allocation8_spill] sm:$0xff] }
 0x3c1   :  { %v9183_v8 = vpop.f32.mrf.mxu0  ;;  %v7598_v23 = vsub.f32 0.0, %v14826_v53  ;;  %v9564_v29 = vpop.eup %9563  ;;  %v14857_v14 = vadd.f32 %v16035_v58, %v16034_v11  ;;  %9581 = vrcp.f32 %v7782_v21  ;;  %v7785_v54 = vadd.f32 1.0, %v9562_v46 }
 0x3c2   :  { %v9088_v17 = vpop.f32.mrf.mxu1  ;;  %v14843_v59 = vadd.f32 %v14439_v39, %v7465_v63  ;;  %v7468_v13 = vadd.f32 %v9183_v8, %v5542_v45  ;;  %v7601_v7 = vsub.f32 0.0, %v14835_v37  ;;  %v5541_v20 = vadd.f32 %v5342_v38, %v14558_v22  ;;  %v9566_v47 = vpop.eup %9565  ;;  %8035 = vst.msk [vmem:[%s15325_s5 + $0x78] sm:$0xff] %vm92_vm0, %v7971_v1 }
 0x3c3   :  { %v7268_v40 = vpop.f32.mrf.mxu0  ;;  %v7688_v35 = vmul.f32 1.442695, %v7598_v23  ;;  %v7970_v41 = vmul.f32 %v9564_v29, %v14678_v6  ;;  %9583 = vpow2.f32 %v7690_v4  ;;  %v9568_v2 = vpop.eup %9567  ;;  %v7784_v57 = vadd.f32 1.0, %v9566_v47 }
 0x3c4   :  { %v5352_v48 = vpop.f32.mrf.mxu1  ;;  %v7600_v52 = vsub.f32 0.0, %v14843_v59  ;;  %v14853_v45 = vadd.f32 %v14439_v39, %v7468_v13  ;;  %v7694_v43 = vmul.f32 1.442695, %v7601_v7  ;;  %9585 = vrcp.f32 %v7785_v54 }
 0x3c5   :  { %v7467_v50 = vadd.f32 %v7268_v40, %v5541_v20  ;;  %v5544_v22 = vadd.f32 %v9088_v17, %v14562_v27  ;;  %8034 = vst.msk [vmem:[%s15325_s5 + $0x70] sm:$0xff] %vm92_vm0, %v7970_v41  ;;  %v7787_v13 = vadd.f32 1.0, %v9568_v2  ;;  %9587 = vpow2.f32 %v7688_v35  ;;  %v9570_v17 = vpop.eup %9569 }
 0x3c6   :  { %v9186_v42 = vpop.f32.mrf.mxu0  ;;  %v7603_v8 = vsub.f32 0.0, %v14853_v45  ;;  %v7692_v6 = vmul.f32 1.442695, %v7600_v52  ;;  %v5543_v4 = vadd.f32 %v5352_v48, %v14572_v31  ;;  %9589 = vrcp.f32 %v7784_v57  ;;  %v9572_v11 = vpop.eup %9571 }
 0x3c7   :  { %v14873_v21 = vadd.f32 %v14439_v39, %v7467_v50  ;;  %v7470_v7 = vadd.f32 %v9186_v42, %v5544_v22  ;;  %9591 = vrcp.f32 %v7787_v13  ;;  %v7786_v35 = vadd.f32 1.0, %v9570_v17  ;;  %v16036_v13 = vld [vmem:[#allocation6_spill] sm:$0xff] }
 0x3c8   :  { %v7278_v23 = vpop.f32.mrf.mxu0  ;;  %v7698_v46 = vmul.f32 1.442695, %v7603_v8  ;;  %9593 = vpow2.f32 %v7694_v43  ;;  %v7973_v58 = vmul.f32 %v9572_v11, %v14716_v34  ;;  %v9574_v47 = vpop.eup %9573  ;;  %v16039_v11 = vld [vmem:[#allocation99_spill] sm:$0xff] }
 0x3c9   :  { %v9091_v32 = vpop.f32.mrf.mxu1  ;;  %v7469_v1 = vadd.f32 %v7278_v23, %v5543_v4  ;;  %v7602_v31 = vsub.f32 0.0, %v14873_v21  ;;  %v14879_v48 = vadd.f32 %v14439_v39, %v7470_v7  ;;  %9595 = vpow2.f32 %v7692_v6  ;;  %v16037_v6 = vld [vmem:[#allocation72_spill] sm:$0xff] }
 0x3ca   :  { %v5546_v40 = vadd.f32 %v9091_v32, %v14576_v5  ;;  %9597 = vrcp.f32 %v7786_v35  ;;  %8037 = vst.msk [vmem:[%s15325_s5 + $0x88] sm:$0xff] %vm92_vm0, %v7973_v58  ;;  %v7972_v2 = vmul.f32 %v9574_v47, %v14731_v61  ;;  %v14901_v4 = vadd.f32 %v16037_v6, %v16036_v13 }
 0x3cb   :  { %v5362_v63 = vpop.f32.mrf.mxu1  ;;  %v9189_v12 = vpop.f32.mrf.mxu0  ;;  %v14883_v5 = vadd.f32 %v14439_v39, %v7469_v1  ;;  %v7696_v54 = vmul.f32 1.442695, %v7602_v31  ;;  %9599 = vpow2.f32 %v7698_v46 }
 0x3cc   :  { %v5545_v29 = vadd.f32 %v5362_v63, %v14580_v3  ;;  %v7472_v32 = vadd.f32 %v9189_v12, %v5546_v40  ;;  %v7605_v3 = vsub.f32 0.0, %v14879_v48  ;;  %v9576_v8 = vpop.eup %9575  ;;  %8036 = vst.msk [vmem:[%s15325_s5 + $0x80] sm:$0xff] %vm92_vm0, %v7972_v2 }
 0x3cd   :  { %v7288_v42 = vpop.f32.mrf.mxu0  ;;  %v7604_v34 = vsub.f32 0.0, %v14883_v5  ;;  %9601 = vpow2.f32 %v7696_v54  ;;  %v9578_v22 = vpop.eup %9577  ;;  %v7789_v12 = vadd.f32 1.0, %v9576_v8 }
 0x3ce   :  { %v7471_v20 = vadd.f32 %v7288_v42, %v5545_v29  ;;  %v14892_v41 = vadd.f32 %v14439_v39, %v7472_v32  ;;  %v7702_v23 = vmul.f32 1.442695, %v7605_v3  ;;  %v9580_v17 = vpop.eup %9579  ;;  %v16038_v29 = vld [vmem:[#allocation19_spill] sm:$0xff] }
 0x3cf   :  { %v7700_v7 = vmul.f32 1.442695, %v7604_v34  ;;  %v9582_v1 = vpop.eup %9581  ;;  %v14913_v35 = vadd.f32 %v16039_v11, %v16038_v29  ;;  %v7788_v58 = vadd.f32 1.0, %v9580_v17  ;;  %v14955_v29 = vld [vmem:[%s15324_s4] ss:$0 sm:$0xff] }
 0x3d0   :  { %v9094_v38 = vpop.f32.mrf.mxu1  ;;  %v14897_v57 = vadd.f32 %v14439_v39, %v7471_v20  ;;  %v7607_v40 = vsub.f32 0.0, %v14892_v41  ;;  %9603 = vpow2.f32 %v7702_v23  ;;  %v9584_v32 = vpop.eup %9583 }
 0x3d1   :  { %v5548_v43 = vadd.f32 %v9094_v38, %v14589_v26  ;;  %v7975_v26 = vmul.f32 %v9578_v22, %v14742_v10  ;;  %9605 = vrcp.f32 %v7789_v12  ;;  %v7974_v10 = vmul.f32 %v9582_v1, %v14752_v56  ;;  %v9586_v3 = vpop.eup %9585 }
 0x3d2   :  { %v5372_v27 = vpop.f32.mrf.mxu1  ;;  %v7606_v61 = vsub.f32 0.0, %v14897_v57  ;;  %v7706_v42 = vmul.f32 1.442695, %v7607_v40  ;;  %9607 = vpow2.f32 %v7700_v7  ;;  %v7791_v47 = vadd.f32 1.0, %v9584_v32  ;;  %v9588_v2 = vpop.eup %9587 }
 0x3d3   :  { %v5547_v38 = vadd.f32 %v5372_v27, %v14593_v24  ;;  %8039 = vst.msk [vmem:[%s15325_s5 + $0x98] sm:$0xff] %vm92_vm0, %v7975_v26  ;;  %9609 = vrcp.f32 %v7788_v58  ;;  %8038 = vst.msk [vmem:[%s15325_s5 + $0x90] sm:$0xff] %vm92_vm0, %v7974_v10  ;;  %v7977_v56 = vmul.f32 %v9586_v3, %v14761_v18  ;;  %v9590_v13 = vpop.eup %9589 }
 0x3d4   :  { %v7704_v24 = vmul.f32 1.442695, %v7606_v61  ;;  %9611 = vpow2.f32 %v7706_v42  ;;  %v7976_v18 = vmul.f32 %v9590_v13, %v14764_v51  ;;  %v16041_v42 = vld [vmem:[#allocation68_spill] sm:$0xff] }
 0x3d5   :  { %v9097_v52 = vpop.f32.mrf.mxu1  ;;  %9613 = vrcp.f32 %v7791_v47  ;;  %8041 = vst.msk [vmem:[%s15325_s5 + $0xa8] sm:$0xff] %vm92_vm0, %v7977_v56 }
 0x3d6   :  { %v5550_v34 = vadd.f32 %v9097_v52, %v14597_v19  ;;  %v7790_v19 = vadd.f32 1.0, %v9588_v2  ;;  %9615 = vpow2.f32 %v7704_v24  ;;  %8040 = vst.msk [vmem:[%s15325_s5 + $0xa0] sm:$0xff] %vm92_vm0, %v7976_v18 }
 0x3d7   :  { %v5382_v63 = vpop.f32.mrf.mxu1 }
 0x3d8   :  { %v5549_v8 = vadd.f32 %v5382_v63, %v14606_v44  ;;  %v9592_v63 = vpop.eup %9591  ;;  %9617 = vrcp.f32 %v7790_v19 }
 0x3d9   :  { %v9100_v50 = vpop.f32.mrf.mxu1  ;;  %v9594_v40 = vpop.eup %9593  ;;  %v7979_v17 = vmul.f32 %v9592_v63, %v14774_v62 }
 0x3da   :  { %v5552_v44 = vadd.f32 %v9100_v50, %v14610_v30  ;;  %v9596_v61 = vpop.eup %9595  ;;  %v7793_v51 = vadd.f32 1.0, %v9594_v40 }
 0x3db   :  { %v5392_v46 = vpop.f32.mrf.mxu1  ;;  %v9598_v1 = vpop.eup %9597  ;;  %8043 = vst.msk [vmem:[%s15325_s5 + $0xb8] sm:$0xff] %vm92_vm0, %v7979_v17 }
 0x3dc   :  { %v9192_v31 = vpop.f32.mrf.mxu0  ;;  %v5551_v52 = vadd.f32 %v5392_v46, %v14618_v0  ;;  %v9600_v24 = vpop.eup %9599  ;;  %9619 = vrcp.f32 %v7793_v51 }
 0x3dd   :  { %v7474_v27 = vadd.f32 %v9192_v31, %v5548_v43  ;;  %v9103_v54 = vpop.f32.mrf.mxu1  ;;  %v16040_v31 = vld [vmem:[#allocation55_spill] sm:$0xff] }
 0x3de   :  { %v7298_v20 = vpop.f32.mrf.mxu0  ;;  %v5554_v50 = vadd.f32 %v9103_v54, %v14622_v36  ;;  %v7792_v36 = vadd.f32 1.0, %v9596_v61 }
 0x3df   :  { %v14928_v43 = vadd.f32 %v14439_v39, %v7474_v27  ;;  %v7473_v23 = vadd.f32 %v7298_v20, %v5547_v38  ;;  %v5402_v22 = vpop.f32.mrf.mxu1  ;;  %v7978_v27 = vmul.f32 %v9598_v1, %v14787_v16  ;;  %v9602_v20 = vpop.eup %9601 }
 0x3e0   :  { %v9195_v6 = vpop.f32.mrf.mxu0  ;;  %v5553_v58 = vadd.f32 %v5402_v22, %v16040_v31  ;;  %9621 = vrcp.f32 %v7792_v36  ;;  %v7794_v16 = vadd.f32 1.0, %v9602_v20  ;;  %v9604_v13 = vpop.eup %9603 }
 0x3e1   :  { %v7609_v12 = vsub.f32 0.0, %v14928_v43  ;;  %v14939_v7 = vadd.f32 %v14439_v39, %v7473_v23  ;;  %v7476_v0 = vadd.f32 %v9195_v6, %v5550_v34  ;;  %v7795_v34 = vadd.f32 1.0, %v9600_v24  ;;  %8042 = vst.msk [vmem:[%s15325_s5 + $0xb0] sm:$0xff] %vm92_vm0, %v7978_v27  ;;  %v9606_v40 = vpop.eup %9605 }
 0x3e2   :  { %v7308_v30 = vpop.f32.mrf.mxu0  ;;  %v9106_v26 = vpop.f32.mrf.mxu1  ;;  %v7797_v17 = vadd.f32 1.0, %v9604_v13 }
 0x3e3   :  { %v7710_v38 = vmul.f32 1.442695, %v7609_v12  ;;  %v7608_v39 = vsub.f32 0.0, %v14939_v7  ;;  %v7475_v46 = vadd.f32 %v7308_v30, %v5549_v8  ;;  %v14958_v11 = vadd.f32 %v14955_v29, %v7476_v0 }
 0x3e4   :  { %v9198_v62 = vpop.f32.mrf.mxu0  ;;  %v5556_v32 = vadd.f32 %v9106_v26, %v16041_v42  ;;  %v5412_v10 = vpop.f32.mrf.mxu1 }
 0x3e5   :  { %v7708_v54 = vmul.f32 1.442695, %v7608_v39  ;;  %v14964_v3 = vadd.f32 %v14955_v29, %v7475_v46  ;;  %v7611_v8 = vsub.f32 0.0, %v14958_v11  ;;  %v7478_v2 = vadd.f32 %v9198_v62, %v5552_v44  ;;  %v16042_v44 = vld [vmem:[#allocation65_spill] sm:$0xff]  ;;  %v9608_v26 = vpop.eup %9607 }
 0x3e6   :  { %v7318_v47 = vpop.f32.mrf.mxu0  ;;  %9623 = vpow2.f32 %v7710_v38  ;;  %v5555_v18 = vadd.f32 %v5412_v10, %v16042_v44  ;;  %v9610_v46 = vpop.eup %9609  ;;  %v7796_v1 = vadd.f32 1.0, %v9608_v26 }
 0x3e7   :  { %v14967_v56 = vpop.f32.mrf.mxu1  ;;  %v7610_v23 = vsub.f32 0.0, %v14964_v3  ;;  %v7477_v22 = vadd.f32 %v7318_v47, %v5551_v52  ;;  %9625 = vrcp.f32 %v7795_v34  ;;  %v7714_v19 = vmul.f32 1.442695, %v7611_v8  ;;  %v9612_v31 = vpop.eup %9611 }
 0x3e8   :  { %v9201_v6 = vpop.f32.mrf.mxu0  ;;  %v14975_v63 = vadd.f32 %v14955_v29, %v7478_v2  ;;  %9627 = vrcp.f32 %v7794_v16  ;;  %v7981_v52 = vmul.f32 %v9606_v40, %v14802_v55  ;;  %v7980_v55 = vmul.f32 %v9610_v46, %v14806_v25  ;;  %v9614_v27 = vpop.eup %9613  ;;  %v16045_v46 = vld [vmem:[#allocation17_spill] sm:$0xff] }
 0x3e9   :  { %v5422_v12 = vpop.f32.mrf.mxu1  ;;  %v7712_v30 = vmul.f32 1.442695, %v7610_v23  ;;  %v14979_v0 = vadd.f32 %v14955_v29, %v7477_v22  ;;  %9629 = vpow2.f32 %v7708_v54  ;;  %v7480_v38 = vadd.f32 %v9201_v6, %v5554_v50  ;;  %v9616_v47 = vpop.eup %9615 }
 0x3ea   :  { %v7328_v61 = vpop.f32.mrf.mxu0  ;;  %v7613_v51 = vsub.f32 0.0, %v14975_v63  ;;  %9631 = vrcp.f32 %v7797_v17  ;;  %8045 = vst.msk [vmem:[%s15325_s5 + $0xc8] sm:$0xff] %vm92_vm0, %v7981_v52  ;;  %v7799_v54 = vadd.f32 1.0, %v9612_v31  ;;  %8044 = vst.msk [vmem:[%s15325_s5 + $0xc0] sm:$0xff] %vm92_vm0, %v7980_v55  ;;  %v7983_v25 = vmul.f32 %v9614_v27, %v14809_v60  ;;  %v9618_v23 = vpop.eup %9617 }
 0x3eb   :  { %v9112_v39 = vpop.f32.mrf.mxu1  ;;  %v7612_v62 = vsub.f32 0.0, %v14979_v0  ;;  %v7479_v36 = vadd.f32 %v7328_v61, %v5553_v58  ;;  %9633 = vpow2.f32 %v7714_v19  ;;  %v14990_v50 = vadd.f32 %v14955_v29, %v7480_v38  ;;  %v9620_v52 = vpop.eup %9619 }
 0x3ec   :  { %v9204_v42 = vpop.f32.mrf.mxu0  ;;  %v7718_v10 = vmul.f32 1.442695, %v7613_v51  ;;  %9635 = vrcp.f32 %v7796_v1  ;;  %v7798_v22 = vadd.f32 1.0, %v9616_v47  ;;  %8047 = vst.msk [vmem:[%s15325_s5 + $0xd8] sm:$0xff] %vm92_vm0, %v7983_v25  ;;  %v7982_v60 = vmul.f32 %v9618_v23, %v14826_v53  ;;  %v16044_v51 = vld [vmem:[#allocation49_spill] sm:$0xff] }
 0x3ed   :  { %v5432_v24 = vpop.f32.mrf.mxu1  ;;  %v7716_v20 = vmul.f32 1.442695, %v7612_v62  ;;  %v14993_v58 = vadd.f32 %v14955_v29, %v7479_v36  ;;  %9637 = vpow2.f32 %v7712_v30  ;;  %v7615_v8 = vsub.f32 0.0, %v14990_v50  ;;  %v9622_v36 = vpop.eup %9621 }
 0x3ee   :  { %v7338_v34 = vpop.f32.mrf.mxu0  ;;  %v7482_v2 = vadd.f32 %v9204_v42, %v5556_v32  ;;  %9639 = vrcp.f32 %v7799_v54  ;;  %8046 = vst.msk [vmem:[%s15325_s5 + $0xd0] sm:$0xff] %vm92_vm0, %v7982_v60  ;;  %v5557_v38 = vadd.f32 %v5422_v12, %v16044_v51  ;;  %v5560_v1 = vadd.f32 %v9112_v39, %v16045_v46  ;;  %v16047_v46 = vld [vmem:[#allocation100_spill] sm:$0xff] }
 0x3ef   :  { %v15001_v16 = vpop.f32.mrf.mxu1  ;;  %v7614_v13 = vsub.f32 0.0, %v14993_v58  ;;  %v7481_v6 = vadd.f32 %v7338_v34, %v5555_v18  ;;  %9641 = vpow2.f32 %v7718_v10  ;;  %v7722_v44 = vmul.f32 1.442695, %v7615_v8  ;;  %v16043_v18 = vld [vmem:[#allocation76_spill] sm:$0xff] }
 0x3f0   :  { %v9207_v19 = vpop.f32.mrf.mxu0  ;;  %v15010_v32 = vadd.f32 %v14955_v29, %v7482_v2  ;;  %9643 = vrcp.f32 %v7798_v22  ;;  %v5558_v26 = vadd.f32 %v14967_v56, %v16043_v18  ;;  %v7985_v31 = vmul.f32 %v9620_v52, %v14835_v37  ;;  %v16046_v22 = vld [vmem:[#allocation77_spill] sm:$0xff] }
 0x3f1   :  { %v15012_v40 = vpop.f32.mrf.mxu1  ;;  %v7720_v17 = vmul.f32 1.442695, %v7614_v13  ;;  %v15015_v30 = vadd.f32 %v14955_v29, %v7481_v6  ;;  %9645 = vpow2.f32 %v7716_v20  ;;  %v7984_v10 = vmul.f32 %v9622_v36, %v14843_v59 }
 0x3f2   :  { %v7348_v53 = vpop.f32.mrf.mxu0  ;;  %v7617_v61 = vsub.f32 0.0, %v15010_v32  ;;  %9647 = vpow2.f32 %v7722_v44  ;;  %v7484_v55 = vadd.f32 %v9207_v19, %v5558_v26  ;;  %8049 = vst.msk [vmem:[%s15325_s5 + $0xe8] sm:$0xff] %vm92_vm0, %v7985_v31  ;;  %v5559_v13 = vadd.f32 %v5432_v24, %v16046_v22  ;;  %v16049_v22 = vld [vmem:[#allocation10_spill] sm:$0xff] }
 0x3f3   :  { %v15026_v62 = vpop.f32.mrf.mxu1  ;;  %v7616_v56 = vsub.f32 0.0, %v15015_v30  ;;  %v9624_v42 = vpop.eup %9623  ;;  %9649 = vpow2.f32 %v7720_v17  ;;  %v7483_v20 = vadd.f32 %v7348_v53, %v5557_v38  ;;  %8048 = vst.msk [vmem:[%s15325_s5 + $0xe0] sm:$0xff] %vm92_vm0, %v7984_v10 }
 0x3f4   :  { %v9210_v27 = vpop.f32.mrf.mxu0  ;;  %v7726_v54 = vmul.f32 1.442695, %v7617_v61  ;;  %v9626_v12 = vpop.eup %9625  ;;  %v7801_v37 = vadd.f32 1.0, %v9624_v42  ;;  %v15038_v25 = vadd.f32 %v14955_v29, %v7484_v55 }
 0x3f5   :  { %v15031_v47 = vpop.f32.mrf.mxu1  ;;  %v7724_v39 = vmul.f32 1.442695, %v7616_v56  ;;  %v7486_v34 = vadd.f32 %v9210_v27, %v5560_v1  ;;  %v9628_v8 = vpop.eup %9627  ;;  %v7987_v59 = vmul.f32 %v9626_v12, %v14853_v45  ;;  %v15046_v23 = vadd.f32 %v14955_v29, %v7483_v20 }
 0x3f6   :  { %v7358_v2 = vpop.f32.mrf.mxu0  ;;  %9651 = vpow2.f32 %v7726_v54  ;;  %v9630_v60 = vpop.eup %9629  ;;  %v7986_v19 = vmul.f32 %v9628_v8, %v14873_v21  ;;  %v7619_v44 = vsub.f32 0.0, %v15038_v25  ;;  %v5562_v1 = vadd.f32 %v15001_v16, %v16047_v46 }
 0x3f7   :  { %v9121_v6 = vpop.f32.mrf.mxu1  ;;  %9653 = vrcp.f32 %v7801_v37  ;;  %v15052_v17 = vadd.f32 %v14955_v29, %v7486_v34  ;;  %v9632_v18 = vpop.eup %9631  ;;  %8051 = vst.msk [vmem:[%s15325_s5 + $0xf8] sm:$0xff] %vm92_vm0, %v7987_v59  ;;  %v7800_v45 = vadd.f32 1.0, %v9630_v60  ;;  %v7618_v24 = vsub.f32 0.0, %v15046_v23  ;;  %v16048_v37 = vld [vmem:[#allocation84_spill] sm:$0xff] }
 0x3f8   :  { %9655 = vpow2.f32 %v7724_v39  ;;  %v7485_v26 = vadd.f32 %v7358_v2, %v5559_v13  ;;  %v9634_v53 = vpop.eup %9633  ;;  %8050 = vst.msk [vmem:[%s15325_s5 + $0xf0] sm:$0xff] %vm92_vm0, %v7986_v19  ;;  %v7989_v21 = vmul.f32 %v9632_v18, %v14879_v48  ;;  %v9213_v61 = vpop.f32.mrf.mxu0  ;;  %v7730_v51 = vmul.f32 1.442695, %v7619_v44 }
 0x3f9   :  { %v5462_v52 = vpop.f32.mrf.mxu1  ;;  %v7621_v38 = vsub.f32 0.0, %v15052_v17  ;;  %v9636_v36 = vpop.eup %9635  ;;  %9657 = vrcp.f32 %v7800_v45  ;;  %v7803_v31 = vadd.f32 1.0, %v9634_v53  ;;  %v7728_v56 = vmul.f32 1.442695, %v7618_v24 }
 0x3fa   :  { %v15068_v55 = vadd.f32 %v14955_v29, %v7485_v26  ;;  %v9638_v10 = vpop.eup %9637  ;;  %8053 = vst.msk [vmem:[%s15325_s5 + $0x108] sm:$0xff] %vm92_vm0, %v7989_v21  ;;  %v7988_v48 = vmul.f32 %v9636_v36, %v14883_v5  ;;  %9659 = vpow2.f32 %v7730_v51  ;;  %v7488_v54 = vadd.f32 %v9213_v61, %v5562_v1  ;;  %v7368_v59 = vpop.f32.mrf.mxu0  ;;  %v16050_v26 = vld [vmem:[#allocation9_spill] sm:$0xff]  ;;  %v16051_v51 = vld [vmem:[#allocation48_spill] sm:$0xff] }
 0x3fb   :  { %v9124_v42 = vpop.f32.mrf.mxu1  ;;  %v7734_v27 = vmul.f32 1.442695, %v7621_v38  ;;  %v9640_v16 = vpop.eup %9639  ;;  %9661 = vrcp.f32 %v7803_v31  ;;  %v7802_v20 = vadd.f32 1.0, %v9638_v10  ;;  %v5561_v39 = vadd.f32 %v15012_v40, %v16048_v37 }
 0x3fc   :  { %v7620_v12 = vsub.f32 0.0, %v15068_v55  ;;  %v9642_v8 = vpop.eup %9641  ;;  %8052 = vst.msk [vmem:[%s15325_s5 + $0x100] sm:$0xff] %vm92_vm0, %v7988_v48  ;;  %v7991_v5 = vmul.f32 %v9640_v16, %v14892_v41  ;;  %9663 = vpow2.f32 %v7728_v56  ;;  %v15084_v2 = vadd.f32 %v14955_v29, %v7488_v54 }
 0x3fd   :  { %v5472_v34 = vpop.f32.mrf.mxu1  ;;  %v5564_v13 = vadd.f32 %v15026_v62, %v16049_v22  ;;  %v9644_v60 = vpop.eup %9643  ;;  %9665 = vrcp.f32 %v7802_v20  ;;  %v7805_v40 = vadd.f32 1.0, %v9642_v8  ;;  %v7487_v44 = vadd.f32 %v7368_v59, %v5561_v39 }
 0x3fe   :  { %v7732_v19 = vmul.f32 1.442695, %v7620_v12  ;;  %v9646_v45 = vpop.eup %9645  ;;  %8055 = vst.msk [vmem:[%s15325_s5 + $0x118] sm:$0xff] %vm92_vm0, %v7991_v5  ;;  %v7990_v41 = vmul.f32 %v9644_v60, %v14897_v57  ;;  %9667 = vpow2.f32 %v7734_v27  ;;  %v7623_v24 = vsub.f32 0.0, %v15084_v2 }
 0x3ff   :  { %v9127_v18 = vpop.f32.mrf.mxu1  ;;  %v5563_v62 = vadd.f32 %v15031_v47, %v16050_v26  ;;  %v9648_v53 = vpop.eup %9647  ;;  %9669 = vrcp.f32 %v7805_v40  ;;  %v7804_v21 = vadd.f32 1.0, %v9646_v45  ;;  %v15097_v61 = vadd.f32 %v14955_v29, %v7487_v44 }
 0x400   :  { %v5566_v38 = vadd.f32 %v9121_v6, %v16051_v51  ;;  %v9650_v1 = vpop.eup %9649  ;;  %8054 = vst.msk [vmem:[%s15325_s5 + $0x110] sm:$0xff] %vm92_vm0, %v7990_v41  ;;  %v7807_v36 = vadd.f32 1.0, %v9648_v53  ;;  %9671 = vpow2.f32 %v7732_v19  ;;  %v7738_v31 = vmul.f32 1.442695, %v7623_v24 }
 0x401   :  { %v5482_v46 = vpop.f32.mrf.mxu1  ;;  %v5565_v47 = vadd.f32 %v5462_v52, %v14694_v9  ;;  %9673 = vrcp.f32 %v7804_v21  ;;  %v7806_v56 = vadd.f32 1.0, %v9650_v1  ;;  %v7622_v10 = vsub.f32 0.0, %v15097_v61 }
 0x402   :  { %9675 = vrcp.f32 %v7807_v36  ;;  %v5568_v16 = vadd.f32 %v9124_v42, %v14700_v49  ;;  %v5567_v20 = vadd.f32 %v5472_v34, %v14704_v15  ;;  %v15109_v12 = vadd.f32 %v9127_v18, %v14708_v33 }
 0x403   :  { %v9130_v27 = vpop.f32.mrf.mxu1  ;;  %v9652_v6 = vpop.eup %9651  ;;  %9677 = vrcp.f32 %v7806_v56  ;;  %v7736_v9 = vmul.f32 1.442695, %v7622_v10  ;;  %v15116_v49 = vadd.f32 %v5482_v46, %v14720_v28 }
 0x404   :  { %v9216_v57 = vpop.f32.mrf.mxu0  ;;  %v9654_v37 = vpop.eup %9653  ;;  %v7809_v39 = vadd.f32 1.0, %v9652_v6  ;;  %9679 = vpow2.f32 %v7738_v31  ;;  %v15127_v28 = vadd.f32 %v9130_v27, %v14857_v14 }
 0x405   :  { %v7490_v48 = vadd.f32 %v9216_v57, %v5564_v13  ;;  %v5492_v8 = vpop.f32.mrf.mxu1  ;;  %v9656_v5 = vpop.eup %9655  ;;  %v7993_v59 = vmul.f32 %v9654_v37, %v14928_v43  ;;  %v16052_v37 = vld [vmem:[#allocation25_spill] sm:$0xff] }
 0x406   :  { %v7378_v54 = vpop.f32.mrf.mxu0  ;;  %9681 = vrcp.f32 %v7809_v39  ;;  %v7808_v15 = vadd.f32 1.0, %v9656_v5  ;;  %v9658_v60 = vpop.eup %9657  ;;  %v15130_v19 = vadd.f32 %v5492_v8, %v14901_v4 }
 0x407   :  { %v15112_v52 = vadd.f32 %v14955_v29, %v7490_v48  ;;  %v7489_v13 = vadd.f32 %v7378_v54, %v5563_v62  ;;  %v9133_v34 = vpop.f32.mrf.mxu1  ;;  %8057 = vst.msk [vmem:[%s15325_s5 + $0x128] sm:$0xff] %vm92_vm0, %v7993_v59  ;;  %9683 = vpow2.f32 %v7736_v9  ;;  %v9660_v44 = vpop.eup %9659  ;;  %v7992_v18 = vmul.f32 %v9658_v60, %v14939_v7 }
 0x408   :  { %v9219_v22 = vpop.f32.mrf.mxu0  ;;  %9685 = vrcp.f32 %v7808_v15  ;;  %v9662_v24 = vpop.eup %9661  ;;  %v7811_v62 = vadd.f32 1.0, %v9660_v44  ;;  %v15138_v14 = vadd.f32 %v9133_v34, %v14913_v35 }
 0x409   :  { %v7625_v33 = vsub.f32 0.0, %v15112_v52  ;;  %v7492_v42 = vadd.f32 %v9219_v22, %v5566_v38  ;;  %v15124_v43 = vadd.f32 %v14955_v29, %v7489_v13  ;;  %v9664_v51 = vpop.eup %9663  ;;  %8056 = vst.msk [vmem:[%s15325_s5 + $0x120] sm:$0xff] %vm92_vm0, %v7992_v18  ;;  %v7995_v4 = vmul.f32 %v9662_v24, %v14958_v11  ;;  %v5502_v46 = vpop.f32.mrf.mxu1 }
 0x40a   :  { %v7388_v40 = vpop.f32.mrf.mxu0  ;;  %v9666_v1 = vpop.eup %9665  ;;  %v7810_v36 = vadd.f32 1.0, %v9664_v51  ;;  %v15159_v39 = vadd.f32 %v5502_v46, %v16052_v37 }
 0x40b   :  { %v7742_v45 = vmul.f32 1.442695, %v7625_v33  ;;  %v15134_v41 = vadd.f32 %v14955_v29, %v7492_v42  ;;  %v7624_v53 = vsub.f32 0.0, %v15124_v43  ;;  %v7491_v21 = vadd.f32 %v7388_v40, %v5565_v47  ;;  %v9668_v47 = vpop.eup %9667  ;;  %8059 = vst.msk [vmem:[%s15325_s5 + $0x138] sm:$0xff] %vm92_vm0, %v7995_v4 }
 0x40c   :  { %v9222_v26 = vpop.f32.mrf.mxu0  ;;  %v7994_v11 = vmul.f32 %v9666_v1, %v14964_v3  ;;  %v9670_v27 = vpop.eup %9669  ;;  %v7813_v54 = vadd.f32 1.0, %v9668_v47 }
 0x40d   :  { %9687 = vpow2.f32 %v7742_v45  ;;  %v7627_v7 = vsub.f32 0.0, %v15134_v41  ;;  %v7494_v38 = vadd.f32 %v9222_v26, %v5568_v16  ;;  %v7740_v31 = vmul.f32 1.442695, %v7624_v53  ;;  %v9672_v9 = vpop.eup %9671 }
 0x40e   :  { %v7398_v57 = vpop.f32.mrf.mxu0  ;;  %9689 = vrcp.f32 %v7811_v62  ;;  %v15147_v35 = vadd.f32 %v14955_v29, %v7491_v21  ;;  %8058 = vst.msk [vmem:[%s15325_s5 + $0x130] sm:$0xff] %vm92_vm0, %v7994_v11  ;;  %v7997_v3 = vmul.f32 %v9670_v27, %v14975_v63  ;;  %v9674_v5 = vpop.eup %9673  ;;  %v7812_v22 = vadd.f32 1.0, %v9672_v9 }
 0x40f   :  { %v7746_v56 = vmul.f32 1.442695, %v7627_v7  ;;  %v15155_v10 = vadd.f32 %v14955_v29, %v7494_v38  ;;  %v7493_v48 = vadd.f32 %v7398_v57, %v5567_v20  ;;  %9691 = vrcp.f32 %v7810_v36  ;;  %v9676_v33 = vpop.eup %9675 }
 0x410   :  { %v9225_v6 = vpop.f32.mrf.mxu0  ;;  %v7626_v16 = vsub.f32 0.0, %v15147_v35  ;;  %9693 = vpow2.f32 %v7740_v31  ;;  %8061 = vst.msk [vmem:[%s15325_s5 + $0x148] sm:$0xff] %vm92_vm0, %v7997_v3  ;;  %v7996_v63 = vmul.f32 %v9674_v5, %v14979_v0  ;;  %v9678_v60 = vpop.eup %9677  ;;  %v7999_v40 = vmul.f32 %v9676_v33, %v14990_v50 }
 0x411   :  { %v7629_v20 = vsub.f32 0.0, %v15155_v10  ;;  %v15168_v8 = vadd.f32 %v14955_v29, %v7493_v48  ;;  %9695 = vrcp.f32 %v7813_v54  ;;  %v7496_v15 = vadd.f32 %v9225_v6, %v15109_v12  ;;  %v9680_v45 = vpop.eup %9679 }
 0x412   :  { %v7408_v59 = vpop.f32.mrf.mxu0  ;;  %v7744_v13 = vmul.f32 1.442695, %v7626_v16  ;;  %9697 = vpow2.f32 %v7746_v56  ;;  %8060 = vst.msk [vmem:[%s15325_s5 + $0x140] sm:$0xff] %vm92_vm0, %v7996_v63  ;;  %v7998_v0 = vmul.f32 %v9678_v60, %v14993_v58  ;;  %8063 = vst.msk [vmem:[%s15325_s5 + $0x158] sm:$0xff] %vm92_vm0, %v7999_v40 }
 0x413   :  { %v7750_v42 = vmul.f32 1.442695, %v7629_v20  ;;  %v7628_v34 = vsub.f32 0.0, %v15168_v8  ;;  %9699 = vrcp.f32 %v7812_v22  ;;  %v15179_v18 = vadd.f32 %v14955_v29, %v7496_v15  ;;  %v9682_v50 = vpop.eup %9681 }
 0x414   :  { %v9228_v44 = vpop.f32.mrf.mxu0  ;;  %v7495_v12 = vadd.f32 %v7408_v59, %v15116_v49  ;;  %9701 = vpow2.f32 %v7744_v13  ;;  %v7815_v49 = vadd.f32 1.0, %v9680_v45  ;;  %v9684_v51 = vpop.eup %9683  ;;  %8062 = vst.msk [vmem:[%s15325_s5 + $0x150] sm:$0xff] %vm92_vm0, %v7998_v0  ;;  %v8001_v58 = vmul.f32 %v9682_v50, %v15010_v32 }
 0x415   :  { %v7748_v24 = vmul.f32 1.442695, %v7628_v34  ;;  %v7498_v26 = vadd.f32 %v9228_v44, %v15127_v28  ;;  %9703 = vpow2.f32 %v7750_v42  ;;  %v7631_v53 = vsub.f32 0.0, %v15179_v18  ;;  %v9686_v7 = vpop.eup %9685 }
 0x416   :  { %v7418_v62 = vpop.f32.mrf.mxu0  ;;  %v15194_v21 = vadd.f32 %v14955_v29, %v7495_v12  ;;  %v7814_v46 = vadd.f32 1.0, %v9684_v51  ;;  %8065 = vst.msk [vmem:[%s15325_s5 + $0x168] sm:$0xff] %vm92_vm0, %v8001_v58  ;;  %v8000_v32 = vmul.f32 %v9686_v7, %v15015_v30 }
 0x417   :  { %9705 = vpow2.f32 %v7748_v24  ;;  %v15202_v28 = vadd.f32 %v14955_v29, %v7498_v26  ;;  %v7497_v4 = vadd.f32 %v7418_v62, %v15130_v19  ;;  %v7754_v1 = vmul.f32 1.442695, %v7631_v53 }
 0x418   :  { %v9231_v38 = vpop.f32.mrf.mxu0  ;;  %9707 = vrcp.f32 %v7815_v49  ;;  %v7630_v57 = vsub.f32 0.0, %v15194_v21  ;;  %8064 = vst.msk [vmem:[%s15325_s5 + $0x160] sm:$0xff] %vm92_vm0, %v8000_v32 }
 0x419   :  { %v7633_v36 = vsub.f32 0.0, %v15202_v28  ;;  %v15213_v31 = vadd.f32 %v14955_v29, %v7497_v4  ;;  %v7500_v19 = vadd.f32 %v9231_v38, %v15138_v14  ;;  %9709 = vrcp.f32 %v7814_v46 }
 0x41a   :  { %v9688_v47 = vpop.eup %9687  ;;  %v7752_v11 = vmul.f32 1.442695, %v7630_v57  ;;  %v7428_v48 = vpop.f32.mrf.mxu0  ;;  %9711 = vpow2.f32 %v7754_v1 }
 0x41b   :  { %v9690_v56 = vpop.eup %9689  ;;  %v7817_v27 = vadd.f32 1.0, %v9688_v47  ;;  %v7758_v30 = vmul.f32 1.442695, %v7633_v36  ;;  %v7632_v6 = vsub.f32 0.0, %v15213_v31  ;;  %v15223_v14 = vadd.f32 %v14955_v29, %v7500_v19 }
 0x41c   :  { %v8003_v54 = vmul.f32 %v9690_v56, %v15038_v25  ;;  %9713 = vpow2.f32 %v7752_v11  ;;  %v7499_v16 = vadd.f32 %v7428_v48, %v15159_v39  ;;  %v9692_v37 = vpop.eup %9691 }
 0x41d   :  { %9715 = vrcp.f32 %v7817_v27  ;;  %v7756_v9 = vmul.f32 1.442695, %v7632_v6  ;;  %v9694_v3 = vpop.eup %9693  ;;  %v8002_v20 = vmul.f32 %v9692_v37, %v15046_v23  ;;  %v7635_v25 = vsub.f32 0.0, %v15223_v14 }
 0x41e   :  { %8067 = vst.msk [vmem:[%s15325_s5 + $0x178] sm:$0xff] %vm92_vm0, %v8003_v54  ;;  %9717 = vpow2.f32 %v7758_v30  ;;  %v15233_v5 = vadd.f32 %v14955_v29, %v7499_v16  ;;  %v9696_v59 = vpop.eup %9695  ;;  %v7816_v22 = vadd.f32 1.0, %v9694_v3 }
 0x41f   :  { %9719 = vpow2.f32 %v7756_v9  ;;  %v9698_v39 = vpop.eup %9697  ;;  %8066 = vst.msk [vmem:[%s15325_s5 + $0x170] sm:$0xff] %vm92_vm0, %v8002_v20  ;;  %v8005_v13 = vmul.f32 %v9696_v59, %v15052_v17  ;;  %v7762_v15 = vmul.f32 1.442695, %v7635_v25 }
 0x420   :  { %v7634_v23 = vsub.f32 0.0, %v15233_v5  ;;  %v9700_v33 = vpop.eup %9699  ;;  %9721 = vrcp.f32 %v7816_v22  ;;  %v7819_v63 = vadd.f32 1.0, %v9698_v39 }
 0x421   :  { %v9702_v42 = vpop.eup %9701  ;;  %8069 = vst.msk [vmem:[%s15325_s5 + $0x188] sm:$0xff] %vm92_vm0, %v8005_v13  ;;  %v8004_v29 = vmul.f32 %v9700_v33, %v15068_v55  ;;  %9723 = vpow2.f32 %v7762_v15 }
 0x422   :  { %v7760_v34 = vmul.f32 1.442695, %v7634_v23  ;;  %v9704_v60 = vpop.eup %9703  ;;  %9725 = vrcp.f32 %v7819_v63  ;;  %v7818_v40 = vadd.f32 1.0, %v9702_v42 }
 0x423   :  { %8068 = vst.msk [vmem:[%s15325_s5 + $0x180] sm:$0xff] %vm92_vm0, %v8004_v29  ;;  %v7821_v44 = vadd.f32 1.0, %v9704_v60 }
 0x424   :  { %v9706_v17 = vpop.eup %9705  ;;  %9727 = vpow2.f32 %v7760_v34 }
 0x425   :  { %v9708_v12 = vpop.eup %9707  ;;  %9729 = vrcp.f32 %v7818_v40  ;;  %v7820_v45 = vadd.f32 1.0, %v9706_v17 }
 0x426   :  { %v8007_v0 = vmul.f32 %v9708_v12, %v15084_v2  ;;  %9731 = vrcp.f32 %v7821_v44  ;;  %v9710_v55 = vpop.eup %9709 }
 0x427   :  { %9733 = vrcp.f32 %v7820_v45  ;;  %v9712_v24 = vpop.eup %9711  ;;  %v8006_v26 = vmul.f32 %v9710_v55, %v15097_v61 }
 0x428   :  { %8071 = vst.msk [vmem:[%s15325_s5 + $0x198] sm:$0xff] %vm92_vm0, %v8007_v0  ;;  %v7823_v62 = vadd.f32 1.0, %v9712_v24 }
 0x429   :  { %v9714_v50 = vpop.eup %9713  ;;  %8070 = vst.msk [vmem:[%s15325_s5 + $0x190] sm:$0xff] %vm92_vm0, %v8006_v26 }
 0x42a   :  { %v9716_v49 = vpop.eup %9715  ;;  %v7822_v2 = vadd.f32 1.0, %v9714_v50  ;;  %9735 = vrcp.f32 %v7823_v62 }
 0x42b   :  { %v9718_v53 = vpop.eup %9717  ;;  %v8009_v51 = vmul.f32 %v9716_v49, %v15112_v52 }
 0x42c   :  { %v9720_v58 = vpop.eup %9719  ;;  %9737 = vrcp.f32 %v7822_v2  ;;  %v7825_v4 = vadd.f32 1.0, %v9718_v53 }
 0x42d   :  { %8073 = vst.msk [vmem:[%s15325_s5 + $0x1a8] sm:$0xff] %vm92_vm0, %v8009_v51  ;;  %v7824_v61 = vadd.f32 1.0, %v9720_v58  ;;  %v9722_v7 = vpop.eup %9721 }
 0x42e   :  { %9739 = vrcp.f32 %v7825_v4  ;;  %v9724_v38 = vpop.eup %9723  ;;  %v8008_v46 = vmul.f32 %v9722_v7, %v15124_v43 }
 0x42f   :  { %9741 = vrcp.f32 %v7824_v61  ;;  %v9726_v1 = vpop.eup %9725  ;;  %v7827_v57 = vadd.f32 1.0, %v9724_v38 }
 0x430   :  { %8072 = vst.msk [vmem:[%s15325_s5 + $0x1a0] sm:$0xff] %vm92_vm0, %v8008_v46  ;;  %v8011_v52 = vmul.f32 %v9726_v1, %v15134_v41 }
 0x431   :  { %v9728_v32 = vpop.eup %9727  ;;  %9743 = vrcp.f32 %v7827_v57 }
 0x432   :  { %v9730_v36 = vpop.eup %9729  ;;  %v7826_v19 = vadd.f32 1.0, %v9728_v32  ;;  %8075 = vst.msk [vmem:[%s15325_s5 + $0x1b8] sm:$0xff] %vm92_vm0, %v8011_v52 }
 0x433   :  { %v9732_v47 = vpop.eup %9731  ;;  %v8010_v43 = vmul.f32 %v9730_v36, %v15147_v35 }
 0x434   :  { %v9734_v11 = vpop.eup %9733  ;;  %v8013_v56 = vmul.f32 %v9732_v47, %v15155_v10  ;;  %9745 = vrcp.f32 %v7826_v19 }
 0x435   :  { %8074 = vst.msk [vmem:[%s15325_s5 + $0x1b0] sm:$0xff] %vm92_vm0, %v8010_v43  ;;  %v8012_v41 = vmul.f32 %v9734_v11, %v15168_v8 }
 0x436   :  { %8077 = vst.msk [vmem:[%s15325_s5 + $0x1c8] sm:$0xff] %vm92_vm0, %v8013_v56 }
 0x437   :  { %8076 = vst.msk [vmem:[%s15325_s5 + $0x1c0] sm:$0xff] %vm92_vm0, %v8012_v41  ;;  %v9736_v35 = vpop.eup %9735 }
 0x438   :  { %v8015_v48 = vmul.f32 %v9736_v35, %v15179_v18 }
 0x439   :  { %v9738_v10 = vpop.eup %9737 }
 0x43a   :  { %v8014_v27 = vmul.f32 %v9738_v10, %v15194_v21  ;;  %8079 = vst.msk [vmem:[%s15325_s5 + $0x1d8] sm:$0xff] %vm92_vm0, %v8015_v48 }
 0x43b   :  { %v9740_v30 = vpop.eup %9739 }
 0x43c   :  { %v9742_v8 = vpop.eup %9741  ;;  %8078 = vst.msk [vmem:[%s15325_s5 + $0x1d0] sm:$0xff] %vm92_vm0, %v8014_v27  ;;  %v8017_v6 = vmul.f32 %v9740_v30, %v15202_v28 }
 0x43d   :  { %v8016_v54 = vmul.f32 %v9742_v8, %v15213_v31 }
 0x43e   :  { %8081 = vst.msk [vmem:[%s15325_s5 + $0x1e8] sm:$0xff] %vm92_vm0, %v8017_v6  ;;  %v9744_v18 = vpop.eup %9743 }
 0x43f   :  { %8080 = vst.msk [vmem:[%s15325_s5 + $0x1e0] sm:$0xff] %vm92_vm0, %v8016_v54  ;;  %v8019_v21 = vmul.f32 %v9744_v18, %v15223_v14 }
 0x441   :  { %v9746_v16 = vpop.eup %9745  ;;  %8083 = vst.msk [vmem:[%s15325_s5 + $0x1f8] sm:$0xff] %vm92_vm0, %v8019_v21 }
 0x442   :  { %v8018_v28 = vmul.f32 %v9746_v16, %v15233_v5 }
 0x444   :  { %8082 = vst.msk [vmem:[%s15325_s5 + $0x1f0] sm:$0xff] %vm92_vm0, %v8018_v28 }

</bundles_post_ra>
